<compile_context>
chip_gen: v5e
topology: v5e:2x2
jax: 0.10.0
libtpu: 0.0.40
codegen_flags: <defaults>
</compile_context>

<pallas_src>
import functools
import math

import jax
import jax.numpy as jnp
from jax import lax
from jax.experimental import pallas as pl
from jax.experimental.pallas import tpu as pltpu

N_HEADS = 8


# --------------------------------------------------------------------------
# Fused kernel: QKV projection + 8-head attention + residual/mean epilogue
#               + in-VMEM im2col + 3x3-conv GEMM.  One grid step per batch.
# --------------------------------------------------------------------------
def _cross_batch_attention_kernel(
    x_ref, xmean_ref, wqkv_ref, bqkv_ref, gamma_ref, wconv_ref, bconv_ref,
    o_ref, y_ref, yext_ref, *, n_heads, d_k, H, W):
  C = n_heads * d_k
  HW = H * W
  f32 = jnp.float32
  bf16 = jnp.bfloat16

  x = x_ref[0]                       # (C, HW) f32, channel-major
  xm = xmean_ref[0]                  # (C, HW) f32 (batch mean, shared block)
  gamma = gamma_ref[0]               # scalar f32 from SMEM

  # ---- fused QKV projection: a single (3C, C) @ (C, HW) MXU matmul ---------
  # 1/sqrt(d_k) is pre-folded into the q rows of wqkv / bqkv in the wrapper.
  qkv = jnp.dot(wqkv_ref[...], x.astype(bf16),
                preferred_element_type=f32) + bqkv_ref[...]      # (3C, HW) f32
  q = qkv[0:C, :]
  k = qkv[C:2 * C, :]
  v = qkv[2 * C:3 * C, :]
  k_t = k.T                          # (HW, C): one aligned transpose per batch

  # ---- per-head attention; epilogue written straight into the y scratch ----
  for h in range(n_heads):           # static unroll (8 heads, tiny d_k)
    lo, hi = h * d_k, (h + 1) * d_k
    # key-major scores: s_t[t, p] = <k[:, t], q_scaled[:, p]>   -> (HW_k, HW_q)
    s_t = jnp.dot(k_t[:, lo:hi].astype(bf16), q[lo:hi, :].astype(bf16),
                  preferred_element_type=f32)
    m = jnp.max(s_t, axis=0, keepdims=True)                      # (1, HW_q)
    e = jnp.exp(s_t - m)                                         # f32
    # Deferred normalization: EUP reciprocal of the (1, HW_q) column sums.
    r = pl.reciprocal(jnp.sum(e, axis=0, keepdims=True), approx=True)
    # TODO(synk): attn_drop (p=0.1) is identity here (eval mode); training
    # dropout would use pltpu.prng_seed / pltpu.prng_random_bits on `e`.
    oh = jnp.dot(v[lo:hi, :].astype(bf16), e.astype(bf16),
                 preferred_element_type=f32)                     # (d_k, HW_q)
    # y = x_mean + gamma * attn + x, written per-head into the conv input.
    y_ref[lo:hi, :] = xm[lo:hi, :] + x[lo:hi, :] + gamma * (oh * r)

  # ---- fused 3x3 'SAME' conv: in-VMEM im2col + one (C,9C)@(9C,HW) GEMM -----
  # Zero-padded flat buffer: yext[:, W+1 : W+1+HW] = y_flat.  For tap (di,dj),
  # yext[:, p + di*W + dj] equals y[c, i+di-1, j+dj-1]; row-out-of-range taps
  # land in the zero pads, column wraps are masked out explicitly.
  yext_ref[...] = jnp.zeros_like(yext_ref)
  yext_ref[:, W + 1:W + 1 + HW] = y_ref[...]
  yext = yext_ref[...]                                           # (C, HW+2W+2)
  jcol = lax.broadcasted_iota(jnp.int32, (1, HW), 1) % W
  col_keep = [jnp.logical_and(jcol + dj >= 1, jcol + dj <= W) for dj in range(3)]
  chunks = []
  for di in range(3):
    for dj in range(3):
      off = di * W + dj
      shifted = yext[:, off:off + HW]                            # (C, HW)
      chunks.append(jnp.where(col_keep[dj], shifted, 0.0).astype(bf16))
  patches = jnp.concatenate(chunks, axis=0)                      # (9C, HW) bf16
  out = jnp.dot(wconv_ref[...], patches,
                preferred_element_type=f32) + bconv_ref[...]     # (C, HW) f32
  o_ref[0] = out.astype(o_ref.dtype)


def _cross_batch_attention_forward(x_cs, x_mean_cs, wqkv, bqkv, gamma,
                                   w_conv_mat, b_conv_col, H, W):
  B, C, HW = x_cs.shape
  d_k = C // N_HEADS
  kernel = functools.partial(_cross_batch_attention_kernel,
                             n_heads=N_HEADS, d_k=d_k, H=H, W=W)
  shared2 = lambda b: (0, 0)
  return pl.pallas_call(
      kernel,
      out_shape=jax.ShapeDtypeStruct((B, C, HW), x_cs.dtype),
      grid=(B,),
      in_specs=[
          pl.BlockSpec((1, C, HW), lambda b: (b, 0, 0)),            # x (per batch)
          pl.BlockSpec((1, C, HW), lambda b: (0, 0, 0)),            # batch mean
          pl.BlockSpec((3 * C, C), shared2),                        # fused Wqkv (bf16)
          pl.BlockSpec((3 * C, 1), shared2),                        # fused bqkv (f32)
          pl.BlockSpec(memory_space=pltpu.MemorySpace.SMEM),        # gamma scalar
          pl.BlockSpec((C, 9 * C), shared2),                        # conv weight (bf16)
          pl.BlockSpec((C, 1), shared2),                            # conv bias (f32)
      ],
      out_specs=pl.BlockSpec((1, C, HW), lambda b: (b, 0, 0)),
      scratch_shapes=[
          pltpu.VMEM((C, HW), jnp.float32),                         # y = mean + att_out
          pltpu.VMEM((C, HW + 2 * W + 2), jnp.float32),             # zero-padded flat y
      ],
      compiler_params=pltpu.CompilerParams(
          dimension_semantics=("parallel",),
          vmem_limit_bytes=32 * 1024 * 1024),
  )(x_cs, x_mean_cs, wqkv, bqkv, gamma, w_conv_mat, b_conv_col)


# --------------------------------------------------------------------------
# Module wrapper.
# --------------------------------------------------------------------------
class CrossBatchAttentionPallas:
  """JAX/Pallas port of models.common.CrossBatchAttention (eval mode)."""

  def __init__(self, in_channels, key):
    assert in_channels % N_HEADS == 0
    C = in_channels
    ks = jax.random.split(key, 8)
    s = 0.1
    self.wq = s * jax.random.normal(ks[0], (C, C), jnp.float32)
    self.wk = s * jax.random.normal(ks[1], (C, C), jnp.float32)
    self.wv = s * jax.random.normal(ks[2], (C, C), jnp.float32)
    self.bq = s * jax.random.normal(ks[3], (C, 1), jnp.float32)
    self.bk = s * jax.random.normal(ks[4], (C, 1), jnp.float32)
    self.bv = s * jax.random.normal(ks[5], (C, 1), jnp.float32)
    # gamma is a learnable scalar (0 at init in PyTorch); nonzero here so the
    # attention path is actually exercised by the self-check.
    self.gamma = jnp.full((1,), 0.5, dtype=jnp.float32)
    self.conv_w = s * jax.random.normal(ks[6], (C, C, 3, 3), jnp.float32)
    self.conv_b = s * jax.random.normal(ks[7], (C,), jnp.float32)
    self.in_channels = C

  def __call__(self, x):
    B, C, H, W = x.shape
    HW = H * W
    d_k = C // N_HEADS
    scale = 1.0 / math.sqrt(d_k)
    x_cs = x.reshape(B, C, HW)                       # NCHW -> channel-major (free)
    x_mean = jnp.mean(x_cs, axis=0, keepdims=True)   # tiny reduce; leave to XLA
    # Fused / scale-folded / bf16 parameter views (cheap one-time XLA work).
    wqkv = jnp.concatenate([self.wq * scale, self.wk, self.wv],
                           axis=0).astype(jnp.bfloat16)            # (3C, C)
    bqkv = jnp.concatenate([self.bq * scale, self.bk, self.bv], axis=0)  # (3C, 1)
    w_conv_mat = jnp.transpose(self.conv_w, (0, 2, 3, 1)).reshape(
        C, 9 * C).astype(jnp.bfloat16)                              # (C, 9C)
    b_conv_col = self.conv_b.reshape(C, 1)
    out_cs = _cross_batch_attention_forward(
        x_cs, x_mean, wqkv, bqkv, self.gamma, w_conv_mat, b_conv_col, H, W)
    return out_cs.reshape(B, C, H, W)


# --------------------------------------------------------------------------
# Pure-JAX reference (independent path: unfused f32 params, einsum + lax.conv).
# --------------------------------------------------------------------------
def reference_forward(x, m):
  B, C, H, W = x.shape
  HW = H * W
  dk = C // N_HEADS
  x_cs = x.reshape(B, C, HW)

  def proj(w, b):
    return jnp.einsum('oi,bip->bop', w, x_cs) + b[None, :, :]

  q = proj(m.wq, m.bq).reshape(B, N_HEADS, dk, HW)
  k = proj(m.wk, m.bk).reshape(B, N_HEADS, dk, HW)
  v = proj(m.wv, m.bv).reshape(B, N_HEADS, dk, HW)
  s = jnp.einsum('bhdq,bhdk->bhqk', q, k) / math.sqrt(dk)
  p = jax.nn.softmax(s, axis=-1)
  att = jnp.einsum('bhqk,bhdk->bhdq', p, v).reshape(B, C, HW)
  att_out = m.gamma[0] * att + x_cs
  y = (jnp.mean(x_cs, axis=0, keepdims=True) + att_out).reshape(B, C, H, W)
  out = lax.conv_general_dilated(
      y, m.conv_w, window_strides=(1, 1), padding='SAME',
      dimension_numbers=('NCHW', 'OIHW', 'NCHW'))
  return out + m.conv_b[None, :, None, None]


if __name__ == "__main__":
  key = jax.random.PRNGKey(0)
  k_x, k_p = jax.random.split(key)

  # Small shapes: batch=2, channels=32 (must divide by 8 heads), 16x16 spatial.
  B, C, H, W = 2, 32, 16, 16
  x = jax.random.normal(k_x, (B, C, H, W), dtype=jnp.float32)

  mod = CrossBatchAttentionPallas(C, k_p)
  fwd = jax.jit(mod.__call__)

  out = jax.block_until_ready(fwd(x))
  ref = jax.block_until_ready(reference_forward(x, mod))

  assert out.shape == (B, C, H, W) and out.dtype == jnp.float32
  max_err = float(jnp.max(jnp.abs(out - ref)))
  # bf16 MXU operands + approx reciprocal => slightly looser tolerance than a
  # pure-f32 comparison (per review: re-validated tolerance after the change).
  assert jnp.allclose(out, ref, rtol=5e-2, atol=5e-2), f"max abs err {max_err}"

  print("KERNEL_OK")
</pallas_src>

<mosaic_0001>
module attributes {stable_mosaic.version = 11 : i64} {
  func.func @_cross_batch_attention_kernel(%arg0: i32, %arg1: memref<1x32x256xf32, #tpu.memory_space<vmem>>, %arg2: memref<1x32x256xf32, #tpu.memory_space<vmem>>, %arg3: memref<96x32xbf16, #tpu.memory_space<vmem>>, %arg4: memref<96x1xf32, #tpu.memory_space<vmem>>, %arg5: memref<1xf32, #tpu.memory_space<smem>>, %arg6: memref<32x288xbf16, #tpu.memory_space<vmem>>, %arg7: memref<32x1xf32, #tpu.memory_space<vmem>>, %arg8: memref<1x32x256xf32, #tpu.memory_space<vmem>>, %arg9: memref<32x256xf32, #tpu.memory_space<vmem>>, %arg10: memref<32x290xf32, #tpu.memory_space<vmem>>) attributes {dimension_semantics = [#tpu.dimension_semantics<parallel>], iteration_bounds = array<i64: 2>, scalar_prefetch = 0 : i64, scratch_operands = 2 : i64, tpu.core_type = #tpu.core_type<tc>, window_params = [{transform_indices = @transform_0, window_bounds = array<i64: 1, 32, 256>}, {pipeline_mode = #tpu.pipeline_mode<synchronous>, transform_indices = @transform_1, window_bounds = array<i64: 1, 32, 256>}, {pipeline_mode = #tpu.pipeline_mode<synchronous>, transform_indices = @transform_2, window_bounds = array<i64: 96, 32>}, {pipeline_mode = #tpu.pipeline_mode<synchronous>, transform_indices = @transform_3, window_bounds = array<i64: 96, 1>}, {transform_indices = @transform_4, window_bounds = array<i64: 1>}, {pipeline_mode = #tpu.pipeline_mode<synchronous>, transform_indices = @transform_5, window_bounds = array<i64: 32, 288>}, {pipeline_mode = #tpu.pipeline_mode<synchronous>, transform_indices = @transform_6, window_bounds = array<i64: 32, 1>}, {transform_indices = @transform_7, window_bounds = array<i64: 1, 32, 256>}]} {
    %c0 = arith.constant 0 : index
    %c0_0 = arith.constant 0 : index
    %c0_1 = arith.constant 0 : index
    %0 = vector.load %arg1[%c0, %c0_0, %c0_1] : memref<1x32x256xf32, #tpu.memory_space<vmem>>, vector<1x32x256xf32>
    %1 = vector.shape_cast %0 : vector<1x32x256xf32> to vector<32x256xf32>
    %c0_2 = arith.constant 0 : index
    %c0_3 = arith.constant 0 : index
    %c0_4 = arith.constant 0 : index
    %2 = vector.load %arg2[%c0_2, %c0_3, %c0_4] : memref<1x32x256xf32, #tpu.memory_space<vmem>>, vector<1x32x256xf32>
    %3 = vector.shape_cast %2 : vector<1x32x256xf32> to vector<32x256xf32>
    %c0_5 = arith.constant 0 : index
    %4 = memref.load %arg5[%c0_5] : memref<1xf32, #tpu.memory_space<smem>>
    %c0_6 = arith.constant 0 : index
    %c0_7 = arith.constant 0 : index
    %5 = vector.load %arg3[%c0_6, %c0_7] : memref<96x32xbf16, #tpu.memory_space<vmem>>, vector<96x32xbf16>
    %6 = arith.truncf %1 : vector<32x256xf32> to vector<32x256xbf16>
    %cst = arith.constant dense<0.000000e+00> : vector<96x256xf32>
    %7 = tpu.matmul %5, %6, %cst {dimension_numbers = #tpu.dot_dimension_numbers<[1], [0], [0], [1], [0, 0, 1, 1], [], []>} : vector<96x32xbf16>, vector<32x256xbf16>, vector<96x256xf32> -> vector<96x256xf32>
    %c0_8 = arith.constant 0 : index
    %c0_9 = arith.constant 0 : index
    %8 = vector.load %arg4[%c0_8, %c0_9] : memref<96x1xf32, #tpu.memory_space<vmem>>, vector<96x1xf32>
    %9 = vector.broadcast %8 : vector<96x1xf32> to vector<96x256xf32>
    %10 = arith.addf %7, %9 : vector<96x256xf32>
    %11 = vector.extract_strided_slice %10 {offsets = [0, 0], sizes = [32, 256], strides = [1, 1]} : vector<96x256xf32> to vector<32x256xf32>
    %12 = vector.extract_strided_slice %10 {offsets = [32, 0], sizes = [32, 256], strides = [1, 1]} : vector<96x256xf32> to vector<32x256xf32>
    %13 = vector.extract_strided_slice %10 {offsets = [64, 0], sizes = [32, 256], strides = [1, 1]} : vector<96x256xf32> to vector<32x256xf32>
    %14 = tpu.transpose %12, [1, 0] : vector<32x256xf32> -> vector<256x32xf32>
    %15 = vector.extract_strided_slice %14 {offsets = [0, 0], sizes = [256, 4], strides = [1, 1]} : vector<256x32xf32> to vector<256x4xf32>
    %16 = arith.truncf %15 : vector<256x4xf32> to vector<256x4xbf16>
    %17 = vector.extract_strided_slice %11 {offsets = [0, 0], sizes = [4, 256], strides = [1, 1]} : vector<32x256xf32> to vector<4x256xf32>
    %18 = arith.truncf %17 : vector<4x256xf32> to vector<4x256xbf16>
    %cst_10 = arith.constant dense<0.000000e+00> : vector<256x256xf32>
    %19 = tpu.matmul %16, %18, %cst_10 {dimension_numbers = #tpu.dot_dimension_numbers<[1], [0], [0], [1], [0, 0, 1, 1], [], []>} : vector<256x4xbf16>, vector<4x256xbf16>, vector<256x256xf32> -> vector<256x256xf32>
    %cst_11 = arith.constant dense<0xFF800000> : vector<256xf32>
    %20 = vector.multi_reduction <maximumf>, %19, %cst_11 [0] : vector<256x256xf32> to vector<256xf32>
    %21 = vector.shape_cast %20 : vector<256xf32> to vector<1x256xf32>
    %22 = vector.broadcast %21 : vector<1x256xf32> to vector<256x256xf32>
    %23 = arith.subf %19, %22 : vector<256x256xf32>
    %24 = math.exp %23 : vector<256x256xf32>
    %cst_12 = arith.constant dense<0.000000e+00> : vector<256xf32>
    %25 = vector.multi_reduction <add>, %24, %cst_12 [0] : vector<256x256xf32> to vector<256xf32>
    %26 = vector.shape_cast %25 : vector<256xf32> to vector<1x256xf32>
    %27 = tpu.reciprocal %26 {approx = true} : vector<1x256xf32> -> vector<1x256xf32>
    %28 = vector.extract_strided_slice %13 {offsets = [0, 0], sizes = [4, 256], strides = [1, 1]} : vector<32x256xf32> to vector<4x256xf32>
    %29 = arith.truncf %28 : vector<4x256xf32> to vector<4x256xbf16>
    %30 = arith.truncf %24 : vector<256x256xf32> to vector<256x256xbf16>
    %cst_13 = arith.constant dense<0.000000e+00> : vector<4x256xf32>
    %31 = tpu.matmul %29, %30, %cst_13 {dimension_numbers = #tpu.dot_dimension_numbers<[1], [0], [0], [1], [0, 0, 1, 1], [], []>} : vector<4x256xbf16>, vector<256x256xbf16>, vector<4x256xf32> -> vector<4x256xf32>
    %32 = vector.extract_strided_slice %3 {offsets = [0, 0], sizes = [4, 256], strides = [1, 1]} : vector<32x256xf32> to vector<4x256xf32>
    %33 = vector.extract_strided_slice %1 {offsets = [0, 0], sizes = [4, 256], strides = [1, 1]} : vector<32x256xf32> to vector<4x256xf32>
    %34 = arith.addf %32, %33 : vector<4x256xf32>
    %35 = vector.broadcast %27 : vector<1x256xf32> to vector<4x256xf32>
    %36 = arith.mulf %31, %35 : vector<4x256xf32>
    %37 = vector.broadcast %4 : f32 to vector<4x256xf32>
    %38 = arith.mulf %37, %36 : vector<4x256xf32>
    %39 = arith.addf %34, %38 : vector<4x256xf32>
    %c0_14 = arith.constant 0 : index
    %c0_15 = arith.constant 0 : index
    %40 = vector.load %arg9[%c0_14, %c0_15] : memref<32x256xf32, #tpu.memory_space<vmem>>, vector<4x256xf32>
    tpu.vector_store %arg9[%c0_14, %c0_15], %39 {strides = array<i32>} : memref<32x256xf32, #tpu.memory_space<vmem>>, vector<4x256xf32>,
    %41 = vector.extract_strided_slice %14 {offsets = [0, 4], sizes = [256, 4], strides = [1, 1]} : vector<256x32xf32> to vector<256x4xf32>
    %42 = arith.truncf %41 : vector<256x4xf32> to vector<256x4xbf16>
    %43 = vector.extract_strided_slice %11 {offsets = [4, 0], sizes = [4, 256], strides = [1, 1]} : vector<32x256xf32> to vector<4x256xf32>
    %44 = arith.truncf %43 : vector<4x256xf32> to vector<4x256xbf16>
    %cst_16 = arith.constant dense<0.000000e+00> : vector<256x256xf32>
    %45 = tpu.matmul %42, %44, %cst_16 {dimension_numbers = #tpu.dot_dimension_numbers<[1], [0], [0], [1], [0, 0, 1, 1], [], []>} : vector<256x4xbf16>, vector<4x256xbf16>, vector<256x256xf32> -> vector<256x256xf32>
    %cst_17 = arith.constant dense<0xFF800000> : vector<256xf32>
    %46 = vector.multi_reduction <maximumf>, %45, %cst_17 [0] : vector<256x256xf32> to vector<256xf32>
    %47 = vector.shape_cast %46 : vector<256xf32> to vector<1x256xf32>
    %48 = vector.broadcast %47 : vector<1x256xf32> to vector<256x256xf32>
    %49 = arith.subf %45, %48 : vector<256x256xf32>
    %50 = math.exp %49 : vector<256x256xf32>
    %cst_18 = arith.constant dense<0.000000e+00> : vector<256xf32>
    %51 = vector.multi_reduction <add>, %50, %cst_18 [0] : vector<256x256xf32> to vector<256xf32>
    %52 = vector.shape_cast %51 : vector<256xf32> to vector<1x256xf32>
    %53 = tpu.reciprocal %52 {approx = true} : vector<1x256xf32> -> vector<1x256xf32>
    %54 = vector.extract_strided_slice %13 {offsets = [4, 0], sizes = [4, 256], strides = [1, 1]} : vector<32x256xf32> to vector<4x256xf32>
    %55 = arith.truncf %54 : vector<4x256xf32> to vector<4x256xbf16>
    %56 = arith.truncf %50 : vector<256x256xf32> to vector<256x256xbf16>
    %cst_19 = arith.constant dense<0.000000e+00> : vector<4x256xf32>
    %57 = tpu.matmul %55, %56, %cst_19 {dimension_numbers = #tpu.dot_dimension_numbers<[1], [0], [0], [1], [0, 0, 1, 1], [], []>} : vector<4x256xbf16>, vector<256x256xbf16>, vector<4x256xf32> -> vector<4x256xf32>
    %58 = vector.extract_strided_slice %3 {offsets = [4, 0], sizes = [4, 256], strides = [1, 1]} : vector<32x256xf32> to vector<4x256xf32>
    %59 = vector.extract_strided_slice %1 {offsets = [4, 0], sizes = [4, 256], strides = [1, 1]} : vector<32x256xf32> to vector<4x256xf32>
    %60 = arith.addf %58, %59 : vector<4x256xf32>
    %61 = vector.broadcast %53 : vector<1x256xf32> to vector<4x256xf32>
    %62 = arith.mulf %57, %61 : vector<4x256xf32>
    %63 = vector.broadcast %4 : f32 to vector<4x256xf32>
    %64 = arith.mulf %63, %62 : vector<4x256xf32>
    %65 = arith.addf %60, %64 : vector<4x256xf32>
    %c4 = arith.constant 4 : index
    %c0_20 = arith.constant 0 : index
    %66 = vector.load %arg9[%c4, %c0_20] : memref<32x256xf32, #tpu.memory_space<vmem>>, vector<4x256xf32>
    tpu.vector_store %arg9[%c4, %c0_20], %65 {strides = array<i32>} : memref<32x256xf32, #tpu.memory_space<vmem>>, vector<4x256xf32>,
    %67 = vector.extract_strided_slice %14 {offsets = [0, 8], sizes = [256, 4], strides = [1, 1]} : vector<256x32xf32> to vector<256x4xf32>
    %68 = arith.truncf %67 : vector<256x4xf32> to vector<256x4xbf16>
    %69 = vector.extract_strided_slice %11 {offsets = [8, 0], sizes = [4, 256], strides = [1, 1]} : vector<32x256xf32> to vector<4x256xf32>
    %70 = arith.truncf %69 : vector<4x256xf32> to vector<4x256xbf16>
    %cst_21 = arith.constant dense<0.000000e+00> : vector<256x256xf32>
    %71 = tpu.matmul %68, %70, %cst_21 {dimension_numbers = #tpu.dot_dimension_numbers<[1], [0], [0], [1], [0, 0, 1, 1], [], []>} : vector<256x4xbf16>, vector<4x256xbf16>, vector<256x256xf32> -> vector<256x256xf32>
    %cst_22 = arith.constant dense<0xFF800000> : vector<256xf32>
    %72 = vector.multi_reduction <maximumf>, %71, %cst_22 [0] : vector<256x256xf32> to vector<256xf32>
    %73 = vector.shape_cast %72 : vector<256xf32> to vector<1x256xf32>
    %74 = vector.broadcast %73 : vector<1x256xf32> to vector<256x256xf32>
    %75 = arith.subf %71, %74 : vector<256x256xf32>
    %76 = math.exp %75 : vector<256x256xf32>
    %cst_23 = arith.constant dense<0.000000e+00> : vector<256xf32>
    %77 = vector.multi_reduction <add>, %76, %cst_23 [0] : vector<256x256xf32> to vector<256xf32>
    %78 = vector.shape_cast %77 : vector<256xf32> to vector<1x256xf32>
    %79 = tpu.reciprocal %78 {approx = true} : vector<1x256xf32> -> vector<1x256xf32>
    %80 = vector.extract_strided_slice %13 {offsets = [8, 0], sizes = [4, 256], strides = [1, 1]} : vector<32x256xf32> to vector<4x256xf32>
    %81 = arith.truncf %80 : vector<4x256xf32> to vector<4x256xbf16>
    %82 = arith.truncf %76 : vector<256x256xf32> to vector<256x256xbf16>
    %cst_24 = arith.constant dense<0.000000e+00> : vector<4x256xf32>
    %83 = tpu.matmul %81, %82, %cst_24 {dimension_numbers = #tpu.dot_dimension_numbers<[1], [0], [0], [1], [0, 0, 1, 1], [], []>} : vector<4x256xbf16>, vector<256x256xbf16>, vector<4x256xf32> -> vector<4x256xf32>
    %84 = vector.extract_strided_slice %3 {offsets = [8, 0], sizes = [4, 256], strides = [1, 1]} : vector<32x256xf32> to vector<4x256xf32>
    %85 = vector.extract_strided_slice %1 {offsets = [8, 0], sizes = [4, 256], strides = [1, 1]} : vector<32x256xf32> to vector<4x256xf32>
    %86 = arith.addf %84, %85 : vector<4x256xf32>
    %87 = vector.broadcast %79 : vector<1x256xf32> to vector<4x256xf32>
    %88 = arith.mulf %83, %87 : vector<4x256xf32>
    %89 = vector.broadcast %4 : f32 to vector<4x256xf32>
    %90 = arith.mulf %89, %88 : vector<4x256xf32>
    %91 = arith.addf %86, %90 : vector<4x256xf32>
    %c8 = arith.constant 8 : index
    %c0_25 = arith.constant 0 : index
    %92 = vector.load %arg9[%c8, %c0_25] : memref<32x256xf32, #tpu.memory_space<vmem>>, vector<4x256xf32>
    tpu.vector_store %arg9[%c8, %c0_25], %91 {strides = array<i32>} : memref<32x256xf32, #tpu.memory_space<vmem>>, vector<4x256xf32>,
    %93 = vector.extract_strided_slice %14 {offsets = [0, 12], sizes = [256, 4], strides = [1, 1]} : vector<256x32xf32> to vector<256x4xf32>
    %94 = arith.truncf %93 : vector<256x4xf32> to vector<256x4xbf16>
    %95 = vector.extract_strided_slice %11 {offsets = [12, 0], sizes = [4, 256], strides = [1, 1]} : vector<32x256xf32> to vector<4x256xf32>
    %96 = arith.truncf %95 : vector<4x256xf32> to vector<4x256xbf16>
    %cst_26 = arith.constant dense<0.000000e+00> : vector<256x256xf32>
    %97 = tpu.matmul %94, %96, %cst_26 {dimension_numbers = #tpu.dot_dimension_numbers<[1], [0], [0], [1], [0, 0, 1, 1], [], []>} : vector<256x4xbf16>, vector<4x256xbf16>, vector<256x256xf32> -> vector<256x256xf32>
    %cst_27 = arith.constant dense<0xFF800000> : vector<256xf32>
    %98 = vector.multi_reduction <maximumf>, %97, %cst_27 [0] : vector<256x256xf32> to vector<256xf32>
    %99 = vector.shape_cast %98 : vector<256xf32> to vector<1x256xf32>
    %100 = vector.broadcast %99 : vector<1x256xf32> to vector<256x256xf32>
    %101 = arith.subf %97, %100 : vector<256x256xf32>
    %102 = math.exp %101 : vector<256x256xf32>
    %cst_28 = arith.constant dense<0.000000e+00> : vector<256xf32>
    %103 = vector.multi_reduction <add>, %102, %cst_28 [0] : vector<256x256xf32> to vector<256xf32>
    %104 = vector.shape_cast %103 : vector<256xf32> to vector<1x256xf32>
    %105 = tpu.reciprocal %104 {approx = true} : vector<1x256xf32> -> vector<1x256xf32>
    %106 = vector.extract_strided_slice %13 {offsets = [12, 0], sizes = [4, 256], strides = [1, 1]} : vector<32x256xf32> to vector<4x256xf32>
    %107 = arith.truncf %106 : vector<4x256xf32> to vector<4x256xbf16>
    %108 = arith.truncf %102 : vector<256x256xf32> to vector<256x256xbf16>
    %cst_29 = arith.constant dense<0.000000e+00> : vector<4x256xf32>
    %109 = tpu.matmul %107, %108, %cst_29 {dimension_numbers = #tpu.dot_dimension_numbers<[1], [0], [0], [1], [0, 0, 1, 1], [], []>} : vector<4x256xbf16>, vector<256x256xbf16>, vector<4x256xf32> -> vector<4x256xf32>
    %110 = vector.extract_strided_slice %3 {offsets = [12, 0], sizes = [4, 256], strides = [1, 1]} : vector<32x256xf32> to vector<4x256xf32>
    %111 = vector.extract_strided_slice %1 {offsets = [12, 0], sizes = [4, 256], strides = [1, 1]} : vector<32x256xf32> to vector<4x256xf32>
    %112 = arith.addf %110, %111 : vector<4x256xf32>
    %113 = vector.broadcast %105 : vector<1x256xf32> to vector<4x256xf32>
    %114 = arith.mulf %109, %113 : vector<4x256xf32>
    %115 = vector.broadcast %4 : f32 to vector<4x256xf32>
    %116 = arith.mulf %115, %114 : vector<4x256xf32>
    %117 = arith.addf %112, %116 : vector<4x256xf32>
    %c12 = arith.constant 12 : index
    %c0_30 = arith.constant 0 : index
    %118 = vector.load %arg9[%c12, %c0_30] : memref<32x256xf32, #tpu.memory_space<vmem>>, vector<4x256xf32>
    tpu.vector_store %arg9[%c12, %c0_30], %117 {strides = array<i32>} : memref<32x256xf32, #tpu.memory_space<vmem>>, vector<4x256xf32>,
    %119 = vector.extract_strided_slice %14 {offsets = [0, 16], sizes = [256, 4], strides = [1, 1]} : vector<256x32xf32> to vector<256x4xf32>
    %120 = arith.truncf %119 : vector<256x4xf32> to vector<256x4xbf16>
    %121 = vector.extract_strided_slice %11 {offsets = [16, 0], sizes = [4, 256], strides = [1, 1]} : vector<32x256xf32> to vector<4x256xf32>
    %122 = arith.truncf %121 : vector<4x256xf32> to vector<4x256xbf16>
    %cst_31 = arith.constant dense<0.000000e+00> : vector<256x256xf32>
    %123 = tpu.matmul %120, %122, %cst_31 {dimension_numbers = #tpu.dot_dimension_numbers<[1], [0], [0], [1], [0, 0, 1, 1], [], []>} : vector<256x4xbf16>, vector<4x256xbf16>, vector<256x256xf32> -> vector<256x256xf32>
    %cst_32 = arith.constant dense<0xFF800000> : vector<256xf32>
    %124 = vector.multi_reduction <maximumf>, %123, %cst_32 [0] : vector<256x256xf32> to vector<256xf32>
    %125 = vector.shape_cast %124 : vector<256xf32> to vector<1x256xf32>
    %126 = vector.broadcast %125 : vector<1x256xf32> to vector<256x256xf32>
    %127 = arith.subf %123, %126 : vector<256x256xf32>
    %128 = math.exp %127 : vector<256x256xf32>
    %cst_33 = arith.constant dense<0.000000e+00> : vector<256xf32>
    %129 = vector.multi_reduction <add>, %128, %cst_33 [0] : vector<256x256xf32> to vector<256xf32>
    %130 = vector.shape_cast %129 : vector<256xf32> to vector<1x256xf32>
    %131 = tpu.reciprocal %130 {approx = true} : vector<1x256xf32> -> vector<1x256xf32>
    %132 = vector.extract_strided_slice %13 {offsets = [16, 0], sizes = [4, 256], strides = [1, 1]} : vector<32x256xf32> to vector<4x256xf32>
    %133 = arith.truncf %132 : vector<4x256xf32> to vector<4x256xbf16>
    %134 = arith.truncf %128 : vector<256x256xf32> to vector<256x256xbf16>
    %cst_34 = arith.constant dense<0.000000e+00> : vector<4x256xf32>
    %135 = tpu.matmul %133, %134, %cst_34 {dimension_numbers = #tpu.dot_dimension_numbers<[1], [0], [0], [1], [0, 0, 1, 1], [], []>} : vector<4x256xbf16>, vector<256x256xbf16>, vector<4x256xf32> -> vector<4x256xf32>
    %136 = vector.extract_strided_slice %3 {offsets = [16, 0], sizes = [4, 256], strides = [1, 1]} : vector<32x256xf32> to vector<4x256xf32>
    %137 = vector.extract_strided_slice %1 {offsets = [16, 0], sizes = [4, 256], strides = [1, 1]} : vector<32x256xf32> to vector<4x256xf32>
    %138 = arith.addf %136, %137 : vector<4x256xf32>
    %139 = vector.broadcast %131 : vector<1x256xf32> to vector<4x256xf32>
    %140 = arith.mulf %135, %139 : vector<4x256xf32>
    %141 = vector.broadcast %4 : f32 to vector<4x256xf32>
    %142 = arith.mulf %141, %140 : vector<4x256xf32>
    %143 = arith.addf %138, %142 : vector<4x256xf32>
    %c16 = arith.constant 16 : index
    %c0_35 = arith.constant 0 : index
    %144 = vector.load %arg9[%c16, %c0_35] : memref<32x256xf32, #tpu.memory_space<vmem>>, vector<4x256xf32>
    tpu.vector_store %arg9[%c16, %c0_35], %143 {strides = array<i32>} : memref<32x256xf32, #tpu.memory_space<vmem>>, vector<4x256xf32>,
    %145 = vector.extract_strided_slice %14 {offsets = [0, 20], sizes = [256, 4], strides = [1, 1]} : vector<256x32xf32> to vector<256x4xf32>
    %146 = arith.truncf %145 : vector<256x4xf32> to vector<256x4xbf16>
    %147 = vector.extract_strided_slice %11 {offsets = [20, 0], sizes = [4, 256], strides = [1, 1]} : vector<32x256xf32> to vector<4x256xf32>
    %148 = arith.truncf %147 : vector<4x256xf32> to vector<4x256xbf16>
    %cst_36 = arith.constant dense<0.000000e+00> : vector<256x256xf32>
    %149 = tpu.matmul %146, %148, %cst_36 {dimension_numbers = #tpu.dot_dimension_numbers<[1], [0], [0], [1], [0, 0, 1, 1], [], []>} : vector<256x4xbf16>, vector<4x256xbf16>, vector<256x256xf32> -> vector<256x256xf32>
    %cst_37 = arith.constant dense<0xFF800000> : vector<256xf32>
    %150 = vector.multi_reduction <maximumf>, %149, %cst_37 [0] : vector<256x256xf32> to vector<256xf32>
    %151 = vector.shape_cast %150 : vector<256xf32> to vector<1x256xf32>
    %152 = vector.broadcast %151 : vector<1x256xf32> to vector<256x256xf32>
    %153 = arith.subf %149, %152 : vector<256x256xf32>
    %154 = math.exp %153 : vector<256x256xf32>
    %cst_38 = arith.constant dense<0.000000e+00> : vector<256xf32>
    %155 = vector.multi_reduction <add>, %154, %cst_38 [0] : vector<256x256xf32> to vector<256xf32>
    %156 = vector.shape_cast %155 : vector<256xf32> to vector<1x256xf32>
    %157 = tpu.reciprocal %156 {approx = true} : vector<1x256xf32> -> vector<1x256xf32>
    %158 = vector.extract_strided_slice %13 {offsets = [20, 0], sizes = [4, 256], strides = [1, 1]} : vector<32x256xf32> to vector<4x256xf32>
    %159 = arith.truncf %158 : vector<4x256xf32> to vector<4x256xbf16>
    %160 = arith.truncf %154 : vector<256x256xf32> to vector<256x256xbf16>
    %cst_39 = arith.constant dense<0.000000e+00> : vector<4x256xf32>
    %161 = tpu.matmul %159, %160, %cst_39 {dimension_numbers = #tpu.dot_dimension_numbers<[1], [0], [0], [1], [0, 0, 1, 1], [], []>} : vector<4x256xbf16>, vector<256x256xbf16>, vector<4x256xf32> -> vector<4x256xf32>
    %162 = vector.extract_strided_slice %3 {offsets = [20, 0], sizes = [4, 256], strides = [1, 1]} : vector<32x256xf32> to vector<4x256xf32>
    %163 = vector.extract_strided_slice %1 {offsets = [20, 0], sizes = [4, 256], strides = [1, 1]} : vector<32x256xf32> to vector<4x256xf32>
    %164 = arith.addf %162, %163 : vector<4x256xf32>
    %165 = vector.broadcast %157 : vector<1x256xf32> to vector<4x256xf32>
    %166 = arith.mulf %161, %165 : vector<4x256xf32>
    %167 = vector.broadcast %4 : f32 to vector<4x256xf32>
    %168 = arith.mulf %167, %166 : vector<4x256xf32>
    %169 = arith.addf %164, %168 : vector<4x256xf32>
    %c20 = arith.constant 20 : index
    %c0_40 = arith.constant 0 : index
    %170 = vector.load %arg9[%c20, %c0_40] : memref<32x256xf32, #tpu.memory_space<vmem>>, vector<4x256xf32>
    tpu.vector_store %arg9[%c20, %c0_40], %169 {strides = array<i32>} : memref<32x256xf32, #tpu.memory_space<vmem>>, vector<4x256xf32>,
    %171 = vector.extract_strided_slice %14 {offsets = [0, 24], sizes = [256, 4], strides = [1, 1]} : vector<256x32xf32> to vector<256x4xf32>
    %172 = arith.truncf %171 : vector<256x4xf32> to vector<256x4xbf16>
    %173 = vector.extract_strided_slice %11 {offsets = [24, 0], sizes = [4, 256], strides = [1, 1]} : vector<32x256xf32> to vector<4x256xf32>
    %174 = arith.truncf %173 : vector<4x256xf32> to vector<4x256xbf16>
    %cst_41 = arith.constant dense<0.000000e+00> : vector<256x256xf32>
    %175 = tpu.matmul %172, %174, %cst_41 {dimension_numbers = #tpu.dot_dimension_numbers<[1], [0], [0], [1], [0, 0, 1, 1], [], []>} : vector<256x4xbf16>, vector<4x256xbf16>, vector<256x256xf32> -> vector<256x256xf32>
    %cst_42 = arith.constant dense<0xFF800000> : vector<256xf32>
    %176 = vector.multi_reduction <maximumf>, %175, %cst_42 [0] : vector<256x256xf32> to vector<256xf32>
    %177 = vector.shape_cast %176 : vector<256xf32> to vector<1x256xf32>
    %178 = vector.broadcast %177 : vector<1x256xf32> to vector<256x256xf32>
    %179 = arith.subf %175, %178 : vector<256x256xf32>
    %180 = math.exp %179 : vector<256x256xf32>
    %cst_43 = arith.constant dense<0.000000e+00> : vector<256xf32>
    %181 = vector.multi_reduction <add>, %180, %cst_43 [0] : vector<256x256xf32> to vector<256xf32>
    %182 = vector.shape_cast %181 : vector<256xf32> to vector<1x256xf32>
    %183 = tpu.reciprocal %182 {approx = true} : vector<1x256xf32> -> vector<1x256xf32>
    %184 = vector.extract_strided_slice %13 {offsets = [24, 0], sizes = [4, 256], strides = [1, 1]} : vector<32x256xf32> to vector<4x256xf32>
    %185 = arith.truncf %184 : vector<4x256xf32> to vector<4x256xbf16>
    %186 = arith.truncf %180 : vector<256x256xf32> to vector<256x256xbf16>
    %cst_44 = arith.constant dense<0.000000e+00> : vector<4x256xf32>
    %187 = tpu.matmul %185, %186, %cst_44 {dimension_numbers = #tpu.dot_dimension_numbers<[1], [0], [0], [1], [0, 0, 1, 1], [], []>} : vector<4x256xbf16>, vector<256x256xbf16>, vector<4x256xf32> -> vector<4x256xf32>
    %188 = vector.extract_strided_slice %3 {offsets = [24, 0], sizes = [4, 256], strides = [1, 1]} : vector<32x256xf32> to vector<4x256xf32>
    %189 = vector.extract_strided_slice %1 {offsets = [24, 0], sizes = [4, 256], strides = [1, 1]} : vector<32x256xf32> to vector<4x256xf32>
    %190 = arith.addf %188, %189 : vector<4x256xf32>
    %191 = vector.broadcast %183 : vector<1x256xf32> to vector<4x256xf32>
    %192 = arith.mulf %187, %191 : vector<4x256xf32>
    %193 = vector.broadcast %4 : f32 to vector<4x256xf32>
    %194 = arith.mulf %193, %192 : vector<4x256xf32>
    %195 = arith.addf %190, %194 : vector<4x256xf32>
    %c24 = arith.constant 24 : index
    %c0_45 = arith.constant 0 : index
    %196 = vector.load %arg9[%c24, %c0_45] : memref<32x256xf32, #tpu.memory_space<vmem>>, vector<4x256xf32>
    tpu.vector_store %arg9[%c24, %c0_45], %195 {strides = array<i32>} : memref<32x256xf32, #tpu.memory_space<vmem>>, vector<4x256xf32>,
    %197 = vector.extract_strided_slice %14 {offsets = [0, 28], sizes = [256, 4], strides = [1, 1]} : vector<256x32xf32> to vector<256x4xf32>
    %198 = arith.truncf %197 : vector<256x4xf32> to vector<256x4xbf16>
    %199 = vector.extract_strided_slice %11 {offsets = [28, 0], sizes = [4, 256], strides = [1, 1]} : vector<32x256xf32> to vector<4x256xf32>
    %200 = arith.truncf %199 : vector<4x256xf32> to vector<4x256xbf16>
    %cst_46 = arith.constant dense<0.000000e+00> : vector<256x256xf32>
    %201 = tpu.matmul %198, %200, %cst_46 {dimension_numbers = #tpu.dot_dimension_numbers<[1], [0], [0], [1], [0, 0, 1, 1], [], []>} : vector<256x4xbf16>, vector<4x256xbf16>, vector<256x256xf32> -> vector<256x256xf32>
    %cst_47 = arith.constant dense<0xFF800000> : vector<256xf32>
    %202 = vector.multi_reduction <maximumf>, %201, %cst_47 [0] : vector<256x256xf32> to vector<256xf32>
    %203 = vector.shape_cast %202 : vector<256xf32> to vector<1x256xf32>
    %204 = vector.broadcast %203 : vector<1x256xf32> to vector<256x256xf32>
    %205 = arith.subf %201, %204 : vector<256x256xf32>
    %206 = math.exp %205 : vector<256x256xf32>
    %cst_48 = arith.constant dense<0.000000e+00> : vector<256xf32>
    %207 = vector.multi_reduction <add>, %206, %cst_48 [0] : vector<256x256xf32> to vector<256xf32>
    %208 = vector.shape_cast %207 : vector<256xf32> to vector<1x256xf32>
    %209 = tpu.reciprocal %208 {approx = true} : vector<1x256xf32> -> vector<1x256xf32>
    %210 = vector.extract_strided_slice %13 {offsets = [28, 0], sizes = [4, 256], strides = [1, 1]} : vector<32x256xf32> to vector<4x256xf32>
    %211 = arith.truncf %210 : vector<4x256xf32> to vector<4x256xbf16>
    %212 = arith.truncf %206 : vector<256x256xf32> to vector<256x256xbf16>
    %cst_49 = arith.constant dense<0.000000e+00> : vector<4x256xf32>
    %213 = tpu.matmul %211, %212, %cst_49 {dimension_numbers = #tpu.dot_dimension_numbers<[1], [0], [0], [1], [0, 0, 1, 1], [], []>} : vector<4x256xbf16>, vector<256x256xbf16>, vector<4x256xf32> -> vector<4x256xf32>
    %214 = vector.extract_strided_slice %3 {offsets = [28, 0], sizes = [4, 256], strides = [1, 1]} : vector<32x256xf32> to vector<4x256xf32>
    %215 = vector.extract_strided_slice %1 {offsets = [28, 0], sizes = [4, 256], strides = [1, 1]} : vector<32x256xf32> to vector<4x256xf32>
    %216 = arith.addf %214, %215 : vector<4x256xf32>
    %217 = vector.broadcast %209 : vector<1x256xf32> to vector<4x256xf32>
    %218 = arith.mulf %213, %217 : vector<4x256xf32>
    %219 = vector.broadcast %4 : f32 to vector<4x256xf32>
    %220 = arith.mulf %219, %218 : vector<4x256xf32>
    %221 = arith.addf %216, %220 : vector<4x256xf32>
    %c28 = arith.constant 28 : index
    %c0_50 = arith.constant 0 : index
    %222 = vector.load %arg9[%c28, %c0_50] : memref<32x256xf32, #tpu.memory_space<vmem>>, vector<4x256xf32>
    tpu.vector_store %arg9[%c28, %c0_50], %221 {strides = array<i32>} : memref<32x256xf32, #tpu.memory_space<vmem>>, vector<4x256xf32>,
    %cst_51 = arith.constant 0.000000e+00 : f32
    %223 = vector.broadcast %cst_51 : f32 to vector<32x290xf32>
    %c0_52 = arith.constant 0 : index
    %c0_53 = arith.constant 0 : index
    %224 = vector.load %arg10[%c0_52, %c0_53] : memref<32x290xf32, #tpu.memory_space<vmem>>, vector<32x290xf32>
    tpu.vector_store %arg10[%c0_52, %c0_53], %223 {strides = array<i32>} : memref<32x290xf32, #tpu.memory_space<vmem>>, vector<32x290xf32>,
    %c0_54 = arith.constant 0 : index
    %c0_55 = arith.constant 0 : index
    %225 = vector.load %arg9[%c0_54, %c0_55] : memref<32x256xf32, #tpu.memory_space<vmem>>, vector<32x256xf32>
    %c0_56 = arith.constant 0 : index
    %c17 = arith.constant 17 : index
    %226 = vector.load %arg10[%c0_56, %c17] : memref<32x290xf32, #tpu.memory_space<vmem>>, vector<32x256xf32>
    tpu.vector_store %arg10[%c0_56, %c17], %225 {strides = array<i32>} : memref<32x290xf32, #tpu.memory_space<vmem>>, vector<32x256xf32>,
    %c0_57 = arith.constant 0 : index
    %c0_58 = arith.constant 0 : index
    %227 = vector.load %arg10[%c0_57, %c0_58] : memref<32x290xf32, #tpu.memory_space<vmem>>, vector<32x290xf32>
    %228 = tpu.iota {dimensions = array<i32: 1>} : vector<1x256xi32>
    %c16_i32 = arith.constant 16 : i32
    %c0_i32 = arith.constant 0 : i32
    %229 = arith.cmpi eq, %c16_i32, %c0_i32 : i32
    %c1_i32 = arith.constant 1 : i32
    %230 = arith.select %229, %c1_i32, %c16_i32 : i32
    %231 = vector.broadcast %230 : i32 to vector<1x256xi32>
    %232 = arith.remsi %228, %231 : vector<1x256xi32>
    %c0_i32_59 = arith.constant 0 : i32
    %233 = vector.broadcast %c0_i32_59 : i32 to vector<1x256xi32>
    %234 = arith.cmpi ne, %232, %233 : vector<1x256xi32>
    %c0_i32_60 = arith.constant 0 : i32
    %235 = vector.broadcast %c0_i32_60 : i32 to vector<1x256xi32>
    %236 = arith.cmpi slt, %232, %235 : vector<1x256xi32>
    %c0_i32_61 = arith.constant 0 : i32
    %237 = arith.cmpi slt, %230, %c0_i32_61 : i32
    %238 = vector.broadcast %237 : i1 to vector<1x256xi1>
    %239 = vector.broadcast %238 : vector<1x256xi1> to vector<1x256xi1>
    %240 = arith.xori %236, %239 : vector<1x256xi1>
    %241 = arith.andi %240, %234 : vector<1x256xi1>
    %242 = vector.broadcast %230 : i32 to vector<1x256xi32>
    %243 = arith.addi %232, %242 : vector<1x256xi32>
    %244 = arith.select %241, %243, %232 : vector<1x256xi1>, vector<1x256xi32>
    %c0_i32_62 = arith.constant 0 : i32
    %245 = vector.broadcast %c0_i32_62 : i32 to vector<1x256xi32>
    %246 = arith.addi %244, %245 : vector<1x256xi32>
    %c1_i32_63 = arith.constant 1 : i32
    %247 = vector.broadcast %c1_i32_63 : i32 to vector<1x256xi32>
    %248 = arith.cmpi sge, %246, %247 : vector<1x256xi32>
    %c0_i32_64 = arith.constant 0 : i32
    %249 = vector.broadcast %c0_i32_64 : i32 to vector<1x256xi32>
    %250 = arith.addi %244, %249 : vector<1x256xi32>
    %c16_i32_65 = arith.constant 16 : i32
    %251 = vector.broadcast %c16_i32_65 : i32 to vector<1x256xi32>
    %252 = arith.cmpi sle, %250, %251 : vector<1x256xi32>
    %253 = arith.andi %248, %252 : vector<1x256xi1>
    %c1_i32_66 = arith.constant 1 : i32
    %254 = vector.broadcast %c1_i32_66 : i32 to vector<1x256xi32>
    %255 = arith.addi %244, %254 : vector<1x256xi32>
    %c1_i32_67 = arith.constant 1 : i32
    %256 = vector.broadcast %c1_i32_67 : i32 to vector<1x256xi32>
    %257 = arith.cmpi sge, %255, %256 : vector<1x256xi32>
    %c1_i32_68 = arith.constant 1 : i32
    %258 = vector.broadcast %c1_i32_68 : i32 to vector<1x256xi32>
    %259 = arith.addi %244, %258 : vector<1x256xi32>
    %c16_i32_69 = arith.constant 16 : i32
    %260 = vector.broadcast %c16_i32_69 : i32 to vector<1x256xi32>
    %261 = arith.cmpi sle, %259, %260 : vector<1x256xi32>
    %262 = arith.andi %257, %261 : vector<1x256xi1>
    %c2_i32 = arith.constant 2 : i32
    %263 = vector.broadcast %c2_i32 : i32 to vector<1x256xi32>
    %264 = arith.addi %244, %263 : vector<1x256xi32>
    %c1_i32_70 = arith.constant 1 : i32
    %265 = vector.broadcast %c1_i32_70 : i32 to vector<1x256xi32>
    %266 = arith.cmpi sge, %264, %265 : vector<1x256xi32>
    %c2_i32_71 = arith.constant 2 : i32
    %267 = vector.broadcast %c2_i32_71 : i32 to vector<1x256xi32>
    %268 = arith.addi %244, %267 : vector<1x256xi32>
    %c16_i32_72 = arith.constant 16 : i32
    %269 = vector.broadcast %c16_i32_72 : i32 to vector<1x256xi32>
    %270 = arith.cmpi sle, %268, %269 : vector<1x256xi32>
    %271 = arith.andi %266, %270 : vector<1x256xi1>
    %272 = vector.extract_strided_slice %227 {offsets = [0, 0], sizes = [32, 256], strides = [1, 1]} : vector<32x290xf32> to vector<32x256xf32>
    %cst_73 = arith.constant 0.000000e+00 : f32
    %273 = vector.shape_cast %253 : vector<1x256xi1> to vector<1x256xi1>
    %274 = vector.broadcast %273 : vector<1x256xi1> to vector<32x256xi1>
    %275 = vector.broadcast %cst_73 : f32 to vector<32x256xf32>
    %276 = arith.select %274, %272, %275 : vector<32x256xi1>, vector<32x256xf32>
    %277 = arith.truncf %276 : vector<32x256xf32> to vector<32x256xbf16>
    %278 = vector.extract_strided_slice %227 {offsets = [0, 1], sizes = [32, 256], strides = [1, 1]} : vector<32x290xf32> to vector<32x256xf32>
    %cst_74 = arith.constant 0.000000e+00 : f32
    %279 = vector.shape_cast %262 : vector<1x256xi1> to vector<1x256xi1>
    %280 = vector.broadcast %279 : vector<1x256xi1> to vector<32x256xi1>
    %281 = vector.broadcast %cst_74 : f32 to vector<32x256xf32>
    %282 = arith.select %280, %278, %281 : vector<32x256xi1>, vector<32x256xf32>
    %283 = arith.truncf %282 : vector<32x256xf32> to vector<32x256xbf16>
    %284 = vector.extract_strided_slice %227 {offsets = [0, 2], sizes = [32, 256], strides = [1, 1]} : vector<32x290xf32> to vector<32x256xf32>
    %cst_75 = arith.constant 0.000000e+00 : f32
    %285 = vector.shape_cast %271 : vector<1x256xi1> to vector<1x256xi1>
    %286 = vector.broadcast %285 : vector<1x256xi1> to vector<32x256xi1>
    %287 = vector.broadcast %cst_75 : f32 to vector<32x256xf32>
    %288 = arith.select %286, %284, %287 : vector<32x256xi1>, vector<32x256xf32>
    %289 = arith.truncf %288 : vector<32x256xf32> to vector<32x256xbf16>
    %290 = vector.extract_strided_slice %227 {offsets = [0, 16], sizes = [32, 256], strides = [1, 1]} : vector<32x290xf32> to vector<32x256xf32>
    %cst_76 = arith.constant 0.000000e+00 : f32
    %291 = vector.shape_cast %253 : vector<1x256xi1> to vector<1x256xi1>
    %292 = vector.broadcast %291 : vector<1x256xi1> to vector<32x256xi1>
    %293 = vector.broadcast %cst_76 : f32 to vector<32x256xf32>
    %294 = arith.select %292, %290, %293 : vector<32x256xi1>, vector<32x256xf32>
    %295 = arith.truncf %294 : vector<32x256xf32> to vector<32x256xbf16>
    %296 = vector.extract_strided_slice %227 {offsets = [0, 17], sizes = [32, 256], strides = [1, 1]} : vector<32x290xf32> to vector<32x256xf32>
    %cst_77 = arith.constant 0.000000e+00 : f32
    %297 = vector.shape_cast %262 : vector<1x256xi1> to vector<1x256xi1>
    %298 = vector.broadcast %297 : vector<1x256xi1> to vector<32x256xi1>
    %299 = vector.broadcast %cst_77 : f32 to vector<32x256xf32>
    %300 = arith.select %298, %296, %299 : vector<32x256xi1>, vector<32x256xf32>
    %301 = arith.truncf %300 : vector<32x256xf32> to vector<32x256xbf16>
    %302 = vector.extract_strided_slice %227 {offsets = [0, 18], sizes = [32, 256], strides = [1, 1]} : vector<32x290xf32> to vector<32x256xf32>
    %cst_78 = arith.constant 0.000000e+00 : f32
    %303 = vector.shape_cast %271 : vector<1x256xi1> to vector<1x256xi1>
    %304 = vector.broadcast %303 : vector<1x256xi1> to vector<32x256xi1>
    %305 = vector.broadcast %cst_78 : f32 to vector<32x256xf32>
    %306 = arith.select %304, %302, %305 : vector<32x256xi1>, vector<32x256xf32>
    %307 = arith.truncf %306 : vector<32x256xf32> to vector<32x256xbf16>
    %308 = vector.extract_strided_slice %227 {offsets = [0, 32], sizes = [32, 256], strides = [1, 1]} : vector<32x290xf32> to vector<32x256xf32>
    %cst_79 = arith.constant 0.000000e+00 : f32
    %309 = vector.shape_cast %253 : vector<1x256xi1> to vector<1x256xi1>
    %310 = vector.broadcast %309 : vector<1x256xi1> to vector<32x256xi1>
    %311 = vector.broadcast %cst_79 : f32 to vector<32x256xf32>
    %312 = arith.select %310, %308, %311 : vector<32x256xi1>, vector<32x256xf32>
    %313 = arith.truncf %312 : vector<32x256xf32> to vector<32x256xbf16>
    %314 = vector.extract_strided_slice %227 {offsets = [0, 33], sizes = [32, 256], strides = [1, 1]} : vector<32x290xf32> to vector<32x256xf32>
    %cst_80 = arith.constant 0.000000e+00 : f32
    %315 = vector.shape_cast %262 : vector<1x256xi1> to vector<1x256xi1>
    %316 = vector.broadcast %315 : vector<1x256xi1> to vector<32x256xi1>
    %317 = vector.broadcast %cst_80 : f32 to vector<32x256xf32>
    %318 = arith.select %316, %314, %317 : vector<32x256xi1>, vector<32x256xf32>
    %319 = arith.truncf %318 : vector<32x256xf32> to vector<32x256xbf16>
    %320 = vector.extract_strided_slice %227 {offsets = [0, 34], sizes = [32, 256], strides = [1, 1]} : vector<32x290xf32> to vector<32x256xf32>
    %cst_81 = arith.constant 0.000000e+00 : f32
    %321 = vector.shape_cast %271 : vector<1x256xi1> to vector<1x256xi1>
    %322 = vector.broadcast %321 : vector<1x256xi1> to vector<32x256xi1>
    %323 = vector.broadcast %cst_81 : f32 to vector<32x256xf32>
    %324 = arith.select %322, %320, %323 : vector<32x256xi1>, vector<32x256xf32>
    %325 = arith.truncf %324 : vector<32x256xf32> to vector<32x256xbf16>
    %326 = tpu.concatenate %277, %283, %289, %295, %301, %307, %313, %319, %325 in 0 : vector<32x256xbf16>, vector<32x256xbf16>, vector<32x256xbf16>, vector<32x256xbf16>, vector<32x256xbf16>, vector<32x256xbf16>, vector<32x256xbf16>, vector<32x256xbf16>, vector<32x256xbf16> -> vector<288x256xbf16>
    %c0_82 = arith.constant 0 : index
    %c0_83 = arith.constant 0 : index
    %327 = vector.load %arg6[%c0_82, %c0_83] : memref<32x288xbf16, #tpu.memory_space<vmem>>, vector<32x288xbf16>
    %cst_84 = arith.constant dense<0.000000e+00> : vector<32x256xf32>
    %328 = tpu.matmul %327, %326, %cst_84 {dimension_numbers = #tpu.dot_dimension_numbers<[1], [0], [0], [1], [0, 0, 1, 1], [], []>} : vector<32x288xbf16>, vector<288x256xbf16>, vector<32x256xf32> -> vector<32x256xf32>
    %c0_85 = arith.constant 0 : index
    %c0_86 = arith.constant 0 : index
    %329 = vector.load %arg7[%c0_85, %c0_86] : memref<32x1xf32, #tpu.memory_space<vmem>>, vector<32x1xf32>
    %330 = vector.broadcast %329 : vector<32x1xf32> to vector<32x256xf32>
    %331 = arith.addf %328, %330 : vector<32x256xf32>
    %c0_87 = arith.constant 0 : index
    %c0_88 = arith.constant 0 : index
    %c0_89 = arith.constant 0 : index
    %332 = vector.load %arg8[%c0_87, %c0_88, %c0_89] : memref<1x32x256xf32, #tpu.memory_space<vmem>>, vector<1x32x256xf32>
    %333 = vector.shape_cast %332 : vector<1x32x256xf32> to vector<32x256xf32>
    %334 = vector.shape_cast %331 : vector<32x256xf32> to vector<1x32x256xf32>
    tpu.vector_store %arg8[%c0_87, %c0_88, %c0_89], %334 {strides = array<i32>} : memref<1x32x256xf32, #tpu.memory_space<vmem>>, vector<1x32x256xf32>,
    return
  }
  func.func @transform_0(%arg0: i32) -> (i32, i32, i32) {
    %c0_i32 = arith.constant 0 : i32
    %c0_i32_0 = arith.constant 0 : i32
    %c0_i32_1 = arith.constant 0 : i32
    return %arg0, %c0_i32, %c0_i32_0 : i32, i32, i32
  }
  func.func @transform_1(%arg0: i32) -> (i32, i32, i32) {
    %c0_i32 = arith.constant 0 : i32
    %c0_i32_0 = arith.constant 0 : i32
    %c0_i32_1 = arith.constant 0 : i32
    %c0_i32_2 = arith.constant 0 : i32
    return %c0_i32, %c0_i32_0, %c0_i32_1 : i32, i32, i32
  }
  func.func @transform_2(%arg0: i32) -> (i32, i32) {
    %c0_i32 = arith.constant 0 : i32
    %c0_i32_0 = arith.constant 0 : i32
    %c0_i32_1 = arith.constant 0 : i32
    return %c0_i32, %c0_i32_0 : i32, i32
  }
  func.func @transform_3(%arg0: i32) -> (i32, i32) {
    %c0_i32 = arith.constant 0 : i32
    %c0_i32_0 = arith.constant 0 : i32
    %c0_i32_1 = arith.constant 0 : i32
    return %c0_i32, %c0_i32_0 : i32, i32
  }
  func.func @transform_4(%arg0: i32) -> i32 {
    %c0_i32 = arith.constant 0 : i32
    %c0_i32_0 = arith.constant 0 : i32
    return %c0_i32 : i32
  }
  func.func @transform_5(%arg0: i32) -> (i32, i32) {
    %c0_i32 = arith.constant 0 : i32
    %c0_i32_0 = arith.constant 0 : i32
    %c0_i32_1 = arith.constant 0 : i32
    return %c0_i32, %c0_i32_0 : i32, i32
  }
  func.func @transform_6(%arg0: i32) -> (i32, i32) {
    %c0_i32 = arith.constant 0 : i32
    %c0_i32_0 = arith.constant 0 : i32
    %c0_i32_1 = arith.constant 0 : i32
    return %c0_i32, %c0_i32_0 : i32, i32
  }
  func.func @transform_7(%arg0: i32) -> (i32, i32, i32) {
    %c0_i32 = arith.constant 0 : i32
    %c0_i32_0 = arith.constant 0 : i32
    %c0_i32_1 = arith.constant 0 : i32
    return %arg0, %c0_i32, %c0_i32_0 : i32, i32, i32
  }
}

</mosaic_0001>

<bundles_post_ra>
// kernel: a_call__.1
= control target key start
LH: loop header
LB: loop body
LE: loop exit
PB: predicated region body
PF: predicated region fallthrough
CT: control target
= control target key end

     0   :  { %s9030_s26 = smov 0   ;;  %s15118_s0 = inlined_call_operand.vmem [shape: f32[2,32,256], index: 0, kind: input, shape index: {}]   ;;  %s15119_s1 = inlined_call_operand.vmem [shape: f32[1,32,256], index: 1, kind: input, shape index: {}]   ;;  %s15120_s2 = inlined_call_operand.vmem [shape: bf16[96,32], index: 2, kind: input, shape index: {}]   ;;  %s15121_s3 = inlined_call_operand.vmem [shape: f32[96,1], index: 3, kind: input, shape index: {}]   ;;  %s15122_s4 = inlined_call_operand.<no memory space> [shape: f32[1], index: 4, kind: input, shape index: {}]   ;;  %s15123_s5 = inlined_call_operand.vmem [shape: bf16[32,288], index: 5, kind: input, shape index: {}]   ;;  %s15124_s6 = inlined_call_operand.vmem [shape: f32[32,1], index: 6, kind: input, shape index: {}]   ;;  %s15125_s7 = inlined_call_operand.vmem [shape: f32[2,32,256], index: 7, kind: output, shape index: {}]  }
   0x1   :  { %12 = sst [smem:[#allocation4]] %s15122_s4 }
   0x2 LB: > { %s7273_s27 = sadd.s32 4294967295, %s8968_s26   ;;  %p7277_p0 = scmp.ge.s32.totalorder %s8968_s26, 1  ;;  %s8968_s26 = sphi %s9030_s26, %s18_s26  }
   0x3   : > { %p238_p1 = scmp.lt.s32.totalorder %s8968_s26, 3 }
   0x5   : > { %p239_p2 = pnand %p7277_p0, %p238_p1 }
   0x7   : > { %242 = sbr.rel (%p239_p2) target bundleno = 5102 (0x13ee), region = 48 }
   0xc   : > { %p270_p3 = scmp.lt.s32.totalorder %s7273_s27, 1  ;;  %v7606_v12 = vld [vmem:[%s15120_s2] sm:$0xff]  ;;  %vm416_vm0 = vcmask 261120   ;;  %v8970_v15 = vmov 0   ;;  %v320_v16 = vld [vmem:[%s15121_s3 + $0x30] sm:$0xff]  ;;  %v319_v17 = vld [vmem:[%s15121_s3 + $0x28] sm:$0xff] }
   0xd   : > { %v318_v13 = vld [vmem:[%s15121_s3 + $0x20] sm:$0xff]  ;;  %7645 = vset.pattern.permute.xlu2 %v8970_v15  ;;  %7643 = vset.pattern.permute.xlu0 %v8970_v15  ;;  %v7607_v18 = vld [vmem:[%s15120_s2 + $0x8] sm:$0xff]  ;;  %v321_v19 = vld [vmem:[%s15121_s3 + $0x38] sm:$0xff]  ;;  %vm644_vm1 = vcmask 1041408   ;;  %vm595_vm2 = vcmask 31744   ;;  %s8971_s10 = smov 124  }
   0xe   : > { %s16078_s27 = smov (!%p270_p3, %s7273_s27), 1  ;;  %v314_v14 = vld [vmem:[%s15121_s3] sm:$0xff]  ;;  %348 = vperm.xlu0 %7643, %v318_v13   ;;  %7644 = vset.pattern.permute.xlu1 %v8970_v15  ;;  %v7608_v21 = vld [vmem:[%s15120_s2 + $0x10] sm:$0xff]  ;;  %v7609_v22 = vld [vmem:[%s15120_s2 + $0x18] sm:$0xff]  ;;  %s8972_s11 = smov 116   ;;  %vm6314_vm3 = vcmask 1047688  }
   0xf   : > { %s7604_s4 = sshll.u32 %s16078_s27, 6  ;;  %328 = vperm.xlu2 %7645, %v314_v14   ;;  %358 = vperm.xlu1 %7644, %v320_v16   ;;  %v322_v20 = vld [vmem:[%s15121_s3 + $0x40] sm:$0xff]  ;;  %s8973_s14 = smov 112   ;;  %vm6254_vm4 = vcmask 277504   ;;  %vm6297_vm5 = vcmask 138240   ;;  %vm6444_vm6 = vcmask 1039360  }
  0x10   : > { %s9046_s30 = scalar_lea.vmem %s15118_s0, %s7604_s4  ;;  %v7610_v23 = vld [vmem:[%s15120_s2 + $0x20] sm:$0xff]  ;;  %s8974_s17 = smov 108   ;;  %vm6554_vm9 = vcmask 916480   ;;  %vm6501_vm10 = vcmask 1031168   ;;  %vm6766_vm11 = vcmask 777216   ;;  %vm6713_vm14 = vcmask 785408  }
  0x11   : > { %v285_v0 = vld [vmem:[%s9046_s30 + $0x20] sm:$0xff]  ;;  %v287_v1 = vld [vmem:[%s9046_s30 + $0x30] sm:$0xff]  ;;  %v286_v2 = vld [vmem:[%s9046_s30 + $0x28] sm:$0xff]  ;;  %s8975_s20 = smov 120   ;;  %s8976_s23 = smov 104   ;;  %vm6660_vm15 = vcmask 900096  }
  0x12   : > { %v312_v3 = vpack.c.bf16 %v287_v1, %v285_v0  ;;  %v288_v4 = vld [vmem:[%s9046_s30 + $0x38] sm:$0xff]  ;;  %v281_v5 = vld [vmem:[%s9046_s30] sm:$0xff]  ;;  %v283_v6 = vld [vmem:[%s9046_s30 + $0x10] sm:$0xff]  ;;  %s8977_s28 = smov 100   ;;  %s8980_s18 = smov 127  }
  0x13   : > { %v313_v7 = vpack.c.bf16 %v288_v4, %v286_v2  ;;  %v282_v8 = vld [vmem:[%s9046_s30 + $0x8] sm:$0xff]  ;;  %v284_v9 = vld [vmem:[%s9046_s30 + $0x18] sm:$0xff]  ;;  %v310_v10 = vpack.c.bf16 %v283_v6, %v281_v5  ;;  %s8981_s29 = smov 95   ;;  %s8982_s8 = smov 126  }
  0x14   : > { %441 = vmatpush.bf16.msra.mxu0 %v312_v3  ;;  %v311_v11 = vpack.c.bf16 %v284_v9, %v282_v8  ;;  %s8983_s9 = smov 96   ;;  %s8986_s16 = smov 94  }
  0x15   : > { %480 = vmatpush.bf16.msra.mxu1 %v313_v7 }
  0x16   : > { %353 = vperm.xlu0 %7643, %v319_v17  }
  0x17   : > { %363 = vperm.xlu1 %7644, %v321_v19  }
  0x18   : > { %442 = vmatpush.bf16.msra.mxu0 %v310_v10 }
  0x19   : > { %481 = vmatpush.bf16.msra.mxu1 %v311_v11 }
  0x1b   : > { %7306 = vmatmul.msk.bf16.vlgmr.msra.gmra.mxu0 %vm416_vm0, %v7606_v12 }
  0x1c   : > { %7312 = vmatmul.msk.bf16.vlgmr.msra.gmra.mxu1 %vm416_vm0, %v7606_v12 }
  0x1f   : > { %368 = vperm.xlu1 %7644, %v322_v20  }
  0x2b   : > { %7307 = vmatmul.msk.bf16.gmra.mxu0 %vm416_vm0, %v7607_v18 }
  0x2c   : > { %7313 = vmatmul.msk.bf16.gmra.mxu1 %vm416_vm0, %v7607_v18 }
  0x3b   : > { %7308 = vmatmul.msk.bf16.gmra.mxu0 %vm416_vm0, %v7608_v21 }
  0x3c   : > { %7314 = vmatmul.msk.bf16.gmra.mxu1 %vm416_vm0, %v7608_v21 }
  0x4b   : > { %7309 = vmatmul.msk.bf16.gmra.mxu0 %vm416_vm0, %v7609_v22 }
  0x4c   : > { %7315 = vmatmul.msk.bf16.gmra.mxu1 %vm416_vm0, %v7609_v22 }
  0x5b   : > { %7310 = vmatmul.msk.bf16.gmra.mxu0 %vm416_vm0, %v7610_v23 }
  0x5c   : > { %7316 = vmatmul.msk.bf16.gmra.mxu1 %vm416_vm0, %v7610_v23 }
  0x69   : > { %v329_v24 = vpop.permute.xlu2 %328 }
  0x80   : > { %v349_v37 = vpop.permute.xlu0 %348 }
  0x81   : > { %v359_v49 = vpop.permute.xlu1 %358 }
  0x88   : > { %v354_v44 = vpop.permute.xlu0 %353 }
  0x89   : > { %v364_v54 = vpop.permute.xlu1 %363 }
  0x98   : > { %v444_v25 = vpop.f32.mrf.mxu0 }
  0x99   : > { %v445_v26 = vadd.f32 %v444_v25, %v329_v24  ;;  %v483_v27 = vpop.f32.mrf.mxu1 }
  0x9a   : > { %v484_v36 = vadd.f32 %v483_v27, %v329_v24 }
  0x9b   : > { %v9099_v28 = vpack.c.bf16 %v445_v26, %v445_v26 }
  0x9c   : > { %v9115_v41 = vpack.c.bf16 %v484_v36, %v484_v36 }
  0x9d   : > { %15443 = vst [vmem:[#allocation5_spill] sm:$0xff] %v9099_v28  ;;  %v646_v29 = vsel %vm644_vm1, %v9099_v28, 0 }
  0x9e   : > { %658 = vmatpush.bf16.msra.mxu2 %v646_v29  ;;  %15450 = vst [vmem:[#allocation12_spill] sm:$0xff] %v9115_v41  ;;  %v649_v43 = vsel %vm644_vm1, %v9115_v41, 0 }
  0x9f   : > { %747 = vmatpush.bf16.msra.mxu3 %v649_v43 }
  0xa0   : > { %v9103_v30 = vpop.f32.mrf.mxu0 }
  0xa1   : > { %15444 = vst [vmem:[#allocation6_spill] sm:$0xff] %v9103_v30  ;;  %v9105_v31 = vpop.f32.mrf.mxu1 }
  0xa2   : > { %15445 = vst [vmem:[#allocation7_spill] sm:$0xff] %v9105_v31 }
  0xa8   : > { %v9107_v32 = vpop.f32.mrf.mxu0 }
  0xa9   : > { %15446 = vst [vmem:[#allocation8_spill] sm:$0xff] %v9107_v32  ;;  %v9109_v33 = vpop.f32.mrf.mxu1 }
  0xaa   : > { %15447 = vst [vmem:[#allocation9_spill] sm:$0xff] %v9109_v33 }
  0xb0   : > { %v9111_v34 = vpop.f32.mrf.mxu0 }
  0xb1   : > { %15448 = vst [vmem:[#allocation10_spill] sm:$0xff] %v9111_v34  ;;  %v9113_v35 = vpop.f32.mrf.mxu1 }
  0xb2   : > { %15449 = vst [vmem:[#allocation11_spill] sm:$0xff] %v9113_v35  ;;  %v325_v35 = vld [vmem:[%s15121_s3 + $0x58] sm:$0xff] }
  0xb8   : > { %v454_v38 = vpop.f32.mrf.mxu0 }
  0xb9   : > { %v455_v39 = vadd.f32 %v454_v38, %v349_v37  ;;  %v493_v40 = vpop.f32.mrf.mxu1 }
  0xba   : > { %v494_v42 = vadd.f32 %v493_v40, %v349_v37 }
  0xbb   : > { %513 = vxpose.xlu2.b32.start [1/4] (short) %v455_v39, 128  ;;  %v323_v39 = vld [vmem:[%s15121_s3 + $0x48] sm:$0xff] }
  0xbc   : > { %545 = vxpose.xlu0.b32.start [1/4] (short) %v494_v42, 128 }
  0xc0   : > { %v456_v45 = vpop.f32.mrf.mxu0 }
  0xc1   : > { %v457_v46 = vadd.f32 %v456_v45, %v354_v44  ;;  %v495_v47 = vpop.f32.mrf.mxu1 }
  0xc2   : > { %v496_v48 = vadd.f32 %v495_v47, %v354_v44 }
  0xc3   : > { %514 = vxpose.xlu2.b32.cont [2/4] (short) %v457_v46, 128 }
  0xc4   : > { %546 = vxpose.xlu0.b32.cont [2/4] (short) %v496_v48, 128 }
  0xc8   : > { %v459_v50 = vpop.f32.mrf.mxu0 }
  0xc9   : > { %v460_v51 = vadd.f32 %v459_v50, %v359_v49  ;;  %v498_v52 = vpop.f32.mrf.mxu1 }
  0xca   : > { %v499_v53 = vadd.f32 %v498_v52, %v359_v49 }
  0xcb   : > { %515 = vxpose.xlu2.b32.cont [3/4] (short) %v460_v51, 128 }
  0xcc   : > { %547 = vxpose.xlu0.b32.cont [3/4] (short) %v499_v53, 128 }
  0xd0   : > { %v461_v55 = vpop.f32.mrf.mxu0 }
  0xd1   : > { %v462_v56 = vadd.f32 %v461_v55, %v364_v54  ;;  %v500_v57 = vpop.f32.mrf.mxu1 }
  0xd2   : > { %v501_v58 = vadd.f32 %v500_v57, %v364_v54  ;;  %v316_v57 = vld [vmem:[%s15121_s3 + $0x10] sm:$0xff] }
  0xd3   : > { %516 = vxpose.xlu2.b32.end [4/4] (short) %v462_v56, 128 }
  0xd4   : > { %548 = vxpose.xlu0.b32.end [4/4] (short) %v501_v58, 128 }
 0x154   : > { %v529_v59 = vpop.trf.xlu2 }
 0x15c   : > { %v530_v60 = vpop.trf.xlu2 }
 0x15d   : > { %v9119_v61 = vpack.c.bf16 %v530_v60, %v529_v59 }
 0x15f   : > { %15451 = vst [vmem:[#allocation13_spill] sm:$0xff] %v9119_v61  ;;  %1284 = vrot.lane.b32.xlu1 %v9119_v61, %s8971_s10  ;;  %7318 = vmatmul.msk.bf16.vlgmr.msra.gmra.mxu2 %vm595_vm2, %v9119_v61 }
 0x160   : > { %v561_v62 = vpop.trf.xlu0  ;;  %7334 = vmatmul.msk.bf16.vlgmr.msra.gmra.mxu3 %vm595_vm2, %v9119_v61 }
 0x164   : > { %v531_v63 = vpop.trf.xlu2 }
 0x168   : > { %v562_v0 = vpop.trf.xlu0 }
 0x169   : > { %v9153_v18 = vpack.c.bf16 %v562_v0, %v561_v62 }
 0x16b   : > { %15456 = vst [vmem:[#allocation18_spill] sm:$0xff] %v9153_v18 }
 0x16c   : > { %v532_v1 = vpop.trf.xlu2 }
 0x16d   : > { %v9127_v2 = vpack.c.bf16 %v532_v1, %v531_v63 }
 0x16f   : > { %15452 = vst [vmem:[#allocation14_spill] sm:$0xff] %v9127_v2  ;;  %1286 = vrot.lane.b32.xlu1 %v9127_v2, %s8971_s10  ;;  %7319 = vmatmul.msk.bf16.gmra.mxu2 %vm595_vm2, %v9127_v2 }
 0x170   : > { %v563_v3 = vpop.trf.xlu0  ;;  %7335 = vmatmul.msk.bf16.gmra.mxu3 %vm595_vm2, %v9127_v2 }
 0x174   : > { %v533_v4 = vpop.trf.xlu2 }
 0x178   : > { %v564_v5 = vpop.trf.xlu0 }
 0x179   : > { %v9206_v45 = vpack.c.bf16 %v564_v5, %v563_v3  ;;  %v315_v3 = vld [vmem:[%s15121_s3 + $0x8] sm:$0xff] }
 0x17b   : > { %15462 = vst [vmem:[#allocation24_spill] sm:$0xff] %v9206_v45 }
 0x17c   : > { %v534_v6 = vpop.trf.xlu2 }
 0x17d   : > { %v9135_v7 = vpack.c.bf16 %v534_v6, %v533_v4 }
 0x17f   : > { %15453 = vst [vmem:[#allocation15_spill] sm:$0xff] %v9135_v7  ;;  %1288 = vrot.lane.b32.xlu1 %v9135_v7, %s8971_s10  ;;  %7320 = vmatmul.msk.bf16.gmra.mxu2 %vm595_vm2, %v9135_v7 }
 0x180   : > { %v565_v8 = vpop.trf.xlu0  ;;  %7336 = vmatmul.msk.bf16.gmra.mxu3 %vm595_vm2, %v9135_v7 }
 0x184   : > { %v535_v9 = vpop.trf.xlu2 }
 0x188   : > { %v566_v10 = vpop.trf.xlu0 }
 0x189   : > { %v9214_v46 = vpack.c.bf16 %v566_v10, %v565_v8 }
 0x18b   : > { %15463 = vst [vmem:[#allocation25_spill] sm:$0xff] %v9214_v46 }
 0x18c   : > { %v536_v11 = vpop.trf.xlu2 }
 0x18d   : > { %v9143_v12 = vpack.c.bf16 %v536_v11, %v535_v9  ;;  %v317_v11 = vld [vmem:[%s15121_s3 + $0x18] sm:$0xff] }
 0x18f   : > { %15454 = vst [vmem:[#allocation16_spill] sm:$0xff] %v9143_v12  ;;  %1290 = vrot.lane.b32.xlu1 %v9143_v12, %s8971_s10  ;;  %7321 = vmatmul.msk.bf16.gmra.mxu2 %vm595_vm2, %v9143_v12 }
 0x190   : > { %v567_v13 = vpop.trf.xlu0  ;;  %7337 = vmatmul.msk.bf16.gmra.mxu3 %vm595_vm2, %v9143_v12 }
 0x194   : > { %v537_v14 = vpop.trf.xlu2 }
 0x198   : > { %v568_v15 = vpop.trf.xlu0 }
 0x199   : > { %v9179_v36 = vpack.c.bf16 %v568_v15, %v567_v13 }
 0x19b   : > { %15459 = vst [vmem:[#allocation21_spill] sm:$0xff] %v9179_v36 }
 0x19c   : > { %v538_v16 = vpop.trf.xlu2 }
 0x19d   : > { %v9151_v17 = vpack.c.bf16 %v538_v16, %v537_v14 }
 0x19f   : > { %15455 = vst [vmem:[#allocation17_spill] sm:$0xff] %v9151_v17  ;;  %1292 = vrot.lane.b32.xlu1 %v9151_v17, %s8971_s10  ;;  %7322 = vmatmul.msk.bf16.gmra.mxu2 %vm595_vm2, %v9151_v17 }
 0x1a0   : > { %v569_v19 = vpop.trf.xlu0  ;;  %7338 = vmatmul.msk.bf16.gmra.mxu3 %vm595_vm2, %v9151_v17 }
 0x1a2   : > { %1300 = vrot.lane.b32.xlu0 %v9153_v18, %s8971_s10 }
 0x1a4   : > { %v539_v20 = vpop.trf.xlu2 }
 0x1a8   : > { %v570_v21 = vpop.trf.xlu0 }
 0x1a9   : > { %v9238_v51 = vpack.c.bf16 %v570_v21, %v569_v19  ;;  %v7611_v19 = vld [vmem:[%s15120_s2 + $0x28] sm:$0xff] }
 0x1aa   : > { %2706 = vrot.lane.b32.xlu0 %v9135_v7, %s8972_s11  ;;  %7311 = vmatmul.msk.bf16.gmra.mxu0 %vm416_vm0, %v7611_v19 }
 0x1ab   : > { %15464 = vst [vmem:[#allocation26_spill] sm:$0xff] %v9238_v51  ;;  %7317 = vmatmul.msk.bf16.gmra.mxu1 %vm416_vm0, %v7611_v19 }
 0x1ac   : > { %v540_v22 = vpop.trf.xlu2 }
 0x1ad   : > { %v9165_v23 = vpack.c.bf16 %v540_v22, %v539_v20 }
 0x1af   : > { %15457 = vst [vmem:[#allocation19_spill] sm:$0xff] %v9165_v23  ;;  %1294 = vrot.lane.b32.xlu1 %v9165_v23, %s8971_s10  ;;  %7323 = vmatmul.msk.bf16.gmra.mxu2 %vm595_vm2, %v9165_v23 }
 0x1b0   : > { %v571_v24 = vpop.trf.xlu0  ;;  %7339 = vmatmul.msk.bf16.gmra.mxu3 %vm595_vm2, %v9165_v23 }
 0x1b2   : > { %2712 = vrot.lane.b32.xlu0 %v9165_v23, %s8972_s11 }
 0x1b4   : > { %v541_v25 = vpop.trf.xlu2 }
 0x1b8   : > { %v572_v26 = vpop.trf.xlu0 }
 0x1b9   : > { %v9240_v52 = vpack.c.bf16 %v572_v26, %v571_v24 }
 0x1ba   : > { %2718 = vrot.lane.b32.xlu0 %v9153_v18, %s8972_s11 }
 0x1bb   : > { %15465 = vst [vmem:[#allocation27_spill] sm:$0xff] %v9240_v52 }
 0x1bc   : > { %v542_v27 = vpop.trf.xlu2 }
 0x1bd   : > { %v9177_v29 = vpack.c.bf16 %v542_v27, %v541_v25 }
 0x1bf   : > { %15458 = vst [vmem:[#allocation20_spill] sm:$0xff] %v9177_v29  ;;  %1296 = vrot.lane.b32.xlu2 %v9177_v29, %s8971_s10  ;;  %7324 = vmatmul.msk.bf16.gmra.mxu2 %vm595_vm2, %v9177_v29 }
 0x1c0   : > { %v573_v37 = vpop.trf.xlu0  ;;  %7340 = vmatmul.msk.bf16.gmra.mxu3 %vm595_vm2, %v9177_v29 }
 0x1c2   : > { %2724 = vrot.lane.b32.xlu0 %v9179_v36, %s8972_s11 }
 0x1c4   : > { %v543_v38 = vpop.trf.xlu2 }
 0x1c7   : > { %373 = vperm.xlu2 %7645, %v323_v39  }
 0x1c8   : > { %v574_v40 = vpop.trf.xlu0 }
 0x1c9   : > { %v9192_v42 = vpack.c.bf16 %v574_v40, %v573_v37 }
 0x1cb   : > { %15460 = vst [vmem:[#allocation22_spill] sm:$0xff] %v9192_v42  ;;  %2730 = vrot.lane.b32.xlu0 %v9192_v42, %s8972_s11 }
 0x1cc   : > { %v544_v43 = vpop.trf.xlu2 }
 0x1cd   : > { %v9196_v44 = vpack.c.bf16 %v544_v43, %v543_v38 }
 0x1cf   : > { %15461 = vst [vmem:[#allocation23_spill] sm:$0xff] %v9196_v44  ;;  %2704 = vrot.lane.b32.xlu2 %v9127_v2, %s8972_s11  ;;  %1298 = vrot.lane.b32.xlu1 %v9196_v44, %s8971_s10 }
 0x1d0   : > { %7325 = vmatmul.msk.bf16.gmra.mxu2 %vm595_vm2, %v9196_v44  ;;  %7341 = vmatmul.msk.bf16.gmra.mxu3 %vm595_vm2, %v9196_v44  ;;  %v575_v50 = vpop.trf.xlu0 }
 0x1d3   : > { %3418 = vrot.lane.b32.xlu0 %v9119_v61, %s8973_s14 }
 0x1d7   : > { %2710 = vrot.lane.b32.xlu2 %v9151_v17, %s8972_s11  ;;  %1302 = vrot.lane.b32.xlu1 %v9206_v45, %s8971_s10 }
 0x1d8   : > { %v576_v56 = vpop.trf.xlu0 }
 0x1d9   : > { %v9263_v58 = vpack.c.bf16 %v576_v56, %v575_v50 }
 0x1db   : > { %3424 = vrot.lane.b32.xlu0 %v9143_v12, %s8973_s14  ;;  %15467 = vst [vmem:[#allocation29_spill] sm:$0xff] %v9263_v58 }
 0x1df   : > { %2716 = vrot.lane.b32.xlu2 %v9196_v44, %s8972_s11  ;;  %1304 = vrot.lane.b32.xlu1 %v9214_v46, %s8971_s10 }
 0x1e0   : > { %7326 = vmatmul.msk.bf16.gmra.mxu2 %vm595_vm2, %v9153_v18  ;;  %7342 = vmatmul.msk.bf16.gmra.mxu3 %vm595_vm2, %v9153_v18 }
 0x1e2   : > { %v9226_v47 = vpop.f32.mrf.mxu2 }
 0x1e3   : > { %v9228_v48 = vpop.f32.mrf.mxu3  ;;  %3430 = vrot.lane.b32.xlu0 %v9177_v29, %s8973_s14 }
 0x1e7   : > { %2722 = vrot.lane.b32.xlu2 %v9214_v46, %s8972_s11  ;;  %1306 = vrot.lane.b32.xlu1 %v9179_v36, %s8971_s10 }
 0x1ea   : > { %v9236_v49 = vpop.f32.mrf.mxu2 }
 0x1eb   : > { %v9242_v53 = vpop.f32.mrf.mxu3  ;;  %3436 = vrot.lane.b32.xlu0 %v9206_v45, %s8973_s14 }
 0x1ef   : > { %2728 = vrot.lane.b32.xlu2 %v9240_v52, %s8972_s11  ;;  %1308 = vrot.lane.b32.xlu1 %v9238_v51, %s8971_s10 }
 0x1f0   : > { %7327 = vmatmul.msk.bf16.gmra.mxu2 %vm595_vm2, %v9206_v45  ;;  %7343 = vmatmul.msk.bf16.gmra.mxu3 %vm595_vm2, %v9206_v45 }
 0x1f2   : > { %v9254_v54 = vpop.f32.mrf.mxu2 }
 0x1f3   : > { %v9256_v55 = vpop.f32.mrf.mxu3  ;;  %3442 = vrot.lane.b32.xlu0 %v9238_v51, %s8973_s14 }
 0x1f4   : > { %15466 = vst [vmem:[#allocation28_spill] sm:$0xff] %v9256_v55 }
 0x1f7   : > { %338 = vperm.xlu2 %7645, %v316_v57   ;;  %1310 = vrot.lane.b32.xlu1 %v9240_v52, %s8971_s10 }
 0x1fa   : > { %v9267_v59 = vpop.f32.mrf.mxu2 }
 0x1fb   : > { %15468 = vst [vmem:[#allocation30_spill] sm:$0xff] %v9267_v59  ;;  %v9269_v60 = vpop.f32.mrf.mxu3  ;;  %3448 = vrot.lane.b32.xlu0 %v9263_v58, %s8973_s14 }
 0x1fc   : > { %15469 = vst [vmem:[#allocation31_spill] sm:$0xff] %v9269_v60 }
 0x1ff   : > { %3422 = vrot.lane.b32.xlu2 %v9135_v7, %s8973_s14  ;;  %1312 = vrot.lane.b32.xlu1 %v9192_v42, %s8971_s10 }
 0x200   : > { %7328 = vmatmul.msk.bf16.gmra.mxu2 %vm595_vm2, %v9214_v46  ;;  %7344 = vmatmul.msk.bf16.gmra.mxu3 %vm595_vm2, %v9214_v46 }
 0x202   : > { %v9281_v62 = vpop.f32.mrf.mxu2 }
 0x203   : > { %15470 = vst [vmem:[#allocation32_spill] sm:$0xff] %v9281_v62  ;;  %v9283_v63 = vpop.f32.mrf.mxu3  ;;  %4122 = vrot.lane.b32.xlu0 %v9127_v2, %s8974_s17 }
 0x207   : > { %3428 = vrot.lane.b32.xlu2 %v9165_v23, %s8973_s14  ;;  %1314 = vrot.lane.b32.xlu1 %v9263_v58, %s8971_s10  ;;  %s8984_s10 = smov 110  }
 0x20a   : > { %v9291_v0 = vpop.f32.mrf.mxu2 }
 0x20b   : > { %15471 = vst [vmem:[#allocation33_spill] sm:$0xff] %v9291_v0  ;;  %v9293_v1 = vpop.f32.mrf.mxu3  ;;  %4128 = vrot.lane.b32.xlu0 %v9151_v17, %s8974_s17 }
 0x20f   : > { %3434 = vrot.lane.b32.xlu2 %v9153_v18, %s8973_s14  ;;  %333 = vperm.xlu1 %7644, %v315_v3  }
 0x210   : > { %7329 = vmatmul.msk.bf16.gmra.mxu2 %vm595_vm2, %v9179_v36  ;;  %7345 = vmatmul.msk.bf16.gmra.mxu3 %vm595_vm2, %v9179_v36 }
 0x212   : > { %v9306_v4 = vpop.f32.mrf.mxu2 }
 0x213   : > { %v9308_v5 = vpop.f32.mrf.mxu3  ;;  %4134 = vrot.lane.b32.xlu0 %v9196_v44, %s8974_s17 }
 0x217   : > { %3440 = vrot.lane.b32.xlu2 %v9179_v36, %s8973_s14  ;;  %2000 = vrot.lane.b32.xlu1 %v9119_v61, %s8975_s20 }
 0x21a   : > { %v9316_v6 = vpop.f32.mrf.mxu2 }
 0x21b   : > { %v9318_v8 = vpop.f32.mrf.mxu3  ;;  %4140 = vrot.lane.b32.xlu0 %v9214_v46, %s8974_s17 }
 0x21c   : > { %15472 = vst [vmem:[#allocation34_spill] sm:$0xff] %v9318_v8 }
 0x21f   : > { %3446 = vrot.lane.b32.xlu2 %v9192_v42, %s8973_s14  ;;  %2002 = vrot.lane.b32.xlu1 %v9127_v2, %s8975_s20 }
 0x220   : > { %7330 = vmatmul.msk.bf16.gmra.mxu2 %vm595_vm2, %v9238_v51  ;;  %7346 = vmatmul.msk.bf16.gmra.mxu3 %vm595_vm2, %v9238_v51 }
 0x222   : > { %v9330_v9 = vpop.f32.mrf.mxu2 }
 0x223   : > { %v9332_v10 = vpop.f32.mrf.mxu3  ;;  %4146 = vrot.lane.b32.xlu0 %v9240_v52, %s8974_s17 }
 0x227   : > { %4120 = vrot.lane.b32.xlu2 %v9119_v61, %s8974_s17  ;;  %2004 = vrot.lane.b32.xlu1 %v9135_v7, %s8975_s20 }
 0x22a   : > { %v9343_v13 = vpop.f32.mrf.mxu2 }
 0x22b   : > { %v9345_v14 = vpop.f32.mrf.mxu3  ;;  %343 = vperm.xlu0 %7643, %v317_v11  }
 0x22c   : > { %15473 = vst [vmem:[#allocation35_spill] sm:$0xff] %v9345_v14 }
 0x22f   : > { %4126 = vrot.lane.b32.xlu2 %v9143_v12, %s8974_s17  ;;  %2006 = vrot.lane.b32.xlu1 %v9143_v12, %s8975_s20 }
 0x230   : > { %7331 = vmatmul.msk.bf16.gmra.mxu2 %vm595_vm2, %v9240_v52  ;;  %7347 = vmatmul.msk.bf16.gmra.mxu3 %vm595_vm2, %v9240_v52 }
 0x232   : > { %v9355_v15 = vpop.f32.mrf.mxu2 }
 0x233   : > { %v9357_v16 = vpop.f32.mrf.mxu3  ;;  %4840 = vrot.lane.b32.xlu0 %v9135_v7, %s8976_s23 }
 0x237   : > { %4132 = vrot.lane.b32.xlu2 %v9177_v29, %s8974_s17  ;;  %2008 = vrot.lane.b32.xlu1 %v9151_v17, %s8975_s20 }
 0x23a   : > { %v9370_v20 = vpop.f32.mrf.mxu2 }
 0x23b   : > { %v9372_v21 = vpop.f32.mrf.mxu3  ;;  %4846 = vrot.lane.b32.xlu0 %v9165_v23, %s8976_s23 }
 0x23f   : > { %4138 = vrot.lane.b32.xlu2 %v9206_v45, %s8974_s17  ;;  %2010 = vrot.lane.b32.xlu1 %v9165_v23, %s8975_s20 }
 0x240   : > { %7332 = vmatmul.msk.bf16.gmra.mxu2 %vm595_vm2, %v9192_v42  ;;  %7348 = vmatmul.msk.bf16.gmra.mxu3 %vm595_vm2, %v9192_v42 }
 0x242   : > { %v9384_v22 = vpop.f32.mrf.mxu2 }
 0x243   : > { %v9386_v24 = vpop.f32.mrf.mxu3  ;;  %4852 = vrot.lane.b32.xlu0 %v9153_v18, %s8976_s23 }
 0x247   : > { %4144 = vrot.lane.b32.xlu2 %v9238_v51, %s8974_s17  ;;  %2012 = vrot.lane.b32.xlu1 %v9177_v29, %s8975_s20 }
 0x24a   : > { %v9394_v25 = vpop.f32.mrf.mxu2 }
 0x24b   : > { %v9396_v26 = vpop.f32.mrf.mxu3  ;;  %4858 = vrot.lane.b32.xlu0 %v9179_v36, %s8976_s23 }
 0x24c   : > { %15474 = vst [vmem:[#allocation36_spill] sm:$0xff] %v9396_v26 }
 0x24f   : > { %4150 = vrot.lane.b32.xlu2 %v9263_v58, %s8974_s17  ;;  %2014 = vrot.lane.b32.xlu1 %v9196_v44, %s8975_s20 }
 0x250   : > { %7333 = vmatmul.msk.bf16.gmra.mxu2 %vm595_vm2, %v9263_v58  ;;  %7349 = vmatmul.msk.bf16.gmra.mxu3 %vm595_vm2, %v9263_v58 }
 0x253   : > { %4864 = vrot.lane.b32.xlu0 %v9192_v42, %s8976_s23  ;;  %v9410_v27 = vpop.f32.mrf.mxu2  ;;  %v9412_v37 = vpop.f32.mrf.mxu3 }
 0x254   : > { %15475 = vst [vmem:[#allocation37_spill] sm:$0xff] %v9412_v37 }
 0x257   : > { %4838 = vrot.lane.b32.xlu2 %v9127_v2, %s8976_s23  ;;  %2016 = vrot.lane.b32.xlu1 %v9153_v18, %s8975_s20 }
 0x25b   : > { %5538 = vrot.lane.b32.xlu0 %v9119_v61, %s8977_s28  ;;  %v9420_v38 = vpop.f32.mrf.mxu2  ;;  %v9422_v39 = vpop.f32.mrf.mxu3 }
 0x25c   : > { %15476 = vst [vmem:[#allocation38_spill] sm:$0xff] %v9422_v39 }
 0x25f   : > { %4844 = vrot.lane.b32.xlu2 %v9151_v17, %s8976_s23  ;;  %2018 = vrot.lane.b32.xlu1 %v9206_v45, %s8975_s20 }
 0x263   : > { %5544 = vrot.lane.b32.xlu0 %v9143_v12, %s8977_s28  ;;  %v9430_v40 = vpop.f32.mrf.mxu2  ;;  %v9432_v43 = vpop.f32.mrf.mxu3 }
 0x264   : > { %15477 = vst [vmem:[#allocation39_spill] sm:$0xff] %v9432_v43 }
 0x267   : > { %4850 = vrot.lane.b32.xlu2 %v9196_v44, %s8976_s23  ;;  %2020 = vrot.lane.b32.xlu1 %v9214_v46, %s8975_s20 }
 0x26b   : > { %5550 = vrot.lane.b32.xlu0 %v9177_v29, %s8977_s28  ;;  %v9440_v50 = vpop.f32.mrf.mxu2  ;;  %v9442_v56 = vpop.f32.mrf.mxu3 }
 0x26c   : > { %15478 = vst [vmem:[#allocation40_spill] sm:$0xff] %v9442_v56 }
 0x26f   : > { %4856 = vrot.lane.b32.xlu2 %v9214_v46, %s8976_s23  ;;  %2022 = vrot.lane.b32.xlu1 %v9179_v36, %s8975_s20 }
 0x273   : > { %5556 = vrot.lane.b32.xlu0 %v9206_v45, %s8977_s28  ;;  %v9450_v57 = vpop.f32.mrf.mxu2  ;;  %v9452_v3 = vpop.f32.mrf.mxu3 }
 0x277   : > { %4862 = vrot.lane.b32.xlu2 %v9240_v52, %s8976_s23  ;;  %2024 = vrot.lane.b32.xlu1 %v9238_v51, %s8975_s20 }
 0x27b   : > { %5562 = vrot.lane.b32.xlu0 %v9238_v51, %s8977_s28  ;;  %v9460_v11 = vpop.f32.mrf.mxu2  ;;  %v9462_v19 = vpop.f32.mrf.mxu3 }
 0x27c   : > { %15479 = vst [vmem:[#allocation41_spill] sm:$0xff] %v9460_v11 }
 0x27f   : > { %383 = vperm.xlu2 %7645, %v325_v35   ;;  %2026 = vrot.lane.b32.xlu1 %v9240_v52, %s8975_s20 }
 0x283   : > { %5568 = vrot.lane.b32.xlu0 %v9263_v58, %s8977_s28  ;;  %v9471_v34 = vpop.f32.mrf.mxu2  ;;  %v9473_v33 = vpop.f32.mrf.mxu3 }
 0x287   : > { %5542 = vrot.lane.b32.xlu2 %v9135_v7, %s8977_s28  ;;  %2028 = vrot.lane.b32.xlu1 %v9192_v42, %s8975_s20 }
 0x28b   : > { %v9479_v32 = vpop.f32.mrf.mxu2  ;;  %v9481_v31 = vpop.f32.mrf.mxu3 }
 0x28c   : > { %15480 = vst [vmem:[#allocation42_spill] sm:$0xff] %v9481_v31 }
 0x28f   : > { %5548 = vrot.lane.b32.xlu2 %v9165_v23, %s8977_s28  ;;  %2030 = vrot.lane.b32.xlu1 %v9263_v58, %s8975_s20 }
 0x293   : > { %v9487_v35 = vpop.f32.mrf.mxu2  ;;  %v9489_v30 = vpop.f32.mrf.mxu3 }
 0x294   : > { %15481 = vst [vmem:[#allocation43_spill] sm:$0xff] %v9489_v30 }
 0x297   : > { %5554 = vrot.lane.b32.xlu2 %v9153_v18, %s8977_s28  ;;  %2702 = vrot.lane.b32.xlu1 %v9119_v61, %s8972_s11 }
 0x29b   : > { %v9495_v41 = vpop.f32.mrf.mxu2  ;;  %v9497_v28 = vpop.f32.mrf.mxu3 }
 0x29c   : > { %15482 = vst [vmem:[#allocation44_spill] sm:$0xff] %v9497_v28 }
 0x29f   : > { %5560 = vrot.lane.b32.xlu2 %v9179_v36, %s8977_s28  ;;  %2708 = vrot.lane.b32.xlu1 %v9143_v12, %s8972_s11 }
 0x2a3   : > { %v9503_v23 = vpop.f32.mrf.mxu2  ;;  %v9505_v7 = vpop.f32.mrf.mxu3 }
 0x2a4   : > { %15483 = vst [vmem:[#allocation45_spill] sm:$0xff] %v9505_v7 }
 0x2a7   : > { %5566 = vrot.lane.b32.xlu2 %v9192_v42, %s8977_s28  ;;  %2714 = vrot.lane.b32.xlu1 %v9177_v29, %s8972_s11  ;;  %v829_v29 = vmax.f32 %v9226_v47, %v9254_v54  ;;  %v830_v42 = vmax.f32 %v9236_v49, %v9267_v59 }
 0x2ab   : > { %v9511_v61 = vpop.f32.mrf.mxu2  ;;  %v9513_v18 = vpop.f32.mrf.mxu3 }
 0x2ac   : > { %15484 = vst [vmem:[#allocation46_spill] sm:$0xff] %v9513_v18  ;;  %v832_v18 = vmax.f32 %v830_v42, %v9291_v0 }
 0x2ae   : > { %v834_v52 = vmax.f32 %v832_v18, %v9316_v6 }
 0x2af   : > { %2720 = vrot.lane.b32.xlu1 %v9206_v45, %s8972_s11  ;;  %v831_v45 = vmax.f32 %v829_v29, %v9281_v62 }
 0x2b0   : > { %v836_v28 = vmax.f32 %v834_v52, %v9343_v13 }
 0x2b2   : > { %v838_v29 = vmax.f32 %v836_v28, %v9370_v20 }
 0x2b3   : > { %v9517_v36 = vpop.f32.mrf.mxu2  ;;  %v9521_v12 = vpop.f32.mrf.mxu3 }
 0x2b4   : > { %15485 = vst [vmem:[#allocation47_spill] sm:$0xff] %v9521_v12  ;;  %v833_v12 = vmax.f32 %v831_v45, %v9306_v4  ;;  %v840_v0 = vmax.f32 %v838_v29, %v9394_v25 }
 0x2b6   : > { %v842_v18 = vmax.f32 %v840_v0, %v9420_v38 }
 0x2b7   : > { %2726 = vrot.lane.b32.xlu1 %v9238_v51, %s8972_s11 }
 0x2bb   : > { %v9523_v7 = vpop.f32.mrf.mxu2  ;;  %v9533_v30 = vpop.f32.mrf.mxu3 }
 0x2bf   : > { %2732 = vrot.lane.b32.xlu1 %v9263_v58, %s8972_s11  ;;  %v835_v58 = vmax.f32 %v833_v12, %v9330_v9  ;;  %s297_s11 = sld [smem:[#allocation4]] }
 0x2c1   : > { %v837_v59 = vmax.f32 %v835_v58, %v9355_v15 }
 0x2c3   : > { %v9535_v51 = vpop.f32.mrf.mxu2  ;;  %v839_v42 = vmax.f32 %v837_v59, %v9384_v22  ;;  %v9551_v12 = vpop.f32.mrf.mxu3  ;;  %v867_v59 = vmax.f32 %v9242_v53, %v9269_v60 }
 0x2c5   : > { %v841_v45 = vmax.f32 %v839_v42, %v9410_v27 }
 0x2c7   : > { %3420 = vrot.lane.b32.xlu1 %v9127_v2, %s8973_s14  ;;  %v843_v52 = vmax.f32 %v841_v45, %v9430_v40  ;;  %v844_v2 = vmax.f32 %v842_v18, %v9440_v50  ;;  %v866_v45 = vmax.f32 %v9228_v48, %v9256_v55  ;;  %v869_v18 = vmax.f32 %v867_v59, %v9293_v1 }
 0x2c9   : > { %v845_v28 = vmax.f32 %v843_v52, %v9450_v57  ;;  %v846_v58 = vmax.f32 %v844_v2, %v9460_v11  ;;  %v868_v2 = vmax.f32 %v866_v45, %v9283_v63  ;;  %v871_v11 = vmax.f32 %v869_v18, %v9318_v8 }
 0x2cb   : > { %v9547_v62 = vpop.f32.mrf.mxu2  ;;  %v847_v29 = vmax.f32 %v845_v28, %v9471_v34  ;;  %v848_v0 = vmax.f32 %v846_v58, %v9479_v32  ;;  %v9574_v58 = vpop.f32.mrf.mxu3  ;;  %v870_v55 = vmax.f32 %v868_v2, %v9308_v5  ;;  %v873_v59 = vmax.f32 %v871_v11, %v9345_v14 }
 0x2cd   : > { %v850_v52 = vmax.f32 %v848_v0, %v9495_v41  ;;  %v872_v45 = vmax.f32 %v870_v55, %v9332_v10  ;;  %v875_v18 = vmax.f32 %v873_v59, %v9372_v21 }
 0x2cf   : > { %3426 = vrot.lane.b32.xlu1 %v9151_v17, %s8973_s14  ;;  %v849_v17 = vmax.f32 %v847_v29, %v9487_v35  ;;  %v852_v28 = vmax.f32 %v850_v52, %v9511_v61  ;;  %v877_v2 = vmax.f32 %v875_v18, %v9396_v26  ;;  %v15489_v26 = vld [vmem:[#allocation46_spill] sm:$0xff] }
 0x2d1   : > { %v851_v60 = vmax.f32 %v849_v17, %v9503_v23  ;;  %v854_v0 = vmax.f32 %v852_v28, %v9523_v7  ;;  %v879_v55 = vmax.f32 %v877_v2, %v9422_v39 }
 0x2d3   : > { %v9563_v42 = vpop.f32.mrf.mxu2  ;;  %v853_v29 = vmax.f32 %v851_v60, %v9517_v36  ;;  %v856_v52 = vmax.f32 %v854_v0, %v9547_v62 }
 0x2d5   : > { %v855_v17 = vmax.f32 %v853_v29, %v9535_v51  ;;  %v881_v29 = vmax.f32 %v879_v55, %v9442_v56  ;;  %v15487_v55 = vld [vmem:[#allocation27_spill] sm:$0xff] }
 0x2d6   : > { %v15488_v56 = vld [vmem:[#allocation43_spill] sm:$0xff] }
 0x2d7   : > { %3432 = vrot.lane.b32.xlu1 %v9196_v44, %s8973_s14  ;;  %v874_v44 = vmax.f32 %v872_v45, %v9357_v16  ;;  %v857_v11 = vmax.f32 %v855_v17, %v9563_v42  ;;  %v9598_v45 = vpop.f32.mrf.mxu3  ;;  %v883_v17 = vmax.f32 %v881_v29, %v9462_v19  ;;  %v15490_v29 = vld [vmem:[#allocation45_spill] sm:$0xff] }
 0x2d9   : > { %v876_v28 = vmax.f32 %v874_v44, %v9386_v24  ;;  %v885_v2 = vmax.f32 %v883_v17, %v9481_v31  ;;  %v15491_v17 = vld [vmem:[#allocation47_spill] sm:$0xff] }
 0x2db   : > { %v9586_v8 = vpop.f32.mrf.mxu2  ;;  %v878_v59 = vmax.f32 %v876_v28, %v9412_v37 }
 0x2dc   : > { %v858_v60 = vmax.f32 %v856_v52, %v9586_v8 }
 0x2dd   : > { %v880_v18 = vmax.f32 %v878_v59, %v9432_v43 }
 0x2de   : > { %v859_v14 = vmax.f32 %v857_v11, %v858_v60 }
 0x2df   : > { %3438 = vrot.lane.b32.xlu1 %v9214_v46, %s8973_s14  ;;  %v882_v44 = vmax.f32 %v880_v18, %v9452_v3  ;;  %v15486_v46 = vld [vmem:[#allocation44_spill] sm:$0xff]  ;;  %v9612_v18 = vpop.f32.mrf.mxu3 }
 0x2e0   : > { %v860_v0 = vrot.slane %v859_v14, 4  ;;  %v887_v39 = vmax.f32 %v885_v2, %v15486_v46 }
 0x2e1   : > { %v884_v60 = vmax.f32 %v882_v44, %v9473_v33 }
 0x2e2   : > { %v861_v52 = vmax.f32 %v859_v14, %v860_v0  ;;  %v889_v59 = vmax.f32 %v887_v39, %v15489_v26 }
 0x2e3   : > { %v886_v37 = vmax.f32 %v884_v60, %v15488_v56 }
 0x2e4   : > { %v862_v11 = vrot.slane %v861_v52, 2  ;;  %v891_v0 = vmax.f32 %v889_v59, %v9533_v30 }
 0x2e5   : > { %v888_v14 = vmax.f32 %v886_v37, %v15490_v29 }
 0x2e6   : > { %v863_v28 = vmax.f32 %v861_v52, %v862_v11  ;;  %v893_v44 = vmax.f32 %v891_v0, %v9574_v58  ;;  %v15492_v0 = vld [vmem:[#allocation30_spill] sm:$0xff] }
 0x2e7   : > { %3444 = vrot.lane.b32.xlu1 %v15487_v55, %s8973_s14  ;;  %v890_v31 = vmax.f32 %v888_v14, %v15491_v17 }
 0x2e8   : > { %v864_v43 = vrot.slane %v863_v28, 1  ;;  %v895_v11 = vmax.f32 %v893_v44, %v9612_v18 }
 0x2e9   : > { %v892_v52 = vmax.f32 %v890_v31, %v9551_v12  ;;  %v15493_v31 = vld [vmem:[#allocation32_spill] sm:$0xff] }
 0x2ea   : > { %v9616_v2 = vmax.f32 %v863_v28, %v864_v43 }
 0x2eb   : > { %v894_v60 = vmax.f32 %v892_v52, %v9598_v45 }
 0x2ec   : > { %v903_v39 = vsub.f32 %v9226_v47, %v9616_v2  ;;  %v905_v37 = vsub.f32 %v9236_v49, %v9616_v2  ;;  %v907_v59 = vsub.f32 %v9254_v54, %v9616_v2  ;;  %v909_v43 = vsub.f32 %v15492_v0, %v9616_v2  ;;  %v15494_v47 = vld [vmem:[#allocation33_spill] sm:$0xff] }
 0x2ed   : > { %v896_v14 = vmax.f32 %v894_v60, %v895_v11  ;;  %v911_v44 = vsub.f32 %v15493_v31, %v9616_v2  ;;  %v913_v26 = vsub.f32 %v15494_v47, %v9616_v2  ;;  %v915_v54 = vsub.f32 %v9306_v4, %v9616_v2 }
 0x2ee   : > { %v967_v28 = vmul.f32 1.442695, %v903_v39  ;;  %v971_v55 = vmul.f32 1.442695, %v905_v37  ;;  %v975_v46 = vmul.f32 1.442695, %v907_v59  ;;  %v917_v39 = vsub.f32 %v9316_v6, %v9616_v2 }
 0x2ef   : > { %v897_v52 = vrot.slane %v896_v14, 4  ;;  %v979_v49 = vmul.f32 1.442695, %v909_v43  ;;  %v983_v11 = vmul.f32 1.442695, %v911_v44  ;;  %v919_v59 = vsub.f32 %v9330_v9, %v9616_v2 }
 0x2f0   : > { %7886 = vpow2.f32 %v967_v28  ;;  %v987_v37 = vmul.f32 1.442695, %v913_v26  ;;  %v991_v4 = vmul.f32 1.442695, %v915_v54  ;;  %v925_v43 = vsub.f32 %v9370_v20, %v9616_v2 }
 0x2f1   : > { %7888 = vpow2.f32 %v971_v55  ;;  %v898_v60 = vmax.f32 %v896_v14, %v897_v52  ;;  %v921_v55 = vsub.f32 %v9343_v13, %v9616_v2  ;;  %v995_v9 = vmul.f32 1.442695, %v917_v39 }
 0x2f2   : > { %7890 = vpow2.f32 %v975_v46  ;;  %v923_v46 = vsub.f32 %v9355_v15, %v9616_v2  ;;  %v927_v31 = vsub.f32 %v9384_v22, %v9616_v2  ;;  %v999_v13 = vmul.f32 1.442695, %v919_v59 }
 0x2f3   : > { %7892 = vpow2.f32 %v979_v49  ;;  %v899_v14 = vrot.slane %v898_v60, 2  ;;  %v929_v15 = vsub.f32 %v9394_v25, %v9616_v2  ;;  %v1003_v47 = vmul.f32 1.442695, %v921_v55 }
 0x2f4   : > { %7894 = vpow2.f32 %v983_v11  ;;  %v931_v49 = vsub.f32 %v9410_v27, %v9616_v2  ;;  %v1007_v54 = vmul.f32 1.442695, %v923_v46  ;;  %v933_v22 = vsub.f32 %v9420_v38, %v9616_v2 }
 0x2f5   : > { %7896 = vpow2.f32 %v987_v37  ;;  %v900_v11 = vmax.f32 %v898_v60, %v899_v14  ;;  %v1011_v37 = vmul.f32 1.442695, %v925_v43  ;;  %v935_v59 = vsub.f32 %v9430_v40, %v9616_v2  ;;  %v15495_v43 = vld [vmem:[#allocation41_spill] sm:$0xff] }
 0x2f6   : > { %v9637_v0 = vpop.eup %7886  ;;  %7898 = vpow2.f32 %v991_v4  ;;  %v1015_v25 = vmul.f32 1.442695, %v927_v31  ;;  %v937_v27 = vsub.f32 %v9440_v50, %v9616_v2  ;;  %v939_v60 = vsub.f32 %v9450_v57, %v9616_v2 }
 0x2f7   : > { %v9641_v28 = vpop.eup %7888  ;;  %7900 = vpow2.f32 %v995_v9  ;;  %v1019_v46 = vmul.f32 1.442695, %v929_v15  ;;  %v1023_v38 = vmul.f32 1.442695, %v931_v49  ;;  %v901_v14 = vrot.slane %v900_v11, 1 }
 0x2f8   : > { %v1095_v6 = vadd.f32 %v9641_v28, %v9637_v0  ;;  %v9649_v26 = vpop.eup %7890  ;;  %7902 = vpow2.f32 %v999_v13  ;;  %v941_v9 = vsub.f32 %v15495_v43, %v9616_v2  ;;  %v1027_v31 = vmul.f32 1.442695, %v933_v22 }
 0x2f9   : > { %v9656_v52 = vpop.eup %7892  ;;  %7904 = vpow2.f32 %v1003_v47  ;;  %v943_v50 = vsub.f32 %v9471_v34, %v9616_v2  ;;  %v1031_v13 = vmul.f32 1.442695, %v935_v59  ;;  %v945_v15 = vsub.f32 %v9479_v32, %v9616_v2 }
 0x2fa   : > { %v1096_v44 = vadd.f32 %v9649_v26, %v1095_v6  ;;  %v9663_v39 = vpop.eup %7894  ;;  %7906 = vpow2.f32 %v1007_v54  ;;  %v947_v47 = vsub.f32 %v9487_v35, %v9616_v2  ;;  %v1035_v49 = vmul.f32 1.442695, %v937_v27 }
 0x2fb   : > { %v9670_v4 = vpop.eup %7896  ;;  %7908 = vpow2.f32 %v1011_v37  ;;  %v9693_v22 = vmax.f32 %v900_v11, %v901_v14  ;;  %v959_v59 = vsub.f32 %v9535_v51, %v9616_v2  ;;  %v1043_v32 = vmul.f32 1.442695, %v941_v9 }
 0x2fc   : > { %v1097_v20 = vadd.f32 %v9656_v52, %v1096_v44  ;;  %v9677_v40 = vpop.eup %7898  ;;  %7910 = vpow2.f32 %v1015_v25  ;;  %v963_v35 = vsub.f32 %v9563_v42, %v9616_v2  ;;  %v965_v11 = vsub.f32 %v9586_v8, %v9616_v2 }
 0x2fd   : > { %v9684_v44 = vpop.eup %7900  ;;  %7912 = vpow2.f32 %v1019_v46  ;;  %v1051_v46 = vmul.f32 1.442695, %v945_v15  ;;  %v1055_v51 = vmul.f32 1.442695, %v947_v47  ;;  %v904_v42 = vsub.f32 %v9228_v48, %v9693_v22  ;;  %v15496_v15 = vld [vmem:[#allocation28_spill] sm:$0xff] }
 0x2fe   : > { %v1098_v55 = vadd.f32 %v9663_v39, %v1097_v20  ;;  %v9690_v54 = vpop.eup %7902  ;;  %7914 = vpow2.f32 %v1023_v38  ;;  %v1039_v20 = vmul.f32 1.442695, %v939_v60  ;;  %v1079_v43 = vmul.f32 1.442695, %v959_v59  ;;  %v15497_v59 = vld [vmem:[#allocation31_spill] sm:$0xff] }
 0x2ff   : > { %v9695_v37 = vpop.eup %7904  ;;  %7916 = vpow2.f32 %v1027_v31  ;;  %v906_v9 = vsub.f32 %v9242_v53, %v9693_v22  ;;  %v961_v8 = vsub.f32 %v9547_v62, %v9616_v2  ;;  %v1091_v48 = vmul.f32 1.442695, %v965_v11 }
 0x300   : > { %v1099_v6 = vadd.f32 %v9670_v4, %v1098_v55  ;;  %v9699_v25 = vpop.eup %7906  ;;  %7918 = vpow2.f32 %v1031_v13  ;;  %v1047_v55 = vmul.f32 1.442695, %v943_v50  ;;  %v1087_v50 = vmul.f32 1.442695, %v963_v35 }
 0x301   : > { %v9704_v60 = vpop.eup %7908  ;;  %7920 = vpow2.f32 %v1035_v49  ;;  %v908_v47 = vsub.f32 %v15496_v15, %v9693_v22  ;;  %v955_v53 = vsub.f32 %v9517_v36, %v9616_v2  ;;  %v969_v62 = vmul.f32 1.442695, %v904_v42 }
 0x302   : > { %v1100_v57 = vadd.f32 %v9677_v40, %v1099_v6  ;;  %v9708_v38 = vpop.eup %7910  ;;  %7922 = vpow2.f32 %v1039_v20  ;;  %v973_v35 = vmul.f32 1.442695, %v906_v9  ;;  %v1083_v11 = vmul.f32 1.442695, %v961_v8 }
 0x303   : > { %v9713_v14 = vpop.eup %7912  ;;  %7924 = vpow2.f32 %v1043_v32  ;;  %v910_v32 = vsub.f32 %v15497_v59, %v9693_v22  ;;  %v977_v42 = vmul.f32 1.442695, %v908_v47  ;;  %v1071_v9 = vmul.f32 1.442695, %v955_v53 }
 0x304   : > { %v1101_v34 = vadd.f32 %v9684_v44, %v1100_v57  ;;  %v9717_v31 = vpop.eup %7914  ;;  %7926 = vpow2.f32 %v1047_v55 }
 0x305   : > { %v9722_v57 = vpop.eup %7916  ;;  %7928 = vpow2.f32 %v1051_v46  ;;  %v324_v46 = vld [vmem:[%s15121_s3 + $0x50] sm:$0xff] }
 0x306   : > { %v1102_v27 = vadd.f32 %v9690_v54, %v1101_v34  ;;  %v9726_v49 = vpop.eup %7918  ;;  %7930 = vpow2.f32 %v1055_v51  ;;  %378 = vperm.xlu1 %7644, %v324_v46  }
 0x307   : > { %v9731_v34 = vpop.eup %7920  ;;  %7932 = vpow2.f32 %v1079_v43 }
 0x308   : > { %v1103_v6 = vadd.f32 %v9695_v37, %v1102_v27  ;;  %v9735_v55 = vpop.eup %7922  ;;  %v957_v27 = vsub.f32 %v9523_v7, %v9616_v2  ;;  %7934 = vpow2.f32 %v1087_v50  ;;  %v951_v7 = vsub.f32 %v9503_v23, %v9616_v2 }
 0x309   : > { %v9743_v51 = vpop.eup %7924  ;;  %7936 = vpow2.f32 %v1091_v48  ;;  %v981_v48 = vmul.f32 1.442695, %v910_v32 }
 0x30a   : > { %v1104_v13 = vadd.f32 %v9699_v25, %v1103_v6  ;;  %v912_v6 = vsub.f32 %v9283_v63, %v9693_v22  ;;  %v9747_v43 = vpop.eup %7926  ;;  %7938 = vpow2.f32 %v969_v62  ;;  %v953_v63 = vsub.f32 %v9511_v61, %v9616_v2 }
 0x30b   : > { %v9752_v50 = vpop.eup %7928  ;;  %7940 = vpow2.f32 %v973_v35  ;;  %v1075_v47 = vmul.f32 1.442695, %v957_v27  ;;  %v1063_v32 = vmul.f32 1.442695, %v951_v7  ;;  %v15498_v27 = vld [vmem:[#allocation34_spill] sm:$0xff] }
 0x30c   : > { %v1105_v20 = vadd.f32 %v9704_v60, %v1104_v13  ;;  %v914_v13 = vsub.f32 %v9293_v1, %v9693_v22  ;;  %v9756_v15 = vpop.eup %7930  ;;  %7942 = vpow2.f32 %v1083_v11  ;;  %v985_v62 = vmul.f32 1.442695, %v912_v6 }
 0x30d   : > { %v9761_v53 = vpop.eup %7932  ;;  %7944 = vpow2.f32 %v977_v42  ;;  %v949_v1 = vsub.f32 %v9495_v41, %v9616_v2  ;;  %v918_v11 = vsub.f32 %v15498_v27, %v9693_v22  ;;  %v1187_v41 = vpack.c.bf16 %v9722_v57, %v9717_v31 }
 0x30e   : > { %v1106_v36 = vadd.f32 %v9708_v38, %v1105_v20  ;;  %v916_v20 = vsub.f32 %v9308_v5, %v9693_v22  ;;  %v9765_v59 = vpop.eup %7934  ;;  %7946 = vpow2.f32 %v1071_v9  ;;  %v1067_v5 = vmul.f32 1.442695, %v953_v63  ;;  %v15501_v9 = vld [vmem:[#allocation15_spill] sm:$0xff] }
 0x30f   : > { %v9770_v35 = vpop.eup %7936  ;;  %7948 = vpow2.f32 %v981_v48  ;;  %v920_v42 = vsub.f32 %v9332_v10, %v9693_v22  ;;  %4124 = vrot.lane.b32.xlu1 %v15501_v9, %s8974_s17  ;;  %v1059_v48 = vmul.f32 1.442695, %v949_v1  ;;  %1205 = vmatpush.bf16.msrb.mxu0 %v1187_v41  ;;  %v464_v10 = vpop.f32.mrf.mxu0  ;;  %v1185_v27 = vpack.c.bf16 %v9713_v14, %v9708_v38 }
 0x310   : > { %v1107_v8 = vadd.f32 %v9713_v14, %v1106_v36  ;;  %v989_v36 = vmul.f32 1.442695, %v914_v13  ;;  %v9774_v46 = vpop.eup %7938  ;;  %7950 = vpow2.f32 %v1075_v47  ;;  %v993_v7 = vmul.f32 1.442695, %v916_v20  ;;  %v15503_v47 = vld [vmem:[#allocation35_spill] sm:$0xff]  ;;  %v369_v41 = vpop.permute.xlu1 %368 }
 0x311   : > { %15499 = vst [vmem:[#allocation43_spill] sm:$0xff] %v9774_v46  ;;  %v9779_v2 = vpop.eup %7940  ;;  %7952 = vpow2.f32 %v985_v62  ;;  %v997_v20 = vmul.f32 1.442695, %v918_v11  ;;  %v924_v9 = vsub.f32 %v9357_v16, %v9693_v22  ;;  %v1001_v11 = vmul.f32 1.442695, %v920_v42 }
 0x312   : > { %v1108_v23 = vadd.f32 %v9717_v31, %v1107_v8  ;;  %15500 = vst [vmem:[#allocation45_spill] sm:$0xff] %v9779_v2  ;;  %v1203_v8 = vpack.c.bf16 %v9770_v35, %v9765_v59  ;;  %v9787_v13 = vpop.eup %7942  ;;  %7954 = vpow2.f32 %v1063_v32  ;;  %v1132_v31 = vadd.f32 %v9779_v2, %v9774_v46 }
 0x313   : > { %7956 = vpow2.f32 %v989_v36  ;;  %v1201_v36 = vpack.c.bf16 %v9787_v13, %v9761_v53  ;;  %1206 = vmatpush.bf16.msrb.mxu0 %v1185_v27  ;;  %v926_v16 = vsub.f32 %v9372_v21, %v9693_v22  ;;  %v1009_v21 = vmul.f32 1.442695, %v924_v9  ;;  %v15509_v9 = vld [vmem:[#allocation39_spill] sm:$0xff] }
 0x314   : > { %v1109_v61 = vadd.f32 %v9722_v57, %v1108_v23  ;;  %v9792_v57 = vpop.eup %7944  ;;  %v922_v23 = vsub.f32 %v15503_v47, %v9693_v22  ;;  %1218 = vmatpush.bf16.msrb.mxu1 %v1203_v8  ;;  %7958 = vpow2.f32 %v1067_v5  ;;  %v9810_v5 = vadd.f32 %v464_v10, %v369_v41 }
 0x315   : > { %15502 = vst [vmem:[#allocation47_spill] sm:$0xff] %v9792_v57  ;;  %v9796_v62 = vpop.eup %7946  ;;  %v1133_v32 = vadd.f32 %v9792_v57, %v1132_v31  ;;  %7960 = vpow2.f32 %v993_v7  ;;  %v1013_v46 = vmul.f32 1.442695, %v926_v16  ;;  %v964_v57 = vsub.f32 %v9598_v45, %v9693_v22  ;;  %v15512_v45 = vld [vmem:[#allocation18_spill] sm:$0xff] }
 0x316   : > { %v1110_v6 = vadd.f32 %v9726_v49, %v1109_v61  ;;  %v503_v61 = vpop.f32.mrf.mxu1  ;;  %7962 = vpow2.f32 %v1059_v48  ;;  %v1005_v42 = vmul.f32 1.442695, %v922_v23  ;;  %v928_v48 = vsub.f32 %v9386_v24, %v9693_v22  ;;  %v15506_v23 = vld [vmem:[#allocation19_spill] sm:$0xff] }
 0x317   : > { %v9816_v31 = vadd.f32 %v503_v61, %v369_v41  ;;  %7964 = vpow2.f32 %v997_v20  ;;  %v15505_v61 = vld [vmem:[#allocation36_spill] sm:$0xff]  ;;  %4130 = vrot.lane.b32.xlu1 %v15506_v23, %s8974_s17 }
 0x318   : > { %v1111_v63 = vadd.f32 %v9731_v34, %v1110_v6  ;;  %v9802_v6 = vpop.eup %7948  ;;  %1219 = vmatpush.bf16.msrb.mxu1 %v1201_v36  ;;  %v930_v27 = vsub.f32 %v15505_v61, %v9693_v22  ;;  %7966 = vpow2.f32 %v1001_v11  ;;  %v15507_v36 = vld [vmem:[#allocation37_spill] sm:$0xff]  ;;  %v936_v61 = vsub.f32 %v15509_v9, %v9693_v22  ;;  %v15510_v23 = vld [vmem:[#allocation40_spill] sm:$0xff] }
 0x319   : > { %15504 = vst [vmem:[#allocation30_spill] sm:$0xff] %v9802_v6  ;;  %v9808_v8 = vpop.eup %7950  ;;  %v1134_v38 = vadd.f32 %v9802_v6, %v1133_v32  ;;  %v938_v2 = vsub.f32 %v15510_v23, %v9693_v22  ;;  %7968 = vpow2.f32 %v1005_v42  ;;  %v1017_v42 = vmul.f32 1.442695, %v928_v48 }
 0x31a   : > { %v1112_v1 = vadd.f32 %v9735_v55, %v1111_v63  ;;  %v9814_v14 = vpop.eup %7952  ;;  %v1199_v20 = vpack.c.bf16 %v9808_v8, %v9796_v62  ;;  %7970 = vpow2.f32 %v1009_v21  ;;  %v1021_v23 = vmul.f32 1.442695, %v930_v27 }
 0x31b   : > { %v7955_v7 = vpop.eup %7954  ;;  %v1135_v47 = vadd.f32 %v9814_v14, %v1134_v38  ;;  %7972 = vpow2.f32 %v1013_v46  ;;  %v1179_v27 = vpack.c.bf16 %v9684_v44, %v9677_v40  ;;  %v1037_v44 = vmul.f32 1.442695, %v938_v2 }
 0x31c   : > { %v1113_v63 = vadd.f32 %v9743_v51, %v1112_v1  ;;  %v1183_v1 = vpack.c.bf16 %v9704_v60, %v9699_v25  ;;  %v9826_v32 = vpop.eup %7956  ;;  %v15508_v25 = vld [vmem:[#allocation38_spill] sm:$0xff]  ;;  %1220 = vmatpush.bf16.msrb.mxu1 %v1199_v20  ;;  %7974 = vpow2.f32 %v1017_v42  ;;  %v1193_v2 = vpack.c.bf16 %v9752_v50, %v9747_v43 }
 0x31d   : > { %v7959_v41 = vpop.eup %7958  ;;  %v934_v60 = vsub.f32 %v15508_v25, %v9693_v22  ;;  %v1136_v38 = vadd.f32 %v9826_v32, %v1135_v47  ;;  %v940_v25 = vsub.f32 %v9452_v3, %v9693_v22  ;;  %7976 = vpow2.f32 %v1021_v23 }
 0x31e   : > { %v1114_v10 = vadd.f32 %v9747_v43, %v1113_v63  ;;  %v932_v63 = vsub.f32 %v15507_v36, %v9693_v22  ;;  %1207 = vmatpush.bf16.msrb.mxu0 %v1183_v1  ;;  %v9840_v11 = vpop.eup %7960  ;;  %v1181_v1 = vpack.c.bf16 %v9695_v37, %v9690_v54  ;;  %v1197_v16 = vpack.c.bf16 %v7959_v41, %v7955_v7  ;;  %v15511_v54 = vld [vmem:[#allocation42_spill] sm:$0xff] }
 0x31f   : > { %v1137_v47 = vadd.f32 %v9840_v11, %v1136_v38  ;;  %v966_v37 = vsub.f32 %v9612_v18, %v9693_v22  ;;  %4136 = vrot.lane.b32.xlu1 %v15512_v45, %s8974_s17  ;;  %v1089_v18 = vmul.f32 1.442695, %v964_v57 }
 0x320   : > { %v1115_v24 = vadd.f32 %v9752_v50, %v1114_v10  ;;  %v7963_v10 = vpop.eup %7962  ;;  %v1025_v21 = vmul.f32 1.442695, %v932_v63  ;;  %1221 = vmatpush.bf16.msrb.mxu1 %v1197_v16  ;;  %v1033_v63 = vmul.f32 1.442695, %v936_v61 }
 0x321   : > { %v9852_v6 = vpop.eup %7964  ;;  %v1195_v46 = vpack.c.bf16 %v7963_v10, %v9756_v15 }
 0x322   : > { %v1116_v36 = vadd.f32 %v9756_v15, %v1115_v24  ;;  %v944_v24 = vsub.f32 %v9473_v33, %v9693_v22  ;;  %v1138_v3 = vadd.f32 %v9852_v6, %v1137_v47  ;;  %1208 = vmatpush.bf16.msrb.mxu0 %v1181_v1  ;;  %v9859_v38 = vpop.eup %7966  ;;  %v960_v1 = vsub.f32 %v9551_v12, %v9693_v22 }
 0x323   : > { %v9868_v47 = vpop.eup %7968  ;;  %v962_v12 = vsub.f32 %v9574_v58, %v9693_v22  ;;  %7978 = vpow2.f32 %v1025_v21  ;;  %v956_v58 = vsub.f32 %v15491_v17, %v9693_v22  ;;  %v15514_v21 = vld [vmem:[#allocation21_spill] sm:$0xff] }
 0x324   : > { %v1117_v20 = vadd.f32 %v7963_v10, %v1116_v36  ;;  %v1029_v36 = vmul.f32 1.442695, %v934_v60  ;;  %v1139_v9 = vadd.f32 %v9859_v38, %v1138_v3  ;;  %v9878_v40 = vpop.eup %7970  ;;  %1222 = vmatpush.bf16.msrb.mxu1 %v1195_v46  ;;  %v948_v10 = vsub.f32 %v15488_v56, %v9693_v22 }
 0x325   : > { %v9886_v61 = vpop.eup %7972  ;;  %v1085_v23 = vmul.f32 1.442695, %v962_v12 }
 0x326   : > { %v1118_v48 = vadd.f32 %v7955_v7, %v1117_v20  ;;  %v1140_v60 = vadd.f32 %v9868_v47, %v1139_v9  ;;  %1209 = vmatpush.bf16.msrb.mxu0 %v1179_v27  ;;  %7980 = vpow2.f32 %v1029_v36  ;;  %v1093_v9 = vmul.f32 1.442695, %v966_v37 }
 0x327   : > { %7982 = vpow2.f32 %v1033_v63  ;;  %v1041_v20 = vmul.f32 1.442695, %v940_v25  ;;  %v952_v37 = vsub.f32 %v15490_v29, %v9693_v22  ;;  %4142 = vrot.lane.b32.xlu1 %v15514_v21, %s8974_s17  ;;  %v1073_v27 = vmul.f32 1.442695, %v956_v58  ;;  %v15515_v29 = vld [vmem:[#allocation46_spill] sm:$0xff] }
 0x328   : > { %v1119_v7 = vadd.f32 %v7959_v41, %v1118_v48  ;;  %v1141_v15 = vadd.f32 %v9878_v40, %v1140_v60  ;;  %v1177_v41 = vpack.c.bf16 %v9670_v4, %v9663_v39  ;;  %v9896_v39 = vpop.eup %7974  ;;  %v958_v4 = vsub.f32 %v9533_v30, %v9693_v22  ;;  %1223 = vmatpush.bf16.msrb.mxu1 %v1193_v2  ;;  %v15520_v58 = vld [vmem:[#allocation22_spill] sm:$0xff] }
 0x329   : > { %7984 = vpow2.f32 %v1037_v44  ;;  %v9900_v17 = vpop.eup %7976  ;;  %v15513_v30 = vsub.f32 %v9462_v19, %v9693_v22  ;;  %v1049_v19 = vmul.f32 1.442695, %v944_v24  ;;  %v1189_v24 = vpack.c.bf16 %v9731_v34, %v9726_v49 }
 0x32a   : > { %v1120_v42 = vadd.f32 %v9796_v62, %v1119_v7  ;;  %v1081_v62 = vmul.f32 1.442695, %v960_v1  ;;  %v1142_v16 = vadd.f32 %v9886_v61, %v1141_v15  ;;  %1210 = vmatpush.bf16.msrb.mxu0 %v1177_v41  ;;  %7986 = vpow2.f32 %v1089_v18  ;;  %v7979_v3 = vpop.eup %7978 }
 0x32b   : > { %v1045_v25 = vmul.f32 1.442695, %v15513_v30  ;;  %7988 = vpow2.f32 %v1093_v9  ;;  %v1077_v1 = vmul.f32 1.442695, %v958_v4  ;;  %v15516_v7 = vsub.f32 %v15511_v54, %v9693_v22  ;;  %v15518_v54 = vld [vmem:[#allocation44_spill] sm:$0xff] }
 0x32c   : > { %v1121_v57 = vadd.f32 %v9808_v8, %v1120_v42  ;;  %v1143_v50 = vadd.f32 %v9896_v39, %v1142_v16  ;;  %v1175_v8 = vpack.c.bf16 %v9656_v52, %v9649_v26  ;;  %v7981_v48 = vpop.eup %7980  ;;  %7990 = vpow2.f32 %v1081_v62 }
 0x32d   : > { %v954_v52 = vsub.f32 %v15515_v29, %v9693_v22  ;;  %7992 = vpow2.f32 %v1085_v23  ;;  %v9922_v45 = vpop.eup %7982  ;;  %v1053_v33 = vmul.f32 1.442695, %v15516_v7  ;;  %v1188_v63 = vpack.c.bf16 %v7981_v48, %v7979_v3  ;;  %v15522_v29 = vld [vmem:[#allocation16_spill] sm:$0xff] }
 0x32e   : > { %v1122_v43 = vadd.f32 %v9761_v53, %v1121_v57  ;;  %v1191_v53 = vpack.c.bf16 %v9743_v51, %v9735_v55  ;;  %v1144_v26 = vadd.f32 %v9900_v17, %v1143_v50  ;;  %1211 = vmatpush.bf16.msrb.mxu0 %v1175_v8  ;;  %7994 = vpow2.f32 %v1041_v20 }
 0x32f   : > { %v9927_v46 = vpop.eup %7984  ;;  %7996 = vpow2.f32 %v1045_v25  ;;  %v1065_v12 = vmul.f32 1.442695, %v952_v37  ;;  %v950_v18 = vsub.f32 %v15518_v54, %v9693_v22  ;;  %v1069_v49 = vmul.f32 1.442695, %v954_v52  ;;  %4148 = vrot.lane.b32.xlu1 %v15520_v58, %s8974_s17  ;;  %s8978_s17 = smov 17  }
 0x330   : > { %v1123_v36 = vadd.f32 %v9787_v13, %v1122_v43  ;;  %1224 = vmatpush.bf16.msrb.mxu1 %v1191_v53  ;;  %v1145_v51 = vadd.f32 %v7979_v3, %v1144_v26  ;;  %v1173_v13 = vpack.c.bf16 %v9641_v28, %v9637_v0  ;;  %v9934_v60 = vpop.eup %7986  ;;  %7998 = vpow2.f32 %v1073_v27  ;;  %v15521_v3 = vld [vmem:[#allocation13_spill] sm:$0xff] }
 0x331   : > { %v9939_v0 = vpop.eup %7988  ;;  %v9943_v28 = vpack.c.bf16 %v9810_v5, %v9810_v5  ;;  %8000 = vpow2.f32 %v1077_v1  ;;  %v9956_v5 = vpack.c.bf16 %v9816_v31, %v9816_v31  ;;  %v1057_v41 = vmul.f32 1.442695, %v948_v10 }
 0x332   : > { %v1124_v55 = vadd.f32 %v9765_v59, %v1123_v36  ;;  %v1146_v44 = vadd.f32 %v7981_v48, %v1145_v51  ;;  %1212 = vmatpush.bf16.msrb.mxu0 %v1173_v13  ;;  %v9947_v34 = vpop.eup %7990  ;;  %8002 = vpow2.f32 %v1049_v19  ;;  %v1204_v42 = vpack.c.bf16 %v9939_v0, %v9934_v60  ;;  %v15524_v51 = vld [vmem:[#allocation30_spill] sm:$0xff]  ;;  %v15525_v13 = vld [vmem:[#allocation5_spill] sm:$0xff] }
 0x333   : > { %15517 = vst [vmem:[#allocation32_spill] sm:$0xff] %v9943_v28  ;;  %v9952_v15 = vpop.eup %7992  ;;  %8004 = vpow2.f32 %v1053_v33  ;;  %v1186_v9 = vpack.c.bf16 %v9900_v17, %v9896_v39  ;;  %v1061_v62 = vmul.f32 1.442695, %v950_v18  ;;  %v1184_v39 = vpack.c.bf16 %v9886_v61, %v9878_v40  ;;  %v1285_v40 = vpop.permute.xlu1 %1284 }
 0x334   : > { %v9937_v59 = vadd.f32 %v9770_v35, %v1124_v55  ;;  %1225 = vmatpush.bf16.msrb.mxu1 %v1189_v24  ;;  %v1147_v35 = vadd.f32 %v9922_v45, %v1146_v44  ;;  %15519 = vst [vmem:[#allocation33_spill] sm:$0xff] %v9956_v5  ;;  %v7995_v2 = vpop.eup %7994  ;;  %8006 = vpow2.f32 %v1065_v12  ;;  %v1202_v10 = vpack.c.bf16 %v9952_v15, %v9947_v34  ;;  %v15523_v55 = vld [vmem:[#allocation47_spill] sm:$0xff]  ;;  %v15529_v44 = vld [vmem:[#allocation12_spill] sm:$0xff] }
 0x335   : > { %1213 = vmatmul.bf16.vlgmr.msrb.gmra.mxu0 %v9943_v28  ;;  %v7997_v31 = vpop.eup %7996  ;;  %8008 = vpow2.f32 %v1069_v49  ;;  %v1182_v37 = vpack.c.bf16 %v9868_v47, %v9859_v38  ;;  %v1180_v48 = vpack.c.bf16 %v9852_v6, %v9840_v11  ;;  %v1178_v38 = vpack.c.bf16 %v9826_v32, %v9814_v14  ;;  %v15527_v14 = vld [vmem:[#allocation43_spill] sm:$0xff]  ;;  %v15528_v32 = vld [vmem:[#allocation45_spill] sm:$0xff] }
 0x336   : > { %1231 = vmatpush.bf16.msra.mxu0 %v1188_v63  ;;  %v1148_v57 = vadd.f32 %v9927_v46, %v1147_v35  ;;  %v7999_v56 = vpop.eup %7998  ;;  %8010 = vpow2.f32 %v1057_v41  ;;  %v1176_v6 = vpack.c.bf16 %v15524_v51, %v15523_v55  ;;  %v1318_v7 = vrot.slane %v15525_v13, 2  ;;  %v15526_v63 = vld [vmem:[#allocation20_spill] sm:$0xff] }
 0x337   : > { %1226 = vmatmul.bf16.vlgmr.msrb.gmra.mxu1 %v9956_v5  ;;  %v8001_v16 = vpop.eup %8000  ;;  %8012 = vpow2.f32 %v1061_v62  ;;  %4836 = vrot.lane.b32.xlu1 %v15521_v3, %s8976_s23  ;;  %v1192_v24 = vpack.c.bf16 %v7997_v31, %v7995_v2  ;;  %v1174_v12 = vpack.c.bf16 %v15528_v32, %v15527_v14  ;;  %v1319_v54 = vrot.slane %v15529_v44, 2 }
 0x338   : > { %1244 = vmatpush.bf16.msra.mxu1 %v1204_v42  ;;  %v1149_v22 = vadd.f32 %v7995_v2, %v1148_v57  ;;  %v8003_v4 = vpop.eup %8002  ;;  %v1200_v50 = vpack.c.bf16 %v8001_v16, %v7999_v56  ;;  %v1369_v35 = vsel %vm644_vm1, %v1318_v7, 0 }
 0x339   : > { %v8005_v23 = vpop.eup %8004  ;;  %v1372_v58 = vsel %vm644_vm1, %v1319_v54, 0 }
 0x33a   : > { %1232 = vmatpush.bf16.msra.mxu0 %v1186_v9  ;;  %v1150_v20 = vadd.f32 %v7997_v31, %v1149_v22  ;;  %v8007_v17 = vpop.eup %8006  ;;  %v1194_v1 = vpack.c.bf16 %v8005_v23, %v8003_v4  ;;  %v15534_v31 = vld [vmem:[#allocation17_spill] sm:$0xff] }
 0x33b   : > { %v8009_v8 = vpop.eup %8008  ;;  %v1287_v52 = vpop.permute.xlu1 %1286 }
 0x33c   : > { %1245 = vmatpush.bf16.msra.mxu1 %v1202_v10  ;;  %v1151_v43 = vadd.f32 %v8003_v4, %v1150_v20  ;;  %v8011_v25 = vpop.eup %8010  ;;  %v1198_v21 = vpack.c.bf16 %v8009_v8, %v8007_v17  ;;  %v15536_v10 = vld [vmem:[#allocation25_spill] sm:$0xff]  ;;  %v10032_v4 = vpop.f32.mrf.mxu0  ;;  %v1126_v20 = vrot.slane %v9937_v59, 4 }
 0x33d   : > { %v8013_v53 = vpop.eup %8012  ;;  %15538 = vst [vmem:[#allocation41_spill] sm:$0xff] %v10032_v4 }
 0x33e   : > { %1233 = vmatpush.bf16.msra.mxu0 %v1184_v39  ;;  %v1152_v30 = vadd.f32 %v8005_v23, %v1151_v43  ;;  %v1196_v26 = vpack.c.bf16 %v8013_v53, %v8011_v25  ;;  %v15537_v39 = vld [vmem:[#allocation27_spill] sm:$0xff]  ;;  %v10035_v23 = vpop.f32.mrf.mxu1 }
 0x33f   : > { %4842 = vrot.lane.b32.xlu1 %v15522_v29, %s8976_s23  ;;  %15539 = vst [vmem:[#allocation28_spill] sm:$0xff] %v10035_v23 }
 0x340   : > { %1246 = vmatpush.bf16.msra.mxu1 %v1200_v50  ;;  %v1153_v61 = vadd.f32 %v8011_v25, %v1152_v30 }
 0x342   : > { %1234 = vmatpush.bf16.msra.mxu0 %v1182_v37  ;;  %v1154_v36 = vadd.f32 %v8013_v53, %v1153_v61  ;;  %v289_v61 = vld [vmem:[%s15119_s1] sm:$0xff] }
 0x343   : > { %v1289_v49 = vpop.permute.xlu1 %1288 }
 0x344   : > { %1247 = vmatpush.bf16.msra.mxu1 %v1198_v21  ;;  %v1155_v27 = vadd.f32 %v8007_v17, %v1154_v36  ;;  %v1127_v17 = vadd.f32 %v1126_v20, %v9937_v59  ;;  %v10038_v43 = vpop.f32.mrf.mxu0 }
 0x345   : > { %15540 = vst [vmem:[#allocation31_spill] sm:$0xff] %v10038_v43 }
 0x346   : > { %1235 = vmatpush.bf16.msra.mxu0 %v1180_v48  ;;  %v1156_v47 = vadd.f32 %v8009_v8, %v1155_v27  ;;  %v1128_v50 = vrot.slane %v1127_v17, 2  ;;  %v10040_v8 = vpop.f32.mrf.mxu1  ;;  %v10053_v27 = vstv %s297_s11 }
 0x347   : > { %4848 = vrot.lane.b32.xlu1 %v15526_v63, %s8976_s23  ;;  %15541 = vst [vmem:[#allocation34_spill] sm:$0xff] %v10040_v8 }
 0x348   : > { %1248 = vmatpush.bf16.msra.mxu1 %v1196_v26  ;;  %v1157_v19 = vadd.f32 %v7999_v56, %v1156_v47  ;;  %v15535_v56 = vld [vmem:[#allocation23_spill] sm:$0xff]  ;;  %v1129_v3 = vadd.f32 %v1128_v50, %v1127_v17  ;;  %15544 = vst [vmem:[#allocation36_spill] sm:$0xff] %v10053_v27  ;;  %v8942_v26 = vld [vmem:[%s9046_s30] sm:$0xff] }
 0x349   : > { %v10056_v29 = vadd.f32 %v8942_v26, %v289_v61 }
 0x34a   : > { %1236 = vmatpush.bf16.msra.mxu0 %v1178_v38  ;;  %v1158_v11 = vadd.f32 %v8001_v16, %v1157_v19  ;;  %v1130_v37 = vrot.slane %v1129_v3, 1 }
 0x34b   : > { %v1291_v9 = vpop.permute.xlu1 %1290  ;;  %15545 = vst [vmem:[#allocation19_spill] sm:$0xff] %v10056_v29 }
 0x34c   : > { %1249 = vmatpush.bf16.msra.mxu1 %v1194_v1  ;;  %v1159_v33 = vadd.f32 %v9947_v34, %v1158_v11  ;;  %v1190_v34 = vpack.c.bf16 %v9927_v46, %v9922_v45  ;;  %v15532_v45 = vld [vmem:[#allocation29_spill] sm:$0xff]  ;;  %v10044_v30 = vpop.f32.mrf.mxu0 }
 0x34d   : > { %15542 = vst [vmem:[#allocation15_spill] sm:$0xff] %v10044_v30 }
 0x34e   : > { %1237 = vmatpush.bf16.msra.mxu0 %v1176_v6  ;;  %v1160_v18 = vadd.f32 %v9952_v15, %v1159_v33  ;;  %v15530_v15 = vld [vmem:[#allocation24_spill] sm:$0xff]  ;;  %v10046_v25 = vpop.f32.mrf.mxu1  ;;  %v1297_v6 = vpop.permute.xlu2 %1296 }
 0x34f   : > { %4854 = vrot.lane.b32.xlu1 %v15530_v15, %s8976_s23  ;;  %15543 = vst [vmem:[#allocation35_spill] sm:$0xff] %v10046_v25 }
 0x350   : > { %1250 = vmatpush.bf16.msra.mxu1 %v1192_v24  ;;  %v1161_v42 = vadd.f32 %v9934_v60, %v1160_v18  ;;  %v15531_v60 = vld [vmem:[#allocation26_spill] sm:$0xff] }
 0x351   : > { %v290_v24 = vld [vmem:[%s15119_s1 + $0x8] sm:$0xff] }
 0x352   : > { %1238 = vmatpush.bf16.msra.mxu0 %v1174_v12  ;;  %v1162_v41 = vadd.f32 %v9939_v0, %v1161_v42  ;;  %v15533_v0 = vld [vmem:[#allocation14_spill] sm:$0xff] }
 0x353   : > { %v1293_v2 = vpop.permute.xlu1 %1292  ;;  %v8943_v12 = vld [vmem:[%s9046_s30 + $0x8] sm:$0xff] }
 0x354   : > { %1251 = vmatpush.bf16.msra.mxu1 %v1190_v34  ;;  %v1163_v36 = vrot.slane %v1162_v41, 4  ;;  %v10068_v44 = vadd.f32 %v8943_v12, %v290_v24 }
 0x355   : > { %1239 = vmatmul.bf16.vlgmr.msra.gmra.mxu0 %v9943_v28 }
 0x356   : > { %1381 = vmatpush.bf16.msrb.mxu0 %v1369_v35  ;;  %15546 = vst [vmem:[#allocation37_spill] sm:$0xff] %v10068_v44 }
 0x357   : > { %1252 = vmatmul.bf16.vlgmr.msra.gmra.mxu1 %v9956_v5  ;;  %4860 = vrot.lane.b32.xlu1 %v15531_v60, %s8976_s23 }
 0x358   : > { %1470 = vmatpush.bf16.msrb.mxu1 %v1372_v58 }
 0x35b   : > { %v1295_v46 = vpop.permute.xlu1 %1294 }
 0x35f   : > { %4866 = vrot.lane.b32.xlu1 %v15532_v45, %s8976_s23 }
 0x363   : > { %v10010_v57 = vpop.permute.xlu1 %1298 }
 0x365   : > { %7350 = vmatmul.msk.bf16.vlgmr.msrb.gmra.mxu0 %vm595_vm2, %v1285_v40 }
 0x367   : > { %7366 = vmatmul.msk.bf16.vlgmr.msrb.gmra.mxu1 %vm595_vm2, %v1285_v40  ;;  %5540 = vrot.lane.b32.xlu1 %v15533_v0, %s8977_s28  ;;  %v1131_v40 = vadd.f32 %v1130_v37, %v1129_v3 }
 0x369   : > { %8014 = vrcp.f32 %v1131_v40 }
 0x36b   : > { %v10016_v62 = vpop.permute.xlu1 %1302 }
 0x36f   : > { %5546 = vrot.lane.b32.xlu1 %v15534_v31, %s8977_s28  ;;  %v8015_v48 = vpop.eup %8014 }
 0x373   : > { %v10021_v22 = vpop.permute.xlu1 %1304 }
 0x375   : > { %7351 = vmatmul.msk.bf16.gmra.mxu0 %vm595_vm2, %v1287_v52 }
 0x377   : > { %7367 = vmatmul.msk.bf16.gmra.mxu1 %vm595_vm2, %v1287_v52  ;;  %5552 = vrot.lane.b32.xlu1 %v15535_v56, %s8977_s28  ;;  %v1164_v52 = vadd.f32 %v1163_v36, %v1162_v41  ;;  %v1301_v41 = vpop.permute.xlu0 %1300 }
 0x379   : > { %v1165_v51 = vrot.slane %v1164_v52, 2 }
 0x37b   : > { %v10026_v16 = vpop.permute.xlu1 %1306  ;;  %v1166_v11 = vadd.f32 %v1165_v51, %v1164_v52 }
 0x37d   : > { %v1167_v13 = vrot.slane %v1166_v11, 1 }
 0x37f   : > { %5558 = vrot.lane.b32.xlu1 %v15536_v10, %s8977_s28  ;;  %v1168_v7 = vadd.f32 %v1167_v13, %v1166_v11 }
 0x381   : > { %8016 = vrcp.f32 %v1168_v7 }
 0x385   : > { %7352 = vmatmul.msk.bf16.gmra.mxu0 %vm595_vm2, %v1289_v49 }
 0x387   : > { %7368 = vmatmul.msk.bf16.gmra.mxu1 %vm595_vm2, %v1289_v49  ;;  %5564 = vrot.lane.b32.xlu1 %v15537_v39, %s8977_s28  ;;  %v8017_v32 = vpop.eup %8016 }
 0x395   : > { %7353 = vmatmul.msk.bf16.gmra.mxu0 %vm595_vm2, %v1291_v9 }
 0x397   : > { %7369 = vmatmul.msk.bf16.gmra.mxu1 %vm595_vm2, %v1291_v9 }
 0x3a5   : > { %7354 = vmatmul.msk.bf16.gmra.mxu0 %vm595_vm2, %v1293_v2 }
 0x3a7   : > { %7370 = vmatmul.msk.bf16.gmra.mxu1 %vm595_vm2, %v1293_v2 }
 0x3b2   : > { %v1214_v59 = vpop.f32.mrf.mxu0 }
 0x3b4   : > { %v1227_v21 = vpop.f32.mrf.mxu1 }
 0x3b5   : > { %7355 = vmatmul.msk.bf16.gmra.mxu0 %vm595_vm2, %v1295_v46  ;;  %v1228_v53 = vadd.f32 %v1227_v21, %v1214_v59 }
 0x3b7   : > { %7371 = vmatmul.msk.bf16.gmra.mxu1 %vm595_vm2, %v1295_v46  ;;  %v1259_v38 = vmul.f32 %v8015_v48, %v1228_v53 }
 0x3b9   : > { %v1262_v47 = vmul.f32 %v10053_v27, %v1259_v38 }
 0x3ba   : > { %v1216_v19 = vpop.f32.mrf.mxu0 }
 0x3bb   : > { %v1264_v1 = vadd.f32 %v1262_v47, %v10056_v29 }
 0x3bc   : > { %v1229_v55 = vpop.f32.mrf.mxu1 }
 0x3bd   : > { %1266 = vst [vmem:[#allocation2 + $0x30] sm:$0xf] %v1264_v1 }
 0x3c5   : > { %7356 = vmatmul.msk.bf16.gmra.mxu0 %vm595_vm2, %v1297_v6 }
 0x3c7   : > { %7372 = vmatmul.msk.bf16.gmra.mxu1 %vm595_vm2, %v1297_v6 }
 0x3d2   : > { %v1240_v33 = vpop.f32.mrf.mxu0 }
 0x3d4   : > { %v1253_v63 = vpop.f32.mrf.mxu1 }
 0x3d5   : > { %7357 = vmatmul.msk.bf16.gmra.mxu0 %vm595_vm2, %v10010_v57  ;;  %v1254_v14 = vadd.f32 %v1253_v63, %v1240_v33 }
 0x3d7   : > { %v1260_v54 = vmul.f32 %v8017_v32, %v1254_v14  ;;  %7373 = vmatmul.msk.bf16.gmra.mxu1 %vm595_vm2, %v10010_v57 }
 0x3d9   : > { %v1263_v18 = vmul.f32 %v10053_v27, %v1260_v54 }
 0x3da   : > { %v1242_v49 = vpop.f32.mrf.mxu0 }
 0x3db   : > { %v1265_v35 = vadd.f32 %v1263_v18, %v10068_v44 }
 0x3dc   : > { %v1255_v42 = vpop.f32.mrf.mxu1 }
 0x3dd   : > { %1267 = vst [vmem:[#allocation2] sm:$0xf] %v1265_v35 }
 0x3e2   : > { %v10074_v34 = vpop.f32.mrf.mxu0 }
 0x3e4   : > { %v10076_v58 = vpop.f32.mrf.mxu1 }
 0x3e5   : > { %7358 = vmatmul.msk.bf16.gmra.mxu0 %vm595_vm2, %v1301_v41 }
 0x3e7   : > { %7374 = vmatmul.msk.bf16.gmra.mxu1 %vm595_vm2, %v1301_v41 }
 0x3ea   : > { %v10080_v15 = vpop.f32.mrf.mxu0 }
 0x3ec   : > { %v10082_v9 = vpop.f32.mrf.mxu1 }
 0x3ed   : > { %15547 = vst [vmem:[#allocation38_spill] sm:$0xff] %v10082_v9 }
 0x3f2   : > { %v10084_v60 = vpop.f32.mrf.mxu0 }
 0x3f3   : > { %15548 = vst [vmem:[#allocation39_spill] sm:$0xff] %v10084_v60  ;;  %v1552_v8 = vmax.f32 %v10074_v34, %v10084_v60 }
 0x3f4   : > { %v10086_v2 = vpop.f32.mrf.mxu1 }
 0x3f5   : > { %15549 = vst [vmem:[#allocation40_spill] sm:$0xff] %v10086_v2  ;;  %7359 = vmatmul.msk.bf16.gmra.mxu0 %vm595_vm2, %v10016_v62 }
 0x3f7   : > { %7375 = vmatmul.msk.bf16.gmra.mxu1 %vm595_vm2, %v10016_v62 }
 0x3fa   : > { %v10092_v45 = vpop.f32.mrf.mxu0 }
 0x3fb   : > { %15550 = vst [vmem:[#allocation42_spill] sm:$0xff] %v10092_v45  ;;  %v1553_v43 = vmax.f32 %v10080_v15, %v10092_v45 }
 0x3fc   : > { %v10094_v46 = vpop.f32.mrf.mxu1 }
 0x3fd   : > { %15551 = vst [vmem:[#allocation18_spill] sm:$0xff] %v10094_v46 }
 0x402   : > { %v10096_v0 = vpop.f32.mrf.mxu0 }
 0x403   : > { %15552 = vst [vmem:[#allocation21_spill] sm:$0xff] %v10096_v0  ;;  %v1554_v23 = vmax.f32 %v1552_v8, %v10096_v0 }
 0x404   : > { %v10098_v57 = vpop.f32.mrf.mxu1 }
 0x405   : > { %7360 = vmatmul.msk.bf16.gmra.mxu0 %vm595_vm2, %v10021_v22 }
 0x407   : > { %7376 = vmatmul.msk.bf16.gmra.mxu1 %vm595_vm2, %v10021_v22  ;;  %v1309_v22 = vpop.permute.xlu1 %1308 }
 0x40a   : > { %v10104_v31 = vpop.f32.mrf.mxu0 }
 0x40b   : > { %15553 = vst [vmem:[#allocation46_spill] sm:$0xff] %v10104_v31  ;;  %v1555_v4 = vmax.f32 %v1553_v43, %v10104_v31 }
 0x40c   : > { %v10106_v56 = vpop.f32.mrf.mxu1 }
 0x412   : > { %v10108_v10 = vpop.f32.mrf.mxu0 }
 0x413   : > { %15554 = vst [vmem:[#allocation44_spill] sm:$0xff] %v10108_v10  ;;  %v1556_v27 = vmax.f32 %v1554_v23, %v10108_v10 }
 0x414   : > { %v10110_v62 = vpop.f32.mrf.mxu1 }
 0x415   : > { %7361 = vmatmul.msk.bf16.gmra.mxu0 %vm595_vm2, %v10026_v16 }
 0x417   : > { %7377 = vmatmul.msk.bf16.gmra.mxu1 %vm595_vm2, %v10026_v16  ;;  %v1311_v16 = vpop.permute.xlu1 %1310 }
 0x41a   : > { %v10116_v39 = vpop.f32.mrf.mxu0 }
 0x41b   : > { %v1557_v5 = vmax.f32 %v1555_v4, %v10116_v39 }
 0x41c   : > { %v10118_v20 = vpop.f32.mrf.mxu1 }
 0x41d   : > { %15555 = vst [vmem:[#allocation22_spill] sm:$0xff] %v10118_v20 }
 0x41f   : > { %v1313_v48 = vpop.permute.xlu1 %1312 }
 0x422   : > { %v10120_v17 = vpop.f32.mrf.mxu0 }
 0x423   : > { %v1558_v28 = vmax.f32 %v1556_v27, %v10120_v17  ;;  %v1590_v27 = vmax.f32 %v10082_v9, %v10094_v46 }
 0x424   : > { %v10122_v50 = vpop.f32.mrf.mxu1 }
 0x425   : > { %7362 = vmatmul.msk.bf16.gmra.mxu0 %vm595_vm2, %v1309_v22 }
 0x427   : > { %7378 = vmatmul.msk.bf16.gmra.mxu1 %vm595_vm2, %v1309_v22  ;;  %v1315_v52 = vpop.permute.xlu1 %1314 }
 0x42a   : > { %v10126_v3 = vpop.f32.mrf.mxu0 }
 0x42c   : > { %v10128_v37 = vpop.f32.mrf.mxu1 }
 0x42d   : > { %15556 = vst [vmem:[#allocation13_spill] sm:$0xff] %v10128_v37 }
 0x432   : > { %v10130_v40 = vpop.f32.mrf.mxu0 }
 0x433   : > { %v1560_v60 = vmax.f32 %v1558_v28, %v10130_v40 }
 0x434   : > { %v10132_v59 = vpop.f32.mrf.mxu1 }
 0x435   : > { %7363 = vmatmul.msk.bf16.gmra.mxu0 %vm595_vm2, %v1311_v16 }
 0x437   : > { %7379 = vmatmul.msk.bf16.gmra.mxu1 %vm595_vm2, %v1311_v16 }
 0x43a   : > { %v10136_v61 = vpop.f32.mrf.mxu0 }
 0x43c   : > { %v10138_v21 = vpop.f32.mrf.mxu1 }
 0x43d   : > { %15557 = vst [vmem:[#allocation16_spill] sm:$0xff] %v10138_v21 }
 0x442   : > { %v10140_v53 = vpop.f32.mrf.mxu0 }
 0x443   : > { %v1562_v8 = vmax.f32 %v1560_v60, %v10140_v53 }
 0x444   : > { %v10142_v36 = vpop.f32.mrf.mxu1 }
 0x445   : > { %7364 = vmatmul.msk.bf16.gmra.mxu0 %vm595_vm2, %v1313_v48 }
 0x447   : > { %7380 = vmatmul.msk.bf16.gmra.mxu1 %vm595_vm2, %v1313_v48 }
 0x44a   : > { %v10146_v26 = vpop.f32.mrf.mxu0 }
 0x44c   : > { %v10148_v38 = vpop.f32.mrf.mxu1 }
 0x44d   : > { %15558 = vst [vmem:[#allocation47_spill] sm:$0xff] %v10148_v38 }
 0x452   : > { %v10150_v47 = vpop.f32.mrf.mxu0 }
 0x453   : > { %v1564_v0 = vmax.f32 %v1562_v8, %v10150_v47 }
 0x454   : > { %v10152_v19 = vpop.f32.mrf.mxu1 }
 0x455   : > { %7365 = vmatmul.msk.bf16.gmra.mxu0 %vm595_vm2, %v1315_v52 }
 0x457   : > { %7381 = vmatmul.msk.bf16.gmra.mxu1 %vm595_vm2, %v1315_v52 }
 0x45a   : > { %v10156_v1 = vpop.f32.mrf.mxu0 }
 0x45c   : > { %v10158_v55 = vpop.f32.mrf.mxu1 }
 0x462   : > { %v10160_v51 = vpop.f32.mrf.mxu0 }
 0x463   : > { %v1566_v4 = vmax.f32 %v1564_v0, %v10160_v51  ;;  %v1592_v0 = vmax.f32 %v1590_v27, %v10106_v56 }
 0x464   : > { %v10162_v6 = vpop.f32.mrf.mxu1 }
 0x46a   : > { %v10164_v11 = vpop.f32.mrf.mxu0 }
 0x46c   : > { %v10166_v13 = vpop.f32.mrf.mxu1 }
 0x46d   : > { %15559 = vst [vmem:[#allocation30_spill] sm:$0xff] %v10166_v13 }
 0x472   : > { %v10168_v7 = vpop.f32.mrf.mxu0 }
 0x473   : > { %v1568_v28 = vmax.f32 %v1566_v4, %v10168_v7 }
 0x474   : > { %v10170_v33 = vpop.f32.mrf.mxu1 }
 0x47a   : > { %v10172_v24 = vpop.f32.mrf.mxu0 }
 0x47b   : > { %15560 = vst [vmem:[#allocation5_spill] sm:$0xff] %v10172_v24 }
 0x47c   : > { %v10174_v63 = vpop.f32.mrf.mxu1 }
 0x482   : > { %v10176_v14 = vpop.f32.mrf.mxu0 }
 0x483   : > { %v1570_v60 = vmax.f32 %v1568_v28, %v10176_v14 }
 0x484   : > { %v10178_v32 = vpop.f32.mrf.mxu1 }
 0x48a   : > { %v10180_v12 = vpop.f32.mrf.mxu0 }
 0x48c   : > { %v10182_v54 = vpop.f32.mrf.mxu1 }
 0x48d   : > { %15561 = vst [vmem:[#allocation20_spill] sm:$0xff] %v10182_v54 }
 0x492   : > { %v10184_v18 = vpop.f32.mrf.mxu0 }
 0x494   : > { %v10186_v49 = vpop.f32.mrf.mxu1 }
 0x49a   : > { %v10188_v35 = vpop.f32.mrf.mxu0 }
 0x49c   : > { %v10190_v42 = vpop.f32.mrf.mxu1 }
 0x49d   : > { %15562 = vst [vmem:[#allocation43_spill] sm:$0xff] %v10190_v42 }
 0x4a2   : > { %v10192_v41 = vpop.f32.mrf.mxu0 }
 0x4a4   : > { %v10194_v22 = vpop.f32.mrf.mxu1 }
 0x4a5   : > { %15563 = vst [vmem:[#allocation45_spill] sm:$0xff] %v10194_v22 }
 0x4aa   : > { %v10196_v16 = vpop.f32.mrf.mxu0 }
 0x4ac   : > { %v10198_v48 = vpop.f32.mrf.mxu1 }
 0x4ad   : > { %15564 = vst [vmem:[#allocation12_spill] sm:$0xff] %v10198_v48 }
 0x4b2   : > { %v10200_v52 = vpop.f32.mrf.mxu0 }
 0x4b4   : > { %v10202_v25 = vpop.f32.mrf.mxu1 }
 0x4b5   : > { %15565 = vst [vmem:[#allocation24_spill] sm:$0xff] %v10202_v25  ;;  %v1559_v25 = vmax.f32 %v1557_v5, %v10126_v3 }
 0x4b7   : > { %v1561_v45 = vmax.f32 %v1559_v25, %v10136_v61 }
 0x4b9   : > { %v1563_v43 = vmax.f32 %v1561_v45, %v10146_v26 }
 0x4ba   : > { %v10204_v30 = vpop.f32.mrf.mxu0 }
 0x4bb   : > { %v1565_v23 = vmax.f32 %v1563_v43, %v10156_v1  ;;  %v1589_v43 = vmax.f32 %v10076_v58, %v10086_v2 }
 0x4bc   : > { %v10212_v44 = vpop.f32.mrf.mxu1 }
 0x4bd   : > { %v1567_v5 = vmax.f32 %v1565_v23, %v10164_v11  ;;  %v1572_v23 = vmax.f32 %v1570_v60, %v10184_v18 }
 0x4bf   : > { %v1569_v25 = vmax.f32 %v1567_v5, %v10172_v24  ;;  %v1591_v5 = vmax.f32 %v1589_v43, %v10098_v57  ;;  %v1594_v24 = vmax.f32 %v1592_v0, %v10118_v20  ;;  %v1574_v46 = vmax.f32 %v1572_v23, %v10192_v41 }
 0x4c1   : > { %v1571_v45 = vmax.f32 %v1569_v25, %v10180_v12  ;;  %v1593_v9 = vmax.f32 %v1591_v5, %v10110_v62  ;;  %v1596_v2 = vmax.f32 %v1594_v24, %v10128_v37  ;;  %v1576_v27 = vmax.f32 %v1574_v46, %v10200_v52 }
 0x4c2   : > { %v10214_v29 = vpop.f32.mrf.mxu0 }
 0x4c3   : > { %v1573_v4 = vmax.f32 %v1571_v45, %v10188_v35  ;;  %v1595_v45 = vmax.f32 %v1593_v9, %v10122_v50  ;;  %v1598_v43 = vmax.f32 %v1596_v2, %v10138_v21  ;;  %v1578_v0 = vmax.f32 %v1576_v27, %v10214_v29 }
 0x4c4   : > { %v10228_v10 = vpop.f32.mrf.mxu1 }
 0x4c5   : > { %v1575_v28 = vmax.f32 %v1573_v4, %v10196_v16  ;;  %v1597_v4 = vmax.f32 %v1595_v45, %v10132_v59  ;;  %v1600_v5 = vmax.f32 %v1598_v43, %v10148_v38 }
 0x4c7   : > { %v1577_v60 = vmax.f32 %v1575_v28, %v10204_v30  ;;  %v1599_v28 = vmax.f32 %v1597_v4, %v10142_v36  ;;  %v1602_v9 = vmax.f32 %v1600_v5, %v10158_v55 }
 0x4c9   : > { %v1601_v2 = vmax.f32 %v1599_v28, %v10152_v19  ;;  %v1604_v27 = vmax.f32 %v1602_v9, %v10166_v13 }
 0x4ca   : > { %v10224_v31 = vpop.f32.mrf.mxu0 }
 0x4cb   : > { %v1579_v23 = vmax.f32 %v1577_v60, %v10224_v31  ;;  %v1603_v45 = vmax.f32 %v1601_v2, %v10162_v6  ;;  %v1606_v43 = vmax.f32 %v1604_v27, %v10174_v63 }
 0x4cc   : > { %v10249_v25 = vpop.f32.mrf.mxu1 }
 0x4d2   : > { %v10238_v8 = vpop.f32.mrf.mxu0 }
 0x4d3   : > { %v1580_v24 = vmax.f32 %v1578_v0, %v10238_v8  ;;  %v1605_v0 = vmax.f32 %v1603_v45, %v10170_v33 }
 0x4d4   : > { %v10269_v21 = vpop.f32.mrf.mxu1 }
 0x4d5   : > { %v1607_v5 = vmax.f32 %v1605_v0, %v10178_v32 }
 0x4d7   : > { %v1609_v28 = vmax.f32 %v1607_v5, %v10186_v49 }
 0x4d9   : > { %v1611_v2 = vmax.f32 %v1609_v28, %v10194_v22  ;;  %v15571_v22 = vld [vmem:[#allocation44_spill] sm:$0xff] }
 0x4da   : > { %v10259_v20 = vpop.f32.mrf.mxu0 }
 0x4db   : > { %v1581_v46 = vmax.f32 %v1579_v23, %v10259_v20  ;;  %v1608_v23 = vmax.f32 %v1606_v43, %v10182_v54 }
 0x4dd   : > { %v1582_v37 = vmax.f32 %v1580_v24, %v1581_v46  ;;  %v1610_v24 = vmax.f32 %v1608_v23, %v10190_v42 }
 0x4df   : > { %v1583_v60 = vrot.slane %v1582_v37, 4  ;;  %v1612_v9 = vmax.f32 %v1610_v24, %v10198_v48  ;;  %v15567_v24 = vld [vmem:[#allocation39_spill] sm:$0xff] }
 0x4e1   : > { %v1584_v38 = vmax.f32 %v1582_v37, %v1583_v60  ;;  %v1614_v27 = vmax.f32 %v1612_v9, %v10212_v44  ;;  %v10281_v37 = vpop.f32.mrf.mxu1  ;;  %v15566_v60 = vld [vmem:[#allocation24_spill] sm:$0xff] }
 0x4e2   : > { %v1613_v45 = vmax.f32 %v1611_v2, %v15566_v60  ;;  %v15568_v2 = vld [vmem:[#allocation42_spill] sm:$0xff] }
 0x4e3   : > { %v1585_v4 = vrot.slane %v1584_v38, 2  ;;  %v1616_v43 = vmax.f32 %v1614_v27, %v10249_v25 }
 0x4e4   : > { %v1615_v0 = vmax.f32 %v1613_v45, %v10228_v10  ;;  %v15569_v45 = vld [vmem:[#allocation21_spill] sm:$0xff] }
 0x4e5   : > { %v1586_v46 = vmax.f32 %v1584_v38, %v1585_v4  ;;  %v1618_v38 = vmax.f32 %v1616_v43, %v10281_v37 }
 0x4e6   : > { %v1617_v23 = vmax.f32 %v1615_v0, %v10269_v21 }
 0x4e7   : > { %v1587_v13 = vrot.slane %v1586_v46, 1 }
 0x4e8   : > { %v1619_v9 = vmax.f32 %v1617_v23, %v1618_v38 }
 0x4e9   : > { %v10285_v54 = vmax.f32 %v1586_v46, %v1587_v13 }
 0x4ea   : > { %v1620_v0 = vrot.slane %v1619_v9, 4 }
 0x4eb   : > { %v1626_v4 = vsub.f32 %v10074_v34, %v10285_v54  ;;  %v1628_v5 = vsub.f32 %v10080_v15, %v10285_v54  ;;  %v1630_v28 = vsub.f32 %v15567_v24, %v10285_v54  ;;  %v1632_v13 = vsub.f32 %v15568_v2, %v10285_v54  ;;  %v15570_v34 = vld [vmem:[#allocation46_spill] sm:$0xff] }
 0x4ec   : > { %v1634_v43 = vsub.f32 %v15569_v45, %v10285_v54  ;;  %v1636_v48 = vsub.f32 %v15570_v34, %v10285_v54  ;;  %v1638_v24 = vsub.f32 %v15571_v22, %v10285_v54  ;;  %v1621_v23 = vmax.f32 %v1619_v9, %v1620_v0 }
 0x4ed   : > { %v1690_v46 = vmul.f32 1.442695, %v1626_v4  ;;  %v1694_v27 = vmul.f32 1.442695, %v1628_v5  ;;  %v1698_v42 = vmul.f32 1.442695, %v1630_v28  ;;  %v1640_v4 = vsub.f32 %v10116_v39, %v10285_v54 }
 0x4ee   : > { %v1702_v15 = vmul.f32 1.442695, %v1632_v13  ;;  %v1706_v38 = vmul.f32 1.442695, %v1634_v43  ;;  %v1710_v5 = vmul.f32 1.442695, %v1636_v48  ;;  %v1642_v28 = vsub.f32 %v10120_v17, %v10285_v54 }
 0x4ef   : > { %8018 = vpow2.f32 %v1690_v46  ;;  %v1644_v13 = vsub.f32 %v10126_v3, %v10285_v54  ;;  %v1714_v22 = vmul.f32 1.442695, %v1638_v24  ;;  %v1622_v9 = vrot.slane %v1621_v23, 2 }
 0x4f0   : > { %8020 = vpow2.f32 %v1694_v27  ;;  %v1648_v27 = vsub.f32 %v10136_v61, %v10285_v54  ;;  %v1718_v17 = vmul.f32 1.442695, %v1640_v4  ;;  %v1650_v45 = vsub.f32 %v10140_v53, %v10285_v54 }
 0x4f1   : > { %8022 = vpow2.f32 %v1698_v42  ;;  %v1646_v42 = vsub.f32 %v10130_v40, %v10285_v54  ;;  %v1722_v3 = vmul.f32 1.442695, %v1642_v28  ;;  %v1652_v40 = vsub.f32 %v10146_v26, %v10285_v54 }
 0x4f2   : > { %8024 = vpow2.f32 %v1702_v15  ;;  %v1726_v34 = vmul.f32 1.442695, %v1644_v13  ;;  %v1654_v15 = vsub.f32 %v10150_v47, %v10285_v54  ;;  %v1656_v53 = vsub.f32 %v10156_v1, %v10285_v54 }
 0x4f3   : > { %8026 = vpow2.f32 %v1706_v38  ;;  %v1730_v24 = vmul.f32 1.442695, %v1646_v42  ;;  %v1623_v38 = vmax.f32 %v1621_v23, %v1622_v9  ;;  %v1658_v28 = vsub.f32 %v10160_v51, %v10285_v54 }
 0x4f4   : > { %8028 = vpow2.f32 %v1710_v5  ;;  %v1734_v5 = vmul.f32 1.442695, %v1648_v27  ;;  %v1738_v26 = vmul.f32 1.442695, %v1650_v45  ;;  %v1660_v47 = vsub.f32 %v10164_v11, %v10285_v54  ;;  %v15572_v27 = vld [vmem:[#allocation5_spill] sm:$0xff] }
 0x4f5   : > { %v10306_v2 = vpop.eup %8018  ;;  %8030 = vpow2.f32 %v1714_v22  ;;  %v1662_v23 = vsub.f32 %v10168_v7, %v10285_v54  ;;  %v1742_v42 = vmul.f32 1.442695, %v1652_v40  ;;  %v1746_v1 = vmul.f32 1.442695, %v1654_v15 }
 0x4f6   : > { %v10310_v46 = vpop.eup %8020  ;;  %8032 = vpow2.f32 %v1718_v17  ;;  %v1624_v9 = vrot.slane %v1623_v38, 1  ;;  %v1664_v17 = vsub.f32 %v15572_v27, %v10285_v54  ;;  %v1750_v45 = vmul.f32 1.442695, %v1656_v53  ;;  %v10384_v27 = vpop.permute.xlu2 %373 }
 0x4f7   : > { %v1818_v39 = vadd.f32 %v10310_v46, %v10306_v2  ;;  %v10318_v48 = vpop.eup %8022  ;;  %8034 = vpow2.f32 %v1722_v3  ;;  %v1666_v11 = vsub.f32 %v10176_v14, %v10285_v54  ;;  %v1754_v3 = vmul.f32 1.442695, %v1658_v28  ;;  %15573 = vst [vmem:[#allocation26_spill] sm:$0xff] %v10384_v27 }
 0x4f8   : > { %v10325_v0 = vpop.eup %8024  ;;  %8036 = vpow2.f32 %v1726_v34  ;;  %v1668_v40 = vsub.f32 %v10180_v12, %v10285_v54  ;;  %v1670_v34 = vsub.f32 %v10184_v18, %v10285_v54  ;;  %v1758_v15 = vmul.f32 1.442695, %v1660_v47 }
 0x4f9   : > { %v1819_v43 = vadd.f32 %v10318_v48, %v1818_v39  ;;  %v10332_v4 = vpop.eup %8026  ;;  %8038 = vpow2.f32 %v1730_v24  ;;  %v10362_v53 = vmax.f32 %v1623_v38, %v1624_v9  ;;  %v1682_v28 = vsub.f32 %v10214_v29, %v10285_v54 }
 0x4fa   : > { %v10339_v22 = vpop.eup %8028  ;;  %8040 = vpow2.f32 %v1734_v5  ;;  %v1766_v12 = vmul.f32 1.442695, %v1664_v17  ;;  %v1686_v18 = vsub.f32 %v10238_v8, %v10285_v54  ;;  %v1688_v38 = vsub.f32 %v10259_v20, %v10285_v54 }
 0x4fb   : > { %v1820_v61 = vadd.f32 %v10325_v0, %v1819_v43  ;;  %v10346_v51 = vpop.eup %8030  ;;  %8042 = vpow2.f32 %v1738_v26  ;;  %v1778_v29 = vmul.f32 1.442695, %v1670_v34  ;;  %v1627_v8 = vsub.f32 %v10076_v58, %v10362_v53 }
 0x4fc   : > { %v10353_v43 = vpop.eup %8032  ;;  %8044 = vpow2.f32 %v1742_v42  ;;  %v1774_v42 = vmul.f32 1.442695, %v1668_v40  ;;  %v1802_v17 = vmul.f32 1.442695, %v1682_v28  ;;  %v1814_v58 = vmul.f32 1.442695, %v1688_v38 }
 0x4fd   : > { %v1821_v13 = vadd.f32 %v10332_v4, %v1820_v61  ;;  %v10359_v24 = vpop.eup %8034  ;;  %8046 = vpow2.f32 %v1746_v1  ;;  %v1762_v61 = vmul.f32 1.442695, %v1662_v23  ;;  %v1678_v28 = vsub.f32 %v10200_v52, %v10285_v54 }
 0x4fe   : > { %v10364_v5 = vpop.eup %8036  ;;  %8048 = vpow2.f32 %v1750_v45  ;;  %v15574_v45 = vld [vmem:[#allocation38_spill] sm:$0xff] }
 0x4ff   : > { %v1822_v39 = vadd.f32 %v10339_v22, %v1821_v13  ;;  %v10368_v26 = vpop.eup %8038  ;;  %8050 = vpow2.f32 %v1754_v3  ;;  %v1770_v13 = vmul.f32 1.442695, %v1666_v11  ;;  %v1629_v20 = vsub.f32 %v15574_v45, %v10362_v53 }
 0x500   : > { %v10373_v23 = vpop.eup %8040  ;;  %8052 = vpow2.f32 %v1758_v15  ;;  %v1684_v3 = vsub.f32 %v10224_v31, %v10285_v54  ;;  %v15575_v15 = vld [vmem:[#allocation40_spill] sm:$0xff]  ;;  %v1692_v31 = vmul.f32 1.442695, %v1627_v8  ;;  %v1635_v8 = vsub.f32 %v10098_v57, %v10362_v53 }
 0x501   : > { %v1823_v7 = vadd.f32 %v10346_v51, %v1822_v39  ;;  %v10377_v1 = vpop.eup %8042  ;;  %8054 = vpow2.f32 %v1762_v61  ;;  %v1631_v61 = vsub.f32 %v15575_v15, %v10362_v53  ;;  %v1794_v15 = vmul.f32 1.442695, %v1678_v28 }
 0x502   : > { %v10382_v9 = vpop.eup %8044  ;;  %8056 = vpow2.f32 %v1766_v12  ;;  %v1806_v45 = vmul.f32 1.442695, %v1684_v3  ;;  %v1637_v3 = vsub.f32 %v10106_v56, %v10362_v53  ;;  %v1676_v57 = vsub.f32 %v10196_v16, %v10285_v54 }
 0x503   : > { %v1824_v14 = vadd.f32 %v10353_v43, %v1823_v7  ;;  %v10388_v11 = vpop.eup %8046  ;;  %8058 = vpow2.f32 %v1770_v13  ;;  %v1810_v7 = vmul.f32 1.442695, %v1686_v18  ;;  %v15576_v18 = vld [vmem:[#allocation18_spill] sm:$0xff]  ;;  %v1708_v56 = vmul.f32 1.442695, %v1635_v8 }
 0x504   : > { %v10393_v34 = vpop.eup %8048  ;;  %8060 = vpow2.f32 %v1774_v42  ;;  %v1696_v42 = vmul.f32 1.442695, %v1629_v20  ;;  %v1674_v20 = vsub.f32 %v10192_v41, %v10285_v54 }
 0x505   : > { %v1825_v47 = vadd.f32 %v10359_v24, %v1824_v14  ;;  %v10397_v14 = vpop.eup %8050  ;;  %8062 = vpow2.f32 %v1778_v29 }
 0x506   : > { %v10402_v13 = vpop.eup %8052  ;;  %8064 = vpow2.f32 %v1802_v17  ;;  %v1700_v17 = vmul.f32 1.442695, %v1631_v61 }
 0x507   : > { %v1826_v39 = vadd.f32 %v10364_v5, %v1825_v47  ;;  %v1633_v47 = vsub.f32 %v15576_v18, %v10362_v53  ;;  %v10406_v38 = vpop.eup %8054  ;;  %8066 = vpow2.f32 %v1810_v7 }
 0x508   : > { %v10411_v29 = vpop.eup %8056  ;;  %8068 = vpow2.f32 %v1814_v58 }
 0x509   : > { %v1827_v40 = vadd.f32 %v10368_v26, %v1826_v39  ;;  %v1680_v39 = vsub.f32 %v10204_v30, %v10285_v54  ;;  %8070 = vpow2.f32 %v1692_v31  ;;  %v1704_v7 = vmul.f32 1.442695, %v1633_v47 }
 0x50a   : > { %8072 = vpow2.f32 %v1696_v42  ;;  %v1639_v31 = vsub.f32 %v10110_v62, %v10362_v53  ;;  %v1672_v47 = vsub.f32 %v10188_v35, %v10285_v54  ;;  %v1790_v62 = vmul.f32 1.442695, %v1676_v57 }
 0x50b   : > { %v1828_v12 = vadd.f32 %v10373_v23, %v1827_v40  ;;  %v10415_v40 = vpop.eup %8058  ;;  %v1798_v61 = vmul.f32 1.442695, %v1680_v39  ;;  %8074 = vpow2.f32 %v1806_v45  ;;  %v15578_v45 = vld [vmem:[#allocation22_spill] sm:$0xff]  ;;  %v1908_v54 = vpack.c.bf16 %v10393_v34, %v10388_v11 }
 0x50c   : > { %v10420_v30 = vpop.eup %8060  ;;  %8076 = vpow2.f32 %v1700_v17  ;;  %v1643_v17 = vsub.f32 %v10122_v50, %v10362_v53 }
 0x50d   : > { %v1829_v52 = vadd.f32 %v10377_v1, %v1828_v12  ;;  %v10424_v58 = vpop.eup %8062  ;;  %v10431_v12 = vpop.permute.xlu2 %2704  ;;  %8078 = vpow2.f32 %v1794_v15  ;;  %1932 = vmatpush.bf16.msrb.mxu2 %v1908_v54 }
 0x50e   : > { %v10429_v28 = vpop.eup %8064  ;;  %15577 = vst [vmem:[#allocation29_spill] sm:$0xff] %v10431_v12  ;;  %8080 = vpow2.f32 %v1704_v7  ;;  %v1712_v12 = vmul.f32 1.442695, %v1637_v3  ;;  %v1782_v7 = vmul.f32 1.442695, %v1672_v47 }
 0x50f   : > { %v1830_v18 = vadd.f32 %v10382_v9, %v1829_v52  ;;  %v10435_v42 = vpop.eup %8066  ;;  %v1786_v52 = vmul.f32 1.442695, %v1674_v20  ;;  %8082 = vpow2.f32 %v1798_v61  ;;  %v1716_v20 = vmul.f32 1.442695, %v1639_v31 }
 0x510   : > { %v10440_v39 = vpop.eup %8068  ;;  %8084 = vpow2.f32 %v1708_v56 }
 0x511   : > { %v1831_v41 = vadd.f32 %v10388_v11, %v1830_v18  ;;  %v1641_v18 = vsub.f32 %v15578_v45, %v10362_v53  ;;  %v10444_v27 = vpop.eup %8070  ;;  %v1924_v15 = vpack.c.bf16 %v10440_v39, %v10435_v42  ;;  %8086 = vpow2.f32 %v1786_v52 }
 0x512   : > { %v10449_v35 = vpop.eup %8072  ;;  %8088 = vpow2.f32 %v1712_v12  ;;  %v1906_v52 = vpack.c.bf16 %v10382_v9, %v10377_v1  ;;  %v1647_v45 = vsub.f32 %v10132_v59, %v10362_v53  ;;  %v15582_v9 = vld [vmem:[#allocation16_spill] sm:$0xff] }
 0x513   : > { %v1832_v16 = vadd.f32 %v10393_v34, %v1831_v41  ;;  %15579 = vst [vmem:[#allocation14_spill] sm:$0xff] %v10449_v35  ;;  %v10455_v3 = vpop.eup %8074  ;;  %v1855_v61 = vadd.f32 %v10449_v35, %v10444_v27  ;;  %v15580_v34 = vld [vmem:[#allocation13_spill] sm:$0xff]  ;;  %v1720_v41 = vmul.f32 1.442695, %v1641_v18  ;;  %1945 = vmatpush.bf16.msrb.mxu3 %v1924_v15  ;;  %8090 = vpow2.f32 %v1790_v62 }
 0x514   : > { %v10460_v11 = vpop.eup %8076  ;;  %v1645_v50 = vsub.f32 %v15580_v34, %v10362_v53  ;;  %8092 = vpow2.f32 %v1716_v20  ;;  %v1922_v12 = vpack.c.bf16 %v10455_v3, %v10429_v28  ;;  %1933 = vmatpush.bf16.msrb.mxu2 %v1906_v52  ;;  %v1649_v59 = vsub.f32 %v15582_v9, %v10362_v53 }
 0x515   : > { %v1833_v8 = vadd.f32 %v10397_v14, %v1832_v16  ;;  %v10464_v31 = vpop.eup %8078  ;;  %v1856_v47 = vadd.f32 %v10460_v11, %v1855_v61  ;;  %8094 = vpow2.f32 %v1782_v7  ;;  %v10482_v1 = vpop.permute.xlu2 %2710  ;;  %v1651_v7 = vsub.f32 %v10142_v36, %v10362_v53 }
 0x516   : > { %v10470_v16 = vpop.eup %8080  ;;  %15581 = vst [vmem:[#allocation17_spill] sm:$0xff] %v10482_v1  ;;  %8096 = vpow2.f32 %v1720_v41  ;;  %v1904_v34 = vpack.c.bf16 %v10373_v23, %v10368_v26  ;;  %v1732_v41 = vmul.f32 1.442695, %v1647_v45  ;;  %v1655_v36 = vsub.f32 %v10152_v19, %v10362_v53 }
 0x517   : > { %v1834_v57 = vadd.f32 %v10402_v13, %v1833_v8  ;;  %v1724_v8 = vmul.f32 1.442695, %v1643_v17  ;;  %v10476_v18 = vpop.eup %8082  ;;  %v1857_v54 = vadd.f32 %v10470_v16, %v1856_v47  ;;  %v1728_v17 = vmul.f32 1.442695, %v1645_v50  ;;  %1946 = vmatpush.bf16.msrb.mxu3 %v1922_v12  ;;  %v15583_v47 = vld [vmem:[#allocation47_spill] sm:$0xff] }
 0x518   : > { %v10480_v15 = vpop.eup %8084  ;;  %v1653_v52 = vsub.f32 %v15583_v47, %v10362_v53  ;;  %v1920_v50 = vpack.c.bf16 %v10476_v18, %v10464_v31  ;;  %1934 = vmatpush.bf16.msrb.mxu2 %v1904_v34  ;;  %v1659_v45 = vsub.f32 %v10162_v6, %v10362_v53  ;;  %v1736_v47 = vmul.f32 1.442695, %v1649_v59 }
 0x519   : > { %v1835_v56 = vadd.f32 %v10406_v38, %v1834_v57  ;;  %v8087_v20 = vpop.eup %8086  ;;  %v1858_v61 = vadd.f32 %v10480_v15, %v1857_v54  ;;  %8098 = vpow2.f32 %v1724_v8  ;;  %v1657_v54 = vsub.f32 %v10158_v55, %v10362_v53  ;;  %v15584_v8 = vld [vmem:[#allocation30_spill] sm:$0xff] }
 0x51a   : > { %v1661_v9 = vsub.f32 %v15584_v8, %v10362_v53  ;;  %8100 = vpow2.f32 %v1728_v17  ;;  %v1663_v55 = vsub.f32 %v10170_v33, %v10362_v53  ;;  %v1902_v34 = vpack.c.bf16 %v10364_v5, %v10359_v24  ;;  %v15585_v24 = vld [vmem:[#allocation20_spill] sm:$0xff] }
 0x51b   : > { %v1836_v62 = vadd.f32 %v10411_v29, %v1835_v56  ;;  %v10492_v56 = vpop.eup %8088  ;;  %1947 = vmatpush.bf16.msrb.mxu3 %v1920_v50  ;;  %8102 = vpow2.f32 %v1732_v41  ;;  %v1740_v17 = vmul.f32 1.442695, %v1651_v7  ;;  %v1744_v8 = vmul.f32 1.442695, %v1653_v52 }
 0x51c   : > { %v8091_v12 = vpop.eup %8090  ;;  %v1859_v26 = vadd.f32 %v10492_v56, %v1858_v61  ;;  %1935 = vmatpush.bf16.msrb.mxu2 %v1902_v34  ;;  %v1687_v35 = vsub.f32 %v10269_v21, %v10362_v53  ;;  %8104 = vpow2.f32 %v1736_v47  ;;  %v1748_v41 = vmul.f32 1.442695, %v1655_v36 }
 0x51d   : > { %v1837_v57 = vadd.f32 %v10415_v40, %v1836_v62  ;;  %v10504_v23 = vpop.eup %8092  ;;  %v1918_v59 = vpack.c.bf16 %v8091_v12, %v8087_v20  ;;  %v1900_v52 = vpack.c.bf16 %v10353_v43, %v10346_v51  ;;  %v10534_v34 = vpop.permute.xlu2 %2716  ;;  %v1683_v5 = vsub.f32 %v10228_v10, %v10362_v53 }
 0x51e   : > { %v1860_v61 = vadd.f32 %v10504_v23, %v1859_v26  ;;  %15586 = vst [vmem:[#allocation23_spill] sm:$0xff] %v10534_v34  ;;  %v1689_v21 = vsub.f32 %v10281_v37, %v10362_v53  ;;  %8106 = vpow2.f32 %v1740_v17  ;;  %v1685_v43 = vsub.f32 %v10249_v25, %v10362_v53 }
 0x51f   : > { %v1838_v62 = vadd.f32 %v10420_v30, %v1837_v57  ;;  %v8095_v57 = vpop.eup %8094  ;;  %1948 = vmatpush.bf16.msrb.mxu3 %v1918_v59  ;;  %8108 = vpow2.f32 %v1744_v8  ;;  %v1760_v59 = vmul.f32 1.442695, %v1661_v9  ;;  %v1812_v10 = vmul.f32 1.442695, %v1687_v35 }
 0x520   : > { %v10516_v1 = vpop.eup %8096  ;;  %v1916_v36 = vpack.c.bf16 %v8095_v57, %v10424_v58  ;;  %1936 = vmatpush.bf16.msrb.mxu2 %v1900_v52  ;;  %8110 = vpow2.f32 %v1748_v41  ;;  %v1679_v25 = vsub.f32 %v15566_v60, %v10362_v53  ;;  %v1914_v35 = vpack.c.bf16 %v10420_v30, %v10415_v40 }
 0x521   : > { %v1839_v19 = vadd.f32 %v10424_v58, %v1838_v62  ;;  %v1667_v62 = vsub.f32 %v10178_v32, %v10362_v53  ;;  %v1861_v33 = vadd.f32 %v10516_v1, %v1860_v61  ;;  %v10523_v26 = vpop.eup %8098  ;;  %v1804_v9 = vmul.f32 1.442695, %v1683_v5  ;;  %v15587_v5 = vld [vmem:[#allocation45_spill] sm:$0xff] }
 0x522   : > { %v10532_v61 = vpop.eup %8100  ;;  %v1808_v8 = vmul.f32 1.442695, %v1685_v43  ;;  %v1675_v41 = vsub.f32 %v15587_v5, %v10362_v53  ;;  %v1796_v52 = vmul.f32 1.442695, %v1679_v25  ;;  %v15591_v43 = vsub.f32 %v15585_v24, %v10362_v53  ;;  %v15593_v24 = vld [vmem:[#allocation43_spill] sm:$0xff] }
 0x523   : > { %v1840_v50 = vadd.f32 %v8095_v57, %v1839_v19  ;;  %v1752_v19 = vmul.f32 1.442695, %v1657_v54  ;;  %v1862_v6 = vadd.f32 %v10523_v26, %v1861_v33  ;;  %v1756_v54 = vmul.f32 1.442695, %v1659_v45  ;;  %v10542_v51 = vpop.eup %8102  ;;  %1949 = vmatpush.bf16.msrb.mxu3 %v1916_v36 }
 0x524   : > { %v10550_v45 = vpop.eup %8104  ;;  %v1671_v57 = vsub.f32 %v10186_v49, %v10362_v53  ;;  %v1776_v32 = vmul.f32 1.442695, %v15591_v43  ;;  %v1673_v25 = vsub.f32 %v15593_v24, %v10362_v53  ;;  %v10640_v43 = vpop.permute.xlu0 %2706 }
 0x525   : > { %v1841_v7 = vadd.f32 %v8087_v20, %v1840_v50  ;;  %v1863_v47 = vadd.f32 %v10532_v61, %v1862_v6  ;;  %8112 = vpow2.f32 %v1752_v19  ;;  %v1816_v6 = vmul.f32 1.442695, %v1689_v21  ;;  %15597 = vst [vmem:[#allocation39_spill] sm:$0xff] %v10640_v43 }
 0x526   : > { %8114 = vpow2.f32 %v1756_v54  ;;  %v1764_v50 = vmul.f32 1.442695, %v1663_v55  ;;  %v1894_v54 = vpack.c.bf16 %v10310_v46, %v10306_v2  ;;  %v15592_v46 = vld [vmem:[#allocation32_spill] sm:$0xff] }
 0x527   : > { %v1842_v20 = vadd.f32 %v8091_v12, %v1841_v7  ;;  %v1864_v58 = vadd.f32 %v10542_v51, %v1863_v47  ;;  %v1898_v12 = vpack.c.bf16 %v10339_v22, %v10332_v4  ;;  %v10560_v4 = vpop.eup %8106  ;;  %v1681_v22 = vsub.f32 %v10212_v44, %v10362_v53  ;;  %1950 = vmatpush.bf16.msrb.mxu3 %v1914_v35 }
 0x528   : > { %8116 = vpow2.f32 %v1760_v59  ;;  %v10564_v60 = vpop.eup %8108  ;;  %v15588_v44 = vsub.f32 %v10174_v63, %v10362_v53  ;;  %v1912_v7 = vpack.c.bf16 %v10411_v29, %v10406_v38  ;;  %v1772_v63 = vmul.f32 1.442695, %v1667_v62 }
 0x529   : > { %v1843_v37 = vadd.f32 %v10464_v31, %v1842_v20  ;;  %v1865_v17 = vadd.f32 %v10550_v45, %v1864_v58  ;;  %1937 = vmatpush.bf16.msrb.mxu2 %v1898_v12  ;;  %8118 = vpow2.f32 %v1812_v10  ;;  %v8111_v33 = vpop.eup %8110  ;;  %v1800_v20 = vmul.f32 1.442695, %v1681_v22 }
 0x52a   : > { %v1768_v55 = vmul.f32 1.442695, %v15588_v44  ;;  %8120 = vpow2.f32 %v1816_v6  ;;  %v1910_v62 = vpack.c.bf16 %v10402_v13, %v10397_v14  ;;  %v1928_v12 = vrot.slane %v15592_v46, 2 }
 0x52b   : > { %v1844_v31 = vadd.f32 %v10476_v18, %v1843_v37  ;;  %v1866_v30 = vadd.f32 %v10560_v4, %v1865_v17  ;;  %v1896_v18 = vpack.c.bf16 %v10325_v0, %v10318_v48  ;;  %v8113_v19 = vpop.eup %8112  ;;  %8122 = vpow2.f32 %v1804_v9  ;;  %v10579_v48 = vpop.permute.xlu2 %2722  ;;  %v15590_v0 = vld [vmem:[#allocation12_spill] sm:$0xff]  ;;  %1951 = vmatpush.bf16.msrb.mxu3 %v1912_v7 }
 0x52c   : > { %15589 = vst [vmem:[#allocation25_spill] sm:$0xff] %v10579_v48  ;;  %v1677_v36 = vsub.f32 %v15590_v0, %v10362_v53  ;;  %8124 = vpow2.f32 %v1808_v8  ;;  %v10586_v38 = vpop.eup %8114  ;;  %v1909_v59 = vpack.c.bf16 %v8113_v19, %v8111_v33  ;;  %v1788_v37 = vmul.f32 1.442695, %v1675_v41 }
 0x52d   : > { %v1845_v40 = vadd.f32 %v10429_v28, %v1844_v31  ;;  %v1867_v21 = vadd.f32 %v10564_v60, %v1866_v30  ;;  %1938 = vmatpush.bf16.msrb.mxu2 %v1896_v18  ;;  %8126 = vpow2.f32 %v1764_v50  ;;  %v15594_v31 = vld [vmem:[#allocation33_spill] sm:$0xff]  ;;  %v1780_v17 = vmul.f32 1.442695, %v1671_v57 }
 0x52e   : > { %v10591_v47 = vpop.eup %8116  ;;  %8128 = vpow2.f32 %v1768_v55  ;;  %v1792_v6 = vmul.f32 1.442695, %v1677_v36  ;;  %v1929_v9 = vrot.slane %v15594_v31, 2  ;;  %v1907_v22 = vpack.c.bf16 %v10564_v60, %v10560_v4 }
 0x52f   : > { %v1846_v28 = vadd.f32 %v10455_v3, %v1845_v40  ;;  %v1868_v3 = vadd.f32 %v8111_v33, %v1867_v21  ;;  %v10598_v10 = vpop.eup %8118  ;;  %8130 = vpow2.f32 %v1796_v52  ;;  %1952 = vmatpush.bf16.msrb.mxu3 %v1910_v62  ;;  %v1784_v30 = vmul.f32 1.442695, %v1673_v25 }
 0x530   : > { %v10603_v2 = vpop.eup %8120  ;;  %8132 = vpow2.f32 %v1800_v20  ;;  %v1905_v4 = vpack.c.bf16 %v10550_v45, %v10542_v51  ;;  %v1901_v45 = vpack.c.bf16 %v10516_v1, %v10504_v23  ;;  %v1897_v23 = vpack.c.bf16 %v10470_v16, %v10460_v11 }
 0x531   : > { %v1847_v29 = vadd.f32 %v10435_v42, %v1846_v28  ;;  %v1869_v58 = vadd.f32 %v8113_v19, %v1868_v3  ;;  %1939 = vmatpush.bf16.msrb.mxu2 %v1894_v54  ;;  %v10608_v14 = vpop.eup %8122  ;;  %8134 = vpow2.f32 %v1772_v63  ;;  %v1903_v28 = vpack.c.bf16 %v10532_v61, %v10523_v26 }
 0x532   : > { %v10613_v35 = vpop.eup %8124  ;;  %8136 = vpow2.f32 %v1776_v32  ;;  %1953 = vmatmul.bf16.vlgmr.msrb.gmra.mxu3 %v1929_v9  ;;  %v1899_v26 = vpack.c.bf16 %v10492_v56, %v10480_v15  ;;  %v15598_v32 = vld [vmem:[#allocation6_spill] sm:$0xff] }
 0x533   : > { %v10601_v42 = vadd.f32 %v10440_v39, %v1847_v29  ;;  %v1870_v13 = vadd.f32 %v10586_v38, %v1869_v58  ;;  %v1925_v39 = vpack.c.bf16 %v10603_v2, %v10598_v10  ;;  %v8127_v50 = vpop.eup %8126  ;;  %8138 = vpow2.f32 %v1788_v37  ;;  %v10628_v33 = vpop.permute.xlu2 %2728  ;;  %v15599_v37 = vld [vmem:[#allocation7_spill] sm:$0xff] }
 0x534   : > { %1940 = vmatmul.bf16.vlgmr.msrb.gmra.mxu2 %v1928_v12  ;;  %v8129_v40 = vpop.eup %8128  ;;  %8140 = vpow2.f32 %v1792_v6  ;;  %v1923_v57 = vpack.c.bf16 %v10613_v35, %v10608_v14  ;;  %15595 = vst [vmem:[#allocation27_spill] sm:$0xff] %v10628_v33  ;;  %v334_v29 = vpop.permute.xlu1 %333 }
 0x535   : > { %1958 = vmatpush.bf16.msra.mxu2 %v1909_v59  ;;  %v1871_v8 = vadd.f32 %v10591_v47, %v1870_v13  ;;  %1971 = vmatpush.bf16.msra.mxu3 %v1925_v39  ;;  %v8131_v49 = vpop.eup %8130  ;;  %8142 = vpow2.f32 %v1780_v17  ;;  %v447_v62 = vadd.f32 %v15598_v32, %v334_v29  ;;  %v486_v58 = vadd.f32 %v15599_v37, %v334_v29  ;;  %v15602_v13 = vld [vmem:[#allocation14_spill] sm:$0xff] }
 0x536   : > { %v8133_v18 = vpop.eup %8132  ;;  %8144 = vpow2.f32 %v1784_v30  ;;  %v1913_v56 = vpack.c.bf16 %v8129_v40, %v8127_v50  ;;  %v1895_v39 = vpack.c.bf16 %v15602_v13, %v10444_v27  ;;  %v15628_v13 = vld [vmem:[#allocation19_spill] sm:$0xff] }
 0x537   : > { %v1872_v53 = vadd.f32 %v8127_v50, %v1871_v8  ;;  %v8135_v60 = vpop.eup %8134  ;;  %v1921_v7 = vpack.c.bf16 %v8133_v18, %v8131_v49  ;;  %v10646_v25 = vpack.c.bf16 %v447_v62, %v447_v62  ;;  %v10653_v17 = vpack.c.bf16 %v486_v58, %v486_v58  ;;  %v10661_v50 = vpop.permute.xlu0 %2712 }
 0x538   : > { %v8137_v41 = vpop.eup %8136  ;;  %15604 = vst [vmem:[#allocation44_spill] sm:$0xff] %v10661_v50 }
 0x539   : > { %1959 = vmatpush.bf16.msra.mxu2 %v1907_v22  ;;  %v1873_v5 = vadd.f32 %v8129_v40, %v1872_v53  ;;  %1972 = vmatpush.bf16.msra.mxu3 %v1923_v57  ;;  %v8139_v44 = vpop.eup %8138  ;;  %v1915_v1 = vpack.c.bf16 %v8137_v41, %v8135_v60  ;;  %15600 = vst [vmem:[#allocation42_spill] sm:$0xff] %v10646_v25  ;;  %v2081_v11 = vsel %vm644_vm1, %v10646_v25, 0  ;;  %v2084_v27 = vsel %vm644_vm1, %v10653_v17, 0 }
 0x53a   : > { %v8141_v19 = vpop.eup %8140  ;;  %15603 = vst [vmem:[#allocation46_spill] sm:$0xff] %v10653_v17 }
 0x53b   : > { %v1874_v55 = vadd.f32 %v8135_v60, %v1873_v5  ;;  %v8143_v21 = vpop.eup %8142  ;;  %v1919_v36 = vpack.c.bf16 %v8141_v19, %v8139_v44  ;;  %v10636_v20 = vpop.permute.xlu2 %338 }
 0x53c   : > { %v8145_v51 = vpop.eup %8144  ;;  %15596 = vst [vmem:[#allocation24_spill] sm:$0xff] %v10636_v20 }
 0x53d   : > { %1960 = vmatpush.bf16.msra.mxu2 %v1905_v4  ;;  %v1875_v52 = vadd.f32 %v8137_v41, %v1874_v55  ;;  %1973 = vmatpush.bf16.msra.mxu3 %v1921_v7  ;;  %v1917_v54 = vpack.c.bf16 %v8145_v51, %v8143_v21 }
 0x53f   : > { %v1876_v0 = vadd.f32 %v8143_v21, %v1875_v52 }
 0x541   : > { %1961 = vmatpush.bf16.msra.mxu2 %v1903_v28  ;;  %v1877_v63 = vadd.f32 %v8145_v51, %v1876_v0  ;;  %1974 = vmatpush.bf16.msra.mxu3 %v1919_v36 }
 0x543   : > { %v1878_v3 = vadd.f32 %v8139_v44, %v1877_v63  ;;  %v10649_v6 = vpop.permute.xlu2 %3422  ;;  %v1849_v44 = vrot.slane %v10601_v42, 4 }
 0x544   : > { %15601 = vst [vmem:[#allocation21_spill] sm:$0xff] %v10649_v6 }
 0x545   : > { %1962 = vmatpush.bf16.msra.mxu2 %v1901_v45  ;;  %v1879_v61 = vadd.f32 %v8141_v19, %v1878_v3  ;;  %1975 = vmatpush.bf16.msra.mxu3 %v1917_v54  ;;  %v1850_v19 = vadd.f32 %v1849_v44, %v10601_v42 }
 0x547   : > { %v1880_v59 = vadd.f32 %v8131_v49, %v1879_v61  ;;  %v1851_v28 = vrot.slane %v1850_v19, 2 }
 0x549   : > { %1963 = vmatpush.bf16.msra.mxu2 %v1899_v26  ;;  %v1881_v24 = vadd.f32 %v8133_v18, %v1880_v59  ;;  %1976 = vmatpush.bf16.msra.mxu3 %v1915_v1  ;;  %v1852_v21 = vadd.f32 %v1851_v28, %v1850_v19  ;;  %v15627_v1 = vld [vmem:[#allocation36_spill] sm:$0xff] }
 0x54b   : > { %v1882_v15 = vadd.f32 %v10608_v14, %v1881_v24  ;;  %v1911_v14 = vpack.c.bf16 %v10591_v47, %v10586_v38  ;;  %v2001_v47 = vpop.permute.xlu1 %2000  ;;  %v1853_v36 = vrot.slane %v1852_v21, 1 }
 0x54d   : > { %1964 = vmatpush.bf16.msra.mxu2 %v1897_v23  ;;  %v1883_v22 = vadd.f32 %v10613_v35, %v1882_v15  ;;  %1977 = vmatpush.bf16.msra.mxu3 %v1913_v56  ;;  %v10672_v35 = vpop.permute.xlu0 %2718  ;;  %v1854_v63 = vadd.f32 %v1853_v36, %v1852_v21 }
 0x54e   : > { %15606 = vst [vmem:[#allocation38_spill] sm:$0xff] %v10672_v35 }
 0x54f   : > { %v1884_v16 = vadd.f32 %v10598_v10, %v1883_v22  ;;  %v10670_v10 = vpop.permute.xlu2 %3428  ;;  %8146 = vrcp.f32 %v1854_v63 }
 0x550   : > { %15605 = vst [vmem:[#allocation5_spill] sm:$0xff] %v10670_v10 }
 0x551   : > { %1965 = vmatpush.bf16.msra.mxu2 %v1895_v39  ;;  %v1885_v8 = vadd.f32 %v10603_v2, %v1884_v16  ;;  %1978 = vmatpush.bf16.msra.mxu3 %v1911_v14 }
 0x553   : > { %v1886_v32 = vrot.slane %v1885_v8, 4 }
 0x554   : > { %1966 = vmatmul.bf16.vlgmr.msra.gmra.mxu2 %v1928_v12  ;;  %1979 = vmatmul.bf16.vlgmr.msra.gmra.mxu3 %v1929_v9  ;;  %v2003_v12 = vpop.permute.xlu1 %2002 }
 0x555   : > { %2093 = vmatpush.bf16.msrb.mxu2 %v2081_v11  ;;  %2182 = vmatpush.bf16.msrb.mxu3 %v2084_v27  ;;  %v10677_v2 = vpop.permute.xlu0 %2724  ;;  %v8147_v61 = vpop.eup %8146  ;;  %v1887_v37 = vadd.f32 %v1886_v32, %v1885_v8  ;;  %v15635_v32 = vld [vmem:[#allocation37_spill] sm:$0xff] }
 0x556   : > { %15608 = vst [vmem:[#allocation18_spill] sm:$0xff] %v10677_v2 }
 0x557   : > { %v10674_v38 = vpop.permute.xlu2 %3434  ;;  %v1888_v22 = vrot.slane %v1887_v37, 2 }
 0x558   : > { %15607 = vst [vmem:[#allocation40_spill] sm:$0xff] %v10674_v38 }
 0x559   : > { %v1889_v16 = vadd.f32 %v1888_v22, %v1887_v37 }
 0x55c   : > { %v2005_v49 = vpop.permute.xlu1 %2004 }
 0x55d   : > { %v10682_v46 = vpop.permute.xlu0 %2730 }
 0x55e   : > { %15610 = vst [vmem:[#allocation13_spill] sm:$0xff] %v10682_v46 }
 0x55f   : > { %v10680_v40 = vpop.permute.xlu2 %3440 }
 0x560   : > { %15609 = vst [vmem:[#allocation22_spill] sm:$0xff] %v10680_v40 }
 0x564   : > { %7382 = vmatmul.msk.bf16.vlgmr.msrb.gmra.mxu2 %vm595_vm2, %v2001_v47  ;;  %7398 = vmatmul.msk.bf16.vlgmr.msrb.gmra.mxu3 %vm595_vm2, %v2001_v47  ;;  %v2007_v4 = vpop.permute.xlu1 %2006  ;;  %v1890_v47 = vrot.slane %v1889_v16, 1 }
 0x565   : > { %v10688_v9 = vpop.permute.xlu0 %3418 }
 0x566   : > { %15612 = vst [vmem:[#allocation47_spill] sm:$0xff] %v10688_v9 }
 0x567   : > { %v10685_v31 = vpop.permute.xlu2 %3446 }
 0x568   : > { %15611 = vst [vmem:[#allocation16_spill] sm:$0xff] %v10685_v31 }
 0x56c   : > { %v2009_v7 = vpop.permute.xlu1 %2008 }
 0x56d   : > { %v10693_v53 = vpop.permute.xlu0 %3424 }
 0x56e   : > { %15614 = vst [vmem:[#allocation20_spill] sm:$0xff] %v10693_v53 }
 0x56f   : > { %v10690_v30 = vpop.permute.xlu2 %4120 }
 0x570   : > { %15613 = vst [vmem:[#allocation30_spill] sm:$0xff] %v10690_v30 }
 0x574   : > { %7383 = vmatmul.msk.bf16.gmra.mxu2 %vm595_vm2, %v2003_v12  ;;  %7399 = vmatmul.msk.bf16.gmra.mxu3 %vm595_vm2, %v2003_v12  ;;  %v2011_v45 = vpop.permute.xlu1 %2010  ;;  %v1891_v12 = vadd.f32 %v1890_v47, %v1889_v16 }
 0x575   : > { %v10698_v18 = vpop.permute.xlu0 %3430 }
 0x576   : > { %15616 = vst [vmem:[#allocation12_spill] sm:$0xff] %v10698_v18  ;;  %8148 = vrcp.f32 %v1891_v12 }
 0x577   : > { %v10696_v57 = vpop.permute.xlu2 %4126 }
 0x578   : > { %15615 = vst [vmem:[#allocation45_spill] sm:$0xff] %v10696_v57 }
 0x57c   : > { %v2013_v24 = vpop.permute.xlu1 %2012  ;;  %v8149_v21 = vpop.eup %8148 }
 0x57d   : > { %v10704_v5 = vpop.permute.xlu0 %3436 }
 0x57e   : > { %15618 = vst [vmem:[#allocation43_spill] sm:$0xff] %v10704_v5 }
 0x57f   : > { %v10701_v60 = vpop.permute.xlu2 %4132 }
 0x580   : > { %15617 = vst [vmem:[#allocation32_spill] sm:$0xff] %v10701_v60 }
 0x584   : > { %7384 = vmatmul.msk.bf16.gmra.mxu2 %vm595_vm2, %v2005_v49  ;;  %7400 = vmatmul.msk.bf16.gmra.mxu3 %vm595_vm2, %v2005_v49  ;;  %v2015_v49 = vpop.permute.xlu1 %2014 }
 0x585   : > { %v10709_v55 = vpop.permute.xlu0 %3442 }
 0x586   : > { %15620 = vst [vmem:[#allocation6_spill] sm:$0xff] %v10709_v55 }
 0x587   : > { %v10706_v41 = vpop.permute.xlu2 %4138 }
 0x588   : > { %15619 = vst [vmem:[#allocation33_spill] sm:$0xff] %v10706_v41 }
 0x58d   : > { %v10716_v0 = vpop.permute.xlu0 %3448 }
 0x58e   : > { %15622 = vst [vmem:[#allocation14_spill] sm:$0xff] %v10716_v0 }
 0x58f   : > { %v10714_v52 = vpop.permute.xlu2 %4144 }
 0x590   : > { %15621 = vst [vmem:[#allocation7_spill] sm:$0xff] %v10714_v52 }
 0x594   : > { %7385 = vmatmul.msk.bf16.gmra.mxu2 %vm595_vm2, %v2007_v4  ;;  %7401 = vmatmul.msk.bf16.gmra.mxu3 %vm595_vm2, %v2007_v4 }
 0x595   : > { %v10721_v29 = vpop.permute.xlu0 %4122 }
 0x596   : > { %15624 = vst [vmem:[#allocation49_spill] sm:$0xff] %v10721_v29 }
 0x597   : > { %v10718_v51 = vpop.permute.xlu2 %4150 }
 0x598   : > { %15623 = vst [vmem:[#allocation48_spill] sm:$0xff] %v10718_v51 }
 0x59d   : > { %v10726_v59 = vpop.permute.xlu0 %4128 }
 0x59e   : > { %15626 = vst [vmem:[#allocation51_spill] sm:$0xff] %v10726_v59 }
 0x59f   : > { %v10724_v54 = vpop.permute.xlu2 %4838 }
 0x5a0   : > { %15625 = vst [vmem:[#allocation50_spill] sm:$0xff] %v10724_v54 }
 0x5a4   : > { %7386 = vmatmul.msk.bf16.gmra.mxu2 %vm595_vm2, %v2009_v7  ;;  %7402 = vmatmul.msk.bf16.gmra.mxu3 %vm595_vm2, %v2009_v7 }
 0x5a5   : > { %v10734_v14 = vpop.permute.xlu0 %4134 }
 0x5a6   : > { %15630 = vst [vmem:[#allocation52_spill] sm:$0xff] %v10734_v14 }
 0x5a7   : > { %v10731_v11 = vpop.permute.xlu2 %4844 }
 0x5a8   : > { %15629 = vst [vmem:[#allocation19_spill] sm:$0xff] %v10731_v11 }
 0x5ad   : > { %v10740_v4 = vpop.permute.xlu0 %4140 }
 0x5ae   : > { %15632 = vst [vmem:[#allocation54_spill] sm:$0xff] %v10740_v4 }
 0x5af   : > { %v10737_v8 = vpop.permute.xlu2 %4850 }
 0x5b0   : > { %15631 = vst [vmem:[#allocation53_spill] sm:$0xff] %v10737_v8 }
 0x5b4   : > { %7387 = vmatmul.msk.bf16.gmra.mxu2 %vm595_vm2, %v2011_v45  ;;  %7403 = vmatmul.msk.bf16.gmra.mxu3 %vm595_vm2, %v2011_v45 }
 0x5b5   : > { %v1954_v3 = vpop.f32.mrf.mxu3  ;;  %v10745_v45 = vpop.permute.xlu0 %4146 }
 0x5b6   : > { %15634 = vst [vmem:[#allocation56_spill] sm:$0xff] %v10745_v45 }
 0x5b7   : > { %v1941_v42 = vpop.f32.mrf.mxu2  ;;  %v10743_v19 = vpop.permute.xlu2 %4856 }
 0x5b8   : > { %v1955_v26 = vadd.f32 %v1954_v3, %v1941_v42  ;;  %15633 = vst [vmem:[#allocation55_spill] sm:$0xff] %v10743_v19 }
 0x5ba   : > { %v1984_v62 = vmul.f32 %v8147_v61, %v1955_v26  ;;  %v2017_v61 = vpop.permute.xlu1 %2016 }
 0x5bc   : > { %v1986_v23 = vmul.f32 %v1984_v62, %v15627_v1 }
 0x5bd   : > { %v1956_v56 = vpop.f32.mrf.mxu3 }
 0x5be   : > { %v1990_v15 = vrot.slane %v1986_v23, 4 }
 0x5bf   : > { %v1943_v58 = vpop.f32.mrf.mxu2  ;;  %v10750_v23 = vpop.permute.xlu2 %4862 }
 0x5c0   : > { %v1994_v39 = vadd.f32 %v1990_v15, %v15628_v13  ;;  %15636 = vst [vmem:[#allocation37_spill] sm:$0xff] %v10750_v23  ;;  %v10755_v58 = vpop.permute.xlu0 %343 }
 0x5c1   : > { %15637 = vst [vmem:[#allocation57_spill] sm:$0xff] %v10755_v58 }
 0x5c2   : > { %1996 = vst [vmem:[#allocation2 + $0x30] sm:$0xf0] %v1994_v39  ;;  %v2019_v16 = vpop.permute.xlu1 %2018 }
 0x5c4   : > { %7388 = vmatmul.msk.bf16.gmra.mxu2 %vm595_vm2, %v2013_v24  ;;  %7404 = vmatmul.msk.bf16.gmra.mxu3 %vm595_vm2, %v2013_v24 }
 0x5c7   : > { %v10760_v56 = vpop.permute.xlu2 %383 }
 0x5c8   : > { %15638 = vst [vmem:[#allocation58_spill] sm:$0xff] %v10760_v56  ;;  %v10766_v22 = vpop.permute.xlu0 %4840 }
 0x5c9   : > { %v6265_v27 = vld [vmem:[#allocation2 + $0x30] sm:$0xff]  ;;  %15640 = vst [vmem:[#allocation60_spill] sm:$0xff] %v10766_v22 }
 0x5ca   : > { %6281 = vrot.lane.b32.xlu2 %v6265_v27, %s8978_s17 }
 0x5cf   : > { %v10772_v47 = vpop.permute.xlu2 %5542 }
 0x5d0   : > { %15642 = vst [vmem:[#allocation62_spill] sm:$0xff] %v10772_v47 }
 0x5d4   : > { %7389 = vmatmul.msk.bf16.gmra.mxu2 %vm595_vm2, %v2015_v49  ;;  %7405 = vmatmul.msk.bf16.gmra.mxu3 %vm595_vm2, %v2015_v49  ;;  %v10776_v49 = vpop.permute.xlu0 %4846 }
 0x5d5   : > { %15644 = vst [vmem:[#allocation64_spill] sm:$0xff] %v10776_v49 }
 0x5d7   : > { %v1967_v44 = vpop.f32.mrf.mxu2  ;;  %v1980_v7 = vpop.f32.mrf.mxu3 }
 0x5d8   : > { %v1981_v28 = vadd.f32 %v1980_v7, %v1967_v44 }
 0x5da   : > { %v1985_v36 = vmul.f32 %v8149_v21, %v1981_v28  ;;  %v2021_v28 = vpop.permute.xlu1 %2020  ;;  %v10782_v21 = vpop.permute.xlu2 %5548 }
 0x5db   : > { %15647 = vst [vmem:[#allocation67_spill] sm:$0xff] %v10782_v21 }
 0x5dc   : > { %v1987_v63 = vmul.f32 %v1985_v36, %v15627_v1  ;;  %v10785_v36 = vpop.permute.xlu0 %4852 }
 0x5dd   : > { %15648 = vst [vmem:[#allocation68_spill] sm:$0xff] %v10785_v36 }
 0x5de   : > { %v1991_v3 = vrot.slane %v1987_v63, 4 }
 0x5df   : > { %v1969_v42 = vpop.f32.mrf.mxu2  ;;  %v1982_v26 = vpop.f32.mrf.mxu3 }
 0x5e0   : > { %v1995_v62 = vadd.f32 %v1991_v3, %v15635_v32  ;;  %v8979_v3 = vmov 0.0  }
 0x5e1   : > { %6252 = vst [vmem:[#allocation3] sm:$0xff] %v8979_v3 }
 0x5e2   : > { %1997 = vst [vmem:[#allocation2] sm:$0xf0] %v1995_v62  ;;  %v10792_v26 = vpop.permute.xlu2 %5554 }
 0x5e3   : > { %15650 = vst [vmem:[#allocation70_spill] sm:$0xff] %v10792_v26 }
 0x5e4   : > { %7390 = vmatmul.msk.bf16.gmra.mxu2 %vm595_vm2, %v2017_v61  ;;  %7406 = vmatmul.msk.bf16.gmra.mxu3 %vm595_vm2, %v2017_v61  ;;  %6256 = vst [vmem:[#allocation3 + $0x18] sm:$0xff] %v8979_v3  ;;  %v10796_v32 = vpop.permute.xlu0 %4858 }
 0x5e5   : > { %6259 = vst [vmem:[#allocation3 + $0x30] sm:$0xff] %v8979_v3 }
 0x5e6   : > { %6262 = vst [vmem:[#allocation3 + $0x48] sm:$0xff] %v8979_v3 }
 0x5e7   : > { %v10753_v37 = vpop.f32.mrf.mxu2  ;;  %v10757_v24 = vpop.f32.mrf.mxu3  ;;  %15652 = vst [vmem:[#allocation72_spill] sm:$0xff] %v10796_v32 }
 0x5e8   : > { %6255 = vst.msk [vmem:[#allocation3 + $0x10] sm:$0xff] %vm6254_vm4, %v8979_v3 }
 0x5e9   : > { %v6266_v15 = vld [vmem:[#allocation2] sm:$0xff]  ;;  %6258 = vst.msk [vmem:[#allocation3 + $0x28] sm:$0xff] %vm6254_vm4, %v8979_v3 }
 0x5ea   : > { %6283 = vrot.lane.b32.xlu0 %v6266_v15, %s8978_s17  ;;  %v2023_v15 = vpop.permute.xlu1 %2022  ;;  %6261 = vst.msk [vmem:[#allocation3 + $0x40] sm:$0xff] %vm6254_vm4, %v8979_v3 }
 0x5eb   : > { %6264 = vst.msk [vmem:[#allocation3 + $0x58] sm:$0xff] %vm6254_vm4, %v8979_v3 }
 0x5ec   : > { %v10808_v26 = vpop.permute.xlu0 %4864 }
 0x5ed   : > { %15655 = vst [vmem:[#allocation75_spill] sm:$0xff] %v10808_v26 }
 0x5ef   : > { %v10762_v13 = vpop.f32.mrf.mxu2  ;;  %v10764_v39 = vpop.f32.mrf.mxu3 }
 0x5f0   : > { %15639 = vst [vmem:[#allocation59_spill] sm:$0xff] %v10764_v39 }
 0x5f2   : > { %v2025_v32 = vpop.permute.xlu1 %2024 }
 0x5f4   : > { %7391 = vmatmul.msk.bf16.gmra.mxu2 %vm595_vm2, %v2019_v16  ;;  %7407 = vmatmul.msk.bf16.gmra.mxu3 %vm595_vm2, %v2019_v16  ;;  %v10801_v16 = vpop.permute.xlu2 %5560  ;;  %v10817_v19 = vpop.permute.xlu0 %5538 }
 0x5f5   : > { %15653 = vst [vmem:[#allocation73_spill] sm:$0xff] %v10801_v16 }
 0x5f6   : > { %15658 = vst [vmem:[#allocation78_spill] sm:$0xff] %v10817_v19 }
 0x5f7   : > { %v10770_v27 = vpop.f32.mrf.mxu2  ;;  %v10774_v12 = vpop.f32.mrf.mxu3 }
 0x5f8   : > { %15641 = vst [vmem:[#allocation61_spill] sm:$0xff] %v10770_v27  ;;  %v2264_v2 = vmax.f32 %v10753_v37, %v10770_v27 }
 0x5f9   : > { %15643 = vst [vmem:[#allocation63_spill] sm:$0xff] %v10774_v12 }
 0x5fa   : > { %v2027_v49 = vpop.permute.xlu1 %2026 }
 0x5fc   : > { %v10812_v56 = vpop.permute.xlu2 %5566  ;;  %v10825_v26 = vpop.permute.xlu0 %5544 }
 0x5fd   : > { %15656 = vst [vmem:[#allocation76_spill] sm:$0xff] %v10812_v56 }
 0x5fe   : > { %15659 = vst [vmem:[#allocation79_spill] sm:$0xff] %v10825_v26 }
 0x5ff   : > { %v10778_v44 = vpop.f32.mrf.mxu2  ;;  %v10780_v7 = vpop.f32.mrf.mxu3 }
 0x600   : > { %15645 = vst [vmem:[#allocation65_spill] sm:$0xff] %v10778_v44  ;;  %v2265_v48 = vmax.f32 %v10762_v13, %v10778_v44 }
 0x601   : > { %15646 = vst [vmem:[#allocation66_spill] sm:$0xff] %v10780_v7 }
 0x602   : > { %v2029_v58 = vpop.permute.xlu1 %2028 }
 0x604   : > { %7392 = vmatmul.msk.bf16.gmra.mxu2 %vm595_vm2, %v2021_v28  ;;  %7408 = vmatmul.msk.bf16.gmra.mxu3 %vm595_vm2, %v2021_v28  ;;  %v10835_v19 = vpop.permute.xlu0 %5550 }
 0x605   : > { %15661 = vst [vmem:[#allocation81_spill] sm:$0xff] %v10835_v19 }
 0x607   : > { %v10788_v63 = vpop.f32.mrf.mxu2  ;;  %v10790_v42 = vpop.f32.mrf.mxu3 }
 0x608   : > { %15649 = vst [vmem:[#allocation69_spill] sm:$0xff] %v10788_v63  ;;  %v2266_v35 = vmax.f32 %v2264_v2, %v10788_v63 }
 0x60a   : > { %v2031_v3 = vpop.permute.xlu1 %2030 }
 0x60c   : > { %v10843_v54 = vpop.permute.xlu0 %5556 }
 0x60d   : > { %15663 = vst [vmem:[#allocation83_spill] sm:$0xff] %v10843_v54 }
 0x60f   : > { %v10794_v61 = vpop.f32.mrf.mxu2  ;;  %v10798_v62 = vpop.f32.mrf.mxu3 }
 0x610   : > { %15651 = vst [vmem:[#allocation71_spill] sm:$0xff] %v10794_v61  ;;  %v2267_v34 = vmax.f32 %v2265_v48, %v10794_v61 }
 0x614   : > { %7393 = vmatmul.msk.bf16.gmra.mxu2 %vm595_vm2, %v2023_v15  ;;  %7409 = vmatmul.msk.bf16.gmra.mxu3 %vm595_vm2, %v2023_v15  ;;  %v10851_v51 = vpop.permute.xlu0 %5562 }
 0x615   : > { %15664 = vst [vmem:[#allocation84_spill] sm:$0xff] %v10851_v51 }
 0x617   : > { %v10804_v28 = vpop.f32.mrf.mxu2  ;;  %v10806_v21 = vpop.f32.mrf.mxu3 }
 0x618   : > { %15654 = vst [vmem:[#allocation74_spill] sm:$0xff] %v10804_v28  ;;  %v2268_v43 = vmax.f32 %v2266_v35, %v10804_v28 }
 0x61c   : > { %v10858_v4 = vpop.permute.xlu0 %5568 }
 0x61d   : > { %15666 = vst [vmem:[#allocation86_spill] sm:$0xff] %v10858_v4 }
 0x61f   : > { %v10810_v47 = vpop.f32.mrf.mxu2  ;;  %v10814_v23 = vpop.f32.mrf.mxu3 }
 0x620   : > { %15657 = vst [vmem:[#allocation77_spill] sm:$0xff] %v10814_v23  ;;  %v2269_v17 = vmax.f32 %v2267_v34, %v10810_v47 }
 0x624   : > { %7394 = vmatmul.msk.bf16.gmra.mxu2 %vm595_vm2, %v2025_v32  ;;  %7410 = vmatmul.msk.bf16.gmra.mxu3 %vm595_vm2, %v2025_v32  ;;  %v6282_v16 = vpop.permute.xlu2 %6281 }
 0x625   : > { %6315 = vst.msk [vmem:[#allocation3] sm:$0xff] %vm6314_vm3, %v6282_v16 }
 0x627   : > { %v10820_v15 = vpop.f32.mrf.mxu2  ;;  %v10822_v36 = vpop.f32.mrf.mxu3 }
 0x628   : > { %v2270_v25 = vmax.f32 %v2268_v43, %v10820_v15 }
 0x62c   : > { %v6327_v60 = vld [vmem:[#allocation3] sm:$0xff] }
 0x62f   : > { %v10827_v56 = vpop.f32.mrf.mxu2  ;;  %v10829_v8 = vpop.f32.mrf.mxu3 }
 0x630   : > { %15660 = vst [vmem:[#allocation80_spill] sm:$0xff] %v10829_v8 }
 0x634   : > { %7395 = vmatmul.msk.bf16.gmra.mxu2 %vm595_vm2, %v2027_v49  ;;  %7411 = vmatmul.msk.bf16.gmra.mxu3 %vm595_vm2, %v2027_v49 }
 0x637   : > { %v10833_v32 = vpop.f32.mrf.mxu2  ;;  %v10837_v11 = vpop.f32.mrf.mxu3 }
 0x638   : > { %v2272_v27 = vmax.f32 %v2270_v25, %v10833_v32 }
 0x63f   : > { %v10839_v26 = vpop.f32.mrf.mxu2  ;;  %v10841_v22 = vpop.f32.mrf.mxu3 }
 0x640   : > { %15662 = vst [vmem:[#allocation82_spill] sm:$0xff] %v10841_v22 }
 0x644   : > { %7396 = vmatmul.msk.bf16.gmra.mxu2 %vm595_vm2, %v2029_v58  ;;  %7412 = vmatmul.msk.bf16.gmra.mxu3 %vm595_vm2, %v2029_v58 }
 0x647   : > { %v10847_v49 = vpop.f32.mrf.mxu2  ;;  %v10849_v19 = vpop.f32.mrf.mxu3 }
 0x648   : > { %v2274_v2 = vmax.f32 %v2272_v27, %v10847_v49 }
 0x64f   : > { %v10853_v45 = vpop.f32.mrf.mxu2  ;;  %v10855_v52 = vpop.f32.mrf.mxu3 }
 0x650   : > { %15665 = vst [vmem:[#allocation85_spill] sm:$0xff] %v10855_v52 }
 0x654   : > { %7397 = vmatmul.msk.bf16.gmra.mxu2 %vm595_vm2, %v2031_v3  ;;  %7413 = vmatmul.msk.bf16.gmra.mxu3 %vm595_vm2, %v2031_v3 }
 0x657   : > { %v10861_v54 = vpop.f32.mrf.mxu2  ;;  %v10863_v58 = vpop.f32.mrf.mxu3 }
 0x658   : > { %v2276_v63 = vmax.f32 %v2274_v2, %v10861_v54 }
 0x65c   : > { %v6284_v41 = vpop.permute.xlu0 %6283 }
 0x65d   : > { %v6298_v51 = vsel %vm6297_vm5, %v6282_v16, %v6284_v41  ;;  %6317 = vst.msk [vmem:[#allocation3 + $0x10] sm:$0xff] %vm6297_vm5, %v6284_v41 }
 0x65e   : > { %6316 = vst [vmem:[#allocation3 + $0x8] sm:$0xff] %v6298_v51  ;;  %v7646_v59 = vpack.i.bf16 %v6298_v51, %v6327_v60 }
 0x65f   : > { %v10865_v14 = vpop.f32.mrf.mxu2  ;;  %v10869_v57 = vpop.f32.mrf.mxu3 }
 0x660   : > { %7647 = vrot.lane.b32.xlu0 %v7646_v59, %s8980_s18 }
 0x667   : > { %v10872_v3 = vpop.f32.mrf.mxu2  ;;  %v10874_v4 = vpop.f32.mrf.mxu3 }
 0x668   : > { %7652 = vrot.lane.b32.xlu0 %v7646_v59, %s8973_s14  ;;  %v2278_v34 = vmax.f32 %v2276_v63, %v10872_v3 }
 0x66f   : > { %v10877_v29 = vpop.f32.mrf.mxu2  ;;  %v10879_v30 = vpop.f32.mrf.mxu3 }
 0x670   : > { %15667 = vst [vmem:[#allocation87_spill] sm:$0xff] %v10879_v30 }
 0x677   : > { %v10881_v16 = vpop.f32.mrf.mxu2  ;;  %v10883_v41 = vpop.f32.mrf.mxu3 }
 0x678   : > { %v2280_v25 = vmax.f32 %v2278_v34, %v10881_v16 }
 0x67f   : > { %v10885_v60 = vpop.f32.mrf.mxu2  ;;  %v10887_v51 = vpop.f32.mrf.mxu3 }
 0x680   : > { %15668 = vst [vmem:[#allocation88_spill] sm:$0xff] %v10885_v60 }
 0x687   : > { %v10889_v0 = vpop.f32.mrf.mxu2  ;;  %v10891_v31 = vpop.f32.mrf.mxu3 }
 0x688   : > { %v2282_v27 = vmax.f32 %v2280_v25, %v10889_v0 }
 0x68f   : > { %v10893_v55 = vpop.f32.mrf.mxu2  ;;  %v10895_v40 = vpop.f32.mrf.mxu3 }
 0x690   : > { %15669 = vst [vmem:[#allocation89_spill] sm:$0xff] %v10895_v40 }
 0x697   : > { %v10897_v59 = vpop.f32.mrf.mxu2  ;;  %v10899_v5 = vpop.f32.mrf.mxu3 }
 0x69f   : > { %v10901_v38 = vpop.f32.mrf.mxu2  ;;  %v10903_v18 = vpop.f32.mrf.mxu3 }
 0x6a0   : > { %15670 = vst [vmem:[#allocation90_spill] sm:$0xff] %v10903_v18 }
 0x6a7   : > { %v10905_v10 = vpop.f32.mrf.mxu2  ;;  %v10907_v53 = vpop.f32.mrf.mxu3 }
 0x6af   : > { %v10909_v6 = vpop.f32.mrf.mxu2  ;;  %v10911_v9 = vpop.f32.mrf.mxu3 }
 0x6b0   : > { %15671 = vst [vmem:[#allocation91_spill] sm:$0xff] %v10911_v9 }
 0x6b7   : > { %v10913_v20 = vpop.f32.mrf.mxu2  ;;  %v10915_v46 = vpop.f32.mrf.mxu3 }
 0x6b8   : > { %15672 = vst [vmem:[#allocation92_spill] sm:$0xff] %v10915_v46  ;;  %v2271_v46 = vmax.f32 %v2269_v17, %v10827_v56 }
 0x6ba   : > { %v2273_v44 = vmax.f32 %v2271_v46, %v10839_v26  ;;  %v2302_v46 = vmax.f32 %v10764_v39, %v10780_v7 }
 0x6bc   : > { %v2275_v48 = vmax.f32 %v2273_v44, %v10853_v45  ;;  %v2304_v63 = vmax.f32 %v2302_v46, %v10798_v62 }
 0x6be   : > { %v2277_v35 = vmax.f32 %v2275_v48, %v10865_v14  ;;  %v2301_v48 = vmax.f32 %v10757_v24, %v10774_v12 }
 0x6bf   : > { %v10917_v33 = vpop.f32.mrf.mxu2  ;;  %v10925_v1 = vpop.f32.mrf.mxu3 }
 0x6c0   : > { %15673 = vst [vmem:[#allocation93_spill] sm:$0xff] %v10925_v1  ;;  %v2279_v43 = vmax.f32 %v2277_v35, %v10877_v29  ;;  %v2284_v35 = vmax.f32 %v2282_v27, %v10897_v59 }
 0x6c2   : > { %v2281_v17 = vmax.f32 %v2279_v43, %v10885_v60  ;;  %v2303_v43 = vmax.f32 %v2301_v48, %v10790_v42  ;;  %v2306_v60 = vmax.f32 %v2304_v63, %v10814_v23  ;;  %v2286_v7 = vmax.f32 %v2284_v35, %v10905_v10 }
 0x6c4   : > { %v2283_v44 = vmax.f32 %v2281_v17, %v10893_v55  ;;  %v2305_v39 = vmax.f32 %v2303_v43, %v10806_v21  ;;  %v2308_v12 = vmax.f32 %v2306_v60, %v10829_v8  ;;  %v2288_v46 = vmax.f32 %v2286_v7, %v10913_v20 }
 0x6c6   : > { %v2285_v34 = vmax.f32 %v2283_v44, %v10901_v38  ;;  %v2307_v44 = vmax.f32 %v2305_v39, %v10822_v36  ;;  %v2310_v48 = vmax.f32 %v2308_v12, %v10841_v22 }
 0x6c7   : > { %v10927_v50 = vpop.f32.mrf.mxu2  ;;  %v10941_v28 = vpop.f32.mrf.mxu3 }
 0x6c8   : > { %v2287_v25 = vmax.f32 %v2285_v34, %v10909_v6  ;;  %v2290_v63 = vmax.f32 %v2288_v46, %v10927_v50  ;;  %v2309_v34 = vmax.f32 %v2307_v44, %v10837_v11  ;;  %v2312_v43 = vmax.f32 %v2310_v48, %v10855_v52 }
 0x6ca   : > { %v2289_v27 = vmax.f32 %v2287_v25, %v10917_v33  ;;  %v2311_v25 = vmax.f32 %v2309_v34, %v10849_v19  ;;  %v2314_v39 = vmax.f32 %v2312_v43, %v10869_v57 }
 0x6cc   : > { %v2313_v12 = vmax.f32 %v2311_v25, %v10863_v58  ;;  %v2316_v46 = vmax.f32 %v2314_v39, %v10879_v30 }
 0x6ce   : > { %v2315_v44 = vmax.f32 %v2313_v12, %v10874_v4  ;;  %v2318_v48 = vmax.f32 %v2316_v46, %v10887_v51 }
 0x6cf   : > { %v10937_v61 = vpop.f32.mrf.mxu2  ;;  %v10962_v17 = vpop.f32.mrf.mxu3 }
 0x6d0   : > { %v2291_v35 = vmax.f32 %v2289_v27, %v10937_v61 }
 0x6d7   : > { %v10951_v2 = vpop.f32.mrf.mxu2  ;;  %v10982_v22 = vpop.f32.mrf.mxu3 }
 0x6d8   : > { %v2292_v60 = vmax.f32 %v2290_v63, %v10951_v2  ;;  %v2317_v63 = vmax.f32 %v2315_v44, %v10883_v41 }
 0x6da   : > { %v2319_v43 = vmax.f32 %v2317_v63, %v10891_v31 }
 0x6dc   : > { %v2321_v25 = vmax.f32 %v2319_v43, %v10899_v5 }
 0x6de   : > { %v2323_v12 = vmax.f32 %v2321_v25, %v10907_v53 }
 0x6df   : > { %v10972_v23 = vpop.f32.mrf.mxu2 }
 0x6e0   : > { %v2293_v7 = vmax.f32 %v2291_v35, %v10972_v23  ;;  %v2320_v35 = vmax.f32 %v2318_v48, %v10895_v40 }
 0x6e2   : > { %v2294_v8 = vmax.f32 %v2292_v60, %v2293_v7  ;;  %v2322_v60 = vmax.f32 %v2320_v35, %v10903_v18 }
 0x6e4   : > { %v2295_v27 = vrot.slane %v2294_v8, 4  ;;  %v2324_v39 = vmax.f32 %v2322_v60, %v10911_v9  ;;  %v15675_v60 = vld [vmem:[#allocation61_spill] sm:$0xff] }
 0x6e6   : > { %v2296_v52 = vmax.f32 %v2294_v8, %v2295_v27  ;;  %v2326_v46 = vmax.f32 %v2324_v39, %v10925_v1  ;;  %v10994_v8 = vpop.f32.mrf.mxu3  ;;  %v15674_v27 = vld [vmem:[#allocation92_spill] sm:$0xff]  ;;  %v15679_v1 = vld [vmem:[#allocation74_spill] sm:$0xff] }
 0x6e7   : > { %v2325_v44 = vmax.f32 %v2323_v12, %v15674_v27  ;;  %v15676_v12 = vld [vmem:[#allocation65_spill] sm:$0xff] }
 0x6e8   : > { %v2297_v34 = vrot.slane %v2296_v52, 2  ;;  %v2328_v48 = vmax.f32 %v2326_v46, %v10962_v17 }
 0x6e9   : > { %v2327_v63 = vmax.f32 %v2325_v44, %v10941_v28  ;;  %v15677_v44 = vld [vmem:[#allocation69_spill] sm:$0xff] }
 0x6ea   : > { %v2298_v7 = vmax.f32 %v2296_v52, %v2297_v34  ;;  %v2330_v52 = vmax.f32 %v2328_v48, %v10994_v8 }
 0x6eb   : > { %v2329_v35 = vmax.f32 %v2327_v63, %v10982_v22 }
 0x6ec   : > { %v2299_v30 = vrot.slane %v2298_v7, 1 }
 0x6ed   : > { %v2331_v39 = vmax.f32 %v2329_v35, %v2330_v52 }
 0x6ee   : > { %v10998_v40 = vmax.f32 %v2298_v7, %v2299_v30 }
 0x6ef   : > { %v2332_v63 = vrot.slane %v2331_v39, 4 }
 0x6f0   : > { %v2338_v34 = vsub.f32 %v10753_v37, %v10998_v40  ;;  %v2340_v43 = vsub.f32 %v10762_v13, %v10998_v40  ;;  %v2342_v25 = vsub.f32 %v15675_v60, %v10998_v40  ;;  %v2344_v30 = vsub.f32 %v15676_v12, %v10998_v40  ;;  %v15678_v37 = vld [vmem:[#allocation71_spill] sm:$0xff] }
 0x6f1   : > { %v2346_v48 = vsub.f32 %v15677_v44, %v10998_v40  ;;  %v2348_v9 = vsub.f32 %v15678_v37, %v10998_v40  ;;  %v2350_v60 = vsub.f32 %v15679_v1, %v10998_v40  ;;  %v2333_v35 = vmax.f32 %v2331_v39, %v2332_v63 }
 0x6f2   : > { %v2402_v7 = vmul.f32 1.442695, %v2338_v34  ;;  %v2406_v46 = vmul.f32 1.442695, %v2340_v43  ;;  %v2410_v18 = vmul.f32 1.442695, %v2342_v25  ;;  %v2352_v34 = vsub.f32 %v10810_v47, %v10998_v40 }
 0x6f3   : > { %v2414_v13 = vmul.f32 1.442695, %v2344_v30  ;;  %v2418_v52 = vmul.f32 1.442695, %v2346_v48  ;;  %v2422_v43 = vmul.f32 1.442695, %v2348_v9  ;;  %v2354_v25 = vsub.f32 %v10820_v15, %v10998_v40 }
 0x6f4   : > { %8150 = vpow2.f32 %v2402_v7  ;;  %v2356_v30 = vsub.f32 %v10827_v56, %v10998_v40  ;;  %v2426_v1 = vmul.f32 1.442695, %v2350_v60  ;;  %v2334_v39 = vrot.slane %v2333_v35, 2 }
 0x6f5   : > { %8152 = vpow2.f32 %v2406_v46  ;;  %v2360_v46 = vsub.f32 %v10839_v26, %v10998_v40  ;;  %v2430_v15 = vmul.f32 1.442695, %v2352_v34  ;;  %v2362_v44 = vsub.f32 %v10847_v49, %v10998_v40 }
 0x6f6   : > { %8154 = vpow2.f32 %v2410_v18  ;;  %v2358_v18 = vsub.f32 %v10833_v32, %v10998_v40  ;;  %v2434_v56 = vmul.f32 1.442695, %v2354_v25  ;;  %v2364_v32 = vsub.f32 %v10853_v45, %v10998_v40 }
 0x6f7   : > { %8156 = vpow2.f32 %v2414_v13  ;;  %v2438_v37 = vmul.f32 1.442695, %v2356_v30  ;;  %v2366_v13 = vsub.f32 %v10861_v54, %v10998_v40  ;;  %v2368_v49 = vsub.f32 %v10865_v14, %v10998_v40 }
 0x6f8   : > { %8158 = vpow2.f32 %v2418_v52  ;;  %v2442_v60 = vmul.f32 1.442695, %v2358_v18  ;;  %v2335_v52 = vmax.f32 %v2333_v35, %v2334_v39  ;;  %v2370_v25 = vsub.f32 %v10872_v3, %v10998_v40 }
 0x6f9   : > { %8160 = vpow2.f32 %v2422_v43  ;;  %v2446_v43 = vmul.f32 1.442695, %v2360_v46  ;;  %v2450_v45 = vmul.f32 1.442695, %v2362_v44  ;;  %v2372_v54 = vsub.f32 %v10877_v29, %v10998_v40  ;;  %v15680_v46 = vld [vmem:[#allocation88_spill] sm:$0xff] }
 0x6fa   : > { %v11019_v12 = vpop.eup %8150  ;;  %8162 = vpow2.f32 %v2426_v1  ;;  %v2374_v35 = vsub.f32 %v10881_v16, %v10998_v40  ;;  %v2454_v18 = vmul.f32 1.442695, %v2364_v32  ;;  %v2458_v14 = vmul.f32 1.442695, %v2366_v13 }
 0x6fb   : > { %v11023_v7 = vpop.eup %8152  ;;  %8164 = vpow2.f32 %v2430_v15  ;;  %v2336_v39 = vrot.slane %v2335_v52, 1  ;;  %v2376_v15 = vsub.f32 %v15680_v46, %v10998_v40  ;;  %v2462_v44 = vmul.f32 1.442695, %v2368_v49 }
 0x6fc   : > { %v2530_v47 = vadd.f32 %v11023_v7, %v11019_v12  ;;  %v11031_v9 = vpop.eup %8154  ;;  %8166 = vpow2.f32 %v2434_v56  ;;  %v2378_v29 = vsub.f32 %v10889_v0, %v10998_v40  ;;  %v2466_v56 = vmul.f32 1.442695, %v2370_v25 }
 0x6fd   : > { %v11038_v63 = vpop.eup %8156  ;;  %8168 = vpow2.f32 %v2438_v37  ;;  %v2380_v32 = vsub.f32 %v10893_v55, %v10998_v40  ;;  %v2382_v37 = vsub.f32 %v10897_v59, %v10998_v40  ;;  %v2470_v13 = vmul.f32 1.442695, %v2372_v54 }
 0x6fe   : > { %v2531_v48 = vadd.f32 %v11031_v9, %v2530_v47  ;;  %v11045_v34 = vpop.eup %8158  ;;  %8170 = vpow2.f32 %v2442_v60  ;;  %v11075_v49 = vmax.f32 %v2335_v52, %v2336_v39  ;;  %v2394_v25 = vsub.f32 %v10927_v50, %v10998_v40 }
 0x6ff   : > { %v11052_v1 = vpop.eup %8160  ;;  %8172 = vpow2.f32 %v2446_v43  ;;  %v2478_v55 = vmul.f32 1.442695, %v2376_v15  ;;  %v2398_v59 = vsub.f32 %v10951_v2, %v10998_v40  ;;  %v2400_v52 = vsub.f32 %v10972_v23, %v10998_v40  ;;  %v15681_v15 = vld [vmem:[#allocation59_spill] sm:$0xff] }
 0x700   : > { %v2532_v26 = vadd.f32 %v11038_v63, %v2531_v48  ;;  %v11059_v3 = vpop.eup %8162  ;;  %8174 = vpow2.f32 %v2450_v45  ;;  %v2490_v50 = vmul.f32 1.442695, %v2382_v37  ;;  %v2339_v2 = vsub.f32 %v10757_v24, %v11075_v49  ;;  %v15682_v37 = vld [vmem:[#allocation63_spill] sm:$0xff] }
 0x701   : > { %v11066_v48 = vpop.eup %8164  ;;  %8176 = vpow2.f32 %v2454_v18  ;;  %v2486_v18 = vmul.f32 1.442695, %v2380_v32  ;;  %v2514_v46 = vmul.f32 1.442695, %v2394_v25  ;;  %v2396_v23 = vsub.f32 %v10937_v61, %v10998_v40 }
 0x702   : > { %v2533_v30 = vadd.f32 %v11045_v34, %v2532_v26  ;;  %v11072_v60 = vpop.eup %8166  ;;  %8178 = vpow2.f32 %v2458_v14  ;;  %v2474_v26 = vmul.f32 1.442695, %v2374_v35  ;;  %v2526_v24 = vmul.f32 1.442695, %v2400_v52 }
 0x703   : > { %v11077_v43 = vpop.eup %8168  ;;  %8180 = vpow2.f32 %v2462_v44  ;;  %v2341_v44 = vsub.f32 %v15681_v15, %v11075_v49  ;;  %v2404_v61 = vmul.f32 1.442695, %v2339_v2  ;;  %v2347_v2 = vsub.f32 %v10790_v42, %v11075_v49 }
 0x704   : > { %v2534_v47 = vadd.f32 %v11052_v1, %v2533_v30  ;;  %v11081_v45 = vpop.eup %8170  ;;  %8182 = vpow2.f32 %v2466_v56  ;;  %v2482_v30 = vmul.f32 1.442695, %v2378_v29  ;;  %v2522_v56 = vmul.f32 1.442695, %v2398_v59  ;;  %v15683_v59 = vld [vmem:[#allocation66_spill] sm:$0xff] }
 0x705   : > { %v11086_v35 = vpop.eup %8172  ;;  %8184 = vpow2.f32 %v2470_v13  ;;  %v2343_v13 = vsub.f32 %v15682_v37, %v11075_v49  ;;  %v2388_v42 = vsub.f32 %v10909_v6, %v10998_v40 }
 0x706   : > { %v2535_v16 = vadd.f32 %v11059_v3, %v2534_v47  ;;  %v11090_v14 = vpop.eup %8174  ;;  %8186 = vpow2.f32 %v2474_v26 }
 0x707   : > { %v11095_v39 = vpop.eup %8176  ;;  %8188 = vpow2.f32 %v2478_v55 }
 0x708   : > { %v2536_v0 = vadd.f32 %v11066_v48, %v2535_v16  ;;  %v11099_v29 = vpop.eup %8178  ;;  %8190 = vpow2.f32 %v2482_v30  ;;  %v2345_v30 = vsub.f32 %v15683_v59, %v11075_v49 }
 0x709   : > { %v11104_v32 = vpop.eup %8180  ;;  %8192 = vpow2.f32 %v2486_v18  ;;  %v2392_v18 = vsub.f32 %v10917_v33, %v10998_v40 }
 0x70a   : > { %v2537_v54 = vadd.f32 %v11072_v60, %v2536_v0  ;;  %v11108_v26 = vpop.eup %8182  ;;  %v2390_v0 = vsub.f32 %v10913_v20, %v10998_v40  ;;  %8194 = vpow2.f32 %v2490_v50 }
 0x70b   : > { %v11113_v55 = vpop.eup %8184  ;;  %8196 = vpow2.f32 %v2514_v46  ;;  %v2412_v46 = vmul.f32 1.442695, %v2343_v13  ;;  %v2510_v13 = vmul.f32 1.442695, %v2392_v18  ;;  %v15684_v18 = vld [vmem:[#allocation77_spill] sm:$0xff] }
 0x70c   : > { %v2538_v47 = vadd.f32 %v11077_v43, %v2537_v54  ;;  %v2408_v54 = vmul.f32 1.442695, %v2341_v44  ;;  %v11117_v52 = vpop.eup %8186  ;;  %8198 = vpow2.f32 %v2522_v56  ;;  %v2386_v44 = vsub.f32 %v10905_v10, %v10998_v40 }
 0x70d   : > { %v11122_v50 = vpop.eup %8188  ;;  %8200 = vpow2.f32 %v2526_v24  ;;  %v2416_v56 = vmul.f32 1.442695, %v2345_v30 }
 0x70e   : > { %v2539_v16 = vadd.f32 %v11081_v45, %v2538_v47  ;;  %v2518_v47 = vmul.f32 1.442695, %v2396_v23  ;;  %v11126_v15 = vpop.eup %8190  ;;  %8202 = vpow2.f32 %v2404_v61  ;;  %v2349_v23 = vsub.f32 %v10798_v62, %v11075_v49 }
 0x70f   : > { %v11131_v33 = vpop.eup %8192  ;;  %8204 = vpow2.f32 %v2408_v54  ;;  %v2420_v61 = vmul.f32 1.442695, %v2347_v2  ;;  %v2384_v62 = vsub.f32 %v10901_v38, %v10998_v40  ;;  %v2498_v30 = vmul.f32 1.442695, %v2386_v44 }
 0x710   : > { %v2540_v25 = vadd.f32 %v11086_v35, %v2539_v16  ;;  %v2506_v16 = vmul.f32 1.442695, %v2390_v0  ;;  %v11135_v24 = vpop.eup %8194  ;;  %8206 = vpow2.f32 %v2518_v47  ;;  %v2353_v47 = vsub.f32 %v15684_v18, %v11075_v49 }
 0x711   : > { %v11140_v0 = vpop.eup %8196  ;;  %8208 = vpow2.f32 %v2412_v46  ;;  %v2355_v38 = vsub.f32 %v10822_v36, %v11075_v49  ;;  %v2622_v44 = vpack.c.bf16 %v11104_v32, %v11099_v29 }
 0x712   : > { %v2541_v20 = vadd.f32 %v11090_v14, %v2540_v25  ;;  %v2351_v25 = vsub.f32 %v10806_v21, %v11075_v49  ;;  %v11144_v59 = vpop.eup %8198  ;;  %8210 = vpow2.f32 %v2506_v16  ;;  %v2502_v21 = vmul.f32 1.442695, %v2388_v42 }
 0x713   : > { %v11149_v54 = vpop.eup %8200  ;;  %8212 = vpow2.f32 %v2416_v56  ;;  %v2494_v56 = vmul.f32 1.442695, %v2384_v62  ;;  %2640 = vmatpush.bf16.msra.mxu0 %v2622_v44  ;;  %v2359_v62 = vsub.f32 %v10837_v11, %v11075_v49  ;;  %v2436_v18 = vmul.f32 1.442695, %v2355_v38  ;;  %v15690_v44 = vld [vmem:[#allocation41_spill] sm:$0xff]  ;;  %v15691_v38 = vld [vmem:[#allocation28_spill] sm:$0xff] }
 0x714   : > { %v2542_v37 = vadd.f32 %v11095_v39, %v2541_v20  ;;  %v2424_v20 = vmul.f32 1.442695, %v2349_v23  ;;  %8214 = vpow2.f32 %v2510_v13  ;;  %v2428_v46 = vmul.f32 1.442695, %v2351_v25 }
 0x715   : > { %8216 = vpow2.f32 %v2420_v61  ;;  %v2638_v16 = vpack.c.bf16 %v11149_v54, %v11144_v59  ;;  %v2432_v61 = vmul.f32 1.442695, %v2353_v47 }
 0x716   : > { %v2543_v10 = vadd.f32 %v11099_v29, %v2542_v37  ;;  %v11153_v37 = vpop.eup %8202  ;;  %8218 = vpow2.f32 %v2498_v30 }
 0x717   : > { %15685 = vst [vmem:[#allocation92_spill] sm:$0xff] %v11153_v37  ;;  %v11158_v40 = vpop.eup %8204  ;;  %8220 = vpow2.f32 %v2424_v20  ;;  %2653 = vmatpush.bf16.msra.mxu1 %v2638_v16  ;;  %v2620_v20 = vpack.c.bf16 %v11095_v39, %v11090_v14  ;;  %v15692_v14 = vld [vmem:[#allocation82_spill] sm:$0xff] }
 0x718   : > { %v2544_v6 = vadd.f32 %v11104_v32, %v2543_v10  ;;  %15686 = vst [vmem:[#allocation61_spill] sm:$0xff] %v11158_v40  ;;  %v11164_v23 = vpop.eup %8206  ;;  %v2567_v13 = vadd.f32 %v11158_v40, %v11153_v37  ;;  %v15687_v10 = vld [vmem:[#allocation80_spill] sm:$0xff]  ;;  %8222 = vpow2.f32 %v2502_v21  ;;  %v15689_v21 = vld [vmem:[#allocation26_spill] sm:$0xff]  ;;  %v2361_v39 = vsub.f32 %v15692_v14, %v11075_v49 }
 0x719   : > { %v11169_v36 = vpop.eup %8208  ;;  %v2357_v25 = vsub.f32 %v15687_v10, %v11075_v49  ;;  %8224 = vpow2.f32 %v2428_v46  ;;  %v2636_v47 = vpack.c.bf16 %v11164_v23, %v11140_v0  ;;  %v11189_v16 = vadd.f32 %v15690_v44, %v15689_v21  ;;  %2641 = vmatpush.bf16.msra.mxu0 %v2620_v20 }
 0x71a   : > { %v2545_v2 = vadd.f32 %v11108_v26, %v2544_v6  ;;  %v11173_v29 = vpop.eup %8210  ;;  %v2568_v30 = vadd.f32 %v11169_v36, %v2567_v13  ;;  %8226 = vpow2.f32 %v2494_v56  ;;  %v11197_v46 = vadd.f32 %v15691_v38, %v15689_v21 }
 0x71b   : > { %v11179_v6 = vpop.eup %8212  ;;  %8228 = vpow2.f32 %v2432_v61  ;;  %v2440_v10 = vmul.f32 1.442695, %v2357_v25  ;;  %2654 = vmatpush.bf16.msra.mxu1 %v2636_v47  ;;  %v2444_v38 = vmul.f32 1.442695, %v2359_v62  ;;  %v2618_v25 = vpack.c.bf16 %v11086_v35, %v11081_v45  ;;  %v15694_v45 = vld [vmem:[#allocation87_spill] sm:$0xff] }
 0x71c   : > { %v2546_v42 = vadd.f32 %v11113_v55, %v2545_v2  ;;  %15688 = vst [vmem:[#allocation65_spill] sm:$0xff] %v11179_v6  ;;  %v11185_v2 = vpop.eup %8214  ;;  %8230 = vpow2.f32 %v2436_v18  ;;  %v2371_v62 = vsub.f32 %v10874_v4, %v11075_v49  ;;  %v2373_v35 = vsub.f32 %v15694_v45, %v11075_v49 }
 0x71d   : > { %v11193_v13 = vpop.eup %8216  ;;  %v2634_v61 = vpack.c.bf16 %v11185_v2, %v11173_v29  ;;  %8232 = vpow2.f32 %v2440_v10  ;;  %v2448_v18 = vmul.f32 1.442695, %v2361_v39  ;;  %2642 = vmatpush.bf16.msra.mxu0 %v2618_v25  ;;  %v2616_v39 = vpack.c.bf16 %v11077_v43, %v11072_v60 }
 0x71e   : > { %v2547_v32 = vadd.f32 %v11117_v52, %v2546_v42  ;;  %v2569_v42 = vadd.f32 %v11179_v6, %v2568_v30  ;;  %v8219_v44 = vpop.eup %8218  ;;  %v15693_v30 = vld [vmem:[#allocation85_spill] sm:$0xff]  ;;  %8234 = vpow2.f32 %v2444_v38  ;;  %v2401_v38 = vsub.f32 %v10994_v8, %v11075_v49 }
 0x71f   : > { %v2365_v40 = vsub.f32 %v15693_v30, %v11075_v49  ;;  %v11207_v21 = vpop.eup %8220  ;;  %2655 = vmatpush.bf16.msra.mxu1 %v2634_v61  ;;  %8236 = vpow2.f32 %v2448_v18 }
 0x720   : > { %v2548_v11 = vadd.f32 %v11122_v50, %v2547_v32  ;;  %v2363_v32 = vsub.f32 %v10849_v19, %v11075_v49  ;;  %v2570_v37 = vadd.f32 %v11193_v13, %v2569_v42  ;;  %v8223_v20 = vpop.eup %8222  ;;  %v2367_v19 = vsub.f32 %v10863_v58, %v11075_v49 }
 0x721   : > { %v11219_v14 = vpop.eup %8224  ;;  %v2632_v10 = vpack.c.bf16 %v8223_v20, %v8219_v44  ;;  %v2456_v60 = vmul.f32 1.442695, %v2365_v40  ;;  %2643 = vmatpush.bf16.msra.mxu0 %v2616_v39  ;;  %v2395_v40 = vsub.f32 %v10941_v28, %v11075_v49 }
 0x722   : > { %v2549_v56 = vadd.f32 %v11126_v15, %v2548_v11  ;;  %v2369_v11 = vsub.f32 %v10869_v57, %v11075_v49  ;;  %v2571_v42 = vadd.f32 %v11207_v21, %v2570_v37  ;;  %v2375_v57 = vsub.f32 %v10883_v41, %v11075_v49 }
 0x723   : > { %v2377_v37 = vsub.f32 %v10887_v51, %v11075_v49  ;;  %v2452_v4 = vmul.f32 1.442695, %v2363_v32  ;;  %v2399_v32 = vsub.f32 %v10982_v22, %v11075_v49  ;;  %2656 = vmatpush.bf16.msra.mxu1 %v2632_v10  ;;  %v2387_v10 = vsub.f32 %v10907_v53, %v11075_v49 }
 0x724   : > { %v2550_v47 = vadd.f32 %v11131_v33, %v2549_v56  ;;  %v8227_v56 = vpop.eup %8226  ;;  %v2572_v30 = vadd.f32 %v11219_v14, %v2571_v42  ;;  %v2464_v61 = vmul.f32 1.442695, %v2369_v11  ;;  %v2614_v42 = vpack.c.bf16 %v11066_v48, %v11059_v3 }
 0x725   : > { %v11231_v6 = vpop.eup %8228  ;;  %8238 = vpow2.f32 %v2452_v4  ;;  %v2630_v22 = vpack.c.bf16 %v8227_v56, %v11135_v24  ;;  %v2397_v11 = vsub.f32 %v10962_v17, %v11075_v49  ;;  %v2472_v4 = vmul.f32 1.442695, %v2373_v35 }
 0x726   : > { %v2551_v58 = vadd.f32 %v11135_v24, %v2550_v47  ;;  %v15695_v47 = vld [vmem:[#allocation89_spill] sm:$0xff]  ;;  %v2573_v45 = vadd.f32 %v11231_v6, %v2572_v30  ;;  %v11240_v51 = vpop.eup %8230  ;;  %8240 = vpow2.f32 %v2456_v60  ;;  %2644 = vmatpush.bf16.msra.mxu0 %v2614_v42  ;;  %v2524_v48 = vmul.f32 1.442695, %v2399_v32 }
 0x727   : > { %v11249_v30 = vpop.eup %8232  ;;  %2657 = vmatpush.bf16.msra.mxu1 %v2630_v22  ;;  %v2628_v17 = vpack.c.bf16 %v11131_v33, %v11126_v15  ;;  %v2516_v35 = vmul.f32 1.442695, %v2395_v40  ;;  %v2626_v53 = vpack.c.bf16 %v11122_v50, %v11117_v52  ;;  %v15699_v52 = vsub.f32 %v15695_v47, %v11075_v49 }
 0x728   : > { %v2552_v25 = vadd.f32 %v8227_v56, %v2551_v58  ;;  %v2460_v58 = vmul.f32 1.442695, %v2367_v19  ;;  %v2574_v41 = vadd.f32 %v11240_v51, %v2573_v45  ;;  %v11257_v8 = vpop.eup %8234  ;;  %v2391_v19 = vsub.f32 %v15674_v27, %v11075_v49 }
 0x729   : > { %v11265_v24 = vpop.eup %8236  ;;  %v2612_v27 = vpack.c.bf16 %v11052_v1, %v11045_v34  ;;  %v2476_v1 = vmul.f32 1.442695, %v2375_v57  ;;  %v2610_v45 = vpack.c.bf16 %v11038_v63, %v11031_v9  ;;  %v15697_v57 = vld [vmem:[#allocation91_spill] sm:$0xff]  ;;  %v2488_v50 = vmul.f32 1.442695, %v15699_v52 }
 0x72a   : > { %v2553_v43 = vadd.f32 %v8219_v44, %v2552_v25  ;;  %v2468_v44 = vmul.f32 1.442695, %v2371_v62  ;;  %v2575_v39 = vadd.f32 %v11249_v30, %v2574_v41  ;;  %8242 = vpow2.f32 %v2460_v58  ;;  %v15696_v25 = vld [vmem:[#allocation93_spill] sm:$0xff] }
 0x72b   : > { %8244 = vpow2.f32 %v2464_v61  ;;  %v11273_v56 = vpop.eup %8238  ;;  %v2393_v61 = vsub.f32 %v15696_v25, %v11075_v49  ;;  %v2520_v41 = vmul.f32 1.442695, %v2397_v11  ;;  %2645 = vmatpush.bf16.msra.mxu0 %v2612_v27  ;;  %2658 = vmatpush.bf16.msra.mxu1 %v2628_v17  ;;  %v2508_v60 = vmul.f32 1.442695, %v2391_v19 }
 0x72c   : > { %v2554_v18 = vadd.f32 %v8223_v20, %v2553_v43  ;;  %v2576_v28 = vadd.f32 %v11257_v8, %v2575_v39  ;;  %v2528_v20 = vmul.f32 1.442695, %v2401_v38  ;;  %8246 = vpow2.f32 %v2468_v44  ;;  %v8241_v33 = vpop.eup %8240 }
 0x72d   : > { %8248 = vpow2.f32 %v2472_v4  ;;  %v2389_v38 = vsub.f32 %v15697_v57, %v11075_v49  ;;  %v2512_v22 = vmul.f32 1.442695, %v2393_v61  ;;  %v2500_v40 = vmul.f32 1.442695, %v2387_v10  ;;  %v15700_v4 = vld [vmem:[#allocation90_spill] sm:$0xff] }
 0x72e   : > { %v2555_v3 = vadd.f32 %v11173_v29, %v2554_v18  ;;  %v2577_v29 = vadd.f32 %v11265_v24, %v2576_v28  ;;  %8250 = vpow2.f32 %v2524_v48  ;;  %v2624_v44 = vpack.c.bf16 %v11113_v55, %v11108_v26 }
 0x72f   : > { %8252 = vpow2.f32 %v2528_v20  ;;  %2646 = vmatpush.bf16.msra.mxu0 %v2610_v45  ;;  %2659 = vmatpush.bf16.msra.mxu1 %v2626_v53  ;;  %v2504_v48 = vmul.f32 1.442695, %v2389_v38  ;;  %v11321_v28 = vpack.c.bf16 %v11197_v46, %v11197_v46  ;;  %v15703_v20 = vsub.f32 %v10899_v5, %v11075_v49 }
 0x730   : > { %v2556_v62 = vadd.f32 %v11185_v2, %v2555_v3  ;;  %v2578_v15 = vadd.f32 %v11273_v56, %v2577_v29  ;;  %v2480_v2 = vmul.f32 1.442695, %v2377_v37  ;;  %v8243_v42 = vpop.eup %8242  ;;  %8254 = vpow2.f32 %v2516_v35 }
 0x731   : > { %v15698_v37 = vsub.f32 %v10891_v31, %v11075_v49  ;;  %8256 = vpow2.f32 %v2520_v41  ;;  %v2608_v31 = vpack.c.bf16 %v11023_v7, %v11019_v12  ;;  %v2385_v3 = vsub.f32 %v15700_v4, %v11075_v49  ;;  %15702 = vst [vmem:[#allocation71_spill] sm:$0xff] %v11321_v28 }
 0x732   : > { %v2557_v34 = vadd.f32 %v11140_v0, %v2556_v62  ;;  %v2579_v43 = vadd.f32 %v8241_v33, %v2578_v15  ;;  %v8245_v0 = vpop.eup %8244  ;;  %8258 = vpow2.f32 %v2476_v1  ;;  %v11314_v7 = vpack.c.bf16 %v11189_v16, %v11189_v16 }
 0x733   : > { %v2484_v58 = vmul.f32 1.442695, %v15698_v37  ;;  %v11291_v9 = vpop.eup %8246  ;;  %8260 = vpow2.f32 %v2480_v2  ;;  %v2623_v47 = vpack.c.bf16 %v8245_v0, %v8243_v42  ;;  %2647 = vmatpush.bf16.msra.mxu0 %v2608_v31  ;;  %2660 = vmatpush.bf16.msra.mxu1 %v2624_v44  ;;  %v2492_v27 = vmul.f32 1.442695, %v15703_v20  ;;  %v15708_v44 = vld [vmem:[#allocation46_spill] sm:$0xff] }
 0x734   : > { %v2558_v32 = vadd.f32 %v11164_v23, %v2557_v34  ;;  %v2580_v23 = vadd.f32 %v8243_v42, %v2579_v43  ;;  %v11297_v18 = vpop.eup %8248  ;;  %8262 = vpow2.f32 %v2508_v60  ;;  %15701 = vst [vmem:[#allocation69_spill] sm:$0xff] %v11314_v7  ;;  %v2621_v62 = vpack.c.bf16 %v8241_v33, %v11273_v56 }
 0x735   : > { %v11303_v39 = vpop.eup %8250  ;;  %8264 = vpow2.f32 %v2512_v22  ;;  %v2496_v29 = vmul.f32 1.442695, %v2385_v3  ;;  %v2619_v41 = vpack.c.bf16 %v11265_v24, %v11257_v8  ;;  %v2617_v45 = vpack.c.bf16 %v11249_v30, %v11240_v51  ;;  %v2703_v3 = vpop.permute.xlu1 %2702 }
 0x736   : > { %v2559_v63 = vadd.f32 %v11144_v59, %v2558_v32  ;;  %v2581_v19 = vadd.f32 %v8245_v0, %v2580_v23  ;;  %v11308_v11 = vpop.eup %8252  ;;  %8266 = vpow2.f32 %v2484_v58  ;;  %2648 = vmatmul.bf16.vlgmr.msra.gmra.mxu0 %v11314_v7  ;;  %2661 = vmatmul.bf16.vlgmr.msra.gmra.mxu1 %v11321_v28  ;;  %v2615_v8 = vpack.c.bf16 %v11231_v6, %v11219_v14  ;;  %v15704_v58 = vld [vmem:[#allocation65_spill] sm:$0xff]  ;;  %v15705_v6 = vld [vmem:[#allocation42_spill] sm:$0xff]  ;;  %v15706_v23 = vld [vmem:[#allocation92_spill] sm:$0xff] }
 0x737   : > { %v8255_v12 = vpop.eup %8254  ;;  %2666 = vmatpush.bf16.msrb.mxu0 %v2623_v47  ;;  %v2639_v55 = vpack.c.bf16 %v11308_v11, %v11303_v39  ;;  %8268 = vpow2.f32 %v2488_v50  ;;  %v2613_v38 = vpack.c.bf16 %v11207_v21, %v11193_v13  ;;  %v2611_v22 = vpack.c.bf16 %v15704_v58, %v11169_v36 }
 0x738   : > { %v11306_v59 = vadd.f32 %v11149_v54, %v2559_v63  ;;  %v2582_v26 = vadd.f32 %v11291_v9, %v2581_v19  ;;  %v8257_v54 = vpop.eup %8256  ;;  %8270 = vpow2.f32 %v2500_v40  ;;  %v2736_v14 = vrot.slane %v15705_v6, 2  ;;  %v15707_v40 = vld [vmem:[#allocation61_spill] sm:$0xff] }
 0x739   : > { %v8259_v17 = vpop.eup %8258  ;;  %2679 = vmatpush.bf16.msrb.mxu1 %v2639_v55  ;;  %8272 = vpow2.f32 %v2504_v48  ;;  %v2637_v25 = vpack.c.bf16 %v8257_v54, %v8255_v12  ;;  %v2609_v31 = vpack.c.bf16 %v15707_v40, %v15706_v23  ;;  %v2737_v13 = vrot.slane %v15708_v44, 2 }
 0x73a   : > { %v2583_v16 = vadd.f32 %v11297_v18, %v2582_v26  ;;  %v8261_v35 = vpop.eup %8260  ;;  %8274 = vpow2.f32 %v2492_v27  ;;  %v2625_v19 = vpack.c.bf16 %v11297_v18, %v11291_v9  ;;  %v2787_v36 = vsel %vm644_vm1, %v2736_v14, 0  ;;  %v15710_v9 = vld [vmem:[#allocation39_spill] sm:$0xff]  ;;  %v15711_v26 = vld [vmem:[#allocation17_spill] sm:$0xff] }
 0x73b   : > { %v8263_v46 = vpop.eup %8262  ;;  %2667 = vmatpush.bf16.msrb.mxu0 %v2621_v62  ;;  %8276 = vpow2.f32 %v2496_v29  ;;  %v2627_v52 = vpack.c.bf16 %v8261_v35, %v8259_v17  ;;  %v2790_v4 = vsel %vm644_vm1, %v2737_v13, 0 }
 0x73c   : > { %v2584_v10 = vadd.f32 %v8259_v17, %v2583_v16  ;;  %v8265_v5 = vpop.eup %8264  ;;  %v15712_v17 = vld [vmem:[#allocation44_spill] sm:$0xff] }
 0x73d   : > { %v8267_v49 = vpop.eup %8266  ;;  %2680 = vmatpush.bf16.msrb.mxu1 %v2637_v25  ;;  %v2635_v15 = vpack.c.bf16 %v8265_v5, %v8263_v46  ;;  %v2709_v18 = vpop.permute.xlu1 %2708 }
 0x73e   : > { %v2585_v61 = vadd.f32 %v8261_v35, %v2584_v10  ;;  %v8269_v34 = vpop.eup %8268 }
 0x73f   : > { %v8271_v56 = vpop.eup %8270  ;;  %2668 = vmatpush.bf16.msrb.mxu0 %v2619_v41  ;;  %v2629_v51 = vpack.c.bf16 %v8269_v34, %v8267_v49 }
 0x740   : > { %v2586_v1 = vadd.f32 %v8267_v49, %v2585_v61  ;;  %v8273_v33 = vpop.eup %8272 }
 0x741   : > { %2681 = vmatpush.bf16.msrb.mxu1 %v2635_v15  ;;  %v8275_v53 = vpop.eup %8274  ;;  %v2633_v32 = vpack.c.bf16 %v8273_v33, %v8271_v56 }
 0x742   : > { %v2587_v2 = vadd.f32 %v8269_v34, %v2586_v1  ;;  %v8277_v60 = vpop.eup %8276 }
 0x743   : > { %2669 = vmatpush.bf16.msrb.mxu0 %v2617_v45  ;;  %v2631_v0 = vpack.c.bf16 %v8277_v60, %v8275_v53 }
 0x744   : > { %v2588_v42 = vadd.f32 %v8275_v53, %v2587_v2 }
 0x745   : > { %2682 = vmatpush.bf16.msrb.mxu1 %v2633_v32  ;;  %v2715_v15 = vpop.permute.xlu1 %2714 }
 0x746   : > { %v2589_v43 = vadd.f32 %v8277_v60, %v2588_v42  ;;  %v292_v42 = vld [vmem:[%s15119_s1 + $0x18] sm:$0xff] }
 0x747   : > { %2670 = vmatpush.bf16.msrb.mxu0 %v2615_v8 }
 0x748   : > { %v2590_v24 = vadd.f32 %v8271_v56, %v2589_v43  ;;  %v15715_v43 = vld [vmem:[#allocation23_spill] sm:$0xff] }
 0x749   : > { %2683 = vmatpush.bf16.msrb.mxu1 %v2631_v0 }
 0x74a   : > { %v2591_v57 = vadd.f32 %v8273_v33, %v2590_v24  ;;  %v8945_v24 = vld [vmem:[%s9046_s30 + $0x18] sm:$0xff] }
 0x74b   : > { %2671 = vmatpush.bf16.msrb.mxu0 %v2613_v38  ;;  %v11390_v0 = vadd.f32 %v8945_v24, %v292_v42 }
 0x74c   : > { %v2592_v37 = vadd.f32 %v8263_v46, %v2591_v57  ;;  %v8944_v46 = vld [vmem:[%s9046_s30 + $0x10] sm:$0xff] }
 0x74d   : > { %2684 = vmatpush.bf16.msrb.mxu1 %v2629_v51  ;;  %15716 = vst [vmem:[#allocation88_spill] sm:$0xff] %v11390_v0 }
 0x74e   : > { %v2593_v30 = vadd.f32 %v8265_v5, %v2592_v37  ;;  %v15714_v5 = vld [vmem:[#allocation36_spill] sm:$0xff] }
 0x74f   : > { %2672 = vmatpush.bf16.msrb.mxu0 %v2611_v22 }
 0x750   : > { %v2594_v63 = vadd.f32 %v8255_v12, %v2593_v30 }
 0x751   : > { %2685 = vmatpush.bf16.msrb.mxu1 %v2627_v52 }
 0x752   : > { %v2595_v50 = vadd.f32 %v8257_v54, %v2594_v63  ;;  %v15717_v63 = vld [vmem:[#allocation38_spill] sm:$0xff] }
 0x753   : > { %2673 = vmatpush.bf16.msrb.mxu0 %v2609_v31 }
 0x754   : > { %v2596_v21 = vadd.f32 %v11303_v39, %v2595_v50  ;;  %v15709_v39 = vld [vmem:[#allocation29_spill] sm:$0xff]  ;;  %v2721_v50 = vpop.permute.xlu1 %2720 }
 0x755   : > { %2686 = vmatpush.bf16.msrb.mxu1 %v2625_v19 }
 0x756   : > { %v2597_v47 = vadd.f32 %v11308_v11, %v2596_v21  ;;  %2674 = vmatmul.bf16.vlgmr.msrb.gmra.mxu0 %v11314_v7  ;;  %v2561_v11 = vrot.slane %v11306_v59, 4  ;;  %v15724_v21 = vld [vmem:[#allocation25_spill] sm:$0xff] }
 0x757   : > { %2799 = vmatpush.bf16.msra.mxu0 %v2787_v36 }
 0x758   : > { %2687 = vmatmul.bf16.vlgmr.msrb.gmra.mxu1 %v11321_v28  ;;  %v2562_v48 = vadd.f32 %v2561_v11, %v11306_v59  ;;  %v291_v59 = vld [vmem:[%s15119_s1 + $0x10] sm:$0xff]  ;;  %v2598_v29 = vrot.slane %v2597_v47, 4 }
 0x759   : > { %2888 = vmatpush.bf16.msra.mxu1 %v2790_v4  ;;  %v11378_v10 = vadd.f32 %v8944_v46, %v291_v59 }
 0x75a   : > { %v2563_v12 = vrot.slane %v2562_v48, 2  ;;  %v2599_v61 = vadd.f32 %v2598_v29, %v2597_v47 }
 0x75b   : > { %15713 = vst [vmem:[#allocation74_spill] sm:$0xff] %v11378_v10 }
 0x75c   : > { %v2564_v55 = vadd.f32 %v2563_v12, %v2562_v48  ;;  %v2600_v1 = vrot.slane %v2599_v61, 2  ;;  %v2727_v11 = vpop.permute.xlu1 %2726 }
 0x75e   : > { %v2565_v54 = vrot.slane %v2564_v55, 1  ;;  %v2601_v33 = vadd.f32 %v2600_v1, %v2599_v61 }
 0x760   : > { %v2566_v20 = vadd.f32 %v2565_v54, %v2564_v55  ;;  %v2602_v2 = vrot.slane %v2601_v33, 1 }
 0x762   : > { %8278 = vrcp.f32 %v2566_v20  ;;  %v2603_v45 = vadd.f32 %v2602_v2, %v2601_v33  ;;  %v15730_v20 = vld [vmem:[#allocation27_spill] sm:$0xff] }
 0x764   : > { %8280 = vrcp.f32 %v2603_v45 }
 0x766   : > { %7414 = vmatmul.msk.bf16.vlgmr.msra.gmra.mxu0 %vm595_vm2, %v2703_v3 }
 0x768   : > { %7430 = vmatmul.msk.bf16.vlgmr.msra.gmra.mxu1 %vm595_vm2, %v2703_v3  ;;  %v8279_v35 = vpop.eup %8278  ;;  %v15727_v3 = vld [vmem:[#allocation18_spill] sm:$0xff] }
 0x76a   : > { %v8281_v8 = vpop.eup %8280 }
 0x776   : > { %7415 = vmatmul.msk.bf16.gmra.mxu0 %vm595_vm2, %v15709_v39 }
 0x778   : > { %7431 = vmatmul.msk.bf16.gmra.mxu1 %vm595_vm2, %v15709_v39 }
 0x786   : > { %7416 = vmatmul.msk.bf16.gmra.mxu0 %vm595_vm2, %v15710_v9 }
 0x788   : > { %7432 = vmatmul.msk.bf16.gmra.mxu1 %vm595_vm2, %v15710_v9 }
 0x796   : > { %7417 = vmatmul.msk.bf16.gmra.mxu0 %vm595_vm2, %v2709_v18 }
 0x798   : > { %7433 = vmatmul.msk.bf16.gmra.mxu1 %vm595_vm2, %v2709_v18 }
 0x7a6   : > { %7418 = vmatmul.msk.bf16.gmra.mxu0 %vm595_vm2, %v15711_v26 }
 0x7a8   : > { %7434 = vmatmul.msk.bf16.gmra.mxu1 %vm595_vm2, %v15711_v26 }
 0x7b3   : > { %v2649_v27 = vpop.f32.mrf.mxu0  ;;  %v2662_v16 = vpop.f32.mrf.mxu1 }
 0x7b4   : > { %v2663_v62 = vadd.f32 %v2662_v16, %v2649_v27 }
 0x7b6   : > { %7419 = vmatmul.msk.bf16.gmra.mxu0 %vm595_vm2, %v15712_v17  ;;  %v2694_v25 = vmul.f32 %v8279_v35, %v2663_v62  ;;  %v15732_v62 = vld [vmem:[#allocation13_spill] sm:$0xff] }
 0x7b8   : > { %7435 = vmatmul.msk.bf16.gmra.mxu1 %vm595_vm2, %v15712_v17  ;;  %v2696_v49 = vmul.f32 %v2694_v25, %v15714_v5  ;;  %v2733_v25 = vpop.permute.xlu1 %2732 }
 0x7ba   : > { %v2698_v41 = vadd.f32 %v2696_v49, %v11378_v10 }
 0x7bb   : > { %v2651_v34 = vpop.f32.mrf.mxu0  ;;  %v2664_v56 = vpop.f32.mrf.mxu1 }
 0x7bc   : > { %2700 = vst [vmem:[#allocation2 + $0x18] sm:$0xf] %v2698_v41 }
 0x7c6   : > { %7420 = vmatmul.msk.bf16.gmra.mxu0 %vm595_vm2, %v2715_v15 }
 0x7c8   : > { %7436 = vmatmul.msk.bf16.gmra.mxu1 %vm595_vm2, %v2715_v15 }
 0x7d3   : > { %v2675_v53 = vpop.f32.mrf.mxu0 }
 0x7d5   : > { %v2688_v32 = vpop.f32.mrf.mxu1 }
 0x7d6   : > { %v2689_v60 = vadd.f32 %v2688_v32, %v2675_v53  ;;  %7421 = vmatmul.msk.bf16.gmra.mxu0 %vm595_vm2, %v15715_v43 }
 0x7d8   : > { %v2695_v57 = vmul.f32 %v8281_v8, %v2689_v60  ;;  %7437 = vmatmul.msk.bf16.gmra.mxu1 %vm595_vm2, %v15715_v43 }
 0x7da   : > { %v2697_v38 = vmul.f32 %v2695_v57, %v15714_v5 }
 0x7db   : > { %v2677_v37 = vpop.f32.mrf.mxu0 }
 0x7dc   : > { %v2699_v51 = vadd.f32 %v2697_v38, %v11390_v0 }
 0x7dd   : > { %v2690_v30 = vpop.f32.mrf.mxu1 }
 0x7de   : > { %2701 = vst [vmem:[#allocation2 + $0x10] sm:$0xf] %v2699_v51 }
 0x7e3   : > { %v11396_v58 = vpop.f32.mrf.mxu0 }
 0x7e5   : > { %v11398_v22 = vpop.f32.mrf.mxu1 }
 0x7e6   : > { %7422 = vmatmul.msk.bf16.gmra.mxu0 %vm595_vm2, %v15717_v63 }
 0x7e8   : > { %7438 = vmatmul.msk.bf16.gmra.mxu1 %vm595_vm2, %v15717_v63 }
 0x7eb   : > { %v11404_v52 = vpop.f32.mrf.mxu0 }
 0x7ed   : > { %v11406_v6 = vpop.f32.mrf.mxu1 }
 0x7ee   : > { %15718 = vst [vmem:[#allocation59_spill] sm:$0xff] %v11406_v6 }
 0x7f3   : > { %v11408_v14 = vpop.f32.mrf.mxu0 }
 0x7f4   : > { %15719 = vst [vmem:[#allocation63_spill] sm:$0xff] %v11408_v14 }
 0x7f5   : > { %v11410_v23 = vpop.f32.mrf.mxu1 }
 0x7f6   : > { %15720 = vst [vmem:[#allocation66_spill] sm:$0xff] %v11410_v23  ;;  %7423 = vmatmul.msk.bf16.gmra.mxu0 %vm595_vm2, %v2721_v50 }
 0x7f8   : > { %7439 = vmatmul.msk.bf16.gmra.mxu1 %vm595_vm2, %v2721_v50 }
 0x7fb   : > { %v11414_v40 = vpop.f32.mrf.mxu0 }
 0x7fc   : > { %15721 = vst [vmem:[#allocation77_spill] sm:$0xff] %v11414_v40 }
 0x7fd   : > { %v11416_v31 = vpop.f32.mrf.mxu1 }
 0x7fe   : > { %15722 = vst [vmem:[#allocation80_spill] sm:$0xff] %v11416_v31 }
 0x803   : > { %v11418_v44 = vpop.f32.mrf.mxu0 }
 0x804   : > { %15723 = vst [vmem:[#allocation26_spill] sm:$0xff] %v11418_v44 }
 0x805   : > { %v11420_v13 = vpop.f32.mrf.mxu1 }
 0x806   : > { %7424 = vmatmul.msk.bf16.gmra.mxu0 %vm595_vm2, %v15724_v21 }
 0x808   : > { %7440 = vmatmul.msk.bf16.gmra.mxu1 %vm595_vm2, %v15724_v21 }
 0x80b   : > { %v11426_v19 = vpop.f32.mrf.mxu0 }
 0x80c   : > { %15725 = vst [vmem:[#allocation41_spill] sm:$0xff] %v11426_v19 }
 0x80d   : > { %v11428_v36 = vpop.f32.mrf.mxu1 }
 0x813   : > { %v11430_v47 = vpop.f32.mrf.mxu0 }
 0x814   : > { %15726 = vst [vmem:[#allocation28_spill] sm:$0xff] %v11430_v47 }
 0x815   : > { %v11432_v4 = vpop.f32.mrf.mxu1 }
 0x816   : > { %7425 = vmatmul.msk.bf16.gmra.mxu0 %vm595_vm2, %v15727_v3 }
 0x818   : > { %7441 = vmatmul.msk.bf16.gmra.mxu1 %vm595_vm2, %v15727_v3 }
 0x81b   : > { %v11438_v39 = vpop.f32.mrf.mxu0 }
 0x81d   : > { %v11440_v9 = vpop.f32.mrf.mxu1 }
 0x81e   : > { %15728 = vst [vmem:[#allocation82_spill] sm:$0xff] %v11440_v9 }
 0x823   : > { %v11442_v18 = vpop.f32.mrf.mxu0 }
 0x825   : > { %v11444_v48 = vpop.f32.mrf.mxu1 }
 0x826   : > { %7426 = vmatmul.msk.bf16.gmra.mxu0 %vm595_vm2, %v2727_v11 }
 0x828   : > { %7442 = vmatmul.msk.bf16.gmra.mxu1 %vm595_vm2, %v2727_v11  ;;  %v2970_v11 = vmax.f32 %v11396_v58, %v11408_v14 }
 0x82b   : > { %v11448_v12 = vpop.f32.mrf.mxu0 }
 0x82d   : > { %v11450_v26 = vpop.f32.mrf.mxu1 }
 0x82e   : > { %15729 = vst [vmem:[#allocation85_spill] sm:$0xff] %v11450_v26 }
 0x833   : > { %v11452_v55 = vpop.f32.mrf.mxu0 }
 0x835   : > { %v11454_v54 = vpop.f32.mrf.mxu1 }
 0x836   : > { %7427 = vmatmul.msk.bf16.gmra.mxu0 %vm595_vm2, %v15730_v20 }
 0x838   : > { %7443 = vmatmul.msk.bf16.gmra.mxu1 %vm595_vm2, %v15730_v20  ;;  %v2971_v20 = vmax.f32 %v11404_v52, %v11414_v40 }
 0x83b   : > { %v11460_v27 = vpop.f32.mrf.mxu0 }
 0x83d   : > { %v11462_v17 = vpop.f32.mrf.mxu1 }
 0x83e   : > { %15731 = vst [vmem:[#allocation87_spill] sm:$0xff] %v11462_v17 }
 0x843   : > { %v11464_v59 = vpop.f32.mrf.mxu0 }
 0x845   : > { %v11466_v16 = vpop.f32.mrf.mxu1 }
 0x846   : > { %7428 = vmatmul.msk.bf16.gmra.mxu0 %vm595_vm2, %v15732_v62 }
 0x848   : > { %7444 = vmatmul.msk.bf16.gmra.mxu1 %vm595_vm2, %v15732_v62  ;;  %v2972_v62 = vmax.f32 %v2970_v11, %v11418_v44 }
 0x84a   : > { %v2974_v5 = vmax.f32 %v2972_v62, %v11430_v47 }
 0x84b   : > { %v11472_v35 = vpop.f32.mrf.mxu0 }
 0x84c   : > { %v2976_v7 = vmax.f32 %v2974_v5, %v11442_v18 }
 0x84d   : > { %v11474_v29 = vpop.f32.mrf.mxu1 }
 0x84e   : > { %15733 = vst [vmem:[#allocation89_spill] sm:$0xff] %v11474_v29  ;;  %v2978_v14 = vmax.f32 %v2976_v7, %v11452_v55 }
 0x850   : > { %v2980_v11 = vmax.f32 %v2978_v14, %v11464_v59  ;;  %v3008_v14 = vmax.f32 %v11406_v6, %v11416_v31 }
 0x853   : > { %v11476_v46 = vpop.f32.mrf.mxu0 }
 0x854   : > { %v2982_v44 = vmax.f32 %v2980_v11, %v11476_v46 }
 0x855   : > { %v11478_v49 = vpop.f32.mrf.mxu1 }
 0x856   : > { %7429 = vmatmul.msk.bf16.gmra.mxu0 %vm595_vm2, %v2733_v25 }
 0x858   : > { %7445 = vmatmul.msk.bf16.gmra.mxu1 %vm595_vm2, %v2733_v25  ;;  %v2973_v25 = vmax.f32 %v2971_v20, %v11426_v19 }
 0x85a   : > { %v2975_v28 = vmax.f32 %v2973_v25, %v11438_v39 }
 0x85b   : > { %v11482_v61 = vpop.f32.mrf.mxu0 }
 0x85d   : > { %v11484_v41 = vpop.f32.mrf.mxu1 }
 0x863   : > { %v11486_v34 = vpop.f32.mrf.mxu0 }
 0x864   : > { %v2984_v5 = vmax.f32 %v2982_v44, %v11486_v34  ;;  %v3010_v44 = vmax.f32 %v3008_v14, %v11428_v36 }
 0x865   : > { %v11488_v56 = vpop.f32.mrf.mxu1 }
 0x86b   : > { %v11490_v1 = vpop.f32.mrf.mxu0 }
 0x86d   : > { %v11492_v15 = vpop.f32.mrf.mxu1 }
 0x86e   : > { %15734 = vst [vmem:[#allocation93_spill] sm:$0xff] %v11492_v15 }
 0x873   : > { %v11494_v33 = vpop.f32.mrf.mxu0 }
 0x874   : > { %v2986_v7 = vmax.f32 %v2984_v5, %v11494_v33 }
 0x875   : > { %v11496_v2 = vpop.f32.mrf.mxu1 }
 0x87b   : > { %v11498_v45 = vpop.f32.mrf.mxu0 }
 0x87c   : > { %15735 = vst [vmem:[#allocation91_spill] sm:$0xff] %v11498_v45 }
 0x87d   : > { %v11500_v53 = vpop.f32.mrf.mxu1 }
 0x883   : > { %v11502_v42 = vpop.f32.mrf.mxu0 }
 0x885   : > { %v11504_v32 = vpop.f32.mrf.mxu1 }
 0x88b   : > { %v11506_v60 = vpop.f32.mrf.mxu0 }
 0x88d   : > { %v11508_v43 = vpop.f32.mrf.mxu1 }
 0x88e   : > { %15736 = vst [vmem:[#allocation90_spill] sm:$0xff] %v11508_v43 }
 0x893   : > { %v11510_v8 = vpop.f32.mrf.mxu0 }
 0x895   : > { %v11512_v24 = vpop.f32.mrf.mxu1 }
 0x89b   : > { %v11514_v57 = vpop.f32.mrf.mxu0 }
 0x89d   : > { %v11516_v38 = vpop.f32.mrf.mxu1 }
 0x89e   : > { %15737 = vst [vmem:[#allocation65_spill] sm:$0xff] %v11516_v38 }
 0x8a3   : > { %v11518_v37 = vpop.f32.mrf.mxu0 }
 0x8a5   : > { %v11520_v51 = vpop.f32.mrf.mxu1 }
 0x8a6   : > { %15738 = vst [vmem:[#allocation42_spill] sm:$0xff] %v11520_v51 }
 0x8ab   : > { %v11522_v30 = vpop.f32.mrf.mxu0 }
 0x8ad   : > { %v11524_v63 = vpop.f32.mrf.mxu1 }
 0x8ae   : > { %15739 = vst [vmem:[#allocation92_spill] sm:$0xff] %v11524_v63 }
 0x8b3   : > { %v11526_v50 = vpop.f32.mrf.mxu0 }
 0x8b5   : > { %v11528_v21 = vpop.f32.mrf.mxu1 }
 0x8b6   : > { %15740 = vst [vmem:[#allocation61_spill] sm:$0xff] %v11528_v21  ;;  %v2977_v21 = vmax.f32 %v2975_v28, %v11448_v12 }
 0x8b8   : > { %v2979_v40 = vmax.f32 %v2977_v21, %v11460_v27 }
 0x8ba   : > { %v2981_v20 = vmax.f32 %v2979_v40, %v11472_v35  ;;  %v2988_v40 = vmax.f32 %v2986_v7, %v11502_v42 }
 0x8bb   : > { %v11530_v3 = vpop.f32.mrf.mxu0 }
 0x8bc   : > { %v2983_v62 = vmax.f32 %v2981_v20, %v11482_v61  ;;  %v3007_v20 = vmax.f32 %v11398_v22, %v11410_v23 }
 0x8bd   : > { %v11538_v0 = vpop.f32.mrf.mxu1 }
 0x8be   : > { %v2985_v28 = vmax.f32 %v2983_v62, %v11490_v1  ;;  %v2990_v62 = vmax.f32 %v2988_v40, %v11510_v8 }
 0x8c0   : > { %v2987_v21 = vmax.f32 %v2985_v28, %v11498_v45  ;;  %v3009_v28 = vmax.f32 %v3007_v20, %v11420_v13  ;;  %v3012_v45 = vmax.f32 %v3010_v44, %v11440_v9  ;;  %v2992_v31 = vmax.f32 %v2990_v62, %v11518_v37 }
 0x8c2   : > { %v2989_v25 = vmax.f32 %v2987_v21, %v11506_v60  ;;  %v3011_v6 = vmax.f32 %v3009_v28, %v11432_v4  ;;  %v3014_v23 = vmax.f32 %v3012_v45, %v11450_v26  ;;  %v2994_v14 = vmax.f32 %v2992_v31, %v11526_v50 }
 0x8c3   : > { %v11540_v10 = vpop.f32.mrf.mxu0 }
 0x8c4   : > { %v2991_v5 = vmax.f32 %v2989_v25, %v11514_v57  ;;  %v3013_v25 = vmax.f32 %v3011_v6, %v11444_v48  ;;  %v3016_v20 = vmax.f32 %v3014_v23, %v11462_v17  ;;  %v2996_v44 = vmax.f32 %v2994_v14, %v11540_v10 }
 0x8c5   : > { %v11554_v47 = vpop.f32.mrf.mxu1 }
 0x8c6   : > { %v2993_v7 = vmax.f32 %v2991_v5, %v11522_v30  ;;  %v3015_v5 = vmax.f32 %v3013_v25, %v11454_v54  ;;  %v3018_v28 = vmax.f32 %v3016_v20, %v11474_v29 }
 0x8c8   : > { %v2995_v40 = vmax.f32 %v2993_v7, %v11530_v3  ;;  %v3017_v7 = vmax.f32 %v3015_v5, %v11466_v16  ;;  %v3020_v6 = vmax.f32 %v3018_v28, %v11484_v41 }
 0x8ca   : > { %v3019_v23 = vmax.f32 %v3017_v7, %v11478_v49  ;;  %v3022_v14 = vmax.f32 %v3020_v6, %v11492_v15 }
 0x8cb   : > { %v11550_v19 = vpop.f32.mrf.mxu0 }
 0x8cc   : > { %v2997_v62 = vmax.f32 %v2995_v40, %v11550_v19  ;;  %v3021_v25 = vmax.f32 %v3019_v23, %v11488_v56  ;;  %v3024_v20 = vmax.f32 %v3022_v14, %v11500_v53 }
 0x8cd   : > { %v11575_v21 = vpop.f32.mrf.mxu1 }
 0x8d3   : > { %v11564_v11 = vpop.f32.mrf.mxu0 }
 0x8d4   : > { %v2998_v45 = vmax.f32 %v2996_v44, %v11564_v11  ;;  %v3023_v44 = vmax.f32 %v3021_v25, %v11496_v2 }
 0x8d5   : > { %v11595_v17 = vpop.f32.mrf.mxu1 }
 0x8d6   : > { %v3025_v28 = vmax.f32 %v3023_v44, %v11504_v32 }
 0x8d8   : > { %v3027_v7 = vmax.f32 %v3025_v28, %v11512_v24 }
 0x8da   : > { %v3029_v23 = vmax.f32 %v3027_v7, %v11520_v51  ;;  %v15746_v51 = vld [vmem:[#allocation28_spill] sm:$0xff] }
 0x8db   : > { %v11585_v9 = vpop.f32.mrf.mxu0 }
 0x8dc   : > { %v2999_v31 = vmax.f32 %v2997_v62, %v11585_v9  ;;  %v3026_v62 = vmax.f32 %v3024_v20, %v11508_v43 }
 0x8de   : > { %v3000_v26 = vmax.f32 %v2998_v45, %v2999_v31  ;;  %v3028_v45 = vmax.f32 %v3026_v62, %v11516_v38 }
 0x8e0   : > { %v3001_v40 = vrot.slane %v3000_v26, 4  ;;  %v3030_v6 = vmax.f32 %v3028_v45, %v11524_v63  ;;  %v15742_v45 = vld [vmem:[#allocation63_spill] sm:$0xff] }
 0x8e2   : > { %v3002_v29 = vmax.f32 %v3000_v26, %v3001_v40  ;;  %v3032_v14 = vmax.f32 %v3030_v6, %v11538_v0  ;;  %v11607_v26 = vpop.f32.mrf.mxu1  ;;  %v15741_v40 = vld [vmem:[#allocation61_spill] sm:$0xff] }
 0x8e3   : > { %v3031_v25 = vmax.f32 %v3029_v23, %v15741_v40  ;;  %v15743_v23 = vld [vmem:[#allocation77_spill] sm:$0xff] }
 0x8e4   : > { %v3003_v5 = vrot.slane %v3002_v29, 2  ;;  %v3034_v20 = vmax.f32 %v3032_v14, %v11575_v21 }
 0x8e5   : > { %v3033_v44 = vmax.f32 %v3031_v25, %v11554_v47  ;;  %v15744_v25 = vld [vmem:[#allocation26_spill] sm:$0xff] }
 0x8e6   : > { %v3004_v31 = vmax.f32 %v3002_v29, %v3003_v5  ;;  %v3036_v29 = vmax.f32 %v3034_v20, %v11607_v26 }
 0x8e7   : > { %v3035_v62 = vmax.f32 %v3033_v44, %v11595_v17 }
 0x8e8   : > { %v3005_v15 = vrot.slane %v3004_v31, 1 }
 0x8e9   : > { %v3037_v6 = vmax.f32 %v3035_v62, %v3036_v29 }
 0x8ea   : > { %v11611_v43 = vmax.f32 %v3004_v31, %v3005_v15 }
 0x8eb   : > { %v3038_v44 = vrot.slane %v3037_v6, 4 }
 0x8ec   : > { %v3044_v5 = vsub.f32 %v11396_v58, %v11611_v43  ;;  %v3046_v28 = vsub.f32 %v11404_v52, %v11611_v43  ;;  %v3048_v7 = vsub.f32 %v15742_v45, %v11611_v43  ;;  %v3050_v15 = vsub.f32 %v15743_v23, %v11611_v43  ;;  %v15745_v58 = vld [vmem:[#allocation41_spill] sm:$0xff] }
 0x8ed   : > { %v3052_v20 = vsub.f32 %v15744_v25, %v11611_v43  ;;  %v3054_v63 = vsub.f32 %v15745_v58, %v11611_v43  ;;  %v3056_v45 = vsub.f32 %v15746_v51, %v11611_v43  ;;  %v3039_v62 = vmax.f32 %v3037_v6, %v3038_v44 }
 0x8ee   : > { %v3108_v31 = vmul.f32 1.442695, %v3044_v5  ;;  %v3112_v14 = vmul.f32 1.442695, %v3046_v28  ;;  %v3116_v38 = vmul.f32 1.442695, %v3048_v7  ;;  %v3058_v5 = vsub.f32 %v11438_v39, %v11611_v43 }
 0x8ef   : > { %v3120_v52 = vmul.f32 1.442695, %v3050_v15  ;;  %v3124_v29 = vmul.f32 1.442695, %v3052_v20  ;;  %v3128_v28 = vmul.f32 1.442695, %v3054_v63  ;;  %v3060_v7 = vsub.f32 %v11442_v18, %v11611_v43 }
 0x8f0   : > { %8282 = vpow2.f32 %v3108_v31  ;;  %v3062_v15 = vsub.f32 %v11448_v12, %v11611_v43  ;;  %v3132_v51 = vmul.f32 1.442695, %v3056_v45  ;;  %v3040_v6 = vrot.slane %v3039_v62, 2 }
 0x8f1   : > { %8284 = vpow2.f32 %v3112_v14  ;;  %v3066_v14 = vsub.f32 %v11460_v27, %v11611_v43  ;;  %v3136_v18 = vmul.f32 1.442695, %v3058_v5  ;;  %v3068_v25 = vsub.f32 %v11464_v59, %v11611_v43 }
 0x8f2   : > { %8286 = vpow2.f32 %v3116_v38  ;;  %v3064_v38 = vsub.f32 %v11452_v55, %v11611_v43  ;;  %v3140_v12 = vmul.f32 1.442695, %v3060_v7  ;;  %v3070_v55 = vsub.f32 %v11472_v35, %v11611_v43 }
 0x8f3   : > { %8288 = vpow2.f32 %v3120_v52  ;;  %v3144_v58 = vmul.f32 1.442695, %v3062_v15  ;;  %v3072_v52 = vsub.f32 %v11476_v46, %v11611_v43  ;;  %v3074_v59 = vsub.f32 %v11482_v61, %v11611_v43 }
 0x8f4   : > { %8290 = vpow2.f32 %v3124_v29  ;;  %v3148_v45 = vmul.f32 1.442695, %v3064_v38  ;;  %v3041_v29 = vmax.f32 %v3039_v62, %v3040_v6  ;;  %v3076_v7 = vsub.f32 %v11486_v34, %v11611_v43 }
 0x8f5   : > { %8292 = vpow2.f32 %v3128_v28  ;;  %v3152_v28 = vmul.f32 1.442695, %v3066_v14  ;;  %v3156_v35 = vmul.f32 1.442695, %v3068_v25  ;;  %v3078_v46 = vsub.f32 %v11490_v1, %v11611_v43  ;;  %v15747_v14 = vld [vmem:[#allocation91_spill] sm:$0xff] }
 0x8f6   : > { %v11632_v23 = vpop.eup %8282  ;;  %8294 = vpow2.f32 %v3132_v51  ;;  %v3080_v62 = vsub.f32 %v11494_v33, %v11611_v43  ;;  %v3160_v38 = vmul.f32 1.442695, %v3070_v55  ;;  %v3164_v61 = vmul.f32 1.442695, %v3072_v52 }
 0x8f7   : > { %v11636_v31 = vpop.eup %8284  ;;  %8296 = vpow2.f32 %v3136_v18  ;;  %v3042_v6 = vrot.slane %v3041_v29, 1  ;;  %v3082_v18 = vsub.f32 %v15747_v14, %v11611_v43  ;;  %v3168_v25 = vmul.f32 1.442695, %v3074_v59 }
 0x8f8   : > { %v3236_v39 = vadd.f32 %v11636_v31, %v11632_v23  ;;  %v11644_v63 = vpop.eup %8286  ;;  %8298 = vpow2.f32 %v3140_v12  ;;  %v3084_v1 = vsub.f32 %v11502_v42, %v11611_v43  ;;  %v3172_v12 = vmul.f32 1.442695, %v3076_v7 }
 0x8f9   : > { %v11651_v44 = vpop.eup %8288  ;;  %8300 = vpow2.f32 %v3144_v58  ;;  %v3086_v55 = vsub.f32 %v11506_v60, %v11611_v43  ;;  %v3088_v58 = vsub.f32 %v11510_v8, %v11611_v43  ;;  %v3176_v52 = vmul.f32 1.442695, %v3078_v46 }
 0x8fa   : > { %v3237_v20 = vadd.f32 %v11644_v63, %v3236_v39  ;;  %v11658_v5 = vpop.eup %8290  ;;  %8302 = vpow2.f32 %v3148_v45  ;;  %v11688_v59 = vmax.f32 %v3041_v29, %v3042_v6  ;;  %v3100_v7 = vsub.f32 %v11540_v10, %v11611_v43 }
 0x8fb   : > { %v11665_v51 = vpop.eup %8292  ;;  %8304 = vpow2.f32 %v3152_v28  ;;  %v3184_v60 = vmul.f32 1.442695, %v3082_v18  ;;  %v3104_v8 = vsub.f32 %v11564_v11, %v11611_v43  ;;  %v3106_v29 = vsub.f32 %v11585_v9, %v11611_v43  ;;  %v15748_v18 = vld [vmem:[#allocation59_spill] sm:$0xff] }
 0x8fc   : > { %v3238_v27 = vadd.f32 %v11651_v44, %v3237_v20  ;;  %v11672_v34 = vpop.eup %8294  ;;  %8306 = vpow2.f32 %v3156_v35  ;;  %v3196_v10 = vmul.f32 1.442695, %v3088_v58  ;;  %v3045_v11 = vsub.f32 %v11398_v22, %v11688_v59  ;;  %v15749_v58 = vld [vmem:[#allocation66_spill] sm:$0xff] }
 0x8fd   : > { %v11679_v20 = vpop.eup %8296  ;;  %8308 = vpow2.f32 %v3160_v38  ;;  %v3192_v38 = vmul.f32 1.442695, %v3086_v55  ;;  %v3220_v14 = vmul.f32 1.442695, %v3100_v7  ;;  %v3102_v9 = vsub.f32 %v11550_v19, %v11611_v43 }
 0x8fe   : > { %v3239_v15 = vadd.f32 %v11658_v5, %v3238_v27  ;;  %v11685_v45 = vpop.eup %8298  ;;  %8310 = vpow2.f32 %v3164_v61  ;;  %v3180_v27 = vmul.f32 1.442695, %v3080_v62  ;;  %v3232_v22 = vmul.f32 1.442695, %v3106_v29 }
 0x8ff   : > { %v11690_v28 = vpop.eup %8300  ;;  %8312 = vpow2.f32 %v3168_v25  ;;  %v3047_v25 = vsub.f32 %v15748_v18, %v11688_v59  ;;  %v3110_v19 = vmul.f32 1.442695, %v3045_v11  ;;  %v3053_v11 = vsub.f32 %v11420_v13, %v11688_v59 }
 0x900   : > { %v3240_v39 = vadd.f32 %v11665_v51, %v3239_v15  ;;  %v11694_v35 = vpop.eup %8302  ;;  %8314 = vpow2.f32 %v3172_v12  ;;  %v3188_v15 = vmul.f32 1.442695, %v3084_v1  ;;  %v3228_v12 = vmul.f32 1.442695, %v3104_v8  ;;  %v15750_v8 = vld [vmem:[#allocation80_spill] sm:$0xff] }
 0x901   : > { %v11699_v62 = vpop.eup %8304  ;;  %8316 = vpow2.f32 %v3176_v52  ;;  %v3049_v52 = vsub.f32 %v15749_v58, %v11688_v59  ;;  %v3094_v13 = vsub.f32 %v11522_v30, %v11611_v43 }
 0x902   : > { %v3241_v33 = vadd.f32 %v11672_v34, %v3240_v39  ;;  %v11703_v61 = vpop.eup %8306  ;;  %8318 = vpow2.f32 %v3180_v27 }
 0x903   : > { %v11708_v6 = vpop.eup %8308  ;;  %8320 = vpow2.f32 %v3184_v60 }
 0x904   : > { %v3242_v42 = vadd.f32 %v11679_v20, %v3241_v33  ;;  %v11712_v1 = vpop.eup %8310  ;;  %8322 = vpow2.f32 %v3188_v15  ;;  %v3051_v15 = vsub.f32 %v15750_v8, %v11688_v59 }
 0x905   : > { %v11717_v55 = vpop.eup %8312  ;;  %8324 = vpow2.f32 %v3192_v38  ;;  %v3098_v38 = vsub.f32 %v11530_v3, %v11611_v43 }
 0x906   : > { %v3243_v46 = vadd.f32 %v11685_v45, %v3242_v42  ;;  %v11721_v27 = vpop.eup %8314  ;;  %v3096_v42 = vsub.f32 %v11526_v50, %v11611_v43  ;;  %8326 = vpow2.f32 %v3196_v10 }
 0x907   : > { %v11726_v60 = vpop.eup %8316  ;;  %8328 = vpow2.f32 %v3220_v14  ;;  %v3118_v14 = vmul.f32 1.442695, %v3049_v52  ;;  %v3216_v52 = vmul.f32 1.442695, %v3098_v38  ;;  %v15751_v38 = vld [vmem:[#allocation82_spill] sm:$0xff] }
 0x908   : > { %v3244_v39 = vadd.f32 %v11690_v28, %v3243_v46  ;;  %v3114_v46 = vmul.f32 1.442695, %v3047_v25  ;;  %v11730_v29 = vpop.eup %8318  ;;  %8330 = vpow2.f32 %v3228_v12  ;;  %v3092_v25 = vsub.f32 %v11518_v37, %v11611_v43 }
 0x909   : > { %v11735_v10 = vpop.eup %8320  ;;  %8332 = vpow2.f32 %v3232_v22  ;;  %v3122_v12 = vmul.f32 1.442695, %v3051_v15 }
 0x90a   : > { %v3245_v33 = vadd.f32 %v11694_v35, %v3244_v39  ;;  %v3224_v39 = vmul.f32 1.442695, %v3102_v9  ;;  %v11739_v18 = vpop.eup %8322  ;;  %8334 = vpow2.f32 %v3110_v19  ;;  %v3055_v9 = vsub.f32 %v11428_v36, %v11688_v59 }
 0x90b   : > { %v11744_v3 = vpop.eup %8324  ;;  %8336 = vpow2.f32 %v3114_v46  ;;  %v3126_v19 = vmul.f32 1.442695, %v3053_v11  ;;  %v3090_v36 = vsub.f32 %v11514_v57, %v11611_v43  ;;  %v3204_v15 = vmul.f32 1.442695, %v3092_v25 }
 0x90c   : > { %v3246_v7 = vadd.f32 %v11699_v62, %v3245_v33  ;;  %v3212_v33 = vmul.f32 1.442695, %v3096_v42  ;;  %v11748_v22 = vpop.eup %8326  ;;  %8338 = vpow2.f32 %v3224_v39  ;;  %v3059_v39 = vsub.f32 %v15751_v38, %v11688_v59 }
 0x90d   : > { %v11753_v42 = vpop.eup %8328  ;;  %8340 = vpow2.f32 %v3118_v14  ;;  %v3326_v43 = vpack.c.bf16 %v11717_v55, %v11712_v1  ;;  %v3061_v14 = vsub.f32 %v11444_v48, %v11688_v59  ;;  %v3065_v38 = vsub.f32 %v11454_v54, %v11688_v59 }
 0x90e   : > { %v3247_v50 = vadd.f32 %v11703_v61, %v3246_v7  ;;  %v3057_v7 = vsub.f32 %v11432_v4, %v11688_v59  ;;  %v11757_v8 = vpop.eup %8330  ;;  %8342 = vpow2.f32 %v3212_v33  ;;  %v3208_v4 = vmul.f32 1.442695, %v3094_v13 }
 0x90f   : > { %v11762_v46 = vpop.eup %8332  ;;  %8344 = vpow2.f32 %v3122_v12  ;;  %v3200_v12 = vmul.f32 1.442695, %v3090_v36  ;;  %3350 = vmatpush.bf16.msra.mxu2 %v3326_v43 }
 0x910   : > { %v3248_v58 = vadd.f32 %v11708_v6, %v3247_v50  ;;  %v3130_v50 = vmul.f32 1.442695, %v3055_v9  ;;  %8346 = vpow2.f32 %v3216_v52  ;;  %v3134_v25 = vmul.f32 1.442695, %v3057_v7 }
 0x911   : > { %8348 = vpow2.f32 %v3126_v19  ;;  %v3342_v33 = vpack.c.bf16 %v11762_v46, %v11757_v8 }
 0x912   : > { %v3249_v37 = vadd.f32 %v11712_v1, %v3248_v58  ;;  %v11766_v58 = vpop.eup %8334  ;;  %8350 = vpow2.f32 %v3204_v15  ;;  %v3324_v15 = vpack.c.bf16 %v11708_v6, %v11703_v61  ;;  %v15754_v61 = vld [vmem:[#allocation87_spill] sm:$0xff] }
 0x913   : > { %v11771_v57 = vpop.eup %8336  ;;  %8352 = vpow2.f32 %v3130_v50  ;;  %3363 = vmatpush.bf16.msra.mxu3 %v3342_v33  ;;  %v3067_v6 = vsub.f32 %v15754_v61, %v11688_v59 }
 0x914   : > { %v3250_v30 = vadd.f32 %v11717_v55, %v3249_v37  ;;  %15752 = vst [vmem:[#allocation46_spill] sm:$0xff] %v11771_v57  ;;  %v11777_v9 = vpop.eup %8338  ;;  %v3273_v52 = vadd.f32 %v11771_v57, %v11766_v58  ;;  %v15753_v55 = vld [vmem:[#allocation85_spill] sm:$0xff]  ;;  %v3138_v37 = vmul.f32 1.442695, %v3059_v39  ;;  %8354 = vpow2.f32 %v3208_v4  ;;  %3351 = vmatpush.bf16.msra.mxu2 %v3324_v15 }
 0x915   : > { %v11782_v1 = vpop.eup %8340  ;;  %v3063_v48 = vsub.f32 %v15753_v55, %v11688_v59  ;;  %8356 = vpow2.f32 %v3134_v25  ;;  %v3340_v39 = vpack.c.bf16 %v11777_v9, %v11753_v42  ;;  %v3154_v61 = vmul.f32 1.442695, %v3067_v6 }
 0x916   : > { %v3251_v11 = vadd.f32 %v11721_v27, %v3250_v30  ;;  %v11786_v7 = vpop.eup %8342  ;;  %v3274_v36 = vadd.f32 %v11782_v1, %v3273_v52  ;;  %8358 = vpow2.f32 %v3200_v12  ;;  %v3322_v52 = vpack.c.bf16 %v11699_v62, %v11694_v35 }
 0x917   : > { %v11792_v30 = vpop.eup %8344  ;;  %8360 = vpow2.f32 %v3138_v37  ;;  %v3146_v54 = vmul.f32 1.442695, %v3063_v48  ;;  %3364 = vmatpush.bf16.msra.mxu3 %v3340_v39  ;;  %v3150_v37 = vmul.f32 1.442695, %v3065_v38  ;;  %v3077_v38 = vsub.f32 %v11488_v56, %v11688_v59 }
 0x918   : > { %v3252_v13 = vadd.f32 %v11726_v60, %v3251_v11  ;;  %v3142_v11 = vmul.f32 1.442695, %v3061_v14  ;;  %v11798_v50 = vpop.eup %8346  ;;  %v3275_v43 = vadd.f32 %v11792_v30, %v3274_v36  ;;  %3352 = vmatpush.bf16.msra.mxu2 %v3322_v52  ;;  %v3320_v52 = vpack.c.bf16 %v11690_v28, %v11685_v45  ;;  %v15757_v45 = vld [vmem:[#allocation90_spill] sm:$0xff] }
 0x919   : > { %v11802_v33 = vpop.eup %8348  ;;  %v3338_v48 = vpack.c.bf16 %v11798_v50, %v11786_v7  ;;  %v3083_v56 = vsub.f32 %v11500_v53, %v11688_v59  ;;  %v3105_v57 = vsub.f32 %v11595_v17, %v11688_v59  ;;  %v3107_v28 = vsub.f32 %v11607_v26, %v11688_v59 }
 0x91a   : > { %v3253_v19 = vadd.f32 %v11730_v29, %v3252_v13  ;;  %v8351_v14 = vpop.eup %8350  ;;  %v3069_v13 = vsub.f32 %v11466_v16, %v11688_v59  ;;  %v3276_v12 = vadd.f32 %v11802_v33, %v3275_v43  ;;  %8362 = vpow2.f32 %v3142_v11  ;;  %v15756_v11 = vld [vmem:[#allocation93_spill] sm:$0xff] }
 0x91b   : > { %v11812_v55 = vpop.eup %8352  ;;  %v3073_v16 = vsub.f32 %v11478_v49, %v11688_v59  ;;  %v3079_v43 = vsub.f32 %v15756_v11, %v11688_v59  ;;  %8364 = vpow2.f32 %v3146_v54  ;;  %3365 = vmatpush.bf16.msra.mxu3 %v3338_v48 }
 0x91c   : > { %v3254_v4 = vadd.f32 %v11735_v10, %v3253_v19  ;;  %v15755_v19 = vld [vmem:[#allocation89_spill] sm:$0xff]  ;;  %v8355_v15 = vpop.eup %8354  ;;  %v3277_v35 = vadd.f32 %v11812_v55, %v3276_v12  ;;  %8366 = vpow2.f32 %v3150_v37  ;;  %v3158_v54 = vmul.f32 1.442695, %v3069_v13  ;;  %3353 = vmatpush.bf16.msra.mxu2 %v3320_v52 }
 0x91d   : > { %v3071_v36 = vsub.f32 %v15755_v19, %v11688_v59  ;;  %v11824_v62 = vpop.eup %8356  ;;  %v3336_v6 = vpack.c.bf16 %v8355_v15, %v8351_v14  ;;  %8368 = vpow2.f32 %v3154_v61  ;;  %v3166_v53 = vmul.f32 1.442695, %v3073_v16 }
 0x91e   : > { %v3255_v25 = vadd.f32 %v11739_v18, %v3254_v4  ;;  %v3075_v4 = vsub.f32 %v11484_v41, %v11688_v59  ;;  %v3081_v41 = vsub.f32 %v11496_v2, %v11688_v59  ;;  %v3278_v12 = vadd.f32 %v11824_v62, %v3277_v35 }
 0x91f   : > { %v3162_v11 = vmul.f32 1.442695, %v3071_v36  ;;  %3366 = vmatpush.bf16.msra.mxu3 %v3336_v6  ;;  %v3318_v36 = vpack.c.bf16 %v11679_v20, %v11672_v34  ;;  %v3101_v52 = vsub.f32 %v11554_v47, %v11688_v59  ;;  %8370 = vpow2.f32 %v3158_v54 }
 0x920   : > { %v3256_v39 = vadd.f32 %v11744_v3, %v3255_v25  ;;  %v8359_v25 = vpop.eup %8358  ;;  %v3170_v37 = vmul.f32 1.442695, %v3075_v4  ;;  %v3103_v34 = vsub.f32 %v11575_v21, %v11688_v59  ;;  %v3178_v20 = vmul.f32 1.442695, %v3079_v43 }
 0x921   : > { %v11836_v19 = vpop.eup %8360  ;;  %v3334_v17 = vpack.c.bf16 %v8359_v25, %v11748_v22  ;;  %8372 = vpow2.f32 %v3162_v11  ;;  %3354 = vmatpush.bf16.msra.mxu2 %v3318_v36  ;;  %v3230_v47 = vmul.f32 1.442695, %v3105_v57  ;;  %v3097_v21 = vsub.f32 %v15741_v40, %v11688_v59  ;;  %v15759_v36 = vld [vmem:[#allocation92_spill] sm:$0xff] }
 0x922   : > { %v3257_v49 = vadd.f32 %v11748_v22, %v3256_v39  ;;  %v3085_v39 = vsub.f32 %v11504_v32, %v11688_v59  ;;  %v3279_v2 = vadd.f32 %v11836_v19, %v3278_v12  ;;  %v11843_v35 = vpop.eup %8362  ;;  %8374 = vpow2.f32 %v3166_v53 }
 0x923   : > { %v11852_v12 = vpop.eup %8364  ;;  %3367 = vmatpush.bf16.msra.mxu3 %v3334_v17  ;;  %8376 = vpow2.f32 %v3170_v37  ;;  %v3234_v54 = vmul.f32 1.442695, %v3107_v28  ;;  %v3332_v57 = vpack.c.bf16 %v11744_v3, %v11739_v18  ;;  %v3222_v43 = vmul.f32 1.442695, %v3101_v52  ;;  %v15758_v28 = vld [vmem:[#allocation42_spill] sm:$0xff] }
 0x924   : > { %v3258_v48 = vadd.f32 %v8359_v25, %v3257_v49  ;;  %v3280_v49 = vadd.f32 %v11843_v35, %v3279_v2  ;;  %v11860_v61 = vpop.eup %8366  ;;  %v3089_v25 = vsub.f32 %v11512_v24, %v11688_v59  ;;  %v3226_v11 = vmul.f32 1.442695, %v3103_v34 }
 0x925   : > { %v3314_v3 = vpack.c.bf16 %v11651_v44, %v11644_v63  ;;  %v3093_v53 = vsub.f32 %v15758_v28, %v11688_v59  ;;  %v3095_v52 = vsub.f32 %v15759_v36, %v11688_v59  ;;  %v3190_v63 = vmul.f32 1.442695, %v3085_v39 }
 0x926   : > { %v3259_v13 = vadd.f32 %v8351_v14, %v3258_v48  ;;  %v3174_v14 = vmul.f32 1.442695, %v3077_v38  ;;  %v3281_v4 = vadd.f32 %v11852_v12, %v3280_v49  ;;  %v11868_v38 = vpop.eup %8368  ;;  %v3182_v48 = vmul.f32 1.442695, %v3081_v41 }
 0x927   : > { %3368 = vmatpush.bf16.msra.mxu3 %v3332_v57  ;;  %v3214_v49 = vmul.f32 1.442695, %v3097_v21  ;;  %v3328_v39 = vpack.c.bf16 %v11726_v60, %v11721_v27  ;;  %v3206_v34 = vmul.f32 1.442695, %v3093_v53  ;;  %v15763_v21 = vld [vmem:[#allocation71_spill] sm:$0xff] }
 0x928   : > { %v3260_v16 = vadd.f32 %v8355_v15, %v3259_v13  ;;  %v3282_v22 = vadd.f32 %v11860_v61, %v3281_v4  ;;  %v3316_v15 = vpack.c.bf16 %v11665_v51, %v11658_v5  ;;  %8378 = vpow2.f32 %v3174_v14  ;;  %v11878_v5 = vpop.eup %8370 }
 0x929   : > { %v3099_v51 = vsub.f32 %v11538_v0, %v11688_v59  ;;  %8380 = vpow2.f32 %v3178_v20  ;;  %v8373_v40 = vpop.eup %8372  ;;  %v3186_v13 = vmul.f32 1.442695, %v3083_v56  ;;  %v3330_v0 = vpack.c.bf16 %v11735_v10, %v11730_v29 }
 0x92a   : > { %v3261_v26 = vadd.f32 %v11786_v7, %v3260_v16  ;;  %v3283_v6 = vadd.f32 %v11868_v38, %v3282_v22  ;;  %3355 = vmatpush.bf16.msra.mxu2 %v3316_v15  ;;  %8382 = vpow2.f32 %v3230_v47  ;;  %v15760_v16 = vsub.f32 %v15757_v45, %v11688_v59  ;;  %v15762_v45 = vld [vmem:[#allocation65_spill] sm:$0xff] }
 0x92b   : > { %8384 = vpow2.f32 %v3234_v54  ;;  %v3218_v44 = vmul.f32 1.442695, %v3099_v51  ;;  %3369 = vmatpush.bf16.msra.mxu3 %v3330_v0  ;;  %v3210_v22 = vmul.f32 1.442695, %v3095_v52  ;;  %v3347_v54 = vrot.slane %v15763_v21, 2 }
 0x92c   : > { %v3262_v7 = vadd.f32 %v11798_v50, %v3261_v26  ;;  %v3284_v18 = vadd.f32 %v11878_v5, %v3283_v6  ;;  %v8375_v50 = vpop.eup %8374  ;;  %8386 = vpow2.f32 %v3222_v43  ;;  %v3194_v32 = vmul.f32 1.442695, %v15760_v16 }
 0x92d   : > { %v8377_v41 = vpop.eup %8376  ;;  %8388 = vpow2.f32 %v3226_v11  ;;  %v3091_v26 = vsub.f32 %v15762_v45, %v11688_v59  ;;  %v3198_v57 = vmul.f32 1.442695, %v3089_v25  ;;  %v3315_v16 = vpack.c.bf16 %v11792_v30, %v11782_v1 }
 0x92e   : > { %v3263_v2 = vadd.f32 %v11753_v42, %v3262_v7  ;;  %v3285_v42 = vadd.f32 %v8373_v40, %v3284_v18  ;;  %3356 = vmatpush.bf16.msra.mxu2 %v3314_v3  ;;  %v11896_v56 = vpop.eup %8378  ;;  %8390 = vpow2.f32 %v3182_v48  ;;  %v3327_v14 = vpack.c.bf16 %v8377_v41, %v8375_v50 }
 0x92f   : > { %v11901_v17 = vpop.eup %8380  ;;  %8392 = vpow2.f32 %v3186_v13  ;;  %3370 = vmatpush.bf16.msra.mxu3 %v3328_v39  ;;  %v3325_v7 = vpack.c.bf16 %v8373_v40, %v11878_v5  ;;  %v3202_v48 = vmul.f32 1.442695, %v3091_v26  ;;  %v3323_v5 = vpack.c.bf16 %v11868_v38, %v11860_v61 }
 0x930   : > { %v3264_v37 = vadd.f32 %v11777_v9, %v3263_v2  ;;  %v3286_v10 = vadd.f32 %v8375_v50, %v3285_v42  ;;  %v3312_v9 = vpack.c.bf16 %v11636_v31, %v11632_v23  ;;  %v11908_v4 = vpop.eup %8382  ;;  %8394 = vpow2.f32 %v3214_v49  ;;  %v15761_v31 = vld [vmem:[#allocation69_spill] sm:$0xff] }
 0x931   : > { %v11913_v23 = vpop.eup %8384  ;;  %v3346_v47 = vrot.slane %v15761_v31, 2  ;;  %8396 = vpow2.f32 %v3218_v44  ;;  %v3321_v13 = vpack.c.bf16 %v11852_v12, %v11843_v35  ;;  %v3319_v38 = vpack.c.bf16 %v11836_v19, %v11824_v62  ;;  %v15764_v35 = vld [vmem:[#allocation24_spill] sm:$0xff]  ;;  %v15766_v62 = vld [vmem:[#allocation9_spill] sm:$0xff] }
 0x932   : > { %v3265_v29 = vadd.f32 %v11757_v8, %v3264_v37  ;;  %v3287_v20 = vadd.f32 %v8377_v41, %v3286_v10  ;;  %3357 = vmatpush.bf16.msra.mxu2 %v3312_v9  ;;  %v8387_v27 = vpop.eup %8386  ;;  %8398 = vpow2.f32 %v3190_v63  ;;  %3371 = vmatmul.bf16.vlgmr.msra.gmra.mxu3 %v3347_v54  ;;  %v3317_v63 = vpack.c.bf16 %v11812_v55, %v11802_v33  ;;  %v15765_v12 = vld [vmem:[#allocation8_spill] sm:$0xff] }
 0x933   : > { %v8389_v15 = vpop.eup %8388  ;;  %8400 = vpow2.f32 %v3194_v32  ;;  %v489_v19 = vadd.f32 %v15766_v62, %v15764_v35  ;;  %v3329_v26 = vpack.c.bf16 %v11901_v17, %v11896_v56 }
 0x934   : > { %v11911_v8 = vadd.f32 %v11762_v46, %v3265_v29  ;;  %v3288_v60 = vadd.f32 %v11896_v56, %v3287_v20  ;;  %v3343_v46 = vpack.c.bf16 %v11913_v23, %v11908_v4  ;;  %v8391_v43 = vpop.eup %8390  ;;  %8402 = vpow2.f32 %v3206_v34 }
 0x935   : > { %3358 = vmatmul.bf16.vlgmr.msra.gmra.mxu2 %v3346_v47  ;;  %v8393_v51 = vpop.eup %8392  ;;  %8404 = vpow2.f32 %v3210_v22  ;;  %v3341_v59 = vpack.c.bf16 %v8389_v15, %v8387_v27  ;;  %v450_v29 = vadd.f32 %v15765_v12, %v15764_v35  ;;  %v11949_v20 = vpack.c.bf16 %v489_v19, %v489_v19 }
 0x936   : > { %3376 = vmatpush.bf16.msrb.mxu2 %v3327_v14  ;;  %v3289_v6 = vadd.f32 %v11901_v17, %v3288_v60  ;;  %3389 = vmatpush.bf16.msrb.mxu3 %v3343_v46  ;;  %v8395_v11 = vpop.eup %8394  ;;  %8406 = vpow2.f32 %v3198_v57  ;;  %v3331_v55 = vpack.c.bf16 %v8393_v51, %v8391_v43  ;;  %v15768_v14 = vld [vmem:[#allocation46_spill] sm:$0xff]  ;;  %v15772_v60 = vld [vmem:[#allocation20_spill] sm:$0xff] }
 0x937   : > { %v8397_v25 = vpop.eup %8396  ;;  %8408 = vpow2.f32 %v3202_v48  ;;  %v11945_v39 = vpack.c.bf16 %v450_v29, %v450_v29  ;;  %v3313_v34 = vpack.c.bf16 %v15768_v14, %v11766_v58  ;;  %15769 = vst [vmem:[#allocation39_spill] sm:$0xff] %v11949_v20  ;;  %v3502_v58 = vsel %vm644_vm1, %v11949_v20, 0  ;;  %v15786_v14 = vld [vmem:[#allocation40_spill] sm:$0xff] }
 0x938   : > { %v3290_v24 = vadd.f32 %v8391_v43, %v3289_v6  ;;  %v8399_v40 = vpop.eup %8398  ;;  %v3339_v28 = vpack.c.bf16 %v8397_v25, %v8395_v11 }
 0x939   : > { %v8401_v18 = vpop.eup %8400  ;;  %15767 = vst [vmem:[#allocation29_spill] sm:$0xff] %v11945_v39  ;;  %v3499_v1 = vsel %vm644_vm1, %v11945_v39, 0 }
 0x93a   : > { %3377 = vmatpush.bf16.msrb.mxu2 %v3325_v7  ;;  %v3291_v2 = vadd.f32 %v8393_v51, %v3290_v24  ;;  %3390 = vmatpush.bf16.msrb.mxu3 %v3341_v59  ;;  %v8403_v3 = vpop.eup %8402  ;;  %v3333_v9 = vpack.c.bf16 %v8401_v18, %v8399_v40  ;;  %v15776_v51 = vld [vmem:[#allocation5_spill] sm:$0xff] }
 0x93b   : > { %v8405_v53 = vpop.eup %8404 }
 0x93c   : > { %v3292_v50 = vadd.f32 %v8399_v40, %v3291_v2  ;;  %v8407_v41 = vpop.eup %8406  ;;  %v3337_v49 = vpack.c.bf16 %v8405_v53, %v8403_v3 }
 0x93d   : > { %v8409_v61 = vpop.eup %8408 }
 0x93e   : > { %3378 = vmatpush.bf16.msrb.mxu2 %v3323_v5  ;;  %v3293_v0 = vadd.f32 %v8401_v18, %v3292_v50  ;;  %3391 = vmatpush.bf16.msrb.mxu3 %v3339_v28  ;;  %v3335_v52 = vpack.c.bf16 %v8409_v61, %v8407_v41  ;;  %v15779_v18 = vld [vmem:[#allocation36_spill] sm:$0xff] }
 0x940   : > { %v3294_v37 = vadd.f32 %v8407_v41, %v3293_v0  ;;  %v15780_v0 = vld [vmem:[#allocation12_spill] sm:$0xff]  ;;  %v15781_v41 = vld [vmem:[#allocation74_spill] sm:$0xff] }
 0x942   : > { %3379 = vmatpush.bf16.msrb.mxu2 %v3321_v13  ;;  %v3295_v42 = vadd.f32 %v8409_v61, %v3294_v37  ;;  %3392 = vmatpush.bf16.msrb.mxu3 %v3337_v49 }
 0x944   : > { %v3296_v36 = vadd.f32 %v8403_v3, %v3295_v42 }
 0x946   : > { %3380 = vmatpush.bf16.msrb.mxu2 %v3319_v38  ;;  %v3297_v44 = vadd.f32 %v8405_v53, %v3296_v36  ;;  %3393 = vmatpush.bf16.msrb.mxu3 %v3335_v52 }
 0x948   : > { %v3298_v10 = vadd.f32 %v8395_v11, %v3297_v44 }
 0x94a   : > { %3381 = vmatpush.bf16.msrb.mxu2 %v3317_v63  ;;  %v3299_v32 = vadd.f32 %v8397_v25, %v3298_v10  ;;  %3394 = vmatpush.bf16.msrb.mxu3 %v3333_v9 }
 0x94c   : > { %v3300_v33 = vadd.f32 %v8387_v27, %v3299_v32  ;;  %v15770_v27 = vld [vmem:[#allocation47_spill] sm:$0xff] }
 0x94e   : > { %3382 = vmatpush.bf16.msrb.mxu2 %v3315_v16  ;;  %v3301_v45 = vadd.f32 %v8389_v15, %v3300_v33  ;;  %3395 = vmatpush.bf16.msrb.mxu3 %v3331_v55  ;;  %v3267_v15 = vrot.slane %v11911_v8, 4  ;;  %v15785_v33 = vld [vmem:[#allocation88_spill] sm:$0xff] }
 0x950   : > { %v3302_v30 = vadd.f32 %v11908_v4, %v3301_v45  ;;  %v3421_v4 = vpop.permute.xlu1 %3420 }
 0x952   : > { %3383 = vmatpush.bf16.msrb.mxu2 %v3313_v34  ;;  %v3303_v22 = vadd.f32 %v11913_v23, %v3302_v30  ;;  %3396 = vmatpush.bf16.msrb.mxu3 %v3329_v26  ;;  %v15771_v23 = vld [vmem:[#allocation21_spill] sm:$0xff] }
 0x954   : > { %v3304_v5 = vrot.slane %v3303_v22, 4 }
 0x955   : > { %3384 = vmatmul.bf16.vlgmr.msrb.gmra.mxu2 %v3346_v47  ;;  %3397 = vmatmul.bf16.vlgmr.msrb.gmra.mxu3 %v3347_v54  ;;  %v3268_v54 = vadd.f32 %v3267_v15, %v11911_v8 }
 0x956   : > { %3511 = vmatpush.bf16.msra.mxu2 %v3499_v1  ;;  %3600 = vmatpush.bf16.msra.mxu3 %v3502_v58  ;;  %v3305_v50 = vadd.f32 %v3304_v5, %v3303_v22  ;;  %v15802_v5 = vld [vmem:[#allocation6_spill] sm:$0xff] }
 0x957   : > { %v3269_v57 = vrot.slane %v3268_v54, 2 }
 0x958   : > { %v3427_v56 = vpop.permute.xlu1 %3426  ;;  %v3306_v49 = vrot.slane %v3305_v50, 2 }
 0x959   : > { %v3270_v7 = vadd.f32 %v3269_v57, %v3268_v54 }
 0x95a   : > { %v3307_v61 = vadd.f32 %v3306_v49, %v3305_v50 }
 0x95b   : > { %v3271_v6 = vrot.slane %v3270_v7, 1 }
 0x95c   : > { %v3308_v36 = vrot.slane %v3307_v61, 1 }
 0x95d   : > { %v3272_v48 = vadd.f32 %v3271_v6, %v3270_v7 }
 0x95e   : > { %v3309_v52 = vadd.f32 %v3308_v36, %v3307_v61  ;;  %v15808_v36 = vld [vmem:[#allocation16_spill] sm:$0xff] }
 0x95f   : > { %8410 = vrcp.f32 %v3272_v48  ;;  %v15798_v48 = vld [vmem:[#allocation22_spill] sm:$0xff] }
 0x960   : > { %v3433_v17 = vpop.permute.xlu1 %3432  ;;  %8412 = vrcp.f32 %v3309_v52 }
 0x965   : > { %7446 = vmatmul.msk.bf16.vlgmr.msra.gmra.mxu2 %vm595_vm2, %v15770_v27  ;;  %7462 = vmatmul.msk.bf16.vlgmr.msra.gmra.mxu3 %vm595_vm2, %v15770_v27  ;;  %v8411_v25 = vpop.eup %8410  ;;  %v15790_v27 = vld [vmem:[#allocation43_spill] sm:$0xff] }
 0x966   : > { %v8413_v29 = vpop.eup %8412 }
 0x968   : > { %v11971_v31 = vpop.permute.xlu1 %3438 }
 0x970   : > { %v11975_v47 = vpop.permute.xlu1 %3444 }
 0x975   : > { %7447 = vmatmul.msk.bf16.gmra.mxu2 %vm595_vm2, %v3421_v4  ;;  %7463 = vmatmul.msk.bf16.gmra.mxu3 %vm595_vm2, %v3421_v4 }
 0x978   : > { %v11981_v46 = vpop.permute.xlu1 %378 }
 0x979   : > { %15773 = vst [vmem:[#allocation17_spill] sm:$0xff] %v11981_v46 }
 0x980   : > { %v11984_v21 = vpop.permute.xlu1 %4124 }
 0x981   : > { %15774 = vst [vmem:[#allocation44_spill] sm:$0xff] %v11984_v21 }
 0x985   : > { %7448 = vmatmul.msk.bf16.gmra.mxu2 %vm595_vm2, %v15771_v23  ;;  %7464 = vmatmul.msk.bf16.gmra.mxu3 %vm595_vm2, %v15771_v23 }
 0x988   : > { %v11989_v43 = vpop.permute.xlu1 %4130 }
 0x989   : > { %15775 = vst [vmem:[#allocation23_spill] sm:$0xff] %v11989_v43 }
 0x990   : > { %v11993_v11 = vpop.permute.xlu1 %4136 }
 0x991   : > { %15777 = vst [vmem:[#allocation38_spill] sm:$0xff] %v11993_v11 }
 0x995   : > { %7449 = vmatmul.msk.bf16.gmra.mxu2 %vm595_vm2, %v15772_v60  ;;  %7465 = vmatmul.msk.bf16.gmra.mxu3 %vm595_vm2, %v15772_v60 }
 0x998   : > { %v11997_v2 = vpop.permute.xlu1 %4142 }
 0x999   : > { %15778 = vst [vmem:[#allocation25_spill] sm:$0xff] %v11997_v2 }
 0x9a0   : > { %v12005_v38 = vpop.permute.xlu1 %4148 }
 0x9a1   : > { %15782 = vst [vmem:[#allocation18_spill] sm:$0xff] %v12005_v38 }
 0x9a5   : > { %7450 = vmatmul.msk.bf16.gmra.mxu2 %vm595_vm2, %v3427_v56  ;;  %7466 = vmatmul.msk.bf16.gmra.mxu3 %vm595_vm2, %v3427_v56 }
 0x9a8   : > { %v12009_v63 = vpop.permute.xlu1 %4836 }
 0x9a9   : > { %15783 = vst [vmem:[#allocation27_spill] sm:$0xff] %v12009_v63 }
 0x9b0   : > { %v12012_v9 = vpop.permute.xlu1 %4842 }
 0x9b1   : > { %15784 = vst [vmem:[#allocation13_spill] sm:$0xff] %v12012_v9  ;;  %v7648_v9 = vpop.permute.xlu0 %7647 }
 0x9b2   : > { %v7650_v63 = vunpack.i.h.bf16 %v7648_v9  ;;  %v7649_v38 = vunpack.i.l.bf16 %v7648_v9 }
 0x9b4   : > { %v6445_v21 = vsel %vm6444_vm6, %v7649_v38, %v7650_v63 }
 0x9b5   : > { %7451 = vmatmul.msk.bf16.gmra.mxu2 %vm595_vm2, %v15776_v51  ;;  %7467 = vmatmul.msk.bf16.gmra.mxu3 %vm595_vm2, %v15776_v51  ;;  %v3372_v24 = vpop.f32.mrf.mxu3 }
 0x9b8   : > { %v3359_v8 = vpop.f32.mrf.mxu2  ;;  %v12022_v45 = vpop.permute.xlu1 %4848 }
 0x9b9   : > { %v3373_v59 = vadd.f32 %v3372_v24, %v3359_v8  ;;  %15787 = vst [vmem:[#allocation61_spill] sm:$0xff] %v12022_v45 }
 0x9bb   : > { %v3402_v40 = vmul.f32 %v8411_v25, %v3373_v59 }
 0x9bd   : > { %v3404_v3 = vmul.f32 %v3402_v40, %v15779_v18  ;;  %v3374_v13 = vpop.f32.mrf.mxu3 }
 0x9bf   : > { %v3408_v53 = vrot.slane %v3404_v3, 4 }
 0x9c0   : > { %v3361_v28 = vpop.f32.mrf.mxu2  ;;  %v12031_v58 = vpop.permute.xlu1 %4854 }
 0x9c1   : > { %v3412_v37 = vadd.f32 %v3408_v53, %v15781_v41  ;;  %15789 = vst [vmem:[#allocation77_spill] sm:$0xff] %v12031_v58 }
 0x9c3   : > { %3414 = vst [vmem:[#allocation2 + $0x18] sm:$0xf0] %v3412_v37 }
 0x9c5   : > { %7452 = vmatmul.msk.bf16.gmra.mxu2 %vm595_vm2, %v15780_v0  ;;  %7468 = vmatmul.msk.bf16.gmra.mxu3 %vm595_vm2, %v15780_v0 }
 0x9ca   : > { %v6267_v42 = vld [vmem:[#allocation2 + $0x18] sm:$0xff] }
 0x9cb   : > { %6285 = vrot.lane.b32.xlu1 %v6267_v42, %s8978_s17 }
 0x9d5   : > { %7453 = vmatmul.msk.bf16.gmra.mxu2 %vm595_vm2, %v3433_v17  ;;  %7469 = vmatmul.msk.bf16.gmra.mxu3 %vm595_vm2, %v3433_v17  ;;  %v12041_v17 = vpop.permute.xlu1 %4860 }
 0x9d6   : > { %15792 = vst [vmem:[#allocation41_spill] sm:$0xff] %v12041_v17 }
 0x9d8   : > { %v3385_v44 = vpop.f32.mrf.mxu2  ;;  %v3398_v35 = vpop.f32.mrf.mxu3 }
 0x9d9   : > { %v3399_v12 = vadd.f32 %v3398_v35, %v3385_v44  ;;  %v6329_v35 = vld [vmem:[#allocation3 + $0x10] sm:$0xff] }
 0x9db   : > { %v3403_v10 = vmul.f32 %v8413_v29, %v3399_v12 }
 0x9dd   : > { %v3405_v16 = vmul.f32 %v3403_v10, %v15779_v18  ;;  %v12049_v15 = vpop.permute.xlu1 %4866 }
 0x9de   : > { %15794 = vst [vmem:[#allocation91_spill] sm:$0xff] %v12049_v15 }
 0x9df   : > { %v3409_v19 = vrot.slane %v3405_v16, 4 }
 0x9e0   : > { %v3387_v62 = vpop.f32.mrf.mxu2  ;;  %v3400_v32 = vpop.f32.mrf.mxu3 }
 0x9e1   : > { %v3413_v55 = vadd.f32 %v3409_v19, %v15785_v33  ;;  %v15810_v33 = vld [vmem:[#allocation14_spill] sm:$0xff] }
 0x9e3   : > { %3415 = vst [vmem:[#allocation2 + $0x10] sm:$0xf0] %v3413_v55 }
 0x9e5   : > { %7454 = vmatmul.msk.bf16.gmra.mxu2 %vm595_vm2, %v15786_v14  ;;  %7470 = vmatmul.msk.bf16.gmra.mxu3 %vm595_vm2, %v15786_v14  ;;  %v12059_v6 = vpop.permute.xlu1 %5540 }
 0x9e6   : > { %15797 = vst [vmem:[#allocation80_spill] sm:$0xff] %v12059_v6 }
 0x9e8   : > { %v12020_v34 = vpop.f32.mrf.mxu2  ;;  %v12024_v1 = vpop.f32.mrf.mxu3 }
 0x9ea   : > { %v6268_v30 = vld [vmem:[#allocation2 + $0x10] sm:$0xff] }
 0x9eb   : > { %6287 = vrot.lane.b32.xlu2 %v6268_v30, %s8978_s17 }
 0x9f0   : > { %v12027_v26 = vpop.f32.mrf.mxu2  ;;  %v12029_v22 = vpop.f32.mrf.mxu3 }
 0x9f1   : > { %15788 = vst [vmem:[#allocation63_spill] sm:$0xff] %v12029_v22 }
 0x9f5   : > { %7455 = vmatmul.msk.bf16.gmra.mxu2 %vm595_vm2, %v15790_v27  ;;  %7471 = vmatmul.msk.bf16.gmra.mxu3 %vm595_vm2, %v15790_v27 }
 0x9f8   : > { %v12037_v4 = vpop.f32.mrf.mxu2  ;;  %v12039_v56 = vpop.f32.mrf.mxu3 }
 0x9f9   : > { %15791 = vst [vmem:[#allocation26_spill] sm:$0xff] %v12039_v56  ;;  %v3682_v46 = vmax.f32 %v12020_v34, %v12037_v4 }
 0xa00   : > { %v12043_v23 = vpop.f32.mrf.mxu2  ;;  %v12045_v60 = vpop.f32.mrf.mxu3 }
 0xa01   : > { %15793 = vst [vmem:[#allocation28_spill] sm:$0xff] %v12045_v60  ;;  %v3683_v9 = vmax.f32 %v12027_v26, %v12043_v23 }
 0xa05   : > { %7456 = vmatmul.msk.bf16.gmra.mxu2 %vm595_vm2, %v11971_v31  ;;  %7472 = vmatmul.msk.bf16.gmra.mxu3 %vm595_vm2, %v11971_v31  ;;  %v12071_v31 = vpop.permute.xlu1 %5546 }
 0xa06   : > { %15800 = vst [vmem:[#allocation85_spill] sm:$0xff] %v12071_v31 }
 0xa08   : > { %v12053_v54 = vpop.f32.mrf.mxu2  ;;  %v12055_v57 = vpop.f32.mrf.mxu3 }
 0xa09   : > { %15795 = vst [vmem:[#allocation59_spill] sm:$0xff] %v12053_v54 }
 0xa0d   : > { %v12079_v40 = vpop.permute.xlu1 %5552 }
 0xa0e   : > { %15803 = vst [vmem:[#allocation89_spill] sm:$0xff] %v12079_v40 }
 0xa10   : > { %v12057_v7 = vpop.f32.mrf.mxu2  ;;  %v12061_v51 = vpop.f32.mrf.mxu3 }
 0xa11   : > { %15796 = vst [vmem:[#allocation66_spill] sm:$0xff] %v12057_v7 }
 0xa15   : > { %7457 = vmatmul.msk.bf16.gmra.mxu2 %vm595_vm2, %v15798_v48  ;;  %7473 = vmatmul.msk.bf16.gmra.mxu3 %vm595_vm2, %v15798_v48  ;;  %v12087_v28 = vpop.permute.xlu1 %5558 }
 0xa16   : > { %15804 = vst [vmem:[#allocation93_spill] sm:$0xff] %v12087_v28 }
 0xa18   : > { %v12067_v8 = vpop.f32.mrf.mxu2  ;;  %v12069_v24 = vpop.f32.mrf.mxu3 }
 0xa19   : > { %15799 = vst [vmem:[#allocation82_spill] sm:$0xff] %v12067_v8 }
 0xa1d   : > { %v12099_v41 = vpop.permute.xlu1 %5564 }
 0xa1e   : > { %15806 = vst [vmem:[#allocation42_spill] sm:$0xff] %v12099_v41 }
 0xa20   : > { %v12073_v59 = vpop.f32.mrf.mxu2  ;;  %v12075_v25 = vpop.f32.mrf.mxu3 }
 0xa21   : > { %15801 = vst [vmem:[#allocation87_spill] sm:$0xff] %v12075_v25 }
 0xa25   : > { %7458 = vmatmul.msk.bf16.gmra.mxu2 %vm595_vm2, %v15802_v5  ;;  %7474 = vmatmul.msk.bf16.gmra.mxu3 %vm595_vm2, %v15802_v5 }
 0xa28   : > { %v12083_v3 = vpop.f32.mrf.mxu2  ;;  %v12085_v50 = vpop.f32.mrf.mxu3 }
 0xa30   : > { %v12089_v53 = vpop.f32.mrf.mxu2  ;;  %v12091_v13 = vpop.f32.mrf.mxu3 }
 0xa31   : > { %15805 = vst [vmem:[#allocation90_spill] sm:$0xff] %v12091_v13 }
 0xa35   : > { %7459 = vmatmul.msk.bf16.gmra.mxu2 %vm595_vm2, %v11975_v47  ;;  %7475 = vmatmul.msk.bf16.gmra.mxu3 %vm595_vm2, %v11975_v47 }
 0xa38   : > { %v12097_v0 = vpop.f32.mrf.mxu2  ;;  %v12101_v37 = vpop.f32.mrf.mxu3 }
 0xa3d   : > { %v6286_v61 = vpop.permute.xlu1 %6285 }
 0xa3e   : > { %6318 = vst.msk [vmem:[#allocation3 + $0x18] sm:$0xff] %vm6314_vm3, %v6286_v61 }
 0xa40   : > { %v12103_v49 = vpop.f32.mrf.mxu2  ;;  %v12105_v42 = vpop.f32.mrf.mxu3 }
 0xa41   : > { %15807 = vst [vmem:[#allocation92_spill] sm:$0xff] %v12105_v42 }
 0xa45   : > { %7460 = vmatmul.msk.bf16.gmra.mxu2 %vm595_vm2, %v15808_v36  ;;  %7476 = vmatmul.msk.bf16.gmra.mxu3 %vm595_vm2, %v15808_v36  ;;  %v6288_v47 = vpop.permute.xlu2 %6287  ;;  %v6330_v12 = vld [vmem:[#allocation3 + $0x18] sm:$0xff] }
 0xa46   : > { %v6299_v44 = vsel %vm6297_vm5, %v6286_v61, %v6288_v47  ;;  %6320 = vst.msk [vmem:[#allocation3 + $0x28] sm:$0xff] %vm6297_vm5, %v6288_v47  ;;  %v7656_v10 = vpack.i.bf16 %v6330_v12, %v6329_v35 }
 0xa47   : > { %6319 = vst [vmem:[#allocation3 + $0x20] sm:$0xff] %v6299_v44 }
 0xa48   : > { %v12112_v52 = vpop.f32.mrf.mxu2  ;;  %v12116_v29 = vpop.f32.mrf.mxu3  ;;  %7657 = vrot.lane.b32.xlu1 %v7656_v10, %s8980_s18 }
 0xa4d   : > { %v6332_v62 = vld [vmem:[#allocation3 + $0x28] sm:$0xff] }
 0xa4e   : > { %v7666_v19 = vpack.i.bf16 %v6332_v62, %v6299_v44 }
 0xa50   : > { %v12119_v16 = vpop.f32.mrf.mxu2  ;;  %v12121_v32 = vpop.f32.mrf.mxu3  ;;  %7667 = vrot.lane.b32.xlu2 %v7666_v19, %s8973_s14  ;;  %7662 = vrot.lane.b32.xlu1 %v7656_v10, %s8973_s14 }
 0xa51   : > { %15809 = vst [vmem:[#allocation69_spill] sm:$0xff] %v12121_v32 }
 0xa55   : > { %7461 = vmatmul.msk.bf16.gmra.mxu2 %vm595_vm2, %v15810_v33  ;;  %7477 = vmatmul.msk.bf16.gmra.mxu3 %vm595_vm2, %v15810_v33 }
 0xa58   : > { %v12129_v55 = vpop.f32.mrf.mxu2  ;;  %v12131_v14 = vpop.f32.mrf.mxu3 }
 0xa59   : > { %15811 = vst [vmem:[#allocation65_spill] sm:$0xff] %v12131_v14 }
 0xa60   : > { %v12133_v30 = vpop.f32.mrf.mxu2  ;;  %v12135_v27 = vpop.f32.mrf.mxu3 }
 0xa61   : > { %15812 = vst [vmem:[#allocation71_spill] sm:$0xff] %v12135_v27 }
 0xa68   : > { %v12137_v48 = vpop.f32.mrf.mxu2  ;;  %v12139_v5 = vpop.f32.mrf.mxu3 }
 0xa70   : > { %v12141_v61 = vpop.f32.mrf.mxu2  ;;  %v12143_v36 = vpop.f32.mrf.mxu3 }
 0xa71   : > { %15813 = vst [vmem:[#allocation24_spill] sm:$0xff] %v12143_v36 }
 0xa78   : > { %v12145_v47 = vpop.f32.mrf.mxu2  ;;  %v12147_v44 = vpop.f32.mrf.mxu3 }
 0xa80   : > { %v12149_v35 = vpop.f32.mrf.mxu2  ;;  %v12151_v12 = vpop.f32.mrf.mxu3 }
 0xa81   : > { %15814 = vst [vmem:[#allocation8_spill] sm:$0xff] %v12149_v35 }
 0xa88   : > { %v12153_v10 = vpop.f32.mrf.mxu2  ;;  %v12155_v62 = vpop.f32.mrf.mxu3 }
 0xa90   : > { %v12157_v19 = vpop.f32.mrf.mxu2  ;;  %v12159_v33 = vpop.f32.mrf.mxu3 }
 0xa91   : > { %15815 = vst [vmem:[#allocation9_spill] sm:$0xff] %v12159_v33 }
 0xa98   : > { %v12161_v41 = vpop.f32.mrf.mxu2  ;;  %v12163_v28 = vpop.f32.mrf.mxu3 }
 0xaa0   : > { %v12165_v40 = vpop.f32.mrf.mxu2  ;;  %v12167_v31 = vpop.f32.mrf.mxu3 }
 0xaa1   : > { %15816 = vst [vmem:[#allocation46_spill] sm:$0xff] %v12167_v31 }
 0xaa8   : > { %v12169_v6 = vpop.f32.mrf.mxu2  ;;  %v12171_v15 = vpop.f32.mrf.mxu3 }
 0xaa9   : > { %15817 = vst [vmem:[#allocation47_spill] sm:$0xff] %v12171_v15  ;;  %v3685_v15 = vmax.f32 %v3683_v9, %v12057_v7 }
 0xab0   : > { %v12173_v17 = vpop.f32.mrf.mxu2  ;;  %v12175_v58 = vpop.f32.mrf.mxu3 }
 0xab1   : > { %15818 = vst [vmem:[#allocation21_spill] sm:$0xff] %v12175_v58 }
 0xab8   : > { %v12177_v45 = vpop.f32.mrf.mxu2  ;;  %v12179_v2 = vpop.f32.mrf.mxu3 }
 0xab9   : > { %15819 = vst [vmem:[#allocation20_spill] sm:$0xff] %v12179_v2  ;;  %v3684_v2 = vmax.f32 %v3682_v46, %v12053_v54 }
 0xaba   : > { %v12181_v11 = vpop.permute.xlu1 %7657 }
 0xabb   : > { %15820 = vst [vmem:[#allocation5_spill] sm:$0xff] %v12181_v11  ;;  %v7659_v18 = vunpack.i.l.bf16 %v12181_v11  ;;  %v3686_v38 = vmax.f32 %v3684_v2, %v12067_v8 }
 0xabd   : > { %v6446_v20 = vsel %vm6444_vm6, %v7650_v63, %v7659_v18  ;;  %v3687_v18 = vmax.f32 %v3685_v15, %v12073_v59 }
 0xabe   : > { %v12188_v39 = vpack.c.bf16 %v6446_v20, %v6445_v21  ;;  %v3688_v20 = vmax.f32 %v3686_v38, %v12083_v3 }
 0xabf   : > { %v3689_v21 = vmax.f32 %v3687_v18, %v12089_v53 }
 0xac0   : > { %v12184_v43 = vpop.f32.mrf.mxu2  ;;  %15821 = vst [vmem:[#allocation12_spill] sm:$0xff] %v12188_v39  ;;  %v12196_v58 = vpop.f32.mrf.mxu3  ;;  %v3690_v63 = vmax.f32 %v3688_v20, %v12097_v0 }
 0xac1   : > { %v3691_v39 = vmax.f32 %v3689_v21, %v12103_v49  ;;  %v3720_v21 = vmax.f32 %v12029_v22, %v12045_v60 }
 0xac2   : > { %v3692_v46 = vmax.f32 %v3690_v63, %v12112_v52 }
 0xac3   : > { %v3693_v9 = vmax.f32 %v3691_v39, %v12119_v16 }
 0xac4   : > { %v3694_v54 = vmax.f32 %v3692_v46, %v12129_v55 }
 0xac5   : > { %v3695_v2 = vmax.f32 %v3693_v9, %v12133_v30  ;;  %v3719_v9 = vmax.f32 %v12024_v1, %v12039_v56 }
 0xac6   : > { %v3696_v15 = vmax.f32 %v3694_v54, %v12137_v48  ;;  %v3722_v54 = vmax.f32 %v3720_v21, %v12061_v51 }
 0xac7   : > { %v3697_v38 = vmax.f32 %v3695_v2, %v12141_v61 }
 0xac8   : > { %v12198_v11 = vpop.f32.mrf.mxu2  ;;  %v12212_v8 = vpop.f32.mrf.mxu3  ;;  %v3698_v18 = vmax.f32 %v3696_v15, %v12145_v47 }
 0xac9   : > { %v3699_v20 = vmax.f32 %v3697_v38, %v12149_v35  ;;  %v3721_v38 = vmax.f32 %v3719_v9, %v12055_v57  ;;  %v3724_v35 = vmax.f32 %v3722_v54, %v12075_v25 }
 0xaca   : > { %v3700_v39 = vmax.f32 %v3698_v18, %v12153_v10 }
 0xacb   : > { %v3701_v63 = vmax.f32 %v3699_v20, %v12157_v19  ;;  %v3723_v22 = vmax.f32 %v3721_v38, %v12069_v24  ;;  %v3726_v56 = vmax.f32 %v3724_v35, %v12091_v13 }
 0xacc   : > { %v3702_v2 = vmax.f32 %v3700_v39, %v12161_v41 }
 0xacd   : > { %v3703_v15 = vmax.f32 %v3701_v63, %v12165_v40  ;;  %v3725_v63 = vmax.f32 %v3723_v22, %v12085_v50  ;;  %v3728_v9 = vmax.f32 %v3726_v56, %v12105_v42 }
 0xace   : > { %v3704_v60 = vmax.f32 %v3702_v2, %v12169_v6 }
 0xacf   : > { %v3705_v18 = vmax.f32 %v3703_v15, %v12173_v17  ;;  %v3727_v15 = vmax.f32 %v3725_v63, %v12101_v37  ;;  %v3730_v38 = vmax.f32 %v3728_v9, %v12121_v32 }
 0xad0   : > { %v12208_v7 = vpop.f32.mrf.mxu2  ;;  %v12233_v20 = vpop.f32.mrf.mxu3  ;;  %v3706_v21 = vmax.f32 %v3704_v60, %v12177_v45 }
 0xad1   : > { %v3707_v39 = vmax.f32 %v3705_v18, %v12184_v43  ;;  %v3729_v18 = vmax.f32 %v3727_v15, %v12116_v29  ;;  %v3732_v22 = vmax.f32 %v3730_v38, %v12135_v27 }
 0xad2   : > { %v3708_v54 = vmax.f32 %v3706_v21, %v12198_v11 }
 0xad3   : > { %v3709_v2 = vmax.f32 %v3707_v39, %v12208_v7  ;;  %v3731_v56 = vmax.f32 %v3729_v18, %v12131_v14  ;;  %v3734_v21 = vmax.f32 %v3732_v22, %v12143_v36  ;;  %v15822_v22 = vld [vmem:[#allocation21_spill] sm:$0xff]  ;;  %v15823_v14 = vld [vmem:[#allocation47_spill] sm:$0xff] }
 0xad5   : > { %v3733_v63 = vmax.f32 %v3731_v56, %v12139_v5  ;;  %v3736_v9 = vmax.f32 %v3734_v21, %v12151_v12 }
 0xad8   : > { %v12222_v46 = vpop.f32.mrf.mxu2  ;;  %v12253_v42 = vpop.f32.mrf.mxu3 }
 0xad9   : > { %v3710_v35 = vmax.f32 %v3708_v54, %v12222_v46  ;;  %v3735_v54 = vmax.f32 %v3733_v63, %v12147_v44 }
 0xadb   : > { %v3737_v38 = vmax.f32 %v3735_v54, %v12155_v62 }
 0xadd   : > { %v3739_v18 = vmax.f32 %v3737_v38, %v12163_v28 }
 0xadf   : > { %v3741_v56 = vmax.f32 %v3739_v18, %v15823_v14 }
 0xae0   : > { %v12243_v25 = vpop.f32.mrf.mxu2 }
 0xae1   : > { %v3711_v60 = vmax.f32 %v3709_v2, %v12243_v25  ;;  %v3738_v2 = vmax.f32 %v3736_v9, %v12159_v33 }
 0xae3   : > { %v3712_v13 = vmax.f32 %v3710_v35, %v3711_v60  ;;  %v3740_v35 = vmax.f32 %v3738_v2, %v12167_v31  ;;  %v15827_v31 = vld [vmem:[#allocation82_spill] sm:$0xff] }
 0xae5   : > { %v3713_v39 = vrot.slane %v3712_v13, 4  ;;  %v3742_v36 = vmax.f32 %v3740_v35, %v15822_v22 }
 0xae7   : > { %v3714_v32 = vmax.f32 %v3712_v13, %v3713_v39  ;;  %v3744_v21 = vmax.f32 %v3742_v36, %v12196_v58  ;;  %v12265_v13 = vpop.f32.mrf.mxu3  ;;  %v15824_v39 = vld [vmem:[#allocation20_spill] sm:$0xff] }
 0xae8   : > { %v3743_v63 = vmax.f32 %v3741_v56, %v15824_v39  ;;  %v15825_v56 = vld [vmem:[#allocation59_spill] sm:$0xff] }
 0xae9   : > { %v3715_v15 = vrot.slane %v3714_v32, 2  ;;  %v3746_v9 = vmax.f32 %v3744_v21, %v12233_v20 }
 0xaea   : > { %v3745_v54 = vmax.f32 %v3743_v63, %v12212_v8 }
 0xaeb   : > { %v3716_v60 = vmax.f32 %v3714_v32, %v3715_v15  ;;  %v3748_v32 = vmax.f32 %v3746_v9, %v12265_v13 }
 0xaec   : > { %v3747_v2 = vmax.f32 %v3745_v54, %v12253_v42 }
 0xaed   : > { %v3717_v27 = vrot.slane %v3716_v60, 1 }
 0xaee   : > { %v3749_v35 = vmax.f32 %v3747_v2, %v3748_v32 }
 0xaef   : > { %v12269_v33 = vmax.f32 %v3716_v60, %v3717_v27 }
 0xaf0   : > { %v3750_v9 = vrot.slane %v3749_v35, 4 }
 0xaf1   : > { %v3756_v15 = vsub.f32 %v12020_v34, %v12269_v33  ;;  %v3758_v36 = vsub.f32 %v12027_v26, %v12269_v33  ;;  %v3760_v38 = vsub.f32 %v12037_v4, %v12269_v33  ;;  %v3762_v27 = vsub.f32 %v12043_v23, %v12269_v33  ;;  %v15826_v34 = vld [vmem:[#allocation66_spill] sm:$0xff] }
 0xaf2   : > { %v3764_v21 = vsub.f32 %v15825_v56, %v12269_v33  ;;  %v3766_v54 = vsub.f32 %v15826_v34, %v12269_v33  ;;  %v3768_v4 = vsub.f32 %v15827_v31, %v12269_v33  ;;  %v3751_v2 = vmax.f32 %v3749_v35, %v3750_v9 }
 0xaf3   : > { %v3820_v60 = vmul.f32 1.442695, %v3756_v15  ;;  %v3824_v18 = vmul.f32 1.442695, %v3758_v36  ;;  %v3828_v63 = vmul.f32 1.442695, %v3760_v38  ;;  %v3770_v23 = vsub.f32 %v12073_v59, %v12269_v33 }
 0xaf4   : > { %v3832_v26 = vmul.f32 1.442695, %v3762_v27  ;;  %v3836_v32 = vmul.f32 1.442695, %v3764_v21  ;;  %v3840_v15 = vmul.f32 1.442695, %v3766_v54  ;;  %v3772_v38 = vsub.f32 %v12083_v3, %v12269_v33 }
 0xaf5   : > { %8414 = vpow2.f32 %v3820_v60  ;;  %v3774_v27 = vsub.f32 %v12089_v53, %v12269_v33  ;;  %v3844_v31 = vmul.f32 1.442695, %v3768_v4  ;;  %v3776_v35 = vsub.f32 %v12097_v0, %v12269_v33 }
 0xaf6   : > { %8416 = vpow2.f32 %v3824_v18  ;;  %v3752_v18 = vrot.slane %v3751_v2, 2  ;;  %v3778_v21 = vsub.f32 %v12103_v49, %v12269_v33  ;;  %v3848_v3 = vmul.f32 1.442695, %v3770_v23 }
 0xaf7   : > { %8418 = vpow2.f32 %v3828_v63  ;;  %v3780_v63 = vsub.f32 %v12112_v52, %v12269_v33  ;;  %v3852_v53 = vmul.f32 1.442695, %v3772_v38  ;;  %v3782_v0 = vsub.f32 %v12119_v16, %v12269_v33 }
 0xaf8   : > { %8420 = vpow2.f32 %v3832_v26  ;;  %v3856_v54 = vmul.f32 1.442695, %v3774_v27  ;;  %v3784_v26 = vsub.f32 %v12129_v55, %v12269_v33  ;;  %v3860_v4 = vmul.f32 1.442695, %v3776_v35 }
 0xaf9   : > { %8422 = vpow2.f32 %v3836_v32  ;;  %v3753_v32 = vmax.f32 %v3751_v2, %v3752_v18  ;;  %v3786_v52 = vsub.f32 %v12133_v30, %v12269_v33  ;;  %v3788_v38 = vsub.f32 %v12137_v48, %v12269_v33 }
 0xafa   : > { %8424 = vpow2.f32 %v3840_v15  ;;  %v3864_v15 = vmul.f32 1.442695, %v3778_v21  ;;  %v3868_v16 = vmul.f32 1.442695, %v3780_v63  ;;  %v3790_v55 = vsub.f32 %v12141_v61, %v12269_v33  ;;  %v15828_v21 = vld [vmem:[#allocation8_spill] sm:$0xff] }
 0xafb   : > { %v12290_v36 = vpop.eup %8414  ;;  %8426 = vpow2.f32 %v3844_v31  ;;  %v3792_v2 = vsub.f32 %v12145_v47, %v12269_v33  ;;  %v3872_v35 = vmul.f32 1.442695, %v3782_v0  ;;  %v3876_v30 = vmul.f32 1.442695, %v3784_v26 }
 0xafc   : > { %v12294_v60 = vpop.eup %8416  ;;  %8428 = vpow2.f32 %v3848_v3  ;;  %v3754_v18 = vrot.slane %v3753_v32, 1  ;;  %v3794_v3 = vsub.f32 %v15828_v21, %v12269_v33  ;;  %v3880_v63 = vmul.f32 1.442695, %v3786_v52 }
 0xafd   : > { %v3948_v59 = vadd.f32 %v12294_v60, %v12290_v36  ;;  %v12302_v56 = vpop.eup %8418  ;;  %8430 = vpow2.f32 %v3852_v53  ;;  %v3796_v61 = vsub.f32 %v12153_v10, %v12269_v33  ;;  %v3884_v53 = vmul.f32 1.442695, %v3788_v38 }
 0xafe   : > { %v12309_v34 = vpop.eup %8420  ;;  %8432 = vpow2.f32 %v3856_v54  ;;  %v3798_v0 = vsub.f32 %v12157_v19, %v12269_v33  ;;  %v3800_v54 = vsub.f32 %v12161_v41, %v12269_v33  ;;  %v3888_v26 = vmul.f32 1.442695, %v3790_v55 }
 0xaff   : > { %v3949_v9 = vadd.f32 %v12302_v56, %v3948_v59  ;;  %v12316_v23 = vpop.eup %8422  ;;  %8434 = vpow2.f32 %v3860_v4  ;;  %v12346_v52 = vmax.f32 %v3753_v32, %v3754_v18  ;;  %v3812_v38 = vsub.f32 %v12198_v11, %v12269_v33 }
 0xb00   : > { %v12323_v31 = vpop.eup %8424  ;;  %8436 = vpow2.f32 %v3864_v15  ;;  %v3896_v19 = vmul.f32 1.442695, %v3794_v3  ;;  %v3816_v41 = vsub.f32 %v12222_v46, %v12269_v33  ;;  %v3818_v32 = vsub.f32 %v12243_v25, %v12269_v33  ;;  %v15829_v3 = vld [vmem:[#allocation63_spill] sm:$0xff] }
 0xb01   : > { %v3950_v49 = vadd.f32 %v12309_v34, %v3949_v9  ;;  %v12330_v48 = vpop.eup %8426  ;;  %8438 = vpow2.f32 %v3868_v16  ;;  %v3908_v11 = vmul.f32 1.442695, %v3800_v54  ;;  %v3757_v46 = vsub.f32 %v12024_v1, %v12346_v52  ;;  %v15830_v54 = vld [vmem:[#allocation26_spill] sm:$0xff] }
 0xb02   : > { %v12337_v9 = vpop.eup %8428  ;;  %8440 = vpow2.f32 %v3872_v35  ;;  %v3904_v35 = vmul.f32 1.442695, %v3798_v0  ;;  %v3932_v21 = vmul.f32 1.442695, %v3812_v38  ;;  %v3814_v25 = vsub.f32 %v12208_v7, %v12269_v33 }
 0xb03   : > { %v3951_v27 = vadd.f32 %v12316_v23, %v3950_v49  ;;  %v12343_v4 = vpop.eup %8430  ;;  %8442 = vpow2.f32 %v3876_v30  ;;  %v3892_v49 = vmul.f32 1.442695, %v3792_v2  ;;  %v3944_v1 = vmul.f32 1.442695, %v3818_v32 }
 0xb04   : > { %v12348_v15 = vpop.eup %8432  ;;  %8444 = vpow2.f32 %v3880_v63  ;;  %v3759_v63 = vsub.f32 %v15829_v3, %v12346_v52  ;;  %v3822_v7 = vmul.f32 1.442695, %v3757_v46  ;;  %v3765_v46 = vsub.f32 %v12055_v57, %v12346_v52 }
 0xb05   : > { %v3952_v59 = vadd.f32 %v12323_v31, %v3951_v27  ;;  %v12352_v16 = vpop.eup %8434  ;;  %8446 = vpow2.f32 %v3884_v53  ;;  %v3900_v27 = vmul.f32 1.442695, %v3796_v61  ;;  %v3940_v53 = vmul.f32 1.442695, %v3816_v41  ;;  %v15831_v41 = vld [vmem:[#allocation28_spill] sm:$0xff] }
 0xb06   : > { %v12357_v2 = vpop.eup %8436  ;;  %8448 = vpow2.f32 %v3888_v26  ;;  %v3761_v26 = vsub.f32 %v15830_v54, %v12346_v52  ;;  %v3806_v57 = vsub.f32 %v12173_v17, %v12269_v33 }
 0xb07   : > { %v3953_v47 = vadd.f32 %v12330_v48, %v3952_v59  ;;  %v12361_v30 = vpop.eup %8438  ;;  %8450 = vpow2.f32 %v3892_v49 }
 0xb08   : > { %v12366_v18 = vpop.eup %8440  ;;  %8452 = vpow2.f32 %v3896_v19 }
 0xb09   : > { %v3954_v10 = vadd.f32 %v12337_v9, %v3953_v47  ;;  %v12370_v61 = vpop.eup %8442  ;;  %8454 = vpow2.f32 %v3900_v27  ;;  %v3763_v27 = vsub.f32 %v15831_v41, %v12346_v52 }
 0xb0a   : > { %v12375_v0 = vpop.eup %8444  ;;  %8456 = vpow2.f32 %v3904_v35  ;;  %v3810_v35 = vsub.f32 %v12184_v43, %v12269_v33 }
 0xb0b   : > { %v3955_v55 = vadd.f32 %v12343_v4, %v3954_v10  ;;  %v12379_v49 = vpop.eup %8446  ;;  %v3808_v10 = vsub.f32 %v12177_v45, %v12269_v33  ;;  %8458 = vpow2.f32 %v3908_v11 }
 0xb0c   : > { %v12384_v19 = vpop.eup %8448  ;;  %8460 = vpow2.f32 %v3932_v21  ;;  %v3830_v21 = vmul.f32 1.442695, %v3761_v26  ;;  %v3928_v26 = vmul.f32 1.442695, %v3810_v35  ;;  %v15832_v35 = vld [vmem:[#allocation87_spill] sm:$0xff] }
 0xb0d   : > { %v3956_v59 = vadd.f32 %v12348_v15, %v3955_v55  ;;  %v3826_v55 = vmul.f32 1.442695, %v3759_v63  ;;  %v12388_v32 = vpop.eup %8450  ;;  %8462 = vpow2.f32 %v3940_v53  ;;  %v3804_v63 = vsub.f32 %v12169_v6, %v12269_v33 }
 0xb0e   : > { %v12393_v11 = vpop.eup %8452  ;;  %8464 = vpow2.f32 %v3944_v1  ;;  %v3834_v53 = vmul.f32 1.442695, %v3763_v27 }
 0xb0f   : > { %v3957_v47 = vadd.f32 %v12352_v16, %v3956_v59  ;;  %v3936_v59 = vmul.f32 1.442695, %v3814_v25  ;;  %v12397_v3 = vpop.eup %8454  ;;  %8466 = vpow2.f32 %v3822_v7  ;;  %v3767_v25 = vsub.f32 %v12061_v51, %v12346_v52 }
 0xb10   : > { %v12402_v43 = vpop.eup %8456  ;;  %8468 = vpow2.f32 %v3826_v55  ;;  %v3838_v7 = vmul.f32 1.442695, %v3765_v46  ;;  %v3802_v51 = vsub.f32 %v12165_v40, %v12269_v33  ;;  %v3916_v27 = vmul.f32 1.442695, %v3804_v63 }
 0xb11   : > { %v3958_v38 = vadd.f32 %v12357_v2, %v3957_v47  ;;  %v3924_v47 = vmul.f32 1.442695, %v3808_v10  ;;  %v12406_v1 = vpop.eup %8458  ;;  %8470 = vpow2.f32 %v3936_v59  ;;  %v3771_v59 = vsub.f32 %v15832_v35, %v12346_v52 }
 0xb12   : > { %v12411_v10 = vpop.eup %8460  ;;  %8472 = vpow2.f32 %v3830_v21  ;;  %v4040_v40 = vpack.c.bf16 %v12375_v0, %v12370_v61  ;;  %v3773_v21 = vsub.f32 %v12085_v50, %v12346_v52  ;;  %v3777_v35 = vsub.f32 %v12101_v37, %v12346_v52  ;;  %v15840_v37 = vld [vmem:[#allocation34_spill] sm:$0xff] }
 0xb13   : > { %v3959_v45 = vadd.f32 %v12361_v30, %v3958_v38  ;;  %v3769_v38 = vsub.f32 %v12069_v24, %v12346_v52  ;;  %v12415_v41 = vpop.eup %8462  ;;  %8474 = vpow2.f32 %v3924_v47  ;;  %v3920_v24 = vmul.f32 1.442695, %v3806_v57 }
 0xb14   : > { %v12420_v55 = vpop.eup %8464  ;;  %8476 = vpow2.f32 %v3834_v53  ;;  %v3912_v53 = vmul.f32 1.442695, %v3802_v51  ;;  %4058 = vmatpush.bf16.msrb.mxu0 %v4040_v40  ;;  %v15839_v40 = vld [vmem:[#allocation31_spill] sm:$0xff] }
 0xb15   : > { %v3960_v54 = vadd.f32 %v12366_v18, %v3959_v45  ;;  %v3842_v45 = vmul.f32 1.442695, %v3767_v25  ;;  %8478 = vpow2.f32 %v3928_v26  ;;  %v3846_v63 = vmul.f32 1.442695, %v3769_v38 }
 0xb16   : > { %8480 = vpow2.f32 %v3838_v7  ;;  %v4056_v47 = vpack.c.bf16 %v12420_v55, %v12415_v41 }
 0xb17   : > { %v3961_v6 = vadd.f32 %v12370_v61, %v3960_v54  ;;  %v12424_v54 = vpop.eup %8466  ;;  %8482 = vpow2.f32 %v3916_v27  ;;  %v4038_v27 = vpack.c.bf16 %v12366_v18, %v12361_v30 }
 0xb18   : > { %15833 = vst [vmem:[#allocation74_spill] sm:$0xff] %v12424_v54  ;;  %v12429_v33 = vpop.eup %8468  ;;  %8484 = vpow2.f32 %v3842_v45  ;;  %4071 = vmatpush.bf16.msrb.mxu1 %v4056_v47 }
 0xb19   : > { %v3962_v17 = vadd.f32 %v12375_v0, %v3961_v6  ;;  %15834 = vst [vmem:[#allocation88_spill] sm:$0xff] %v12429_v33  ;;  %v12435_v25 = vpop.eup %8470  ;;  %v3985_v26 = vadd.f32 %v12429_v33, %v12424_v54  ;;  %v15836_v0 = vld [vmem:[#allocation90_spill] sm:$0xff]  ;;  %v3850_v6 = vmul.f32 1.442695, %v3771_v59  ;;  %8486 = vpow2.f32 %v3920_v24  ;;  %v15838_v24 = vld [vmem:[#allocation17_spill] sm:$0xff]  ;;  %4059 = vmatpush.bf16.msrb.mxu0 %v4038_v27 }
 0xb1a   : > { %v12440_v61 = vpop.eup %8472  ;;  %v3775_v50 = vsub.f32 %v15836_v0, %v12346_v52  ;;  %8488 = vpow2.f32 %v3846_v63  ;;  %v4054_v59 = vpack.c.bf16 %v12435_v25, %v12411_v10  ;;  %v12460_v47 = vadd.f32 %v15839_v40, %v15838_v24  ;;  %v15841_v63 = vld [vmem:[#allocation92_spill] sm:$0xff] }
 0xb1b   : > { %v3963_v46 = vadd.f32 %v12379_v49, %v3962_v17  ;;  %15835 = vst [vmem:[#allocation40_spill] sm:$0xff] %v12440_v61  ;;  %v12444_v38 = vpop.eup %8474  ;;  %v3986_v51 = vadd.f32 %v12440_v61, %v3985_v26  ;;  %8490 = vpow2.f32 %v3912_v53  ;;  %v3779_v26 = vsub.f32 %v15841_v63, %v12346_v52 }
 0xb1c   : > { %v12450_v17 = vpop.eup %8476  ;;  %8492 = vpow2.f32 %v3850_v6  ;;  %v3858_v0 = vmul.f32 1.442695, %v3775_v50  ;;  %4072 = vmatpush.bf16.msrb.mxu1 %v4054_v59  ;;  %v4036_v27 = vpack.c.bf16 %v12357_v2, %v12352_v16  ;;  %v3862_v6 = vmul.f32 1.442695, %v3777_v35 }
 0xb1d   : > { %v3964_v57 = vadd.f32 %v12384_v19, %v3963_v46  ;;  %15837 = vst [vmem:[#allocation43_spill] sm:$0xff] %v12450_v17  ;;  %v3854_v46 = vmul.f32 1.442695, %v3773_v21  ;;  %v12456_v45 = vpop.eup %8478  ;;  %v3987_v30 = vadd.f32 %v12450_v17, %v3986_v51  ;;  %v12468_v21 = vadd.f32 %v15840_v37, %v15838_v24  ;;  %v15843_v24 = vld [vmem:[#allocation69_spill] sm:$0xff] }
 0xb1e   : > { %v12464_v18 = vpop.eup %8480  ;;  %v3783_v37 = vsub.f32 %v15843_v24, %v12346_v52  ;;  %v4052_v50 = vpack.c.bf16 %v12456_v45, %v12444_v38  ;;  %4060 = vmatpush.bf16.msrb.mxu0 %v4036_v27  ;;  %v3789_v35 = vsub.f32 %v12139_v5, %v12346_v52  ;;  %v3866_v17 = vmul.f32 1.442695, %v3779_v26 }
 0xb1f   : > { %v3965_v7 = vadd.f32 %v12388_v32, %v3964_v57  ;;  %v8483_v40 = vpop.eup %8482  ;;  %v3988_v51 = vadd.f32 %v12464_v18, %v3987_v30  ;;  %8494 = vpow2.f32 %v3854_v46  ;;  %v15845_v30 = vld [vmem:[#allocation71_spill] sm:$0xff]  ;;  %v15846_v46 = vld [vmem:[#allocation24_spill] sm:$0xff]  ;;  %v4034_v27 = vpack.c.bf16 %v12348_v15, %v12343_v4  ;;  %v15847_v4 = vld [vmem:[#allocation9_spill] sm:$0xff] }
 0xb20   : > { %v12478_v33 = vpop.eup %8484  ;;  %v3787_v54 = vsub.f32 %v15845_v30, %v12346_v52  ;;  %v3791_v24 = vsub.f32 %v15846_v46, %v12346_v52  ;;  %8496 = vpow2.f32 %v3858_v0  ;;  %4073 = vmatpush.bf16.msrb.mxu1 %v4052_v50  ;;  %v3793_v30 = vsub.f32 %v12147_v44, %v12346_v52 }
 0xb21   : > { %v3966_v57 = vadd.f32 %v12393_v11, %v3965_v7  ;;  %v3781_v7 = vsub.f32 %v12116_v29, %v12346_v52  ;;  %15842 = vst [vmem:[#allocation22_spill] sm:$0xff] %v12478_v33  ;;  %v8487_v59 = vpop.eup %8486  ;;  %v15844_v29 = vld [vmem:[#allocation65_spill] sm:$0xff]  ;;  %v3989_v16 = vadd.f32 %v12478_v33, %v3988_v51  ;;  %v3795_v5 = vsub.f32 %v12151_v12, %v12346_v52 }
 0xb22   : > { %v3785_v63 = vsub.f32 %v15844_v29, %v12346_v52  ;;  %v12490_v2 = vpop.eup %8488  ;;  %8498 = vpow2.f32 %v3862_v6  ;;  %v4050_v26 = vpack.c.bf16 %v8487_v59, %v8483_v40  ;;  %v3874_v46 = vmul.f32 1.442695, %v3783_v37  ;;  %4061 = vmatpush.bf16.msrb.mxu0 %v4034_v27 }
 0xb23   : > { %v3967_v53 = vadd.f32 %v12397_v3, %v3966_v57  ;;  %v3990_v51 = vadd.f32 %v12490_v2, %v3989_v16  ;;  %v3870_v0 = vmul.f32 1.442695, %v3781_v7  ;;  %v3817_v33 = vsub.f32 %v12253_v42, %v12346_v52 }
 0xb24   : > { %8500 = vpow2.f32 %v3866_v17  ;;  %v3878_v12 = vmul.f32 1.442695, %v3785_v63  ;;  %4074 = vmatpush.bf16.msrb.mxu1 %v4050_v26  ;;  %v3882_v6 = vmul.f32 1.442695, %v3787_v54  ;;  %v4032_v37 = vpack.c.bf16 %v12337_v9, %v12330_v48 }
 0xb25   : > { %v3968_v57 = vadd.f32 %v12402_v43, %v3967_v53  ;;  %v8491_v53 = vpop.eup %8490  ;;  %v3813_v27 = vsub.f32 %v12212_v8, %v12346_v52  ;;  %v3819_v15 = vsub.f32 %v12265_v13, %v12346_v52  ;;  %8502 = vpow2.f32 %v3870_v0 }
 0xb26   : > { %v12502_v61 = vpop.eup %8492  ;;  %v4048_v42 = vpack.c.bf16 %v8491_v53, %v12406_v1  ;;  %8504 = vpow2.f32 %v3874_v46  ;;  %4062 = vmatpush.bf16.msrb.mxu0 %v4032_v37  ;;  %v3815_v48 = vsub.f32 %v12233_v20, %v12346_v52  ;;  %v3890_v9 = vmul.f32 1.442695, %v3791_v24 }
 0xb27   : > { %v3969_v29 = vadd.f32 %v12406_v1, %v3968_v57  ;;  %v3797_v57 = vsub.f32 %v12155_v62, %v12346_v52  ;;  %v3991_v44 = vadd.f32 %v12502_v61, %v3990_v51  ;;  %v12509_v16 = vpop.eup %8494  ;;  %8506 = vpow2.f32 %v3878_v12 }
 0xb28   : > { %v12518_v51 = vpop.eup %8496  ;;  %v3942_v8 = vmul.f32 1.442695, %v3817_v33  ;;  %4075 = vmatpush.bf16.msrb.mxu1 %v4048_v42  ;;  %8508 = vpow2.f32 %v3882_v6  ;;  %v3809_v20 = vsub.f32 %v15824_v39, %v12346_v52  ;;  %v3946_v0 = vmul.f32 1.442695, %v3819_v15 }
 0xb29   : > { %v3970_v50 = vadd.f32 %v8491_v53, %v3969_v29  ;;  %v3992_v29 = vadd.f32 %v12509_v16, %v3991_v44  ;;  %v12526_v63 = vpop.eup %8498  ;;  %v3801_v53 = vsub.f32 %v12163_v28, %v12346_v52  ;;  %v4046_v33 = vpack.c.bf16 %v12402_v43, %v12397_v3 }
 0xb2a   : > { %v3934_v24 = vmul.f32 1.442695, %v3813_v27  ;;  %v3938_v46 = vmul.f32 1.442695, %v3815_v48  ;;  %v4028_v43 = vpack.c.bf16 %v12309_v34, %v12302_v56  ;;  %v3805_v15 = vsub.f32 %v15823_v14, %v12346_v52 }
 0xb2b   : > { %v3971_v7 = vadd.f32 %v8483_v40, %v3970_v50  ;;  %v3886_v40 = vmul.f32 1.442695, %v3789_v35  ;;  %v3993_v54 = vadd.f32 %v12518_v51, %v3992_v29  ;;  %v12534_v35 = vpop.eup %8500  ;;  %v3894_v50 = vmul.f32 1.442695, %v3793_v30 }
 0xb2c   : > { %4076 = vmatpush.bf16.msrb.mxu1 %v4046_v33  ;;  %v3898_v12 = vmul.f32 1.442695, %v3795_v5  ;;  %v3926_v6 = vmul.f32 1.442695, %v3809_v20  ;;  %v3807_v29 = vsub.f32 %v15822_v22, %v12346_v52  ;;  %v3902_v56 = vmul.f32 1.442695, %v3797_v57 }
 0xb2d   : > { %v3972_v17 = vadd.f32 %v8487_v59, %v3971_v7  ;;  %v3994_v1 = vadd.f32 %v12526_v63, %v3993_v54  ;;  %v4030_v59 = vpack.c.bf16 %v12323_v31, %v12316_v23  ;;  %8510 = vpow2.f32 %v3886_v40  ;;  %v12544_v23 = vpop.eup %8502 }
 0xb2e   : > { %v3811_v31 = vsub.f32 %v12196_v58, %v12346_v52  ;;  %8512 = vpow2.f32 %v3890_v9  ;;  %v8505_v39 = vpop.eup %8504  ;;  %v4044_v58 = vpack.c.bf16 %v12393_v11, %v12388_v32  ;;  %v15848_v22 = vsub.f32 %v15847_v4, %v12346_v52  ;;  %v15850_v4 = vld [vmem:[#allocation46_spill] sm:$0xff] }
 0xb2f   : > { %v3973_v13 = vadd.f32 %v12444_v38, %v3972_v17  ;;  %v3995_v26 = vadd.f32 %v12534_v35, %v3994_v1  ;;  %4063 = vmatpush.bf16.msrb.mxu0 %v4030_v59  ;;  %8514 = vpow2.f32 %v3942_v8  ;;  %v4042_v57 = vpack.c.bf16 %v12384_v19, %v12379_v49 }
 0xb30   : > { %8516 = vpow2.f32 %v3946_v0  ;;  %v3930_v14 = vmul.f32 1.442695, %v3811_v31  ;;  %4077 = vmatpush.bf16.msrb.mxu1 %v4044_v58  ;;  %v3906_v62 = vmul.f32 1.442695, %v15848_v22  ;;  %v3918_v42 = vmul.f32 1.442695, %v3805_v15 }
 0xb31   : > { %v3974_v38 = vadd.f32 %v12456_v45, %v3973_v13  ;;  %v3996_v3 = vadd.f32 %v12544_v23, %v3995_v26  ;;  %v8507_v45 = vpop.eup %8506  ;;  %8518 = vpow2.f32 %v3934_v24  ;;  %v3803_v40 = vsub.f32 %v15850_v4, %v12346_v52  ;;  %v15852_v58 = vld [vmem:[#allocation22_spill] sm:$0xff] }
 0xb32   : > { %v8509_v30 = vpop.eup %8508  ;;  %8520 = vpow2.f32 %v3938_v46  ;;  %v3922_v49 = vmul.f32 1.442695, %v3807_v29  ;;  %v12592_v9 = vpack.c.bf16 %v12468_v21, %v12468_v21  ;;  %v4039_v8 = vpack.c.bf16 %v8505_v39, %v12544_v23 }
 0xb33   : > { %v3975_v44 = vadd.f32 %v12411_v10, %v3974_v38  ;;  %v3997_v10 = vadd.f32 %v8505_v39, %v3996_v3  ;;  %4064 = vmatpush.bf16.msrb.mxu0 %v4028_v43  ;;  %v12562_v34 = vpop.eup %8510  ;;  %8522 = vpow2.f32 %v3894_v50  ;;  %v4041_v37 = vpack.c.bf16 %v8509_v30, %v8507_v45 }
 0xb34   : > { %v12567_v5 = vpop.eup %8512  ;;  %8524 = vpow2.f32 %v3898_v12  ;;  %4078 = vmatpush.bf16.msrb.mxu1 %v4042_v57  ;;  %15851 = vst [vmem:[#allocation16_spill] sm:$0xff] %v12592_v9  ;;  %v3914_v20 = vmul.f32 1.442695, %v3803_v40  ;;  %v4037_v52 = vpack.c.bf16 %v12534_v35, %v12526_v63  ;;  %v4035_v46 = vpack.c.bf16 %v12518_v51, %v12509_v16 }
 0xb35   : > { %v3976_v7 = vadd.f32 %v12435_v25, %v3975_v44  ;;  %v3998_v11 = vadd.f32 %v8507_v45, %v3997_v10  ;;  %v4026_v25 = vpack.c.bf16 %v12294_v60, %v12290_v36  ;;  %v12574_v27 = vpop.eup %8514  ;;  %8526 = vpow2.f32 %v3926_v6  ;;  %v15853_v6 = vld [vmem:[#allocation40_spill] sm:$0xff]  ;;  %v15854_v10 = vld [vmem:[#allocation43_spill] sm:$0xff] }
 0xb36   : > { %v12579_v36 = vpop.eup %8516  ;;  %v12583_v60 = vpack.c.bf16 %v12460_v47, %v12460_v47  ;;  %8528 = vpow2.f32 %v3930_v14  ;;  %v3910_v47 = vmul.f32 1.442695, %v3801_v53  ;;  %v4033_v35 = vpack.c.bf16 %v12502_v61, %v12490_v2  ;;  %v15855_v14 = vld [vmem:[#allocation29_spill] sm:$0xff] }
 0xb37   : > { %v3977_v32 = vadd.f32 %v12415_v41, %v3976_v7  ;;  %v3999_v17 = vadd.f32 %v8509_v30, %v3998_v11  ;;  %4065 = vmatpush.bf16.msrb.mxu0 %v4026_v25  ;;  %v8519_v19 = vpop.eup %8518  ;;  %8530 = vpow2.f32 %v3902_v56  ;;  %v4057_v54 = vpack.c.bf16 %v12579_v36, %v12574_v27  ;;  %4079 = vmatmul.bf16.vlgmr.msrb.gmra.mxu1 %v12592_v9  ;;  %v15856_v11 = vld [vmem:[#allocation74_spill] sm:$0xff]  ;;  %v15857_v25 = vld [vmem:[#allocation88_spill] sm:$0xff] }
 0xb38   : > { %15849 = vst [vmem:[#allocation6_spill] sm:$0xff] %v12583_v60  ;;  %v8521_v48 = vpop.eup %8520  ;;  %8532 = vpow2.f32 %v3906_v62  ;;  %v4031_v30 = vpack.c.bf16 %v15852_v58, %v12464_v18  ;;  %v4029_v29 = vpack.c.bf16 %v15854_v10, %v15853_v6  ;;  %v4154_v61 = vrot.slane %v15855_v14, 2  ;;  %v15858_v62 = vld [vmem:[#allocation39_spill] sm:$0xff]  ;;  %v8947_v58 = vld [vmem:[%s9046_s30 + $0x28] sm:$0xff] }
 0xb39   : > { %v12577_v41 = vadd.f32 %v12420_v55, %v3977_v32  ;;  %v4000_v55 = vadd.f32 %v12562_v34, %v3999_v17  ;;  %v8523_v13 = vpop.eup %8522  ;;  %8534 = vpow2.f32 %v3918_v42  ;;  %4097 = vmatpush.bf16.msra.mxu1 %v4057_v54  ;;  %v4055_v33 = vpack.c.bf16 %v8521_v48, %v8519_v19  ;;  %v15863_v54 = vld [vmem:[#allocation51_spill] sm:$0xff]  ;;  %v15870_v14 = vld [vmem:[#allocation38_spill] sm:$0xff] }
 0xb3a   : > { %4066 = vmatmul.bf16.vlgmr.msrb.gmra.mxu0 %v12583_v60  ;;  %v8525_v59 = vpop.eup %8524  ;;  %8536 = vpow2.f32 %v3922_v49  ;;  %v4027_v22 = vpack.c.bf16 %v15857_v25, %v15856_v11  ;;  %v4155_v18 = vrot.slane %v15858_v62, 2  ;;  %v4043_v17 = vpack.c.bf16 %v12567_v5, %v12562_v34  ;;  %v15859_v49 = vld [vmem:[#allocation30_spill] sm:$0xff]  ;;  %v15861_v34 = vld [vmem:[#allocation44_spill] sm:$0xff]  ;;  %v15874_v25 = vld [vmem:[#allocation33_spill] sm:$0xff] }
 0xb3b   : > { %4084 = vmatpush.bf16.msra.mxu0 %v4041_v37  ;;  %v4001_v1 = vadd.f32 %v12567_v5, %v4000_v55  ;;  %v8527_v21 = vpop.eup %8526  ;;  %8538 = vpow2.f32 %v3910_v47  ;;  %v4045_v32 = vpack.c.bf16 %v8525_v59, %v8523_v13  ;;  %v4205_v37 = vsel %vm644_vm1, %v4154_v61, 0  ;;  %v15862_v5 = vld [vmem:[#allocation45_spill] sm:$0xff] }
 0xb3c   : > { %v8529_v28 = vpop.eup %8528  ;;  %8540 = vpow2.f32 %v3914_v20  ;;  %v4208_v40 = vsel %vm644_vm1, %v4155_v18, 0 }
 0xb3d   : > { %v4002_v0 = vadd.f32 %v8523_v13, %v4001_v1  ;;  %v8531_v53 = vpop.eup %8530  ;;  %4098 = vmatpush.bf16.msra.mxu1 %v4055_v33  ;;  %v4053_v31 = vpack.c.bf16 %v8529_v28, %v8527_v21  ;;  %v15864_v1 = vld [vmem:[#allocation23_spill] sm:$0xff]  ;;  %v8946_v33 = vld [vmem:[%s9046_s30 + $0x20] sm:$0xff] }
 0xb3e   : > { %v8533_v24 = vpop.eup %8532 }
 0xb3f   : > { %4085 = vmatpush.bf16.msra.mxu0 %v4039_v8  ;;  %v4003_v38 = vadd.f32 %v8525_v59, %v4002_v0  ;;  %v8535_v26 = vpop.eup %8534  ;;  %v4047_v51 = vpack.c.bf16 %v8533_v24, %v8531_v53 }
 0xb40   : > { %v8537_v50 = vpop.eup %8536 }
 0xb41   : > { %v4004_v23 = vadd.f32 %v8531_v53, %v4003_v38  ;;  %4099 = vmatpush.bf16.msra.mxu1 %v4053_v31  ;;  %v8539_v44 = vpop.eup %8538  ;;  %v4051_v43 = vpack.c.bf16 %v8537_v50, %v8535_v26  ;;  %v15866_v53 = vld [vmem:[#allocation36_spill] sm:$0xff] }
 0xb42   : > { %v8541_v63 = vpop.eup %8540 }
 0xb43   : > { %4086 = vmatpush.bf16.msra.mxu0 %v4037_v52  ;;  %v4005_v39 = vadd.f32 %v8533_v24, %v4004_v23  ;;  %v4049_v12 = vpack.c.bf16 %v8541_v63, %v8539_v44 }
 0xb45   : > { %v4006_v3 = vadd.f32 %v8539_v44, %v4005_v39  ;;  %4100 = vmatpush.bf16.msra.mxu1 %v4051_v43 }
 0xb47   : > { %4087 = vmatpush.bf16.msra.mxu0 %v4035_v46  ;;  %v4007_v45 = vadd.f32 %v8541_v63, %v4006_v3  ;;  %v15867_v46 = vld [vmem:[#allocation32_spill] sm:$0xff]  ;;  %v294_v63 = vld [vmem:[%s15119_s1 + $0x28] sm:$0xff] }
 0xb49   : > { %v4008_v15 = vadd.f32 %v8535_v26, %v4007_v45  ;;  %4101 = vmatpush.bf16.msra.mxu1 %v4049_v12  ;;  %v15868_v45 = vld [vmem:[#allocation52_spill] sm:$0xff] }
 0xb4b   : > { %4088 = vmatpush.bf16.msra.mxu0 %v4033_v35  ;;  %v4009_v7 = vadd.f32 %v8537_v50, %v4008_v15 }
 0xb4d   : > { %v4010_v16 = vadd.f32 %v8527_v21, %v4009_v7  ;;  %4102 = vmatpush.bf16.msra.mxu1 %v4047_v51 }
 0xb4f   : > { %4089 = vmatpush.bf16.msra.mxu0 %v4031_v30  ;;  %v4011_v56 = vadd.f32 %v8529_v28, %v4010_v16  ;;  %v12667_v30 = vadd.f32 %v8947_v58, %v294_v63 }
 0xb51   : > { %v4012_v2 = vadd.f32 %v8519_v19, %v4011_v56  ;;  %4103 = vmatpush.bf16.msra.mxu1 %v4045_v32  ;;  %15869 = vst [vmem:[#allocation21_spill] sm:$0xff] %v12667_v30 }
 0xb53   : > { %4090 = vmatpush.bf16.msra.mxu0 %v4029_v29  ;;  %v4013_v57 = vadd.f32 %v8521_v48, %v4012_v2 }
 0xb55   : > { %v4014_v42 = vadd.f32 %v12574_v27, %v4013_v57  ;;  %4104 = vmatpush.bf16.msra.mxu1 %v4043_v17  ;;  %v15860_v27 = vld [vmem:[#allocation49_spill] sm:$0xff] }
 0xb57   : > { %4091 = vmatpush.bf16.msra.mxu0 %v4027_v22  ;;  %v4015_v4 = vadd.f32 %v12579_v36, %v4014_v42  ;;  %v3979_v36 = vrot.slane %v12577_v41, 4 }
 0xb58   : > { %4105 = vmatmul.bf16.vlgmr.msra.gmra.mxu1 %v12592_v9 }
 0xb59   : > { %4306 = vmatpush.bf16.msrb.mxu1 %v4208_v40  ;;  %v3980_v19 = vadd.f32 %v3979_v36, %v12577_v41  ;;  %v293_v41 = vld [vmem:[%s15119_s1 + $0x20] sm:$0xff]  ;;  %v4016_v0 = vrot.slane %v4015_v4, 4 }
 0xb5a   : > { %4092 = vmatmul.bf16.vlgmr.msra.gmra.mxu0 %v12583_v60  ;;  %v12653_v28 = vadd.f32 %v8946_v33, %v293_v41 }
 0xb5b   : > { %4217 = vmatpush.bf16.msrb.mxu0 %v4205_v37  ;;  %v3981_v55 = vrot.slane %v3980_v19, 2  ;;  %v4017_v24 = vadd.f32 %v4016_v0, %v4015_v4  ;;  %v15878_v37 = vld [vmem:[#allocation54_spill] sm:$0xff] }
 0xb5c   : > { %15865 = vst [vmem:[#allocation14_spill] sm:$0xff] %v12653_v28 }
 0xb5d   : > { %v3982_v48 = vadd.f32 %v3981_v55, %v3980_v19  ;;  %v4018_v50 = vrot.slane %v4017_v24, 2  ;;  %v15883_v19 = vld [vmem:[#allocation7_spill] sm:$0xff] }
 0xb5f   : > { %v3983_v47 = vrot.slane %v3982_v48, 1  ;;  %v4019_v39 = vadd.f32 %v4018_v50, %v4017_v24 }
 0xb61   : > { %v3984_v8 = vadd.f32 %v3983_v47, %v3982_v48  ;;  %v4020_v44 = vrot.slane %v4019_v39, 1 }
 0xb63   : > { %8542 = vrcp.f32 %v3984_v8  ;;  %v4021_v3 = vadd.f32 %v4020_v44, %v4019_v39  ;;  %v15885_v8 = vld [vmem:[#allocation56_spill] sm:$0xff] }
 0xb65   : > { %8544 = vrcp.f32 %v4021_v3 }
 0xb68   : > { %7494 = vmatmul.msk.bf16.vlgmr.msrb.gmra.mxu1 %vm595_vm2, %v15859_v49 }
 0xb69   : > { %v8543_v21 = vpop.eup %8542 }
 0xb6a   : > { %7478 = vmatmul.msk.bf16.vlgmr.msrb.gmra.mxu0 %vm595_vm2, %v15859_v49  ;;  %v15881_v49 = vld [vmem:[#allocation25_spill] sm:$0xff] }
 0xb6b   : > { %v8545_v12 = vpop.eup %8544 }
 0xb78   : > { %7495 = vmatmul.msk.bf16.gmra.mxu1 %vm595_vm2, %v15860_v27 }
 0xb7a   : > { %7479 = vmatmul.msk.bf16.gmra.mxu0 %vm595_vm2, %v15860_v27 }
 0xb88   : > { %7496 = vmatmul.msk.bf16.gmra.mxu1 %vm595_vm2, %v15861_v34 }
 0xb8a   : > { %7480 = vmatmul.msk.bf16.gmra.mxu0 %vm595_vm2, %v15861_v34 }
 0xb98   : > { %7497 = vmatmul.msk.bf16.gmra.mxu1 %vm595_vm2, %v15862_v5 }
 0xb9a   : > { %7481 = vmatmul.msk.bf16.gmra.mxu0 %vm595_vm2, %v15862_v5 }
 0xba8   : > { %7498 = vmatmul.msk.bf16.gmra.mxu1 %vm595_vm2, %v15863_v54 }
 0xbaa   : > { %7482 = vmatmul.msk.bf16.gmra.mxu0 %vm595_vm2, %v15863_v54 }
 0xbb4   : > { %v4080_v59 = vpop.f32.mrf.mxu1 }
 0xbb7   : > { %v4067_v13 = vpop.f32.mrf.mxu0 }
 0xbb8   : > { %v4081_v20 = vadd.f32 %v4080_v59, %v4067_v13  ;;  %7499 = vmatmul.msk.bf16.gmra.mxu1 %vm595_vm2, %v15864_v1 }
 0xbba   : > { %7483 = vmatmul.msk.bf16.gmra.mxu0 %vm595_vm2, %v15864_v1  ;;  %v4112_v52 = vmul.f32 %v8543_v21, %v4081_v20  ;;  %v15887_v20 = vld [vmem:[#allocation18_spill] sm:$0xff] }
 0xbbc   : > { %v4114_v38 = vmul.f32 %v4112_v52, %v15866_v53  ;;  %v4082_v31 = vpop.f32.mrf.mxu1 }
 0xbbe   : > { %v4116_v23 = vadd.f32 %v4114_v38, %v12653_v28  ;;  %v15889_v38 = vld [vmem:[#allocation48_spill] sm:$0xff] }
 0xbbf   : > { %v4069_v26 = vpop.f32.mrf.mxu0 }
 0xbc0   : > { %4118 = vst [vmem:[#allocation2 + $0x8] sm:$0xf] %v4116_v23 }
 0xbc8   : > { %7500 = vmatmul.msk.bf16.gmra.mxu1 %vm595_vm2, %v15867_v46 }
 0xbca   : > { %7484 = vmatmul.msk.bf16.gmra.mxu0 %vm595_vm2, %v15867_v46 }
 0xbd5   : > { %v4106_v35 = vpop.f32.mrf.mxu1 }
 0xbd7   : > { %v4093_v43 = vpop.f32.mrf.mxu0 }
 0xbd8   : > { %v4107_v15 = vadd.f32 %v4106_v35, %v4093_v43  ;;  %7501 = vmatmul.msk.bf16.gmra.mxu1 %vm595_vm2, %v15868_v45 }
 0xbda   : > { %7485 = vmatmul.msk.bf16.gmra.mxu0 %vm595_vm2, %v15868_v45  ;;  %v4113_v7 = vmul.f32 %v8545_v12, %v4107_v15 }
 0xbdc   : > { %v4115_v16 = vmul.f32 %v4113_v7, %v15866_v53 }
 0xbdd   : > { %v4108_v10 = vpop.f32.mrf.mxu1 }
 0xbde   : > { %v4117_v6 = vadd.f32 %v4115_v16, %v12667_v30 }
 0xbdf   : > { %v4095_v51 = vpop.f32.mrf.mxu0 }
 0xbe0   : > { %4119 = vst [vmem:[#allocation2 + $0x20] sm:$0xf] %v4117_v6 }
 0xbe5   : > { %v12675_v56 = vpop.f32.mrf.mxu1 }
 0xbe7   : > { %v12673_v29 = vpop.f32.mrf.mxu0 }
 0xbe8   : > { %7502 = vmatmul.msk.bf16.gmra.mxu1 %vm595_vm2, %v15870_v14 }
 0xbea   : > { %7486 = vmatmul.msk.bf16.gmra.mxu0 %vm595_vm2, %v15870_v14 }
 0xbed   : > { %v12683_v2 = vpop.f32.mrf.mxu1 }
 0xbee   : > { %15871 = vst [vmem:[#allocation47_spill] sm:$0xff] %v12683_v2 }
 0xbef   : > { %v12681_v61 = vpop.f32.mrf.mxu0 }
 0xbf5   : > { %v12687_v11 = vpop.f32.mrf.mxu1 }
 0xbf6   : > { %15873 = vst [vmem:[#allocation59_spill] sm:$0xff] %v12687_v11 }
 0xbf7   : > { %v12685_v32 = vpop.f32.mrf.mxu0 }
 0xbf8   : > { %15872 = vst [vmem:[#allocation20_spill] sm:$0xff] %v12685_v32  ;;  %7503 = vmatmul.msk.bf16.gmra.mxu1 %vm595_vm2, %v15874_v25 }
 0xbfa   : > { %7487 = vmatmul.msk.bf16.gmra.mxu0 %vm595_vm2, %v15874_v25 }
 0xbfd   : > { %v12695_v62 = vpop.f32.mrf.mxu1 }
 0xbfe   : > { %15876 = vst [vmem:[#allocation82_spill] sm:$0xff] %v12695_v62 }
 0xbff   : > { %v12693_v22 = vpop.f32.mrf.mxu0 }
 0xc00   : > { %15875 = vst [vmem:[#allocation66_spill] sm:$0xff] %v12693_v22 }
 0xc05   : > { %v12699_v57 = vpop.f32.mrf.mxu1 }
 0xc07   : > { %v12697_v18 = vpop.f32.mrf.mxu0 }
 0xc08   : > { %15877 = vst [vmem:[#allocation8_spill] sm:$0xff] %v12697_v18  ;;  %7504 = vmatmul.msk.bf16.gmra.mxu1 %vm595_vm2, %v15878_v37 }
 0xc0a   : > { %7488 = vmatmul.msk.bf16.gmra.mxu0 %vm595_vm2, %v15878_v37 }
 0xc0d   : > { %v12707_v17 = vpop.f32.mrf.mxu1 }
 0xc0f   : > { %v12705_v42 = vpop.f32.mrf.mxu0 }
 0xc10   : > { %15879 = vst [vmem:[#allocation63_spill] sm:$0xff] %v12705_v42 }
 0xc15   : > { %v12711_v40 = vpop.f32.mrf.mxu1 }
 0xc17   : > { %v12709_v4 = vpop.f32.mrf.mxu0 }
 0xc18   : > { %15880 = vst [vmem:[#allocation26_spill] sm:$0xff] %v12709_v4  ;;  %7505 = vmatmul.msk.bf16.gmra.mxu1 %vm595_vm2, %v15881_v49 }
 0xc1a   : > { %7489 = vmatmul.msk.bf16.gmra.mxu0 %vm595_vm2, %v15881_v49 }
 0xc1d   : > { %v12719_v34 = vpop.f32.mrf.mxu1 }
 0xc1e   : > { %15882 = vst [vmem:[#allocation28_spill] sm:$0xff] %v12719_v34 }
 0xc1f   : > { %v12717_v27 = vpop.f32.mrf.mxu0 }
 0xc25   : > { %v12723_v36 = vpop.f32.mrf.mxu1 }
 0xc27   : > { %v12721_v5 = vpop.f32.mrf.mxu0 }
 0xc28   : > { %7506 = vmatmul.msk.bf16.gmra.mxu1 %vm595_vm2, %v15883_v19 }
 0xc2a   : > { %7490 = vmatmul.msk.bf16.gmra.mxu0 %vm595_vm2, %v15883_v19  ;;  %v4388_v19 = vmax.f32 %v12673_v29, %v12685_v32 }
 0xc2d   : > { %v12731_v54 = vpop.f32.mrf.mxu1 }
 0xc2e   : > { %15884 = vst [vmem:[#allocation87_spill] sm:$0xff] %v12731_v54 }
 0xc2f   : > { %v12729_v55 = vpop.f32.mrf.mxu0 }
 0xc35   : > { %v12735_v47 = vpop.f32.mrf.mxu1 }
 0xc37   : > { %v12733_v48 = vpop.f32.mrf.mxu0 }
 0xc38   : > { %7507 = vmatmul.msk.bf16.gmra.mxu1 %vm595_vm2, %v15885_v8 }
 0xc3a   : > { %7491 = vmatmul.msk.bf16.gmra.mxu0 %vm595_vm2, %v15885_v8  ;;  %v4389_v8 = vmax.f32 %v12681_v61, %v12693_v22 }
 0xc3d   : > { %v12743_v1 = vpop.f32.mrf.mxu1 }
 0xc3e   : > { %15886 = vst [vmem:[#allocation90_spill] sm:$0xff] %v12743_v1 }
 0xc3f   : > { %v12741_v13 = vpop.f32.mrf.mxu0 }
 0xc45   : > { %v12747_v59 = vpop.f32.mrf.mxu1 }
 0xc47   : > { %v12745_v41 = vpop.f32.mrf.mxu0 }
 0xc48   : > { %7508 = vmatmul.msk.bf16.gmra.mxu1 %vm595_vm2, %v15887_v20 }
 0xc4a   : > { %7492 = vmatmul.msk.bf16.gmra.mxu0 %vm595_vm2, %v15887_v20  ;;  %v4390_v20 = vmax.f32 %v4388_v19, %v12697_v18 }
 0xc4c   : > { %v4392_v53 = vmax.f32 %v4390_v20, %v12709_v4 }
 0xc4d   : > { %v12755_v0 = vpop.f32.mrf.mxu1 }
 0xc4e   : > { %15888 = vst [vmem:[#allocation17_spill] sm:$0xff] %v12755_v0  ;;  %v4394_v60 = vmax.f32 %v4392_v53, %v12721_v5 }
 0xc4f   : > { %v12753_v21 = vpop.f32.mrf.mxu0 }
 0xc50   : > { %v4396_v32 = vmax.f32 %v4394_v60, %v12733_v48 }
 0xc52   : > { %v4398_v19 = vmax.f32 %v4396_v32, %v12745_v41  ;;  %v4426_v32 = vmax.f32 %v12683_v2, %v12695_v62 }
 0xc55   : > { %v12759_v52 = vpop.f32.mrf.mxu1 }
 0xc57   : > { %v12757_v33 = vpop.f32.mrf.mxu0 }
 0xc58   : > { %7509 = vmatmul.msk.bf16.gmra.mxu1 %vm595_vm2, %v15889_v38  ;;  %v4400_v18 = vmax.f32 %v4398_v19, %v12757_v33 }
 0xc5a   : > { %7493 = vmatmul.msk.bf16.gmra.mxu0 %vm595_vm2, %v15889_v38  ;;  %v4391_v38 = vmax.f32 %v4389_v8, %v12705_v42 }
 0xc5c   : > { %v4393_v9 = vmax.f32 %v4391_v38, %v12717_v27 }
 0xc5d   : > { %v12767_v26 = vpop.f32.mrf.mxu1 }
 0xc5f   : > { %v12765_v24 = vpop.f32.mrf.mxu0 }
 0xc65   : > { %v12771_v31 = vpop.f32.mrf.mxu1 }
 0xc67   : > { %v12769_v23 = vpop.f32.mrf.mxu0 }
 0xc68   : > { %v4402_v53 = vmax.f32 %v4400_v18, %v12769_v23  ;;  %v4428_v18 = vmax.f32 %v4426_v32, %v12707_v17 }
 0xc6d   : > { %v12775_v46 = vpop.f32.mrf.mxu1 }
 0xc6e   : > { %15890 = vst [vmem:[#allocation31_spill] sm:$0xff] %v12775_v46 }
 0xc6f   : > { %v12773_v50 = vpop.f32.mrf.mxu0 }
 0xc75   : > { %v12779_v44 = vpop.f32.mrf.mxu1 }
 0xc77   : > { %v12777_v39 = vpop.f32.mrf.mxu0 }
 0xc78   : > { %v4404_v60 = vmax.f32 %v4402_v53, %v12777_v39 }
 0xc7d   : > { %v12783_v43 = vpop.f32.mrf.mxu1 }
 0xc7f   : > { %v12781_v3 = vpop.f32.mrf.mxu0 }
 0xc80   : > { %15891 = vst [vmem:[#allocation34_spill] sm:$0xff] %v12781_v3 }
 0xc85   : > { %v12787_v35 = vpop.f32.mrf.mxu1 }
 0xc87   : > { %v12785_v63 = vpop.f32.mrf.mxu0 }
 0xc8d   : > { %v12791_v15 = vpop.f32.mrf.mxu1 }
 0xc8e   : > { %15892 = vst [vmem:[#allocation92_spill] sm:$0xff] %v12791_v15 }
 0xc8f   : > { %v12789_v45 = vpop.f32.mrf.mxu0 }
 0xc95   : > { %v12795_v58 = vpop.f32.mrf.mxu1 }
 0xc97   : > { %v12793_v12 = vpop.f32.mrf.mxu0 }
 0xc9d   : > { %v12799_v16 = vpop.f32.mrf.mxu1 }
 0xc9e   : > { %15893 = vst [vmem:[#allocation69_spill] sm:$0xff] %v12799_v16 }
 0xc9f   : > { %v12797_v7 = vpop.f32.mrf.mxu0 }
 0xca5   : > { %v12803_v6 = vpop.f32.mrf.mxu1 }
 0xca6   : > { %15894 = vst [vmem:[#allocation65_spill] sm:$0xff] %v12803_v6 }
 0xca7   : > { %v12801_v51 = vpop.f32.mrf.mxu0 }
 0xcad   : > { %v12807_v14 = vpop.f32.mrf.mxu1 }
 0xcae   : > { %15895 = vst [vmem:[#allocation71_spill] sm:$0xff] %v12807_v14 }
 0xcaf   : > { %v12805_v10 = vpop.f32.mrf.mxu0 }
 0xcb5   : > { %v12811_v37 = vpop.f32.mrf.mxu1 }
 0xcb6   : > { %15896 = vst [vmem:[#allocation24_spill] sm:$0xff] %v12811_v37  ;;  %v4395_v37 = vmax.f32 %v4393_v9, %v12729_v55 }
 0xcb7   : > { %v12809_v25 = vpop.f32.mrf.mxu0 }
 0xcb8   : > { %v4397_v22 = vmax.f32 %v4395_v37, %v12741_v13 }
 0xcba   : > { %v4399_v8 = vmax.f32 %v4397_v22, %v12753_v21  ;;  %v4406_v22 = vmax.f32 %v4404_v60, %v12785_v63 }
 0xcbc   : > { %v4401_v20 = vmax.f32 %v4399_v8, %v12765_v24  ;;  %v4425_v8 = vmax.f32 %v12675_v56, %v12687_v11 }
 0xcbd   : > { %v12821_v30 = vpop.f32.mrf.mxu1 }
 0xcbe   : > { %v4403_v9 = vmax.f32 %v4401_v20, %v12773_v50  ;;  %v4408_v20 = vmax.f32 %v4406_v22, %v12793_v12 }
 0xcbf   : > { %v12813_v49 = vpop.f32.mrf.mxu0 }
 0xcc0   : > { %v4405_v37 = vmax.f32 %v4403_v9, %v12781_v3  ;;  %v4427_v9 = vmax.f32 %v4425_v8, %v12699_v57  ;;  %v4430_v3 = vmax.f32 %v4428_v18, %v12719_v34  ;;  %v4410_v62 = vmax.f32 %v4408_v20, %v12801_v51 }
 0xcc2   : > { %v4407_v38 = vmax.f32 %v4405_v37, %v12789_v45  ;;  %v4429_v2 = vmax.f32 %v4427_v9, %v12711_v40  ;;  %v4432_v11 = vmax.f32 %v4430_v3, %v12731_v54  ;;  %v4412_v32 = vmax.f32 %v4410_v62, %v12809_v25 }
 0xcc4   : > { %v4409_v53 = vmax.f32 %v4407_v38, %v12797_v7  ;;  %v4431_v38 = vmax.f32 %v4429_v2, %v12723_v36  ;;  %v4434_v8 = vmax.f32 %v4432_v11, %v12743_v1 }
 0xcc5   : > { %v12837_v4 = vpop.f32.mrf.mxu1 }
 0xcc6   : > { %v4411_v60 = vmax.f32 %v4409_v53, %v12805_v10  ;;  %v4433_v53 = vmax.f32 %v4431_v38, %v12735_v47  ;;  %v4436_v9 = vmax.f32 %v4434_v8, %v12755_v0 }
 0xcc7   : > { %v12823_v28 = vpop.f32.mrf.mxu0 }
 0xcc8   : > { %v4413_v22 = vmax.f32 %v4411_v60, %v12813_v49  ;;  %v4414_v18 = vmax.f32 %v4412_v32, %v12823_v28  ;;  %v4435_v60 = vmax.f32 %v4433_v53, %v12747_v59  ;;  %v4438_v2 = vmax.f32 %v4436_v9, %v12767_v26 }
 0xcca   : > { %v4437_v11 = vmax.f32 %v4435_v60, %v12759_v52  ;;  %v4440_v32 = vmax.f32 %v4438_v2, %v12775_v46 }
 0xccc   : > { %v4439_v38 = vmax.f32 %v4437_v11, %v12771_v31  ;;  %v4442_v8 = vmax.f32 %v4440_v32, %v12783_v43 }
 0xccd   : > { %v12858_v37 = vpop.f32.mrf.mxu1 }
 0xccf   : > { %v12833_v42 = vpop.f32.mrf.mxu0 }
 0xcd0   : > { %v4415_v20 = vmax.f32 %v4413_v22, %v12833_v42 }
 0xcd5   : > { %v12878_v1 = vpop.f32.mrf.mxu1 }
 0xcd7   : > { %v12847_v19 = vpop.f32.mrf.mxu0 }
 0xcd8   : > { %v4416_v3 = vmax.f32 %v4414_v18, %v12847_v19  ;;  %v4441_v18 = vmax.f32 %v4439_v38, %v12779_v44 }
 0xcda   : > { %v4443_v9 = vmax.f32 %v4441_v18, %v12787_v35 }
 0xcdc   : > { %v4445_v60 = vmax.f32 %v4443_v9, %v12795_v58 }
 0xcde   : > { %v4447_v11 = vmax.f32 %v4445_v60, %v12803_v6  ;;  %v15902_v6 = vld [vmem:[#allocation26_spill] sm:$0xff] }
 0xcdf   : > { %v12868_v34 = vpop.f32.mrf.mxu0 }
 0xce0   : > { %v4417_v62 = vmax.f32 %v4415_v20, %v12868_v34  ;;  %v4444_v20 = vmax.f32 %v4442_v8, %v12791_v15 }
 0xce2   : > { %v4418_v54 = vmax.f32 %v4416_v3, %v4417_v62  ;;  %v4446_v3 = vmax.f32 %v4444_v20, %v12799_v16 }
 0xce4   : > { %v4419_v22 = vrot.slane %v4418_v54, 4  ;;  %v4448_v2 = vmax.f32 %v4446_v3, %v12807_v14  ;;  %v15898_v3 = vld [vmem:[#allocation20_spill] sm:$0xff] }
 0xce6   : > { %v4420_v0 = vmax.f32 %v4418_v54, %v4419_v22  ;;  %v4450_v32 = vmax.f32 %v4448_v2, %v12821_v30  ;;  %v12890_v54 = vpop.f32.mrf.mxu1  ;;  %v15897_v22 = vld [vmem:[#allocation24_spill] sm:$0xff] }
 0xce7   : > { %v4449_v38 = vmax.f32 %v4447_v11, %v15897_v22  ;;  %v15899_v11 = vld [vmem:[#allocation66_spill] sm:$0xff] }
 0xce8   : > { %v4421_v53 = vrot.slane %v4420_v0, 2  ;;  %v4452_v8 = vmax.f32 %v4450_v32, %v12858_v37 }
 0xce9   : > { %v4451_v18 = vmax.f32 %v4449_v38, %v12837_v4  ;;  %v15900_v38 = vld [vmem:[#allocation8_spill] sm:$0xff] }
 0xcea   : > { %v4422_v62 = vmax.f32 %v4420_v0, %v4421_v53  ;;  %v4454_v0 = vmax.f32 %v4452_v8, %v12890_v54 }
 0xceb   : > { %v4453_v20 = vmax.f32 %v4451_v18, %v12878_v1 }
 0xcec   : > { %v4423_v46 = vrot.slane %v4422_v62, 1 }
 0xced   : > { %v4455_v2 = vmax.f32 %v4453_v20, %v4454_v0 }
 0xcee   : > { %v12894_v15 = vmax.f32 %v4422_v62, %v4423_v46 }
 0xcef   : > { %v4456_v18 = vrot.slane %v4455_v2, 4 }
 0xcf0   : > { %v4462_v53 = vsub.f32 %v12673_v29, %v12894_v15  ;;  %v4464_v9 = vsub.f32 %v12681_v61, %v12894_v15  ;;  %v4466_v60 = vsub.f32 %v15898_v3, %v12894_v15  ;;  %v4468_v46 = vsub.f32 %v15899_v11, %v12894_v15  ;;  %v15901_v29 = vld [vmem:[#allocation63_spill] sm:$0xff] }
 0xcf1   : > { %v4470_v8 = vsub.f32 %v15900_v38, %v12894_v15  ;;  %v4472_v14 = vsub.f32 %v15901_v29, %v12894_v15  ;;  %v4474_v3 = vsub.f32 %v15902_v6, %v12894_v15  ;;  %v4457_v20 = vmax.f32 %v4455_v2, %v4456_v18 }
 0xcf2   : > { %v4526_v62 = vmul.f32 1.442695, %v4462_v53  ;;  %v4530_v32 = vmul.f32 1.442695, %v4464_v9  ;;  %v4534_v16 = vmul.f32 1.442695, %v4466_v60  ;;  %v4476_v53 = vsub.f32 %v12717_v27, %v12894_v15 }
 0xcf3   : > { %v4538_v61 = vmul.f32 1.442695, %v4468_v46  ;;  %v4542_v0 = vmul.f32 1.442695, %v4470_v8  ;;  %v4546_v9 = vmul.f32 1.442695, %v4472_v14  ;;  %v4478_v60 = vsub.f32 %v12721_v5, %v12894_v15 }
 0xcf4   : > { %8546 = vpow2.f32 %v4526_v62  ;;  %v4480_v46 = vsub.f32 %v12729_v55, %v12894_v15  ;;  %v4550_v6 = vmul.f32 1.442695, %v4474_v3  ;;  %v4458_v2 = vrot.slane %v4457_v20, 2 }
 0xcf5   : > { %8548 = vpow2.f32 %v4530_v32  ;;  %v4484_v32 = vsub.f32 %v12741_v13, %v12894_v15  ;;  %v4554_v5 = vmul.f32 1.442695, %v4476_v53  ;;  %v4486_v38 = vsub.f32 %v12745_v41, %v12894_v15 }
 0xcf6   : > { %8550 = vpow2.f32 %v4534_v16  ;;  %v4482_v16 = vsub.f32 %v12733_v48, %v12894_v15  ;;  %v4558_v55 = vmul.f32 1.442695, %v4478_v60  ;;  %v4488_v48 = vsub.f32 %v12753_v21, %v12894_v15 }
 0xcf7   : > { %8552 = vpow2.f32 %v4538_v61  ;;  %v4562_v29 = vmul.f32 1.442695, %v4480_v46  ;;  %v4490_v61 = vsub.f32 %v12757_v33, %v12894_v15  ;;  %v4492_v41 = vsub.f32 %v12765_v24, %v12894_v15 }
 0xcf8   : > { %8554 = vpow2.f32 %v4542_v0  ;;  %v4566_v3 = vmul.f32 1.442695, %v4482_v16  ;;  %v4459_v0 = vmax.f32 %v4457_v20, %v4458_v2  ;;  %v4494_v60 = vsub.f32 %v12769_v23, %v12894_v15 }
 0xcf9   : > { %8556 = vpow2.f32 %v4546_v9  ;;  %v4570_v9 = vmul.f32 1.442695, %v4484_v32  ;;  %v4574_v21 = vmul.f32 1.442695, %v4486_v38  ;;  %v4496_v33 = vsub.f32 %v12773_v50, %v12894_v15  ;;  %v15903_v32 = vld [vmem:[#allocation34_spill] sm:$0xff] }
 0xcfa   : > { %v12915_v11 = vpop.eup %8546  ;;  %8558 = vpow2.f32 %v4550_v6  ;;  %v4498_v20 = vsub.f32 %v12777_v39, %v12894_v15  ;;  %v4578_v16 = vmul.f32 1.442695, %v4488_v48  ;;  %v4582_v24 = vmul.f32 1.442695, %v4490_v61 }
 0xcfb   : > { %v12919_v62 = vpop.eup %8548  ;;  %8560 = vpow2.f32 %v4554_v5  ;;  %v4460_v2 = vrot.slane %v4459_v0, 1  ;;  %v4500_v5 = vsub.f32 %v15903_v32, %v12894_v15  ;;  %v4586_v38 = vmul.f32 1.442695, %v4492_v41 }
 0xcfc   : > { %v4654_v27 = vadd.f32 %v12919_v62, %v12915_v11  ;;  %v12927_v14 = vpop.eup %8550  ;;  %8562 = vpow2.f32 %v4558_v55  ;;  %v4502_v50 = vsub.f32 %v12785_v63, %v12894_v15  ;;  %v4590_v55 = vmul.f32 1.442695, %v4494_v60 }
 0xcfd   : > { %v12934_v18 = vpop.eup %8552  ;;  %8564 = vpow2.f32 %v4562_v29  ;;  %v4504_v48 = vsub.f32 %v12789_v45, %v12894_v15  ;;  %v4506_v29 = vsub.f32 %v12793_v12, %v12894_v15  ;;  %v4594_v61 = vmul.f32 1.442695, %v4496_v33 }
 0xcfe   : > { %v4655_v8 = vadd.f32 %v12927_v14, %v4654_v27  ;;  %v12941_v53 = vpop.eup %8554  ;;  %8566 = vpow2.f32 %v4566_v3  ;;  %v12971_v41 = vmax.f32 %v4459_v0, %v4460_v2  ;;  %v4518_v60 = vsub.f32 %v12823_v28, %v12894_v15 }
 0xcff   : > { %v12948_v6 = vpop.eup %8556  ;;  %8568 = vpow2.f32 %v4570_v9  ;;  %v4602_v45 = vmul.f32 1.442695, %v4500_v5  ;;  %v4522_v12 = vsub.f32 %v12847_v19, %v12894_v15  ;;  %v4524_v0 = vsub.f32 %v12868_v34, %v12894_v15  ;;  %v15904_v5 = vld [vmem:[#allocation47_spill] sm:$0xff] }
 0xd00   : > { %v4656_v13 = vadd.f32 %v12934_v18, %v4655_v8  ;;  %v12955_v23 = vpop.eup %8558  ;;  %8570 = vpow2.f32 %v4574_v21  ;;  %v4614_v28 = vmul.f32 1.442695, %v4506_v29  ;;  %v4463_v19 = vsub.f32 %v12675_v56, %v12971_v41  ;;  %v15905_v29 = vld [vmem:[#allocation59_spill] sm:$0xff] }
 0xd01   : > { %v12962_v8 = vpop.eup %8560  ;;  %8572 = vpow2.f32 %v4578_v16  ;;  %v4610_v16 = vmul.f32 1.442695, %v4504_v48  ;;  %v4638_v32 = vmul.f32 1.442695, %v4518_v60  ;;  %v4520_v34 = vsub.f32 %v12833_v42, %v12894_v15 }
 0xd02   : > { %v4657_v46 = vadd.f32 %v12941_v53, %v4656_v13  ;;  %v12968_v3 = vpop.eup %8562  ;;  %8574 = vpow2.f32 %v4582_v24  ;;  %v4598_v13 = vmul.f32 1.442695, %v4498_v20  ;;  %v4650_v56 = vmul.f32 1.442695, %v4524_v0 }
 0xd03   : > { %v12973_v9 = vpop.eup %8564  ;;  %8576 = vpow2.f32 %v4586_v38  ;;  %v4465_v38 = vsub.f32 %v15904_v5, %v12971_v41  ;;  %v4528_v42 = vmul.f32 1.442695, %v4463_v19  ;;  %v4471_v19 = vsub.f32 %v12699_v57, %v12971_v41 }
 0xd04   : > { %v4658_v27 = vadd.f32 %v12948_v6, %v4657_v46  ;;  %v12977_v21 = vpop.eup %8566  ;;  %8578 = vpow2.f32 %v4590_v55  ;;  %v4606_v46 = vmul.f32 1.442695, %v4502_v50  ;;  %v4646_v55 = vmul.f32 1.442695, %v4522_v12  ;;  %v15906_v12 = vld [vmem:[#allocation82_spill] sm:$0xff] }
 0xd05   : > { %v12982_v20 = vpop.eup %8568  ;;  %8580 = vpow2.f32 %v4594_v61  ;;  %v4467_v61 = vsub.f32 %v15905_v29, %v12971_v41  ;;  %v4512_v57 = vsub.f32 %v12805_v10, %v12894_v15 }
 0xd06   : > { %v4659_v39 = vadd.f32 %v12955_v23, %v4658_v27  ;;  %v12986_v24 = vpop.eup %8570  ;;  %8582 = vpow2.f32 %v4598_v13 }
 0xd07   : > { %v12991_v2 = vpop.eup %8572  ;;  %8584 = vpow2.f32 %v4602_v45 }
 0xd08   : > { %v4660_v63 = vadd.f32 %v12962_v8, %v4659_v39  ;;  %v12995_v50 = vpop.eup %8574  ;;  %8586 = vpow2.f32 %v4606_v46  ;;  %v4469_v46 = vsub.f32 %v15906_v12, %v12971_v41 }
 0xd09   : > { %v13000_v48 = vpop.eup %8576  ;;  %8588 = vpow2.f32 %v4610_v16  ;;  %v4516_v16 = vsub.f32 %v12813_v49, %v12894_v15 }
 0xd0a   : > { %v4661_v33 = vadd.f32 %v12968_v3, %v4660_v63  ;;  %v13004_v13 = vpop.eup %8578  ;;  %v4514_v63 = vsub.f32 %v12809_v25, %v12894_v15  ;;  %8590 = vpow2.f32 %v4614_v28 }
 0xd0b   : > { %v13009_v45 = vpop.eup %8580  ;;  %8592 = vpow2.f32 %v4638_v32  ;;  %v4536_v32 = vmul.f32 1.442695, %v4467_v61  ;;  %v4634_v61 = vmul.f32 1.442695, %v4516_v16  ;;  %v15907_v16 = vld [vmem:[#allocation28_spill] sm:$0xff] }
 0xd0c   : > { %v4662_v27 = vadd.f32 %v12973_v9, %v4661_v33  ;;  %v4532_v33 = vmul.f32 1.442695, %v4465_v38  ;;  %v13013_v0 = vpop.eup %8582  ;;  %8594 = vpow2.f32 %v4646_v55  ;;  %v4510_v38 = vsub.f32 %v12801_v51, %v12894_v15 }
 0xd0d   : > { %v13018_v28 = vpop.eup %8584  ;;  %8596 = vpow2.f32 %v4650_v56  ;;  %v4540_v55 = vmul.f32 1.442695, %v4469_v46 }
 0xd0e   : > { %v4663_v39 = vadd.f32 %v12977_v21, %v4662_v27  ;;  %v4642_v27 = vmul.f32 1.442695, %v4520_v34  ;;  %v13022_v5 = vpop.eup %8586  ;;  %8598 = vpow2.f32 %v4528_v42  ;;  %v4473_v34 = vsub.f32 %v12707_v17, %v12971_v41 }
 0xd0f   : > { %v13027_v49 = vpop.eup %8588  ;;  %8600 = vpow2.f32 %v4532_v33  ;;  %v4544_v42 = vmul.f32 1.442695, %v4471_v19  ;;  %v4508_v17 = vsub.f32 %v12797_v7, %v12894_v15  ;;  %v4622_v46 = vmul.f32 1.442695, %v4510_v38 }
 0xd10   : > { %v4664_v60 = vadd.f32 %v12982_v20, %v4663_v39  ;;  %v4630_v39 = vmul.f32 1.442695, %v4514_v63  ;;  %v13031_v56 = vpop.eup %8590  ;;  %8602 = vpow2.f32 %v4642_v27  ;;  %v4477_v27 = vsub.f32 %v15907_v16, %v12971_v41 }
 0xd11   : > { %v13036_v63 = vpop.eup %8592  ;;  %8604 = vpow2.f32 %v4536_v32  ;;  %v4744_v15 = vpack.c.bf16 %v13000_v48, %v12995_v50  ;;  %v4479_v32 = vsub.f32 %v12723_v36, %v12971_v41  ;;  %v4483_v16 = vsub.f32 %v12735_v47, %v12971_v41 }
 0xd12   : > { %v4665_v25 = vadd.f32 %v12986_v24, %v4664_v60  ;;  %v4475_v60 = vsub.f32 %v12711_v40, %v12971_v41  ;;  %v13040_v12 = vpop.eup %8594  ;;  %8606 = vpow2.f32 %v4630_v39  ;;  %v4626_v40 = vmul.f32 1.442695, %v4512_v57 }
 0xd13   : > { %v13045_v33 = vpop.eup %8596  ;;  %8608 = vpow2.f32 %v4540_v55  ;;  %v4618_v55 = vmul.f32 1.442695, %v4508_v17  ;;  %4768 = vmatpush.bf16.msrb.mxu2 %v4744_v15 }
 0xd14   : > { %v4666_v29 = vadd.f32 %v12991_v2, %v4665_v25  ;;  %v4548_v25 = vmul.f32 1.442695, %v4473_v34  ;;  %8610 = vpow2.f32 %v4634_v61  ;;  %v4552_v38 = vmul.f32 1.442695, %v4475_v60 }
 0xd15   : > { %8612 = vpow2.f32 %v4544_v42  ;;  %v4760_v39 = vpack.c.bf16 %v13045_v33, %v13040_v12 }
 0xd16   : > { %v4667_v51 = vadd.f32 %v12995_v50, %v4666_v29  ;;  %v13049_v29 = vpop.eup %8598  ;;  %8614 = vpow2.f32 %v4622_v46  ;;  %v4742_v46 = vpack.c.bf16 %v12991_v2, %v12986_v24  ;;  %v15910_v24 = vld [vmem:[#allocation90_spill] sm:$0xff] }
 0xd17   : > { %v13054_v7 = vpop.eup %8600  ;;  %8616 = vpow2.f32 %v4548_v25  ;;  %4781 = vmatpush.bf16.msrb.mxu3 %v4760_v39  ;;  %v4485_v2 = vsub.f32 %v15910_v24, %v12971_v41 }
 0xd18   : > { %v4668_v10 = vadd.f32 %v13000_v48, %v4667_v51  ;;  %15908 = vst [vmem:[#allocation9_spill] sm:$0xff] %v13054_v7  ;;  %v13060_v34 = vpop.eup %8602  ;;  %v4691_v61 = vadd.f32 %v13054_v7, %v13049_v29  ;;  %v15909_v48 = vld [vmem:[#allocation87_spill] sm:$0xff]  ;;  %v4556_v51 = vmul.f32 1.442695, %v4477_v27  ;;  %8618 = vpow2.f32 %v4626_v40  ;;  %4769 = vmatpush.bf16.msrb.mxu2 %v4742_v46 }
 0xd19   : > { %v13065_v50 = vpop.eup %8604  ;;  %v4481_v36 = vsub.f32 %v15909_v48, %v12971_v41  ;;  %8620 = vpow2.f32 %v4552_v38  ;;  %v4758_v27 = vpack.c.bf16 %v13060_v34, %v13036_v63  ;;  %v4572_v24 = vmul.f32 1.442695, %v4485_v2 }
 0xd1a   : > { %v4669_v19 = vadd.f32 %v13004_v13, %v4668_v10  ;;  %v13069_v60 = vpop.eup %8606  ;;  %v4692_v17 = vadd.f32 %v13065_v50, %v4691_v61  ;;  %8622 = vpow2.f32 %v4618_v55  ;;  %v4740_v61 = vpack.c.bf16 %v12982_v20, %v12977_v21 }
 0xd1b   : > { %v13075_v10 = vpop.eup %8608  ;;  %8624 = vpow2.f32 %v4556_v51  ;;  %v4564_v47 = vmul.f32 1.442695, %v4481_v36  ;;  %4782 = vmatpush.bf16.msrb.mxu3 %v4758_v27  ;;  %v4568_v51 = vmul.f32 1.442695, %v4483_v16  ;;  %v4495_v16 = vsub.f32 %v12771_v31, %v12971_v41 }
 0xd1c   : > { %v4670_v57 = vadd.f32 %v13009_v45, %v4669_v19  ;;  %v4560_v19 = vmul.f32 1.442695, %v4479_v32  ;;  %v13081_v25 = vpop.eup %8610  ;;  %v4693_v15 = vadd.f32 %v13075_v10, %v4692_v17  ;;  %4770 = vmatpush.bf16.msrb.mxu2 %v4740_v61  ;;  %v4738_v61 = vpack.c.bf16 %v12973_v9, %v12968_v3  ;;  %v15913_v3 = vld [vmem:[#allocation92_spill] sm:$0xff] }
 0xd1d   : > { %v13085_v39 = vpop.eup %8612  ;;  %v4756_v36 = vpack.c.bf16 %v13081_v25, %v13069_v60  ;;  %v4501_v31 = vsub.f32 %v12783_v43, %v12971_v41  ;;  %v4523_v7 = vsub.f32 %v12878_v1, %v12971_v41  ;;  %v4525_v9 = vsub.f32 %v12890_v54, %v12971_v41 }
 0xd1e   : > { %v4671_v42 = vadd.f32 %v13013_v0, %v4670_v57  ;;  %v8615_v32 = vpop.eup %8614  ;;  %v4487_v57 = vsub.f32 %v12747_v59, %v12971_v41  ;;  %v4694_v55 = vadd.f32 %v13085_v39, %v4693_v15  ;;  %8626 = vpow2.f32 %v4560_v19  ;;  %v15912_v19 = vld [vmem:[#allocation31_spill] sm:$0xff] }
 0xd1f   : > { %v13095_v48 = vpop.eup %8616  ;;  %v4491_v59 = vsub.f32 %v12759_v52, %v12971_v41  ;;  %v4497_v15 = vsub.f32 %v15912_v19, %v12971_v41  ;;  %8628 = vpow2.f32 %v4564_v47  ;;  %4783 = vmatpush.bf16.msrb.mxu3 %v4756_v36 }
 0xd20   : > { %v4672_v40 = vadd.f32 %v13018_v28, %v4671_v42  ;;  %v15911_v42 = vld [vmem:[#allocation17_spill] sm:$0xff]  ;;  %v8619_v46 = vpop.eup %8618  ;;  %v4695_v21 = vadd.f32 %v13095_v48, %v4694_v55  ;;  %8630 = vpow2.f32 %v4568_v51  ;;  %v4576_v47 = vmul.f32 1.442695, %v4487_v57  ;;  %4771 = vmatpush.bf16.msrb.mxu2 %v4738_v61 }
 0xd21   : > { %v4489_v17 = vsub.f32 %v15911_v42, %v12971_v41  ;;  %v13107_v20 = vpop.eup %8620  ;;  %v4754_v2 = vpack.c.bf16 %v8619_v46, %v8615_v32  ;;  %8632 = vpow2.f32 %v4572_v24  ;;  %v4584_v43 = vmul.f32 1.442695, %v4491_v59 }
 0xd22   : > { %v4673_v38 = vadd.f32 %v13022_v5, %v4672_v40  ;;  %v4493_v40 = vsub.f32 %v12767_v26, %v12971_v41  ;;  %v4499_v26 = vsub.f32 %v12779_v44, %v12971_v41  ;;  %v4696_v55 = vadd.f32 %v13107_v20, %v4695_v21 }
 0xd23   : > { %v4580_v19 = vmul.f32 1.442695, %v4489_v17  ;;  %4784 = vmatpush.bf16.msrb.mxu3 %v4754_v2  ;;  %v4736_v17 = vpack.c.bf16 %v12962_v8, %v12955_v23  ;;  %v4519_v61 = vsub.f32 %v12837_v4, %v12971_v41  ;;  %8634 = vpow2.f32 %v4576_v47 }
 0xd24   : > { %v4674_v27 = vadd.f32 %v13027_v49, %v4673_v38  ;;  %v8623_v38 = vpop.eup %8622  ;;  %v4588_v51 = vmul.f32 1.442695, %v4493_v40  ;;  %v4521_v23 = vsub.f32 %v12858_v37, %v12971_v41  ;;  %v4596_v8 = vmul.f32 1.442695, %v4497_v15 }
 0xd25   : > { %v13119_v42 = vpop.eup %8624  ;;  %v4752_v1 = vpack.c.bf16 %v8623_v38, %v13031_v56  ;;  %8636 = vpow2.f32 %v4580_v19  ;;  %4772 = vmatpush.bf16.msrb.mxu2 %v4736_v17  ;;  %v4648_v4 = vmul.f32 1.442695, %v4523_v7  ;;  %v4515_v37 = vsub.f32 %v15897_v22, %v12971_v41  ;;  %v15915_v17 = vld [vmem:[#allocation71_spill] sm:$0xff] }
 0xd26   : > { %v4675_v52 = vadd.f32 %v13031_v56, %v4674_v27  ;;  %v4503_v27 = vsub.f32 %v12787_v35, %v12971_v41  ;;  %v4697_v44 = vadd.f32 %v13119_v42, %v4696_v55  ;;  %v13126_v21 = vpop.eup %8626  ;;  %8638 = vpow2.f32 %v4584_v43 }
 0xd27   : > { %v13135_v55 = vpop.eup %8628  ;;  %4785 = vmatpush.bf16.msrb.mxu3 %v4752_v1  ;;  %8640 = vpow2.f32 %v4588_v51  ;;  %v4652_v47 = vmul.f32 1.442695, %v4525_v9  ;;  %v4750_v7 = vpack.c.bf16 %v13027_v49, %v13022_v5  ;;  %v4640_v15 = vmul.f32 1.442695, %v4519_v61  ;;  %v15914_v9 = vld [vmem:[#allocation65_spill] sm:$0xff] }
 0xd28   : > { %v4676_v36 = vadd.f32 %v8623_v38, %v4675_v52  ;;  %v4698_v52 = vadd.f32 %v13126_v21, %v4697_v44  ;;  %v13143_v24 = vpop.eup %8630  ;;  %v4507_v38 = vsub.f32 %v12795_v58, %v12971_v41  ;;  %v4644_v19 = vmul.f32 1.442695, %v4521_v23 }
 0xd29   : > { %v4732_v49 = vpack.c.bf16 %v12934_v18, %v12927_v14  ;;  %v4511_v43 = vsub.f32 %v15914_v9, %v12971_v41  ;;  %v4513_v61 = vsub.f32 %v15915_v17, %v12971_v41  ;;  %v4608_v14 = vmul.f32 1.442695, %v4503_v27 }
 0xd2a   : > { %v4677_v57 = vadd.f32 %v8615_v32, %v4676_v36  ;;  %v4592_v32 = vmul.f32 1.442695, %v4495_v16  ;;  %v4699_v40 = vadd.f32 %v13135_v55, %v4698_v52  ;;  %v13151_v16 = vpop.eup %8632  ;;  %v4600_v36 = vmul.f32 1.442695, %v4499_v26 }
 0xd2b   : > { %4786 = vmatpush.bf16.msrb.mxu3 %v4750_v7  ;;  %v4632_v52 = vmul.f32 1.442695, %v4515_v37  ;;  %v4746_v27 = vpack.c.bf16 %v13009_v45, %v13004_v13  ;;  %v4624_v23 = vmul.f32 1.442695, %v4511_v43  ;;  %v15919_v37 = vld [vmem:[#allocation16_spill] sm:$0xff] }
 0xd2c   : > { %v4678_v59 = vadd.f32 %v8619_v46, %v4677_v57  ;;  %v4700_v56 = vadd.f32 %v13143_v24, %v4699_v40  ;;  %v4734_v46 = vpack.c.bf16 %v12948_v6, %v12941_v53  ;;  %8642 = vpow2.f32 %v4592_v32  ;;  %v13161_v53 = vpop.eup %8634 }
 0xd2d   : > { %v4517_v6 = vsub.f32 %v12821_v30, %v12971_v41  ;;  %8644 = vpow2.f32 %v4596_v8  ;;  %v8637_v22 = vpop.eup %8636  ;;  %v4604_v57 = vmul.f32 1.442695, %v4501_v31  ;;  %v4748_v30 = vpack.c.bf16 %v13018_v28, %v13013_v0 }
 0xd2e   : > { %v4679_v54 = vadd.f32 %v13069_v60, %v4678_v59  ;;  %v4701_v2 = vadd.f32 %v13151_v16, %v4700_v56  ;;  %4773 = vmatpush.bf16.msrb.mxu2 %v4734_v46  ;;  %8646 = vpow2.f32 %v4648_v4  ;;  %v15916_v59 = vsub.f32 %v15913_v3, %v12971_v41  ;;  %v15918_v3 = vld [vmem:[#allocation69_spill] sm:$0xff] }
 0xd2f   : > { %8648 = vpow2.f32 %v4652_v47  ;;  %v4636_v18 = vmul.f32 1.442695, %v4517_v6  ;;  %4787 = vmatpush.bf16.msrb.mxu3 %v4748_v30  ;;  %v4628_v56 = vmul.f32 1.442695, %v4513_v61  ;;  %v4765_v47 = vrot.slane %v15919_v37, 2  ;;  %v15931_v37 = vld [vmem:[#allocation64_spill] sm:$0xff] }
 0xd30   : > { %v4680_v60 = vadd.f32 %v13081_v25, %v4679_v54  ;;  %v4702_v5 = vadd.f32 %v13161_v53, %v4701_v2  ;;  %v8639_v25 = vpop.eup %8638  ;;  %8650 = vpow2.f32 %v4640_v15  ;;  %v4612_v35 = vmul.f32 1.442695, %v15916_v59 }
 0xd31   : > { %v8641_v26 = vpop.eup %8640  ;;  %8652 = vpow2.f32 %v4644_v19  ;;  %v4509_v54 = vsub.f32 %v15918_v3, %v12971_v41  ;;  %v4616_v7 = vmul.f32 1.442695, %v4507_v38  ;;  %v4733_v59 = vpack.c.bf16 %v13075_v10, %v13065_v50 }
 0xd32   : > { %v4681_v44 = vadd.f32 %v13036_v63, %v4680_v60  ;;  %v4703_v63 = vadd.f32 %v8637_v22, %v4702_v5  ;;  %4774 = vmatpush.bf16.msrb.mxu2 %v4732_v49  ;;  %v13179_v31 = vpop.eup %8642  ;;  %8654 = vpow2.f32 %v4600_v36  ;;  %v4745_v32 = vpack.c.bf16 %v8641_v26, %v8639_v25 }
 0xd33   : > { %v13184_v1 = vpop.eup %8644  ;;  %8656 = vpow2.f32 %v4604_v57  ;;  %4788 = vmatpush.bf16.msrb.mxu3 %v4746_v27  ;;  %v4743_v60 = vpack.c.bf16 %v8637_v22, %v13161_v53  ;;  %v4620_v36 = vmul.f32 1.442695, %v4509_v54  ;;  %v4741_v53 = vpack.c.bf16 %v13151_v16, %v13143_v24 }
 0xd34   : > { %v4682_v51 = vadd.f32 %v13060_v34, %v4681_v44  ;;  %v4704_v28 = vadd.f32 %v8639_v25, %v4703_v63  ;;  %v4730_v34 = vpack.c.bf16 %v12919_v62, %v12915_v11  ;;  %v13191_v40 = vpop.eup %8646  ;;  %8658 = vpow2.f32 %v4632_v52  ;;  %v15917_v62 = vld [vmem:[#allocation6_spill] sm:$0xff] }
 0xd35   : > { %v13196_v11 = vpop.eup %8648  ;;  %v4764_v4 = vrot.slane %v15917_v62, 2  ;;  %8660 = vpow2.f32 %v4636_v18  ;;  %v4739_v57 = vpack.c.bf16 %v13135_v55, %v13126_v21  ;;  %v4737_v16 = vpack.c.bf16 %v13119_v42, %v13107_v20  ;;  %v15920_v21 = vld [vmem:[#allocation57_spill] sm:$0xff]  ;;  %v15921_v55 = vld [vmem:[#allocation10_spill] sm:$0xff]  ;;  %v15922_v20 = vld [vmem:[#allocation11_spill] sm:$0xff] }
 0xd36   : > { %v4683_v0 = vadd.f32 %v13040_v12, %v4682_v51  ;;  %v4705_v8 = vadd.f32 %v8641_v26, %v4704_v28  ;;  %4775 = vmatpush.bf16.msrb.mxu2 %v4730_v34  ;;  %v8651_v13 = vpop.eup %8650  ;;  %8662 = vpow2.f32 %v4608_v14  ;;  %4789 = vmatmul.bf16.vlgmr.msrb.gmra.mxu3 %v4765_v47  ;;  %v4735_v14 = vpack.c.bf16 %v13095_v48, %v13085_v39 }
 0xd37   : > { %v8653_v46 = vpop.eup %8652  ;;  %8664 = vpow2.f32 %v4612_v35  ;;  %v491_v42 = vadd.f32 %v15922_v20, %v15920_v21  ;;  %v4747_v54 = vpack.c.bf16 %v13184_v1, %v13179_v31 }
 0xd38   : > { %v13194_v12 = vadd.f32 %v13045_v33, %v4683_v0  ;;  %v4706_v45 = vadd.f32 %v13179_v31, %v4705_v8  ;;  %v4761_v33 = vpack.c.bf16 %v13196_v11, %v13191_v40  ;;  %v8655_v15 = vpop.eup %8654  ;;  %8666 = vpow2.f32 %v4624_v23  ;;  %v15927_v31 = vld [vmem:[#allocation50_spill] sm:$0xff] }
 0xd39   : > { %4776 = vmatmul.bf16.vlgmr.msrb.gmra.mxu2 %v4764_v4  ;;  %v8657_v6 = vpop.eup %8656  ;;  %8668 = vpow2.f32 %v4628_v56  ;;  %v4759_v41 = vpack.c.bf16 %v8653_v46, %v8651_v13  ;;  %v452_v0 = vadd.f32 %v15921_v55, %v15920_v21  ;;  %v13232_v8 = vpack.c.bf16 %v491_v42, %v491_v42 }
 0xd3a   : > { %4794 = vmatpush.bf16.msra.mxu2 %v4745_v32  ;;  %v4707_v2 = vadd.f32 %v13184_v1, %v4706_v45  ;;  %4807 = vmatpush.bf16.msra.mxu3 %v4761_v33  ;;  %v8659_v19 = vpop.eup %8658  ;;  %8670 = vpow2.f32 %v4616_v7  ;;  %v4749_v48 = vpack.c.bf16 %v8657_v6, %v8655_v15  ;;  %v15924_v32 = vld [vmem:[#allocation9_spill] sm:$0xff]  ;;  %v15928_v1 = vld [vmem:[#allocation60_spill] sm:$0xff] }
 0xd3b   : > { %v8661_v38 = vpop.eup %8660  ;;  %8672 = vpow2.f32 %v4620_v36  ;;  %v13228_v27 = vpack.c.bf16 %v452_v0, %v452_v0  ;;  %v4731_v23 = vpack.c.bf16 %v15924_v32, %v13049_v29  ;;  %15925 = vst [vmem:[#allocation22_spill] sm:$0xff] %v13232_v8  ;;  %v4920_v29 = vsel %vm644_vm1, %v13232_v8, 0  ;;  %v15932_v36 = vld [vmem:[#allocation36_spill] sm:$0xff]  ;;  %v15936_v0 = vld [vmem:[#allocation21_spill] sm:$0xff] }
 0xd3c   : > { %v4708_v58 = vadd.f32 %v8655_v15, %v4707_v2  ;;  %v8663_v22 = vpop.eup %8662  ;;  %v4757_v9 = vpack.c.bf16 %v8661_v38, %v8659_v19 }
 0xd3d   : > { %v8665_v5 = vpop.eup %8664  ;;  %15923 = vst [vmem:[#allocation46_spill] sm:$0xff] %v13228_v27  ;;  %v4917_v50 = vsel %vm644_vm1, %v13228_v27, 0 }
 0xd3e   : > { %4795 = vmatpush.bf16.msra.mxu2 %v4743_v60  ;;  %v4709_v44 = vadd.f32 %v8657_v6, %v4708_v58  ;;  %4808 = vmatpush.bf16.msra.mxu3 %v4759_v41  ;;  %v8667_v49 = vpop.eup %8666  ;;  %v4751_v34 = vpack.c.bf16 %v8665_v5, %v8663_v22 }
 0xd3f   : > { %v8669_v43 = vpop.eup %8668 }
 0xd40   : > { %v4710_v25 = vadd.f32 %v8663_v22, %v4709_v44  ;;  %v8671_v26 = vpop.eup %8670  ;;  %v4755_v52 = vpack.c.bf16 %v8669_v43, %v8667_v49  ;;  %v15933_v22 = vld [vmem:[#allocation61_spill] sm:$0xff]  ;;  %v15934_v44 = vld [vmem:[#allocation14_spill] sm:$0xff] }
 0xd41   : > { %v8673_v24 = vpop.eup %8672 }
 0xd42   : > { %4796 = vmatpush.bf16.msra.mxu2 %v4741_v53  ;;  %v4711_v30 = vadd.f32 %v8665_v5, %v4710_v25  ;;  %4809 = vmatpush.bf16.msra.mxu3 %v4757_v9  ;;  %v4753_v61 = vpack.c.bf16 %v8673_v24, %v8671_v26 }
 0xd44   : > { %v4712_v51 = vadd.f32 %v8671_v26, %v4711_v30  ;;  %v15935_v30 = vld [vmem:[#allocation53_spill] sm:$0xff]  ;;  %v8948_v26 = vld [vmem:[#allocation3 + $0x10] sm:$0xff] }
 0xd46   : > { %4797 = vmatpush.bf16.msra.mxu2 %v4739_v57  ;;  %v4713_v63 = vadd.f32 %v8673_v24, %v4712_v51  ;;  %4810 = vmatpush.bf16.msra.mxu3 %v4755_v52  ;;  %v8949_v51 = vld [vmem:[#allocation3 + $0x18] sm:$0xff] }
 0xd47   : > { %v7691_v52 = vpack.i.bf16 %v8949_v51, %v8948_v26  ;;  %v15958_v26 = vld [vmem:[#allocation91_spill] sm:$0xff] }
 0xd48   : > { %v4714_v17 = vadd.f32 %v8667_v49, %v4713_v63 }
 0xd4a   : > { %4798 = vmatpush.bf16.msra.mxu2 %v4737_v16  ;;  %v4715_v18 = vadd.f32 %v8669_v43, %v4714_v17  ;;  %4811 = vmatpush.bf16.msra.mxu3 %v4753_v61 }
 0xd4c   : > { %v4716_v28 = vadd.f32 %v8659_v19, %v4715_v18 }
 0xd4e   : > { %4799 = vmatpush.bf16.msra.mxu2 %v4735_v14  ;;  %v4717_v35 = vadd.f32 %v8661_v38, %v4716_v28  ;;  %4812 = vmatpush.bf16.msra.mxu3 %v4751_v34  ;;  %v15937_v34 = vld [vmem:[#allocation68_spill] sm:$0xff] }
 0xd50   : > { %v4718_v39 = vadd.f32 %v8651_v13, %v4717_v35  ;;  %v15926_v13 = vld [vmem:[#allocation27_spill] sm:$0xff] }
 0xd52   : > { %4800 = vmatpush.bf16.msra.mxu2 %v4733_v59  ;;  %v4719_v3 = vadd.f32 %v8653_v46, %v4718_v39  ;;  %4813 = vmatpush.bf16.msra.mxu3 %v4749_v48  ;;  %v15939_v48 = vld [vmem:[#allocation77_spill] sm:$0xff] }
 0xd54   : > { %v4720_v10 = vadd.f32 %v13191_v40, %v4719_v3  ;;  %v15929_v40 = vld [vmem:[#allocation13_spill] sm:$0xff] }
 0xd56   : > { %4801 = vmatpush.bf16.msra.mxu2 %v4731_v23  ;;  %v4721_v56 = vadd.f32 %v13196_v11, %v4720_v10  ;;  %4814 = vmatpush.bf16.msra.mxu3 %v4747_v54  ;;  %v4685_v11 = vrot.slane %v13194_v12, 4  ;;  %v15944_v10 = vld [vmem:[#allocation55_spill] sm:$0xff] }
 0xd58   : > { %v4686_v62 = vadd.f32 %v4685_v11, %v13194_v12  ;;  %v4722_v2 = vrot.slane %v4721_v56, 4 }
 0xd59   : > { %4802 = vmatmul.bf16.vlgmr.msra.gmra.mxu2 %v4764_v4  ;;  %4815 = vmatmul.bf16.vlgmr.msra.gmra.mxu3 %v4765_v47  ;;  %v15930_v4 = vld [vmem:[#allocation19_spill] sm:$0xff] }
 0xd5a   : > { %4929 = vmatpush.bf16.msrb.mxu2 %v4917_v50  ;;  %5018 = vmatpush.bf16.msrb.mxu3 %v4920_v29  ;;  %v4687_v45 = vrot.slane %v4686_v62, 2  ;;  %v4723_v58 = vadd.f32 %v4722_v2, %v4721_v56 }
 0xd5c   : > { %v4688_v33 = vadd.f32 %v4687_v45, %v4686_v62  ;;  %v4724_v49 = vrot.slane %v4723_v58, 2 }
 0xd5e   : > { %v4689_v46 = vrot.slane %v4688_v33, 1  ;;  %v4725_v25 = vadd.f32 %v4724_v49, %v4723_v58  ;;  %v15956_v58 = vld [vmem:[#allocation75_spill] sm:$0xff] }
 0xd60   : > { %v4690_v47 = vadd.f32 %v4689_v46, %v4688_v33  ;;  %v4726_v43 = vrot.slane %v4725_v25, 1 }
 0xd62   : > { %8674 = vrcp.f32 %v4690_v47  ;;  %v4727_v57 = vadd.f32 %v4726_v43, %v4725_v25  ;;  %v15952_v47 = vld [vmem:[#allocation37_spill] sm:$0xff] }
 0xd64   : > { %8676 = vrcp.f32 %v4727_v57  ;;  %v8951_v57 = vld [vmem:[#allocation3 + $0x28] sm:$0xff] }
 0xd68   : > { %v8675_v15 = vpop.eup %8674 }
 0xd69   : > { %7510 = vmatmul.msk.bf16.vlgmr.msrb.gmra.mxu2 %vm595_vm2, %v15926_v13  ;;  %7526 = vmatmul.msk.bf16.vlgmr.msrb.gmra.mxu3 %vm595_vm2, %v15926_v13 }
 0xd6a   : > { %v8677_v17 = vpop.eup %8676 }
 0xd79   : > { %7511 = vmatmul.msk.bf16.gmra.mxu2 %vm595_vm2, %v15927_v31  ;;  %7527 = vmatmul.msk.bf16.gmra.mxu3 %vm595_vm2, %v15927_v31  ;;  %v15947_v31 = vld [vmem:[#allocation72_spill] sm:$0xff] }
 0xd89   : > { %7512 = vmatmul.msk.bf16.gmra.mxu2 %vm595_vm2, %v15928_v1  ;;  %7528 = vmatmul.msk.bf16.gmra.mxu3 %vm595_vm2, %v15928_v1 }
 0xd99   : > { %7513 = vmatmul.msk.bf16.gmra.mxu2 %vm595_vm2, %v15929_v40  ;;  %7529 = vmatmul.msk.bf16.gmra.mxu3 %vm595_vm2, %v15929_v40 }
 0xda9   : > { %7514 = vmatmul.msk.bf16.gmra.mxu2 %vm595_vm2, %v15930_v4  ;;  %7530 = vmatmul.msk.bf16.gmra.mxu3 %vm595_vm2, %v15930_v4  ;;  %v15950_v4 = vld [vmem:[#allocation41_spill] sm:$0xff] }
 0xdb9   : > { %7515 = vmatmul.msk.bf16.gmra.mxu2 %vm595_vm2, %v15931_v37  ;;  %7531 = vmatmul.msk.bf16.gmra.mxu3 %vm595_vm2, %v15931_v37  ;;  %v4790_v60 = vpop.f32.mrf.mxu3 }
 0xdbc   : > { %v4777_v7 = vpop.f32.mrf.mxu2 }
 0xdbd   : > { %v4791_v12 = vadd.f32 %v4790_v60, %v4777_v7  ;;  %v13354_v60 = vpop.permute.xlu1 %7662 }
 0xdbe   : > { %15953 = vst [vmem:[#allocation51_spill] sm:$0xff] %v13354_v60 }
 0xdbf   : > { %v4820_v6 = vmul.f32 %v8675_v15, %v4791_v12  ;;  %v13358_v15 = vpop.permute.xlu2 %7667 }
 0xdc0   : > { %15954 = vst [vmem:[#allocation23_spill] sm:$0xff] %v13358_v15 }
 0xdc1   : > { %v4822_v19 = vmul.f32 %v4820_v6, %v15932_v36  ;;  %v4792_v53 = vpop.f32.mrf.mxu3 }
 0xdc3   : > { %v4826_v38 = vrot.slane %v4822_v19, 4 }
 0xdc4   : > { %v4779_v41 = vpop.f32.mrf.mxu2 }
 0xdc5   : > { %v4830_v5 = vadd.f32 %v4826_v38, %v15934_v44 }
 0xdc7   : > { %4832 = vst [vmem:[#allocation2 + $0x8] sm:$0xf0] %v4830_v5  ;;  %v8950_v5 = vld [vmem:[#allocation3 + $0x20] sm:$0xff] }
 0xdc9   : > { %7516 = vmatmul.msk.bf16.gmra.mxu2 %vm595_vm2, %v15933_v22  ;;  %7532 = vmatmul.msk.bf16.gmra.mxu3 %vm595_vm2, %v15933_v22 }
 0xdce   : > { %v6269_v9 = vld [vmem:[#allocation2 + $0x8] sm:$0xff] }
 0xdcf   : > { %6289 = vrot.lane.b32.xlu1 %v6269_v9, %s8978_s17 }
 0xdd7   : > { %7692 = vrot.lane.b32.xlu1 %v7691_v52, %s8981_s29 }
 0xdd9   : > { %7517 = vmatmul.msk.bf16.gmra.mxu2 %vm595_vm2, %v15935_v30  ;;  %7533 = vmatmul.msk.bf16.gmra.mxu3 %vm595_vm2, %v15935_v30  ;;  %v7696_v30 = vpack.i.bf16 %v8951_v57, %v8950_v5 }
 0xddc   : > { %v4803_v24 = vpop.f32.mrf.mxu2  ;;  %v4816_v16 = vpop.f32.mrf.mxu3 }
 0xddd   : > { %v4817_v63 = vadd.f32 %v4816_v16, %v4803_v24 }
 0xddf   : > { %v4821_v61 = vmul.f32 %v8677_v17, %v4817_v63  ;;  %7717 = vrot.lane.b32.xlu1 %v7691_v52, %s8982_s8 }
 0xde1   : > { %v4823_v14 = vmul.f32 %v4821_v61, %v15932_v36 }
 0xde3   : > { %v4827_v21 = vrot.slane %v4823_v14, 4 }
 0xde4   : > { %v4805_v18 = vpop.f32.mrf.mxu2  ;;  %v4818_v55 = vpop.f32.mrf.mxu3 }
 0xde5   : > { %v4831_v28 = vadd.f32 %v4827_v21, %v15936_v0 }
 0xde7   : > { %4833 = vst [vmem:[#allocation2 + $0x20] sm:$0xf0] %v4831_v28 }
 0xde9   : > { %7518 = vmatmul.msk.bf16.gmra.mxu2 %vm595_vm2, %v15937_v34  ;;  %7534 = vmatmul.msk.bf16.gmra.mxu3 %vm595_vm2, %v15937_v34 }
 0xdec   : > { %v13291_v59 = vpop.f32.mrf.mxu2  ;;  %v13293_v20 = vpop.f32.mrf.mxu3 }
 0xdee   : > { %v6270_v42 = vld [vmem:[#allocation2 + $0x20] sm:$0xff] }
 0xdef   : > { %6291 = vrot.lane.b32.xlu2 %v6270_v42, %s8978_s17 }
 0xdf4   : > { %v13296_v35 = vpop.f32.mrf.mxu2  ;;  %v13298_v39 = vpop.f32.mrf.mxu3 }
 0xdf5   : > { %15938 = vst [vmem:[#allocation40_spill] sm:$0xff] %v13298_v39 }
 0xdf9   : > { %7519 = vmatmul.msk.bf16.gmra.mxu2 %vm595_vm2, %v15939_v48  ;;  %7535 = vmatmul.msk.bf16.gmra.mxu3 %vm595_vm2, %v15939_v48 }
 0xdfc   : > { %v13304_v32 = vpop.f32.mrf.mxu2  ;;  %v13306_v23 = vpop.f32.mrf.mxu3 }
 0xdfd   : > { %15940 = vst [vmem:[#allocation43_spill] sm:$0xff] %v13304_v32  ;;  %v5100_v15 = vmax.f32 %v13291_v59, %v13304_v32 }
 0xdfe   : > { %15941 = vst [vmem:[#allocation29_spill] sm:$0xff] %v13306_v23 }
 0xe04   : > { %v13308_v3 = vpop.f32.mrf.mxu2  ;;  %v13310_v50 = vpop.f32.mrf.mxu3 }
 0xe05   : > { %15942 = vst [vmem:[#allocation74_spill] sm:$0xff] %v13308_v3 }
 0xe06   : > { %15943 = vst [vmem:[#allocation88_spill] sm:$0xff] %v13310_v50 }
 0xe09   : > { %7520 = vmatmul.msk.bf16.gmra.mxu2 %vm595_vm2, %v15944_v10  ;;  %7536 = vmatmul.msk.bf16.gmra.mxu3 %vm595_vm2, %v15944_v10 }
 0xe0c   : > { %v13316_v54 = vpop.f32.mrf.mxu2  ;;  %v13318_v56 = vpop.f32.mrf.mxu3 }
 0xe0d   : > { %15945 = vst [vmem:[#allocation39_spill] sm:$0xff] %v13316_v54 }
 0xe14   : > { %v13320_v29 = vpop.f32.mrf.mxu2  ;;  %v13322_v13 = vpop.f32.mrf.mxu3 }
 0xe15   : > { %15946 = vst [vmem:[#allocation30_spill] sm:$0xff] %v13320_v29 }
 0xe19   : > { %7521 = vmatmul.msk.bf16.gmra.mxu2 %vm595_vm2, %v15947_v31  ;;  %7537 = vmatmul.msk.bf16.gmra.mxu3 %vm595_vm2, %v15947_v31 }
 0xe1c   : > { %v13328_v1 = vpop.f32.mrf.mxu2  ;;  %v13330_v40 = vpop.f32.mrf.mxu3 }
 0xe1d   : > { %15948 = vst [vmem:[#allocation49_spill] sm:$0xff] %v13328_v1 }
 0xe24   : > { %v13332_v11 = vpop.f32.mrf.mxu2  ;;  %v13334_v62 = vpop.f32.mrf.mxu3 }
 0xe25   : > { %15949 = vst [vmem:[#allocation44_spill] sm:$0xff] %v13334_v62 }
 0xe29   : > { %7522 = vmatmul.msk.bf16.gmra.mxu2 %vm595_vm2, %v15950_v4  ;;  %7538 = vmatmul.msk.bf16.gmra.mxu3 %vm595_vm2, %v15950_v4 }
 0xe2c   : > { %v13340_v45 = vpop.f32.mrf.mxu2  ;;  %v13342_v33 = vpop.f32.mrf.mxu3 }
 0xe34   : > { %v13344_v46 = vpop.f32.mrf.mxu2  ;;  %v13346_v37 = vpop.f32.mrf.mxu3 }
 0xe35   : > { %15951 = vst [vmem:[#allocation45_spill] sm:$0xff] %v13346_v37 }
 0xe39   : > { %7523 = vmatmul.msk.bf16.gmra.mxu2 %vm595_vm2, %v15952_v47  ;;  %7539 = vmatmul.msk.bf16.gmra.mxu3 %vm595_vm2, %v15952_v47 }
 0xe3c   : > { %v13352_v7 = vpop.f32.mrf.mxu2  ;;  %v13356_v12 = vpop.f32.mrf.mxu3 }
 0xe41   : > { %v6290_v6 = vpop.permute.xlu1 %6289 }
 0xe42   : > { %6321 = vst.msk [vmem:[#allocation3 + $0x30] sm:$0xff] %vm6314_vm3, %v6290_v6 }
 0xe44   : > { %v13360_v2 = vpop.f32.mrf.mxu2  ;;  %v13362_v19 = vpop.f32.mrf.mxu3 }
 0xe45   : > { %15955 = vst [vmem:[#allocation32_spill] sm:$0xff] %v13362_v19 }
 0xe49   : > { %7524 = vmatmul.msk.bf16.gmra.mxu2 %vm595_vm2, %v15956_v58  ;;  %7540 = vmatmul.msk.bf16.gmra.mxu3 %vm595_vm2, %v15956_v58  ;;  %v6292_v41 = vpop.permute.xlu2 %6291  ;;  %v6333_v22 = vld [vmem:[#allocation3 + $0x30] sm:$0xff]  ;;  %v15964_v58 = vld [vmem:[#allocation5_spill] sm:$0xff] }
 0xe4a   : > { %v6300_v53 = vsel %vm6297_vm5, %v6290_v6, %v6292_v41  ;;  %6323 = vst.msk [vmem:[#allocation3 + $0x40] sm:$0xff] %vm6297_vm5, %v6292_v41  ;;  %v7671_v49 = vpack.i.bf16 %v6333_v22, %v8950_v5  ;;  %v7660_v41 = vunpack.i.h.bf16 %v15964_v58 }
 0xe4b   : > { %6322 = vst [vmem:[#allocation3 + $0x38] sm:$0xff] %v6300_v53  ;;  %v7676_v25 = vpack.i.bf16 %v6300_v53, %v6333_v22 }
 0xe4c   : > { %v13369_v38 = vpop.f32.mrf.mxu2  ;;  %v13373_v44 = vpop.f32.mrf.mxu3  ;;  %7672 = vrot.lane.b32.xlu2 %v7671_v49, %s8980_s18 }
 0xe4d   : > { %7677 = vrot.lane.b32.xlu0 %v7676_v25, %s8973_s14 }
 0xe54   : > { %v13377_v9 = vpop.f32.mrf.mxu2  ;;  %v13379_v43 = vpop.f32.mrf.mxu3  ;;  %7697 = vrot.lane.b32.xlu2 %v7696_v30, %s8981_s29 }
 0xe55   : > { %15957 = vst [vmem:[#allocation52_spill] sm:$0xff] %v13379_v43  ;;  %7682 = vrot.lane.b32.xlu0 %v7676_v25, %s8981_s29 }
 0xe59   : > { %7525 = vmatmul.msk.bf16.gmra.mxu2 %vm595_vm2, %v15958_v26  ;;  %7541 = vmatmul.msk.bf16.gmra.mxu3 %vm595_vm2, %v15958_v26 }
 0xe5c   : > { %v13387_v51 = vpop.f32.mrf.mxu2  ;;  %v13389_v52 = vpop.f32.mrf.mxu3  ;;  %7722 = vrot.lane.b32.xlu2 %v7696_v30, %s8982_s8 }
 0xe64   : > { %v13392_v24 = vpop.f32.mrf.mxu2  ;;  %v13394_v16 = vpop.f32.mrf.mxu3  ;;  %7737 = vrot.lane.b32.xlu2 %v7696_v30, %s8983_s9 }
 0xe6c   : > { %v13397_v63 = vpop.f32.mrf.mxu2  ;;  %v13399_v17 = vpop.f32.mrf.mxu3  ;;  %7762 = vrot.lane.b32.xlu2 %v7696_v30, %s8984_s10 }
 0xe74   : > { %v13402_v61 = vpop.f32.mrf.mxu2  ;;  %v13404_v14 = vpop.f32.mrf.mxu3 }
 0xe75   : > { %15959 = vst [vmem:[#allocation38_spill] sm:$0xff] %v13404_v14 }
 0xe7c   : > { %v13406_v18 = vpop.f32.mrf.mxu2  ;;  %v13408_v21 = vpop.f32.mrf.mxu3 }
 0xe84   : > { %v13410_v55 = vpop.f32.mrf.mxu2  ;;  %v13412_v0 = vpop.f32.mrf.mxu3 }
 0xe85   : > { %15960 = vst [vmem:[#allocation33_spill] sm:$0xff] %v13410_v55 }
 0xe8c   : > { %v13414_v28 = vpop.f32.mrf.mxu2  ;;  %v13416_v34 = vpop.f32.mrf.mxu3 }
 0xe94   : > { %v13418_v42 = vpop.f32.mrf.mxu2  ;;  %v13420_v48 = vpop.f32.mrf.mxu3 }
 0xe95   : > { %15961 = vst [vmem:[#allocation54_spill] sm:$0xff] %v13420_v48 }
 0xe9c   : > { %v13422_v10 = vpop.f32.mrf.mxu2  ;;  %v13424_v31 = vpop.f32.mrf.mxu3 }
 0xea4   : > { %v13426_v4 = vpop.f32.mrf.mxu2  ;;  %v13428_v47 = vpop.f32.mrf.mxu3 }
 0xea5   : > { %15962 = vst [vmem:[#allocation25_spill] sm:$0xff] %v13428_v47 }
 0xea6   : > { %v13430_v6 = vpop.permute.xlu2 %7672 }
 0xea7   : > { %15963 = vst [vmem:[#allocation7_spill] sm:$0xff] %v13430_v6  ;;  %v15387_v53 = vunpack.i.l.bf16 %v13430_v6  ;;  %v5101_v6 = vmax.f32 %v13296_v35, %v13308_v3 }
 0xea9   : > { %v13439_v5 = vsel %vm6444_vm6, %v7660_v41, %v15387_v53  ;;  %v5102_v41 = vmax.f32 %v5100_v15, %v13316_v54  ;;  %v5103_v53 = vmax.f32 %v5101_v6, %v13320_v29 }
 0xeaa   : > { %15965 = vst [vmem:[#allocation56_spill] sm:$0xff] %v13439_v5 }
 0xeab   : > { %v5104_v36 = vmax.f32 %v5102_v41, %v13328_v1  ;;  %v5105_v8 = vmax.f32 %v5103_v53, %v13332_v11 }
 0xeac   : > { %v13434_v22 = vpop.f32.mrf.mxu2  ;;  %v13441_v49 = vpop.f32.mrf.mxu3 }
 0xead   : > { %15966 = vst [vmem:[#allocation18_spill] sm:$0xff] %v13441_v49  ;;  %v5106_v27 = vmax.f32 %v5104_v36, %v13340_v45 }
 0xeaf   : > { %v5108_v32 = vmax.f32 %v5106_v27, %v13352_v7 }
 0xeb1   : > { %v5110_v15 = vmax.f32 %v5108_v32, %v13369_v38  ;;  %v5138_v32 = vmax.f32 %v13298_v39, %v13310_v50 }
 0xeb3   : > { %v5112_v54 = vmax.f32 %v5110_v15, %v13387_v51 }
 0xeb4   : > { %v13443_v25 = vpop.f32.mrf.mxu2  ;;  %v13445_v57 = vpop.f32.mrf.mxu3 }
 0xeb5   : > { %15967 = vst [vmem:[#allocation48_spill] sm:$0xff] %v13445_v57  ;;  %v5114_v36 = vmax.f32 %v5112_v54, %v13397_v63  ;;  %v5140_v54 = vmax.f32 %v5138_v32, %v13322_v13 }
 0xeb7   : > { %v5116_v27 = vmax.f32 %v5114_v36, %v13406_v18 }
 0xebc   : > { %v13447_v30 = vpop.f32.mrf.mxu2  ;;  %v13449_v26 = vpop.f32.mrf.mxu3 }
 0xebd   : > { %15968 = vst [vmem:[#allocation24_spill] sm:$0xff] %v13449_v26  ;;  %v5107_v26 = vmax.f32 %v5105_v8, %v13344_v46 }
 0xebf   : > { %v5109_v3 = vmax.f32 %v5107_v26, %v13360_v2 }
 0xec1   : > { %v5111_v6 = vmax.f32 %v5109_v3, %v13377_v9  ;;  %v5118_v3 = vmax.f32 %v5116_v27, %v13414_v28 }
 0xec3   : > { %v5113_v41 = vmax.f32 %v5111_v6, %v13392_v24  ;;  %v5137_v6 = vmax.f32 %v13293_v20, %v13306_v23 }
 0xec4   : > { %v13451_v58 = vpop.f32.mrf.mxu2  ;;  %v13459_v5 = vpop.f32.mrf.mxu3 }
 0xec5   : > { %v5115_v8 = vmax.f32 %v5113_v41, %v13402_v61  ;;  %v5120_v41 = vmax.f32 %v5118_v3, %v13422_v10 }
 0xec7   : > { %v5117_v53 = vmax.f32 %v5115_v8, %v13410_v55  ;;  %v5139_v8 = vmax.f32 %v5137_v6, %v13318_v56  ;;  %v5142_v55 = vmax.f32 %v5140_v54, %v13334_v62  ;;  %v5122_v50 = vmax.f32 %v5120_v41, %v13434_v22 }
 0xec9   : > { %v5119_v26 = vmax.f32 %v5117_v53, %v13418_v42  ;;  %v5141_v39 = vmax.f32 %v5139_v8, %v13330_v40  ;;  %v5144_v23 = vmax.f32 %v5142_v55, %v13346_v37  ;;  %v5124_v32 = vmax.f32 %v5122_v50, %v13447_v30 }
 0xecb   : > { %v5121_v36 = vmax.f32 %v5119_v26, %v13426_v4  ;;  %v5143_v26 = vmax.f32 %v5141_v39, %v13342_v33  ;;  %v5146_v6 = vmax.f32 %v5144_v23, %v13362_v19 }
 0xecc   : > { %v13461_v60 = vpop.f32.mrf.mxu2  ;;  %v13475_v1 = vpop.f32.mrf.mxu3 }
 0xecd   : > { %v5123_v27 = vmax.f32 %v5121_v36, %v13443_v25  ;;  %v5126_v54 = vmax.f32 %v5124_v32, %v13461_v60  ;;  %v5145_v36 = vmax.f32 %v5143_v26, %v13356_v12  ;;  %v5148_v8 = vmax.f32 %v5146_v6, %v13379_v43 }
 0xecf   : > { %v5125_v3 = vmax.f32 %v5123_v27, %v13451_v58  ;;  %v5147_v27 = vmax.f32 %v5145_v36, %v13373_v44  ;;  %v5150_v39 = vmax.f32 %v5148_v8, %v13394_v16 }
 0xed1   : > { %v5149_v23 = vmax.f32 %v5147_v27, %v13389_v52  ;;  %v5152_v32 = vmax.f32 %v5150_v39, %v13404_v14 }
 0xed3   : > { %v5151_v26 = vmax.f32 %v5149_v23, %v13399_v17  ;;  %v5154_v6 = vmax.f32 %v5152_v32, %v13412_v0 }
 0xed4   : > { %v13471_v29 = vpop.f32.mrf.mxu2  ;;  %v13496_v53 = vpop.f32.mrf.mxu3 }
 0xed5   : > { %v5127_v41 = vmax.f32 %v5125_v3, %v13471_v29 }
 0xedc   : > { %v13485_v15 = vpop.f32.mrf.mxu2  ;;  %v13516_v19 = vpop.f32.mrf.mxu3 }
 0xedd   : > { %v5128_v55 = vmax.f32 %v5126_v54, %v13485_v15  ;;  %v5153_v54 = vmax.f32 %v5151_v26, %v13408_v21 }
 0xedf   : > { %v5155_v8 = vmax.f32 %v5153_v54, %v13416_v34 }
 0xee1   : > { %v5157_v27 = vmax.f32 %v5155_v8, %v13424_v31 }
 0xee3   : > { %v5159_v23 = vmax.f32 %v5157_v27, %v13441_v49  ;;  %v15974_v49 = vld [vmem:[#allocation49_spill] sm:$0xff] }
 0xee4   : > { %v13506_v62 = vpop.f32.mrf.mxu2 }
 0xee5   : > { %v5129_v50 = vmax.f32 %v5127_v41, %v13506_v62  ;;  %v5156_v41 = vmax.f32 %v5154_v6, %v13420_v48 }
 0xee7   : > { %v5130_v37 = vmax.f32 %v5128_v55, %v5129_v50  ;;  %v5158_v55 = vmax.f32 %v5156_v41, %v13428_v47 }
 0xee9   : > { %v5131_v3 = vrot.slane %v5130_v37, 4  ;;  %v5160_v39 = vmax.f32 %v5158_v55, %v13445_v57  ;;  %v15970_v55 = vld [vmem:[#allocation43_spill] sm:$0xff] }
 0xeeb   : > { %v5132_v43 = vmax.f32 %v5130_v37, %v5131_v3  ;;  %v5162_v32 = vmax.f32 %v5160_v39, %v13459_v5  ;;  %v13528_v37 = vpop.f32.mrf.mxu3  ;;  %v15969_v3 = vld [vmem:[#allocation24_spill] sm:$0xff] }
 0xeec   : > { %v5161_v26 = vmax.f32 %v5159_v23, %v15969_v3  ;;  %v15971_v23 = vld [vmem:[#allocation74_spill] sm:$0xff] }
 0xeed   : > { %v5133_v36 = vrot.slane %v5132_v43, 2  ;;  %v5164_v6 = vmax.f32 %v5162_v32, %v13496_v53 }
 0xeee   : > { %v5163_v54 = vmax.f32 %v5161_v26, %v13475_v1  ;;  %v15972_v26 = vld [vmem:[#allocation39_spill] sm:$0xff] }
 0xeef   : > { %v5134_v50 = vmax.f32 %v5132_v43, %v5133_v36  ;;  %v5166_v43 = vmax.f32 %v5164_v6, %v13528_v37 }
 0xef0   : > { %v5165_v41 = vmax.f32 %v5163_v54, %v13516_v19 }
 0xef1   : > { %v5135_v14 = vrot.slane %v5134_v50, 1 }
 0xef2   : > { %v5167_v39 = vmax.f32 %v5165_v41, %v5166_v43 }
 0xef3   : > { %v13532_v48 = vmax.f32 %v5134_v50, %v5135_v14 }
 0xef4   : > { %v5168_v54 = vrot.slane %v5167_v39, 4 }
 0xef5   : > { %v5174_v36 = vsub.f32 %v13291_v59, %v13532_v48  ;;  %v5176_v8 = vsub.f32 %v13296_v35, %v13532_v48  ;;  %v5178_v27 = vsub.f32 %v15970_v55, %v13532_v48  ;;  %v5180_v14 = vsub.f32 %v15971_v23, %v13532_v48  ;;  %v15973_v59 = vld [vmem:[#allocation30_spill] sm:$0xff] }
 0xef6   : > { %v5182_v6 = vsub.f32 %v15972_v26, %v13532_v48  ;;  %v5184_v57 = vsub.f32 %v15973_v59, %v13532_v48  ;;  %v5186_v55 = vsub.f32 %v15974_v49, %v13532_v48  ;;  %v5169_v41 = vmax.f32 %v5167_v39, %v5168_v54 }
 0xef7   : > { %v5238_v50 = vmul.f32 1.442695, %v5174_v36  ;;  %v5242_v32 = vmul.f32 1.442695, %v5176_v8  ;;  %v5246_v47 = vmul.f32 1.442695, %v5178_v27  ;;  %v5188_v36 = vsub.f32 %v13332_v11, %v13532_v48 }
 0xef8   : > { %v5250_v35 = vmul.f32 1.442695, %v5180_v14  ;;  %v5254_v43 = vmul.f32 1.442695, %v5182_v6  ;;  %v5258_v8 = vmul.f32 1.442695, %v5184_v57  ;;  %v5190_v27 = vsub.f32 %v13340_v45, %v13532_v48 }
 0xef9   : > { %8678 = vpow2.f32 %v5238_v50  ;;  %v5192_v14 = vsub.f32 %v13344_v46, %v13532_v48  ;;  %v5262_v49 = vmul.f32 1.442695, %v5186_v55  ;;  %v5170_v39 = vrot.slane %v5169_v41, 2 }
 0xefa   : > { %8680 = vpow2.f32 %v5242_v32  ;;  %v5196_v32 = vsub.f32 %v13360_v2, %v13532_v48  ;;  %v5266_v45 = vmul.f32 1.442695, %v5188_v36  ;;  %v5198_v26 = vsub.f32 %v13369_v38, %v13532_v48 }
 0xefb   : > { %8682 = vpow2.f32 %v5246_v47  ;;  %v5194_v47 = vsub.f32 %v13352_v7, %v13532_v48  ;;  %v5270_v46 = vmul.f32 1.442695, %v5190_v27  ;;  %v5200_v7 = vsub.f32 %v13377_v9, %v13532_v48 }
 0xefc   : > { %8684 = vpow2.f32 %v5250_v35  ;;  %v5274_v59 = vmul.f32 1.442695, %v5192_v14  ;;  %v5202_v35 = vsub.f32 %v13387_v51, %v13532_v48  ;;  %v5204_v38 = vsub.f32 %v13392_v24, %v13532_v48 }
 0xefd   : > { %8686 = vpow2.f32 %v5254_v43  ;;  %v5278_v55 = vmul.f32 1.442695, %v5194_v47  ;;  %v5171_v43 = vmax.f32 %v5169_v41, %v5170_v39  ;;  %v5206_v27 = vsub.f32 %v13397_v63, %v13532_v48 }
 0xefe   : > { %8688 = vpow2.f32 %v5258_v8  ;;  %v5282_v8 = vmul.f32 1.442695, %v5196_v32  ;;  %v5286_v9 = vmul.f32 1.442695, %v5198_v26  ;;  %v5208_v51 = vsub.f32 %v13402_v61, %v13532_v48  ;;  %v15975_v32 = vld [vmem:[#allocation33_spill] sm:$0xff] }
 0xeff   : > { %v13553_v23 = vpop.eup %8678  ;;  %8690 = vpow2.f32 %v5262_v49  ;;  %v5210_v41 = vsub.f32 %v13406_v18, %v13532_v48  ;;  %v5290_v47 = vmul.f32 1.442695, %v5200_v7  ;;  %v5294_v24 = vmul.f32 1.442695, %v5202_v35 }
 0xf00   : > { %v13557_v50 = vpop.eup %8680  ;;  %8692 = vpow2.f32 %v5266_v45  ;;  %v5172_v39 = vrot.slane %v5171_v43, 1  ;;  %v5212_v45 = vsub.f32 %v15975_v32, %v13532_v48  ;;  %v5298_v26 = vmul.f32 1.442695, %v5204_v38 }
 0xf01   : > { %v5366_v11 = vadd.f32 %v13557_v50, %v13553_v23  ;;  %v13565_v57 = vpop.eup %8682  ;;  %8694 = vpow2.f32 %v5270_v46  ;;  %v5214_v61 = vsub.f32 %v13414_v28, %v13532_v48  ;;  %v5302_v46 = vmul.f32 1.442695, %v5206_v27 }
 0xf02   : > { %v13572_v54 = vpop.eup %8684  ;;  %8696 = vpow2.f32 %v5274_v59  ;;  %v5216_v7 = vsub.f32 %v13418_v42, %v13532_v48  ;;  %v5218_v59 = vsub.f32 %v13422_v10, %v13532_v48  ;;  %v5306_v35 = vmul.f32 1.442695, %v5208_v51 }
 0xf03   : > { %v5367_v6 = vadd.f32 %v13565_v57, %v5366_v11  ;;  %v13579_v36 = vpop.eup %8686  ;;  %8698 = vpow2.f32 %v5278_v55  ;;  %v13609_v38 = vmax.f32 %v5171_v43, %v5172_v39  ;;  %v5230_v27 = vsub.f32 %v13461_v60, %v13532_v48 }
 0xf04   : > { %v13586_v49 = vpop.eup %8688  ;;  %8700 = vpow2.f32 %v5282_v8  ;;  %v5314_v42 = vmul.f32 1.442695, %v5212_v45  ;;  %v5234_v10 = vsub.f32 %v13485_v15, %v13532_v48  ;;  %v5236_v43 = vsub.f32 %v13506_v62, %v13532_v48  ;;  %v15976_v45 = vld [vmem:[#allocation40_spill] sm:$0xff] }
 0xf05   : > { %v5368_v2 = vadd.f32 %v13572_v54, %v5367_v6  ;;  %v13593_v63 = vpop.eup %8690  ;;  %8702 = vpow2.f32 %v5286_v9  ;;  %v5326_v60 = vmul.f32 1.442695, %v5218_v59  ;;  %v5175_v15 = vsub.f32 %v13293_v20, %v13609_v38  ;;  %v15977_v59 = vld [vmem:[#allocation29_spill] sm:$0xff] }
 0xf06   : > { %v13600_v6 = vpop.eup %8692  ;;  %8704 = vpow2.f32 %v5290_v47  ;;  %v5322_v47 = vmul.f32 1.442695, %v5216_v7  ;;  %v5350_v32 = vmul.f32 1.442695, %v5230_v27  ;;  %v5232_v62 = vsub.f32 %v13471_v29, %v13532_v48 }
 0xf07   : > { %v5369_v14 = vadd.f32 %v13579_v36, %v5368_v2  ;;  %v13606_v55 = vpop.eup %8694  ;;  %8706 = vpow2.f32 %v5294_v24  ;;  %v5310_v2 = vmul.f32 1.442695, %v5210_v41  ;;  %v5362_v20 = vmul.f32 1.442695, %v5236_v43 }
 0xf08   : > { %v13611_v8 = vpop.eup %8696  ;;  %8708 = vpow2.f32 %v5298_v26  ;;  %v5177_v26 = vsub.f32 %v15976_v45, %v13609_v38  ;;  %v5240_v29 = vmul.f32 1.442695, %v5175_v15  ;;  %v5183_v15 = vsub.f32 %v13318_v56, %v13609_v38 }
 0xf09   : > { %v5370_v11 = vadd.f32 %v13586_v49, %v5369_v14  ;;  %v13615_v9 = vpop.eup %8698  ;;  %8710 = vpow2.f32 %v5302_v46  ;;  %v5318_v14 = vmul.f32 1.442695, %v5214_v61  ;;  %v5358_v46 = vmul.f32 1.442695, %v5234_v10  ;;  %v15978_v10 = vld [vmem:[#allocation88_spill] sm:$0xff] }
 0xf0a   : > { %v13620_v41 = vpop.eup %8700  ;;  %8712 = vpow2.f32 %v5306_v35  ;;  %v5179_v35 = vsub.f32 %v15977_v59, %v13609_v38  ;;  %v5224_v56 = vsub.f32 %v13443_v25, %v13532_v48 }
 0xf0b   : > { %v5371_v18 = vadd.f32 %v13593_v63, %v5370_v11  ;;  %v13624_v24 = vpop.eup %8702  ;;  %8714 = vpow2.f32 %v5310_v2 }
 0xf0c   : > { %v13629_v39 = vpop.eup %8704  ;;  %8716 = vpow2.f32 %v5314_v42 }
 0xf0d   : > { %v5372_v28 = vadd.f32 %v13600_v6, %v5371_v18  ;;  %v13633_v61 = vpop.eup %8706  ;;  %8718 = vpow2.f32 %v5318_v14  ;;  %v5181_v14 = vsub.f32 %v15978_v10, %v13609_v38 }
 0xf0e   : > { %v13638_v7 = vpop.eup %8708  ;;  %8720 = vpow2.f32 %v5322_v47  ;;  %v5228_v47 = vsub.f32 %v13451_v58, %v13532_v48 }
 0xf0f   : > { %v5373_v51 = vadd.f32 %v13606_v55, %v5372_v28  ;;  %v13642_v2 = vpop.eup %8710  ;;  %v5226_v28 = vsub.f32 %v13447_v30, %v13532_v48  ;;  %8722 = vpow2.f32 %v5326_v60 }
 0xf10   : > { %v13647_v42 = vpop.eup %8712  ;;  %8724 = vpow2.f32 %v5350_v32  ;;  %v5248_v32 = vmul.f32 1.442695, %v5179_v35  ;;  %v5346_v35 = vmul.f32 1.442695, %v5228_v47  ;;  %v15979_v47 = vld [vmem:[#allocation44_spill] sm:$0xff] }
 0xf11   : > { %v5374_v11 = vadd.f32 %v13611_v8, %v5373_v51  ;;  %v5244_v51 = vmul.f32 1.442695, %v5177_v26  ;;  %v13651_v43 = vpop.eup %8714  ;;  %8726 = vpow2.f32 %v5358_v46  ;;  %v5222_v26 = vsub.f32 %v13434_v22, %v13532_v48 }
 0xf12   : > { %v13656_v60 = vpop.eup %8716  ;;  %8728 = vpow2.f32 %v5362_v20  ;;  %v5252_v46 = vmul.f32 1.442695, %v5181_v14 }
 0xf13   : > { %v5375_v18 = vadd.f32 %v13615_v9, %v5374_v11  ;;  %v5354_v11 = vmul.f32 1.442695, %v5232_v62  ;;  %v13660_v45 = vpop.eup %8718  ;;  %8730 = vpow2.f32 %v5240_v29  ;;  %v5185_v62 = vsub.f32 %v13322_v13, %v13609_v38 }
 0xf14   : > { %v13665_v58 = vpop.eup %8720  ;;  %8732 = vpow2.f32 %v5244_v51  ;;  %v5256_v29 = vmul.f32 1.442695, %v5183_v15  ;;  %v5220_v13 = vsub.f32 %v13426_v4, %v13532_v48  ;;  %v5334_v14 = vmul.f32 1.442695, %v5222_v26 }
 0xf15   : > { %v5376_v27 = vadd.f32 %v13620_v41, %v5375_v18  ;;  %v5342_v18 = vmul.f32 1.442695, %v5226_v28  ;;  %v13669_v20 = vpop.eup %8722  ;;  %8734 = vpow2.f32 %v5354_v11  ;;  %v5189_v11 = vsub.f32 %v15979_v47, %v13609_v38 }
 0xf16   : > { %v13674_v28 = vpop.eup %8724  ;;  %8736 = vpow2.f32 %v5248_v32  ;;  %v5458_v48 = vpack.c.bf16 %v13638_v7, %v13633_v61  ;;  %v5191_v32 = vsub.f32 %v13342_v33, %v13609_v38  ;;  %v5195_v47 = vsub.f32 %v13356_v12, %v13609_v38  ;;  %v15986_v12 = vld [vmem:[#allocation35_spill] sm:$0xff] }
 0xf17   : > { %v5377_v30 = vadd.f32 %v13624_v24, %v5376_v27  ;;  %v5187_v27 = vsub.f32 %v13330_v40, %v13609_v38  ;;  %v13678_v10 = vpop.eup %8726  ;;  %8738 = vpow2.f32 %v5342_v18  ;;  %v5338_v40 = vmul.f32 1.442695, %v5224_v56 }
 0xf18   : > { %v13683_v51 = vpop.eup %8728  ;;  %8740 = vpow2.f32 %v5252_v46  ;;  %v5330_v46 = vmul.f32 1.442695, %v5220_v13  ;;  %5476 = vmatpush.bf16.msra.mxu0 %v5458_v48  ;;  %v15985_v48 = vld [vmem:[#allocation15_spill] sm:$0xff] }
 0xf19   : > { %v5378_v59 = vadd.f32 %v13629_v39, %v5377_v30  ;;  %v5260_v30 = vmul.f32 1.442695, %v5185_v62  ;;  %8742 = vpow2.f32 %v5346_v35  ;;  %v5264_v26 = vmul.f32 1.442695, %v5187_v27 }
 0xf1a   : > { %8744 = vpow2.f32 %v5256_v29  ;;  %v5474_v18 = vpack.c.bf16 %v13683_v51, %v13678_v10 }
 0xf1b   : > { %v5379_v22 = vadd.f32 %v13633_v61, %v5378_v59  ;;  %v13687_v59 = vpop.eup %8730  ;;  %8746 = vpow2.f32 %v5334_v14  ;;  %v5456_v14 = vpack.c.bf16 %v13629_v39, %v13624_v24 }
 0xf1c   : > { %15980 = vst [vmem:[#allocation20_spill] sm:$0xff] %v13687_v59  ;;  %v13692_v4 = vpop.eup %8732  ;;  %8748 = vpow2.f32 %v5260_v30  ;;  %5489 = vmatpush.bf16.msra.mxu1 %v5474_v18 }
 0xf1d   : > { %v5380_v25 = vadd.f32 %v13638_v7, %v5379_v22  ;;  %15981 = vst [vmem:[#allocation66_spill] sm:$0xff] %v13692_v4  ;;  %v13698_v62 = vpop.eup %8734  ;;  %v5403_v35 = vadd.f32 %v13692_v4, %v13687_v59  ;;  %v15982_v7 = vld [vmem:[#allocation45_spill] sm:$0xff]  ;;  %v5268_v22 = vmul.f32 1.442695, %v5189_v11  ;;  %8750 = vpow2.f32 %v5338_v40  ;;  %v15984_v40 = vld [vmem:[#allocation58_spill] sm:$0xff]  ;;  %5477 = vmatpush.bf16.msra.mxu0 %v5456_v14 }
 0xf1e   : > { %v13703_v61 = vpop.eup %8736  ;;  %v5193_v33 = vsub.f32 %v15982_v7, %v13609_v38  ;;  %8752 = vpow2.f32 %v5264_v26  ;;  %v5472_v11 = vpack.c.bf16 %v13698_v62, %v13674_v28  ;;  %v13723_v18 = vadd.f32 %v15985_v48, %v15984_v40  ;;  %v15987_v26 = vld [vmem:[#allocation32_spill] sm:$0xff] }
 0xf1f   : > { %v5381_v15 = vadd.f32 %v13642_v2, %v5380_v25  ;;  %v13707_v27 = vpop.eup %8738  ;;  %v5404_v13 = vadd.f32 %v13703_v61, %v5403_v35  ;;  %8754 = vpow2.f32 %v5330_v46  ;;  %v5197_v35 = vsub.f32 %v15987_v26, %v13609_v38 }
 0xf20   : > { %v13713_v25 = vpop.eup %8740  ;;  %8756 = vpow2.f32 %v5268_v22  ;;  %v5276_v7 = vmul.f32 1.442695, %v5193_v33  ;;  %5490 = vmatpush.bf16.msra.mxu1 %v5472_v11  ;;  %v5454_v14 = vpack.c.bf16 %v13620_v41, %v13615_v9  ;;  %v5280_v22 = vmul.f32 1.442695, %v5195_v47 }
 0xf21   : > { %v5382_v56 = vadd.f32 %v13647_v42, %v5381_v15  ;;  %15983 = vst [vmem:[#allocation8_spill] sm:$0xff] %v13713_v25  ;;  %v5272_v15 = vmul.f32 1.442695, %v5191_v32  ;;  %v13719_v30 = vpop.eup %8742  ;;  %v5405_v24 = vadd.f32 %v13713_v25, %v5404_v13  ;;  %v13731_v32 = vadd.f32 %v15986_v12, %v15984_v40  ;;  %v15988_v40 = vld [vmem:[#allocation52_spill] sm:$0xff] }
 0xf22   : > { %v13727_v39 = vpop.eup %8744  ;;  %v5201_v12 = vsub.f32 %v15988_v40, %v13609_v38  ;;  %v5470_v33 = vpack.c.bf16 %v13719_v30, %v13707_v27  ;;  %5478 = vmatpush.bf16.msra.mxu0 %v5454_v14  ;;  %v5207_v47 = vsub.f32 %v13399_v17, %v13609_v38  ;;  %v5284_v40 = vmul.f32 1.442695, %v5197_v35 }
 0xf23   : > { %v5383_v29 = vadd.f32 %v13651_v43, %v5382_v56  ;;  %v8747_v48 = vpop.eup %8746  ;;  %v5406_v13 = vadd.f32 %v13727_v39, %v5405_v24  ;;  %8758 = vpow2.f32 %v5272_v15  ;;  %v5205_v24 = vsub.f32 %v13394_v16, %v13609_v38  ;;  %v15989_v15 = vld [vmem:[#allocation38_spill] sm:$0xff] }
 0xf24   : > { %v13741_v4 = vpop.eup %8748  ;;  %v5209_v26 = vsub.f32 %v15989_v15, %v13609_v38  ;;  %8760 = vpow2.f32 %v5276_v7  ;;  %5491 = vmatpush.bf16.msra.mxu1 %v5470_v33  ;;  %v5211_v16 = vsub.f32 %v13408_v21, %v13609_v38  ;;  %v5452_v14 = vpack.c.bf16 %v13611_v8, %v13606_v55  ;;  %v15990_v55 = vld [vmem:[#allocation54_spill] sm:$0xff] }
 0xf25   : > { %v5384_v56 = vadd.f32 %v13656_v60, %v5383_v29  ;;  %v5199_v29 = vsub.f32 %v13373_v44, %v13609_v38  ;;  %v8751_v11 = vpop.eup %8750  ;;  %v5203_v44 = vsub.f32 %v13389_v52, %v13609_v38  ;;  %v5407_v9 = vadd.f32 %v13741_v4, %v5406_v13 }
 0xf26   : > { %v13753_v41 = vpop.eup %8752  ;;  %v5213_v17 = vsub.f32 %v13412_v0, %v13609_v38  ;;  %8762 = vpow2.f32 %v5280_v22  ;;  %v5468_v35 = vpack.c.bf16 %v8751_v11, %v8747_v48  ;;  %v5292_v15 = vmul.f32 1.442695, %v5201_v12  ;;  %5479 = vmatpush.bf16.msra.mxu0 %v5452_v14 }
 0xf27   : > { %v5385_v46 = vadd.f32 %v13660_v45, %v5384_v56  ;;  %v5408_v13 = vadd.f32 %v13753_v41, %v5407_v9  ;;  %v5288_v7 = vmul.f32 1.442695, %v5199_v29  ;;  %v5235_v25 = vsub.f32 %v13516_v19, %v13609_v38 }
 0xf28   : > { %8764 = vpow2.f32 %v5284_v40  ;;  %v5296_v0 = vmul.f32 1.442695, %v5203_v44  ;;  %5492 = vmatpush.bf16.msra.mxu1 %v5468_v35  ;;  %v5300_v22 = vmul.f32 1.442695, %v5205_v24  ;;  %v5450_v12 = vpack.c.bf16 %v13600_v6, %v13593_v63 }
 0xf29   : > { %v5386_v56 = vadd.f32 %v13665_v58, %v5385_v46  ;;  %v8755_v46 = vpop.eup %8754  ;;  %v5231_v14 = vsub.f32 %v13475_v1, %v13609_v38  ;;  %v5237_v8 = vsub.f32 %v13528_v37, %v13609_v38  ;;  %8766 = vpow2.f32 %v5288_v7 }
 0xf2a   : > { %v13765_v59 = vpop.eup %8756  ;;  %v5466_v19 = vpack.c.bf16 %v8755_v46, %v13669_v20  ;;  %8768 = vpow2.f32 %v5292_v15  ;;  %5480 = vmatpush.bf16.msra.mxu0 %v5450_v12  ;;  %v5233_v63 = vsub.f32 %v13496_v53, %v13609_v38  ;;  %v5308_v6 = vmul.f32 1.442695, %v5209_v26  ;;  %v15992_v12 = vld [vmem:[#allocation48_spill] sm:$0xff] }
 0xf2b   : > { %v5387_v52 = vadd.f32 %v13669_v20, %v5386_v56  ;;  %v5215_v56 = vsub.f32 %v13416_v34, %v13609_v38  ;;  %v5409_v21 = vadd.f32 %v13765_v59, %v5408_v13  ;;  %v13772_v9 = vpop.eup %8758  ;;  %8770 = vpow2.f32 %v5296_v0 }
 0xf2c   : > { %v13781_v13 = vpop.eup %8760  ;;  %v5360_v1 = vmul.f32 1.442695, %v5235_v25  ;;  %5493 = vmatpush.bf16.msra.mxu1 %v5466_v19  ;;  %8772 = vpow2.f32 %v5300_v22  ;;  %v5227_v53 = vsub.f32 %v15969_v3, %v13609_v38  ;;  %v5364_v7 = vmul.f32 1.442695, %v5237_v8  ;;  %v15991_v8 = vld [vmem:[#allocation18_spill] sm:$0xff] }
 0xf2d   : > { %v5388_v33 = vadd.f32 %v8755_v46, %v5387_v52  ;;  %v5410_v52 = vadd.f32 %v13772_v9, %v5409_v21  ;;  %v13789_v40 = vpop.eup %8762  ;;  %v5219_v46 = vsub.f32 %v13424_v31, %v13609_v38  ;;  %v5464_v25 = vpack.c.bf16 %v13665_v58, %v13660_v45 }
 0xf2e   : > { %v5352_v26 = vmul.f32 1.442695, %v5231_v14  ;;  %v5356_v15 = vmul.f32 1.442695, %v5233_v63  ;;  %v5446_v58 = vpack.c.bf16 %v13572_v54, %v13565_v57  ;;  %v5223_v0 = vsub.f32 %v15991_v8, %v13609_v38 }
 0xf2f   : > { %v5389_v29 = vadd.f32 %v8747_v48, %v5388_v33  ;;  %v5304_v48 = vmul.f32 1.442695, %v5207_v47  ;;  %v5411_v24 = vadd.f32 %v13781_v13, %v5410_v52  ;;  %v13797_v47 = vpop.eup %8764  ;;  %v5312_v33 = vmul.f32 1.442695, %v5211_v16 }
 0xf30   : > { %5494 = vmatpush.bf16.msra.mxu1 %v5464_v25  ;;  %v5344_v52 = vmul.f32 1.442695, %v5227_v53  ;;  %v5225_v14 = vsub.f32 %v15992_v12, %v13609_v38  ;;  %v5320_v57 = vmul.f32 1.442695, %v5215_v56  ;;  %v5460_v56 = vpack.c.bf16 %v13647_v42, %v13642_v2  ;;  %v15997_v12 = vld [vmem:[#allocation8_spill] sm:$0xff] }
 0xf31   : > { %v5390_v44 = vadd.f32 %v8751_v11, %v5389_v29  ;;  %v5412_v20 = vadd.f32 %v13789_v40, %v5411_v24  ;;  %v5448_v11 = vpack.c.bf16 %v13586_v49, %v13579_v36  ;;  %8774 = vpow2.f32 %v5304_v48  ;;  %v13807_v36 = vpop.eup %8766 }
 0xf32   : > { %v5229_v49 = vsub.f32 %v13459_v5, %v13609_v38  ;;  %8776 = vpow2.f32 %v5308_v6  ;;  %v8769_v3 = vpop.eup %8768  ;;  %v5316_v29 = vmul.f32 1.442695, %v5213_v17  ;;  %v5462_v5 = vpack.c.bf16 %v13656_v60, %v13651_v43 }
 0xf33   : > { %v5391_v37 = vadd.f32 %v13707_v27, %v5390_v44  ;;  %v5413_v35 = vadd.f32 %v13797_v47, %v5412_v20  ;;  %5481 = vmatpush.bf16.msra.mxu0 %v5448_v11  ;;  %8778 = vpow2.f32 %v5360_v1  ;;  %v15993_v44 = vsub.f32 %v15990_v55, %v13609_v38  ;;  %v15995_v55 = vld [vmem:[#allocation25_spill] sm:$0xff] }
 0xf34   : > { %8780 = vpow2.f32 %v5364_v7  ;;  %v5348_v54 = vmul.f32 1.442695, %v5229_v49  ;;  %5495 = vmatpush.bf16.msra.mxu1 %v5462_v5  ;;  %v5336_v63 = vmul.f32 1.442695, %v5223_v0  ;;  %v5221_v1 = vsub.f32 %v15995_v55, %v13609_v38  ;;  %v16002_v55 = vld [vmem:[#allocation78_spill] sm:$0xff] }
 0xf35   : > { %v5392_v27 = vadd.f32 %v13719_v30, %v5391_v37  ;;  %v5414_v45 = vadd.f32 %v13807_v36, %v5413_v35  ;;  %v8771_v30 = vpop.eup %8770  ;;  %8782 = vpow2.f32 %v5352_v26  ;;  %v5324_v34 = vmul.f32 1.442695, %v15993_v44 }
 0xf36   : > { %v8773_v16 = vpop.eup %8772  ;;  %8784 = vpow2.f32 %v5356_v15  ;;  %v5340_v2 = vmul.f32 1.442695, %v5225_v14  ;;  %v13855_v11 = vpack.c.bf16 %v13731_v32, %v13731_v32  ;;  %v5457_v53 = vpack.c.bf16 %v8769_v3, %v13807_v36 }
 0xf37   : > { %v5393_v21 = vadd.f32 %v13674_v28, %v5392_v27  ;;  %v5415_v28 = vadd.f32 %v8769_v3, %v5414_v45  ;;  %5482 = vmatpush.bf16.msra.mxu0 %v5446_v58  ;;  %v13825_v17 = vpop.eup %8774  ;;  %8786 = vpow2.f32 %v5312_v33  ;;  %v5459_v48 = vpack.c.bf16 %v8773_v16, %v8771_v30 }
 0xf38   : > { %v13830_v19 = vpop.eup %8776  ;;  %8788 = vpow2.f32 %v5316_v29  ;;  %5496 = vmatpush.bf16.msra.mxu1 %v5460_v56  ;;  %15996 = vst [vmem:[#allocation26_spill] sm:$0xff] %v13855_v11  ;;  %v5332_v26 = vmul.f32 1.442695, %v5221_v1  ;;  %v5455_v38 = vpack.c.bf16 %v13797_v47, %v13789_v40  ;;  %v5453_v58 = vpack.c.bf16 %v13781_v13, %v13772_v9 }
 0xf39   : > { %v5394_v22 = vadd.f32 %v13698_v62, %v5393_v21  ;;  %v5416_v60 = vadd.f32 %v8771_v30, %v5415_v28  ;;  %v5444_v62 = vpack.c.bf16 %v13557_v50, %v13553_v23  ;;  %v13837_v24 = vpop.eup %8778  ;;  %8790 = vpow2.f32 %v5344_v52 }
 0xf3a   : > { %v13842_v23 = vpop.eup %8780  ;;  %v13846_v50 = vpack.c.bf16 %v13723_v18, %v13723_v18  ;;  %8792 = vpow2.f32 %v5348_v54  ;;  %v5328_v18 = vmul.f32 1.442695, %v5219_v46  ;;  %v5451_v47 = vpack.c.bf16 %v13765_v59, %v13753_v41  ;;  %v15998_v54 = vld [vmem:[#allocation46_spill] sm:$0xff] }
 0xf3b   : > { %v5395_v43 = vadd.f32 %v13678_v10, %v5394_v22  ;;  %v5417_v6 = vadd.f32 %v8773_v16, %v5416_v60  ;;  %5483 = vmatpush.bf16.msra.mxu0 %v5444_v62  ;;  %v8783_v42 = vpop.eup %8782  ;;  %8794 = vpow2.f32 %v5320_v57  ;;  %v5475_v37 = vpack.c.bf16 %v13842_v23, %v13837_v24  ;;  %5497 = vmatmul.bf16.vlgmr.msra.gmra.mxu1 %v13855_v11  ;;  %v15999_v60 = vld [vmem:[#allocation20_spill] sm:$0xff]  ;;  %v16000_v62 = vld [vmem:[#allocation66_spill] sm:$0xff] }
 0xf3c   : > { %15994 = vst [vmem:[#allocation63_spill] sm:$0xff] %v13846_v50  ;;  %v8785_v20 = vpop.eup %8784  ;;  %8796 = vpow2.f32 %v5324_v34  ;;  %v5449_v52 = vpack.c.bf16 %v13741_v4, %v13727_v39  ;;  %v5447_v14 = vpack.c.bf16 %v15997_v12, %v13703_v61  ;;  %v5572_v59 = vrot.slane %v15998_v54, 2  ;;  %v16001_v34 = vld [vmem:[#allocation22_spill] sm:$0xff] }
 0xf3d   : > { %v13840_v10 = vadd.f32 %v13683_v51, %v5395_v43  ;;  %v5418_v51 = vadd.f32 %v13825_v17, %v5417_v6  ;;  %v8787_v7 = vpop.eup %8786  ;;  %8798 = vpow2.f32 %v5336_v63  ;;  %5515 = vmatpush.bf16.msrb.mxu1 %v5475_v37  ;;  %v5473_v49 = vpack.c.bf16 %v8785_v20, %v8783_v42  ;;  %v16013_v54 = vld [vmem:[#allocation70_spill] sm:$0xff] }
 0xf3e   : > { %5484 = vmatmul.bf16.vlgmr.msra.gmra.mxu0 %v13846_v50  ;;  %v8789_v27 = vpop.eup %8788  ;;  %8800 = vpow2.f32 %v5340_v2  ;;  %v5445_v44 = vpack.c.bf16 %v16000_v62, %v15999_v60  ;;  %v5573_v4 = vrot.slane %v16001_v34, 2  ;;  %v5623_v56 = vsel %vm644_vm1, %v5572_v59, 0  ;;  %v16017_v62 = vld [vmem:[#allocation83_spill] sm:$0xff] }
 0xf3f   : > { %5502 = vmatpush.bf16.msrb.mxu0 %v5459_v48  ;;  %v5419_v25 = vadd.f32 %v13830_v19, %v5418_v51  ;;  %v8791_v32 = vpop.eup %8790  ;;  %8802 = vpow2.f32 %v5328_v18  ;;  %v5463_v43 = vpack.c.bf16 %v8789_v27, %v8787_v7  ;;  %v5461_v61 = vpack.c.bf16 %v13830_v19, %v13825_v17  ;;  %v16004_v17 = vld [vmem:[#allocation62_spill] sm:$0xff]  ;;  %v16005_v19 = vld [vmem:[#allocation79_spill] sm:$0xff] }
 0xf40   : > { %v8793_v31 = vpop.eup %8792  ;;  %8804 = vpow2.f32 %v5332_v26  ;;  %v5626_v6 = vsel %vm644_vm1, %v5573_v4, 0  ;;  %vm6607_vm1 = vcmask 908288  }
 0xf41   : > { %v5420_v35 = vadd.f32 %v8787_v7, %v5419_v25  ;;  %v8795_v46 = vpop.eup %8794  ;;  %5516 = vmatpush.bf16.msrb.mxu1 %v5473_v49  ;;  %v5471_v21 = vpack.c.bf16 %v8793_v31, %v8791_v32 }
 0xf42   : > { %v8797_v33 = vpop.eup %8796 }
 0xf43   : > { %5503 = vmatpush.bf16.msrb.mxu0 %v5457_v53  ;;  %v5421_v36 = vadd.f32 %v8789_v27, %v5420_v35  ;;  %v8799_v15 = vpop.eup %8798  ;;  %v5465_v13 = vpack.c.bf16 %v8797_v33, %v8795_v46  ;;  %v16007_v53 = vld [vmem:[#allocation67_spill] sm:$0xff] }
 0xf44   : > { %v8801_v45 = vpop.eup %8800 }
 0xf45   : > { %v5422_v3 = vadd.f32 %v8795_v46, %v5421_v36  ;;  %5517 = vmatpush.bf16.msrb.mxu1 %v5471_v21  ;;  %v8803_v8 = vpop.eup %8802  ;;  %v5469_v29 = vpack.c.bf16 %v8801_v45, %v8799_v15  ;;  %v16010_v21 = vld [vmem:[#allocation81_spill] sm:$0xff] }
 0xf46   : > { %v8805_v40 = vpop.eup %8804 }
 0xf47   : > { %5504 = vmatpush.bf16.msrb.mxu0 %v5455_v38  ;;  %v5423_v30 = vadd.f32 %v8797_v33, %v5422_v3  ;;  %v5467_v22 = vpack.c.bf16 %v8805_v40, %v8803_v8 }
 0xf49   : > { %v5424_v0 = vadd.f32 %v8803_v8, %v5423_v30  ;;  %5518 = vmatpush.bf16.msrb.mxu1 %v5469_v29 }
 0xf4b   : > { %5505 = vmatpush.bf16.msrb.mxu0 %v5453_v58  ;;  %v5425_v5 = vadd.f32 %v8805_v40, %v5424_v0  ;;  %v296_v0 = vld [vmem:[%s15119_s1 + $0x38] sm:$0xff]  ;;  %v16011_v40 = vld [vmem:[#allocation89_spill] sm:$0xff] }
 0xf4d   : > { %v5426_v16 = vadd.f32 %v8799_v15, %v5425_v5  ;;  %5519 = vmatpush.bf16.msrb.mxu1 %v5467_v22 }
 0xf4f   : > { %5506 = vmatpush.bf16.msrb.mxu0 %v5451_v47  ;;  %v5427_v28 = vadd.f32 %v8801_v45, %v5426_v16  ;;  %v8953_v16 = vld [vmem:[%s9046_s30 + $0x38] sm:$0xff] }
 0xf50   : > { %v13930_v22 = vadd.f32 %v8953_v16, %v296_v0 }
 0xf51   : > { %v5428_v9 = vadd.f32 %v8791_v32, %v5427_v28  ;;  %5520 = vmatpush.bf16.msrb.mxu1 %v5465_v13  ;;  %v8952_v32 = vld [vmem:[%s9046_s30 + $0x30] sm:$0xff]  ;;  %s8985_s30 = smov 111  }
 0xf52   : > { %16012 = vst [vmem:[#allocation47_spill] sm:$0xff] %v13930_v22 }
 0xf53   : > { %5507 = vmatpush.bf16.msrb.mxu0 %v5449_v52  ;;  %v5429_v57 = vadd.f32 %v8793_v31, %v5428_v9  ;;  %v16009_v31 = vld [vmem:[#allocation36_spill] sm:$0xff] }
 0xf55   : > { %v5430_v41 = vadd.f32 %v8783_v42, %v5429_v57  ;;  %5521 = vmatpush.bf16.msrb.mxu1 %v5463_v43  ;;  %v16006_v42 = vld [vmem:[#allocation85_spill] sm:$0xff] }
 0xf57   : > { %5508 = vmatpush.bf16.msrb.mxu0 %v5447_v14  ;;  %v5431_v39 = vadd.f32 %v8785_v20, %v5430_v41 }
 0xf59   : > { %v5432_v48 = vadd.f32 %v13837_v24, %v5431_v39  ;;  %5522 = vmatpush.bf16.msrb.mxu1 %v5461_v61  ;;  %v16003_v24 = vld [vmem:[#allocation80_spill] sm:$0xff] }
 0xf5b   : > { %5509 = vmatpush.bf16.msrb.mxu0 %v5445_v44  ;;  %v5433_v63 = vadd.f32 %v13842_v23, %v5432_v48  ;;  %v5397_v23 = vrot.slane %v13840_v10, 4 }
 0xf5c   : > { %5523 = vmatmul.bf16.vlgmr.msrb.gmra.mxu1 %v13855_v11 }
 0xf5d   : > { %5724 = vmatpush.bf16.msra.mxu1 %v5626_v6  ;;  %v5398_v1 = vadd.f32 %v5397_v23, %v13840_v10  ;;  %v295_v10 = vld [vmem:[%s15119_s1 + $0x30] sm:$0xff]  ;;  %v5434_v26 = vrot.slane %v5433_v63, 4 }
 0xf5e   : > { %5510 = vmatmul.bf16.vlgmr.msrb.gmra.mxu0 %v13846_v50  ;;  %v13916_v35 = vadd.f32 %v8952_v32, %v295_v10 }
 0xf5f   : > { %5635 = vmatpush.bf16.msra.mxu0 %v5623_v56  ;;  %v5399_v2 = vrot.slane %v5398_v1, 2  ;;  %v5435_v46 = vadd.f32 %v5434_v26, %v5433_v63  ;;  %v16021_v56 = vld [vmem:[#allocation93_spill] sm:$0xff] }
 0xf60   : > { %16008 = vst [vmem:[#allocation34_spill] sm:$0xff] %v13916_v35 }
 0xf61   : > { %v5400_v51 = vadd.f32 %v5399_v2, %v5398_v1  ;;  %v5436_v3 = vrot.slane %v5435_v46, 2  ;;  %v16026_v1 = vld [vmem:[#allocation84_spill] sm:$0xff] }
 0xf63   : > { %v5401_v37 = vrot.slane %v5400_v51, 1  ;;  %v5437_v45 = vadd.f32 %v5436_v3, %v5435_v46 }
 0xf65   : > { %v5402_v20 = vadd.f32 %v5401_v37, %v5400_v51  ;;  %v5438_v58 = vrot.slane %v5437_v45, 1 }
 0xf67   : > { %8806 = vrcp.f32 %v5402_v20  ;;  %v5439_v30 = vadd.f32 %v5438_v58, %v5437_v45  ;;  %v16028_v20 = vld [vmem:[#allocation42_spill] sm:$0xff] }
 0xf69   : > { %8808 = vrcp.f32 %v5439_v30 }
 0xf6c   : > { %7558 = vmatmul.msk.bf16.vlgmr.msra.gmra.mxu1 %vm595_vm2, %v16002_v55 }
 0xf6d   : > { %v8807_v27 = vpop.eup %8806 }
 0xf6e   : > { %7542 = vmatmul.msk.bf16.vlgmr.msra.gmra.mxu0 %vm595_vm2, %v16002_v55  ;;  %v16024_v55 = vld [vmem:[#allocation73_spill] sm:$0xff] }
 0xf6f   : > { %v8809_v5 = vpop.eup %8808 }
 0xf7c   : > { %7559 = vmatmul.msk.bf16.gmra.mxu1 %vm595_vm2, %v16003_v24 }
 0xf7e   : > { %7543 = vmatmul.msk.bf16.gmra.mxu0 %vm595_vm2, %v16003_v24 }
 0xf8c   : > { %7560 = vmatmul.msk.bf16.gmra.mxu1 %vm595_vm2, %v16004_v17 }
 0xf8e   : > { %7544 = vmatmul.msk.bf16.gmra.mxu0 %vm595_vm2, %v16004_v17 }
 0xf9c   : > { %7561 = vmatmul.msk.bf16.gmra.mxu1 %vm595_vm2, %v16005_v19 }
 0xf9e   : > { %7545 = vmatmul.msk.bf16.gmra.mxu0 %vm595_vm2, %v16005_v19 }
 0xfac   : > { %7562 = vmatmul.msk.bf16.gmra.mxu1 %vm595_vm2, %v16006_v42 }
 0xfae   : > { %7546 = vmatmul.msk.bf16.gmra.mxu0 %vm595_vm2, %v16006_v42 }
 0xfb8   : > { %v5498_v7 = vpop.f32.mrf.mxu1 }
 0xfbb   : > { %v5485_v18 = vpop.f32.mrf.mxu0 }
 0xfbc   : > { %v5499_v25 = vadd.f32 %v5498_v7, %v5485_v18  ;;  %7563 = vmatmul.msk.bf16.gmra.mxu1 %vm595_vm2, %v16007_v53 }
 0xfbe   : > { %7547 = vmatmul.msk.bf16.gmra.mxu0 %vm595_vm2, %v16007_v53  ;;  %v5530_v49 = vmul.f32 %v8807_v27, %v5499_v25  ;;  %v16030_v25 = vld [vmem:[#allocation76_spill] sm:$0xff] }
 0xfc0   : > { %v5532_v38 = vmul.f32 %v5530_v49, %v16009_v31  ;;  %v5500_v15 = vpop.f32.mrf.mxu1 }
 0xfc2   : > { %v5534_v33 = vadd.f32 %v5532_v38, %v13916_v35  ;;  %v16032_v38 = vld [vmem:[#allocation86_spill] sm:$0xff] }
 0xfc3   : > { %v5487_v36 = vpop.f32.mrf.mxu0 }
 0xfc4   : > { %5536 = vst [vmem:[#allocation2 + $0x28] sm:$0xf] %v5534_v33 }
 0xfcc   : > { %7564 = vmatmul.msk.bf16.gmra.mxu1 %vm595_vm2, %v16010_v21 }
 0xfce   : > { %7548 = vmatmul.msk.bf16.gmra.mxu0 %vm595_vm2, %v16010_v21 }
 0xfd9   : > { %v5524_v29 = vpop.f32.mrf.mxu1 }
 0xfdb   : > { %v5511_v8 = vpop.f32.mrf.mxu0 }
 0xfdc   : > { %v5525_v47 = vadd.f32 %v5524_v29, %v5511_v8  ;;  %7565 = vmatmul.msk.bf16.gmra.mxu1 %vm595_vm2, %v16011_v40 }
 0xfde   : > { %7549 = vmatmul.msk.bf16.gmra.mxu0 %vm595_vm2, %v16011_v40  ;;  %v5531_v52 = vmul.f32 %v8809_v5, %v5525_v47 }
 0xfe0   : > { %v5533_v28 = vmul.f32 %v5531_v52, %v16009_v31 }
 0xfe1   : > { %v5526_v12 = vpop.f32.mrf.mxu1 }
 0xfe2   : > { %v5535_v13 = vadd.f32 %v5533_v28, %v13930_v22 }
 0xfe3   : > { %v5513_v9 = vpop.f32.mrf.mxu0 }
 0xfe4   : > { %5537 = vst [vmem:[#allocation2 + $0x38] sm:$0xf] %v5535_v13 }
 0xfe9   : > { %v13938_v57 = vpop.f32.mrf.mxu1 }
 0xfeb   : > { %v13936_v14 = vpop.f32.mrf.mxu0 }
 0xfec   : > { %7566 = vmatmul.msk.bf16.gmra.mxu1 %vm595_vm2, %v16013_v54 }
 0xfee   : > { %7550 = vmatmul.msk.bf16.gmra.mxu0 %vm595_vm2, %v16013_v54 }
 0xff1   : > { %v13946_v41 = vpop.f32.mrf.mxu1 }
 0xff2   : > { %16014 = vst [vmem:[#allocation59_spill] sm:$0xff] %v13946_v41 }
 0xff3   : > { %v13944_v59 = vpop.f32.mrf.mxu0 }
 0xff9   : > { %v13950_v60 = vpop.f32.mrf.mxu1 }
 0xffa   : > { %16016 = vst [vmem:[#allocation28_spill] sm:$0xff] %v13950_v60 }
 0xffb   : > { %v13948_v43 = vpop.f32.mrf.mxu0 }
 0xffc   : > { %16015 = vst [vmem:[#allocation82_spill] sm:$0xff] %v13948_v43  ;;  %7567 = vmatmul.msk.bf16.gmra.mxu1 %vm595_vm2, %v16017_v62 }
 0xffe   : > { %7551 = vmatmul.msk.bf16.gmra.mxu0 %vm595_vm2, %v16017_v62 }
0x1001   : > { %v13958_v34 = vpop.f32.mrf.mxu1 }
0x1002   : > { %16019 = vst [vmem:[#allocation90_spill] sm:$0xff] %v13958_v34 }
0x1003   : > { %v13956_v44 = vpop.f32.mrf.mxu0 }
0x1004   : > { %16018 = vst [vmem:[#allocation87_spill] sm:$0xff] %v13956_v44 }
0x1009   : > { %v13962_v39 = vpop.f32.mrf.mxu1 }
0x100b   : > { %v13960_v4 = vpop.f32.mrf.mxu0 }
0x100c   : > { %16020 = vst [vmem:[#allocation17_spill] sm:$0xff] %v13960_v4  ;;  %7568 = vmatmul.msk.bf16.gmra.mxu1 %vm595_vm2, %v16021_v56 }
0x100e   : > { %7552 = vmatmul.msk.bf16.gmra.mxu0 %vm595_vm2, %v16021_v56 }
0x1011   : > { %v13970_v61 = vpop.f32.mrf.mxu1 }
0x1013   : > { %v13968_v48 = vpop.f32.mrf.mxu0 }
0x1014   : > { %16022 = vst [vmem:[#allocation31_spill] sm:$0xff] %v13968_v48 }
0x1019   : > { %v13974_v6 = vpop.f32.mrf.mxu1 }
0x101b   : > { %v13972_v63 = vpop.f32.mrf.mxu0 }
0x101c   : > { %16023 = vst [vmem:[#allocation92_spill] sm:$0xff] %v13972_v63  ;;  %7569 = vmatmul.msk.bf16.gmra.mxu1 %vm595_vm2, %v16024_v55 }
0x101e   : > { %7553 = vmatmul.msk.bf16.gmra.mxu0 %vm595_vm2, %v16024_v55 }
0x1021   : > { %v13982_v17 = vpop.f32.mrf.mxu1 }
0x1022   : > { %16025 = vst [vmem:[#allocation65_spill] sm:$0xff] %v13982_v17 }
0x1023   : > { %v13980_v24 = vpop.f32.mrf.mxu0 }
0x1029   : > { %v13986_v23 = vpop.f32.mrf.mxu1 }
0x102b   : > { %v13984_v19 = vpop.f32.mrf.mxu0 }
0x102c   : > { %7570 = vmatmul.msk.bf16.gmra.mxu1 %vm595_vm2, %v16026_v1 }
0x102e   : > { %7554 = vmatmul.msk.bf16.gmra.mxu0 %vm595_vm2, %v16026_v1  ;;  %v5806_v1 = vmax.f32 %v13936_v14, %v13948_v43 }
0x1031   : > { %v13994_v42 = vpop.f32.mrf.mxu1 }
0x1032   : > { %16027 = vst [vmem:[#allocation71_spill] sm:$0xff] %v13994_v42 }
0x1033   : > { %v13992_v2 = vpop.f32.mrf.mxu0 }
0x1039   : > { %v13998_v37 = vpop.f32.mrf.mxu1 }
0x103b   : > { %v13996_v51 = vpop.f32.mrf.mxu0 }
0x103c   : > { %7571 = vmatmul.msk.bf16.gmra.mxu1 %vm595_vm2, %v16028_v20 }
0x103e   : > { %7555 = vmatmul.msk.bf16.gmra.mxu0 %vm595_vm2, %v16028_v20  ;;  %v5807_v20 = vmax.f32 %v13944_v59, %v13956_v44 }
0x1041   : > { %v14006_v53 = vpop.f32.mrf.mxu1 }
0x1042   : > { %16029 = vst [vmem:[#allocation6_spill] sm:$0xff] %v14006_v53 }
0x1043   : > { %v14004_v18 = vpop.f32.mrf.mxu0 }
0x1049   : > { %v14010_v7 = vpop.f32.mrf.mxu1 }
0x104b   : > { %v14008_v10 = vpop.f32.mrf.mxu0 }
0x104c   : > { %7572 = vmatmul.msk.bf16.gmra.mxu1 %vm595_vm2, %v16030_v25 }
0x104e   : > { %7556 = vmatmul.msk.bf16.gmra.mxu0 %vm595_vm2, %v16030_v25  ;;  %v5808_v25 = vmax.f32 %v5806_v1, %v13960_v4 }
0x1050   : > { %v5810_v31 = vmax.f32 %v5808_v25, %v13972_v63 }
0x1051   : > { %v14018_v26 = vpop.f32.mrf.mxu1 }
0x1052   : > { %16031 = vst [vmem:[#allocation69_spill] sm:$0xff] %v14018_v26  ;;  %v5812_v50 = vmax.f32 %v5810_v31, %v13984_v19 }
0x1053   : > { %v14016_v27 = vpop.f32.mrf.mxu0 }
0x1054   : > { %v5814_v43 = vmax.f32 %v5812_v50, %v13996_v51 }
0x1056   : > { %v5816_v1 = vmax.f32 %v5814_v43, %v14008_v10  ;;  %v5844_v43 = vmax.f32 %v13946_v41, %v13958_v34 }
0x1059   : > { %v14022_v49 = vpop.f32.mrf.mxu1 }
0x105b   : > { %v14020_v32 = vpop.f32.mrf.mxu0 }
0x105c   : > { %7573 = vmatmul.msk.bf16.gmra.mxu1 %vm595_vm2, %v16032_v38  ;;  %v5818_v4 = vmax.f32 %v5816_v1, %v14020_v32 }
0x105e   : > { %7557 = vmatmul.msk.bf16.gmra.mxu0 %vm595_vm2, %v16032_v38  ;;  %v5809_v38 = vmax.f32 %v5807_v20, %v13968_v48  ;;  %vm6819_vm2 = vcmask 769024  }
0x1060   : > { %v5811_v11 = vmax.f32 %v5809_v38, %v13980_v24 }
0x1061   : > { %v14030_v36 = vpop.f32.mrf.mxu1 }
0x1063   : > { %v14028_v46 = vpop.f32.mrf.mxu0 }
0x1069   : > { %v14034_v15 = vpop.f32.mrf.mxu1 }
0x106b   : > { %v14032_v33 = vpop.f32.mrf.mxu0 }
0x106c   : > { %v5820_v31 = vmax.f32 %v5818_v4, %v14032_v33  ;;  %v5846_v4 = vmax.f32 %v5844_v43, %v13970_v61 }
0x1071   : > { %v14038_v21 = vpop.f32.mrf.mxu1 }
0x1072   : > { %16033 = vst [vmem:[#allocation16_spill] sm:$0xff] %v14038_v21 }
0x1073   : > { %v14036_v3 = vpop.f32.mrf.mxu0 }
0x1079   : > { %v14042_v58 = vpop.f32.mrf.mxu1 }
0x107b   : > { %v14040_v45 = vpop.f32.mrf.mxu0 }
0x107c   : > { %v5822_v50 = vmax.f32 %v5820_v31, %v14040_v45 }
0x1081   : > { %v14046_v8 = vpop.f32.mrf.mxu1 }
0x1083   : > { %v14044_v30 = vpop.f32.mrf.mxu0 }
0x1084   : > { %16034 = vst [vmem:[#allocation57_spill] sm:$0xff] %v14044_v30 }
0x1089   : > { %v14050_v29 = vpop.f32.mrf.mxu1 }
0x108b   : > { %v14048_v0 = vpop.f32.mrf.mxu0 }
0x1091   : > { %v14054_v47 = vpop.f32.mrf.mxu1 }
0x1092   : > { %16035 = vst [vmem:[#allocation10_spill] sm:$0xff] %v14054_v47 }
0x1093   : > { %v14052_v40 = vpop.f32.mrf.mxu0 }
0x1099   : > { %v14058_v16 = vpop.f32.mrf.mxu1 }
0x109b   : > { %v14056_v5 = vpop.f32.mrf.mxu0 }
0x10a1   : > { %v14062_v28 = vpop.f32.mrf.mxu1 }
0x10a2   : > { %16036 = vst [vmem:[#allocation11_spill] sm:$0xff] %v14062_v28 }
0x10a3   : > { %v14060_v52 = vpop.f32.mrf.mxu0 }
0x10a9   : > { %v14066_v13 = vpop.f32.mrf.mxu1 }
0x10aa   : > { %16037 = vst [vmem:[#allocation9_spill] sm:$0xff] %v14066_v13 }
0x10ab   : > { %v14064_v9 = vpop.f32.mrf.mxu0 }
0x10b1   : > { %v14070_v54 = vpop.f32.mrf.mxu1 }
0x10b2   : > { %16038 = vst [vmem:[#allocation27_spill] sm:$0xff] %v14070_v54 }
0x10b3   : > { %v14068_v12 = vpop.f32.mrf.mxu0 }
0x10b9   : > { %v14074_v56 = vpop.f32.mrf.mxu1 }
0x10ba   : > { %16039 = vst [vmem:[#allocation50_spill] sm:$0xff] %v14074_v56  ;;  %v5813_v56 = vmax.f32 %v5811_v11, %v13992_v2 }
0x10bb   : > { %v14072_v62 = vpop.f32.mrf.mxu0 }
0x10bc   : > { %v5815_v44 = vmax.f32 %v5813_v56, %v14004_v18 }
0x10be   : > { %v5817_v20 = vmax.f32 %v5815_v44, %v14016_v27  ;;  %v5824_v44 = vmax.f32 %v5822_v50, %v14048_v0 }
0x10c0   : > { %v5819_v25 = vmax.f32 %v5817_v20, %v14028_v46  ;;  %v5843_v20 = vmax.f32 %v13938_v57, %v13950_v60 }
0x10c1   : > { %v14084_v22 = vpop.f32.mrf.mxu1 }
0x10c2   : > { %v5821_v11 = vmax.f32 %v5819_v25, %v14036_v3  ;;  %v5826_v25 = vmax.f32 %v5824_v44, %v14056_v5 }
0x10c3   : > { %v14076_v55 = vpop.f32.mrf.mxu0 }
0x10c4   : > { %v5823_v56 = vmax.f32 %v5821_v11, %v14044_v30  ;;  %v5845_v11 = vmax.f32 %v5843_v20, %v13962_v39  ;;  %v5848_v30 = vmax.f32 %v5846_v4, %v13982_v17  ;;  %v5828_v34 = vmax.f32 %v5826_v25, %v14064_v9 }
0x10c6   : > { %v5825_v38 = vmax.f32 %v5823_v56, %v14052_v40  ;;  %v5847_v41 = vmax.f32 %v5845_v11, %v13974_v6  ;;  %v5850_v60 = vmax.f32 %v5848_v30, %v13994_v42  ;;  %v5830_v43 = vmax.f32 %v5828_v34, %v14072_v62 }
0x10c8   : > { %v5827_v31 = vmax.f32 %v5825_v38, %v14060_v52  ;;  %v5849_v38 = vmax.f32 %v5847_v41, %v13986_v23  ;;  %v5852_v20 = vmax.f32 %v5850_v60, %v14006_v53 }
0x10c9   : > { %v14100_v63 = vpop.f32.mrf.mxu1 }
0x10ca   : > { %v5829_v50 = vmax.f32 %v5827_v31, %v14068_v12  ;;  %v5851_v31 = vmax.f32 %v5849_v38, %v13998_v37  ;;  %v5854_v11 = vmax.f32 %v5852_v20, %v14018_v26 }
0x10cb   : > { %v14086_v35 = vpop.f32.mrf.mxu0 }
0x10cc   : > { %v5831_v44 = vmax.f32 %v5829_v50, %v14076_v55  ;;  %v5832_v4 = vmax.f32 %v5830_v43, %v14086_v35  ;;  %v5853_v50 = vmax.f32 %v5851_v31, %v14010_v7  ;;  %v5856_v41 = vmax.f32 %v5854_v11, %v14030_v36 }
0x10ce   : > { %v5855_v60 = vmax.f32 %v5853_v50, %v14022_v49  ;;  %v5858_v43 = vmax.f32 %v5856_v41, %v14038_v21 }
0x10d0   : > { %v5857_v38 = vmax.f32 %v5855_v60, %v14034_v15  ;;  %v5860_v20 = vmax.f32 %v5858_v43, %v14046_v8 }
0x10d1   : > { %v14121_v56 = vpop.f32.mrf.mxu1 }
0x10d3   : > { %v14096_v48 = vpop.f32.mrf.mxu0 }
0x10d4   : > { %v5833_v25 = vmax.f32 %v5831_v44, %v14096_v48 }
0x10d9   : > { %v14141_v53 = vpop.f32.mrf.mxu1 }
0x10db   : > { %v14110_v1 = vpop.f32.mrf.mxu0 }
0x10dc   : > { %v5834_v30 = vmax.f32 %v5832_v4, %v14110_v1  ;;  %v5859_v4 = vmax.f32 %v5857_v38, %v14042_v58 }
0x10de   : > { %v5861_v11 = vmax.f32 %v5859_v4, %v14050_v29 }
0x10e0   : > { %v5863_v50 = vmax.f32 %v5861_v11, %v14058_v16 }
0x10e2   : > { %v5865_v60 = vmax.f32 %v5863_v50, %v14066_v13  ;;  %v16045_v13 = vld [vmem:[#allocation92_spill] sm:$0xff] }
0x10e3   : > { %v14131_v17 = vpop.f32.mrf.mxu0 }
0x10e4   : > { %v5835_v34 = vmax.f32 %v5833_v25, %v14131_v17  ;;  %v5862_v25 = vmax.f32 %v5860_v20, %v14054_v47 }
0x10e6   : > { %v5836_v42 = vmax.f32 %v5834_v30, %v5835_v34  ;;  %v5864_v30 = vmax.f32 %v5862_v25, %v14062_v28 }
0x10e8   : > { %v5837_v44 = vrot.slane %v5836_v42, 4  ;;  %v5866_v41 = vmax.f32 %v5864_v30, %v14070_v54  ;;  %v16041_v30 = vld [vmem:[#allocation82_spill] sm:$0xff] }
0x10ea   : > { %v5838_v26 = vmax.f32 %v5836_v42, %v5837_v44  ;;  %v5868_v43 = vmax.f32 %v5866_v41, %v14084_v22  ;;  %v14153_v42 = vpop.f32.mrf.mxu1  ;;  %v16040_v44 = vld [vmem:[#allocation50_spill] sm:$0xff] }
0x10eb   : > { %v5867_v38 = vmax.f32 %v5865_v60, %v16040_v44  ;;  %v16042_v60 = vld [vmem:[#allocation87_spill] sm:$0xff] }
0x10ec   : > { %v5839_v31 = vrot.slane %v5838_v26, 2  ;;  %v5870_v20 = vmax.f32 %v5868_v43, %v14121_v56 }
0x10ed   : > { %v5869_v4 = vmax.f32 %v5867_v38, %v14100_v63  ;;  %v16043_v38 = vld [vmem:[#allocation17_spill] sm:$0xff] }
0x10ee   : > { %v5840_v34 = vmax.f32 %v5838_v26, %v5839_v31  ;;  %v5872_v26 = vmax.f32 %v5870_v20, %v14153_v42 }
0x10ef   : > { %v5871_v25 = vmax.f32 %v5869_v4, %v14141_v53 }
0x10f0   : > { %v5841_v21 = vrot.slane %v5840_v34, 1 }
0x10f1   : > { %v5873_v41 = vmax.f32 %v5871_v25, %v5872_v26 }
0x10f2   : > { %v14157_v47 = vmax.f32 %v5840_v34, %v5841_v21 }
0x10f3   : > { %v5874_v4 = vrot.slane %v5873_v41, 4 }
0x10f4   : > { %v5880_v31 = vsub.f32 %v13936_v14, %v14157_v47  ;;  %v5882_v11 = vsub.f32 %v13944_v59, %v14157_v47  ;;  %v5884_v50 = vsub.f32 %v16041_v30, %v14157_v47  ;;  %v5886_v21 = vsub.f32 %v16042_v60, %v14157_v47  ;;  %v16044_v14 = vld [vmem:[#allocation31_spill] sm:$0xff] }
0x10f5   : > { %v5888_v20 = vsub.f32 %v16043_v38, %v14157_v47  ;;  %v5890_v54 = vsub.f32 %v16044_v14, %v14157_v47  ;;  %v5892_v30 = vsub.f32 %v16045_v13, %v14157_v47  ;;  %v5875_v25 = vmax.f32 %v5873_v41, %v5874_v4 }
0x10f6   : > { %v5944_v34 = vmul.f32 1.442695, %v5880_v31  ;;  %v5948_v43 = vmul.f32 1.442695, %v5882_v11  ;;  %v5952_v28 = vmul.f32 1.442695, %v5884_v50  ;;  %v5894_v31 = vsub.f32 %v13980_v24, %v14157_v47 }
0x10f7   : > { %v5956_v59 = vmul.f32 1.442695, %v5886_v21  ;;  %v5960_v26 = vmul.f32 1.442695, %v5888_v20  ;;  %v5964_v11 = vmul.f32 1.442695, %v5890_v54  ;;  %v5896_v50 = vsub.f32 %v13984_v19, %v14157_v47 }
0x10f8   : > { %8810 = vpow2.f32 %v5944_v34  ;;  %v5898_v21 = vsub.f32 %v13992_v2, %v14157_v47  ;;  %v5968_v13 = vmul.f32 1.442695, %v5892_v30  ;;  %v5876_v41 = vrot.slane %v5875_v25, 2 }
0x10f9   : > { %8812 = vpow2.f32 %v5948_v43  ;;  %v5902_v43 = vsub.f32 %v14004_v18, %v14157_v47  ;;  %v5972_v19 = vmul.f32 1.442695, %v5894_v31  ;;  %v5904_v38 = vsub.f32 %v14008_v10, %v14157_v47 }
0x10fa   : > { %8814 = vpow2.f32 %v5952_v28  ;;  %v5900_v28 = vsub.f32 %v13996_v51, %v14157_v47  ;;  %v5976_v2 = vmul.f32 1.442695, %v5896_v50  ;;  %v5906_v51 = vsub.f32 %v14016_v27, %v14157_v47 }
0x10fb   : > { %8816 = vpow2.f32 %v5956_v59  ;;  %v5980_v14 = vmul.f32 1.442695, %v5898_v21  ;;  %v5908_v59 = vsub.f32 %v14020_v32, %v14157_v47  ;;  %v5910_v10 = vsub.f32 %v14028_v46, %v14157_v47 }
0x10fc   : > { %8818 = vpow2.f32 %v5960_v26  ;;  %v5984_v30 = vmul.f32 1.442695, %v5900_v28  ;;  %v5877_v26 = vmax.f32 %v5875_v25, %v5876_v41  ;;  %v5912_v50 = vsub.f32 %v14032_v33, %v14157_v47 }
0x10fd   : > { %8820 = vpow2.f32 %v5964_v11  ;;  %v5988_v11 = vmul.f32 1.442695, %v5902_v43  ;;  %v5992_v27 = vmul.f32 1.442695, %v5904_v38  ;;  %v5914_v32 = vsub.f32 %v14036_v3, %v14157_v47  ;;  %v16046_v43 = vld [vmem:[#allocation57_spill] sm:$0xff] }
0x10fe   : > { %v14178_v60 = vpop.eup %8810  ;;  %8822 = vpow2.f32 %v5968_v13  ;;  %v5916_v25 = vsub.f32 %v14040_v45, %v14157_v47  ;;  %v5996_v28 = vmul.f32 1.442695, %v5906_v51  ;;  %v6000_v46 = vmul.f32 1.442695, %v5908_v59 }
0x10ff   : > { %v14182_v34 = vpop.eup %8812  ;;  %8824 = vpow2.f32 %v5972_v19  ;;  %v5878_v41 = vrot.slane %v5877_v26, 1  ;;  %v5918_v19 = vsub.f32 %v16046_v43, %v14157_v47  ;;  %v6004_v38 = vmul.f32 1.442695, %v5910_v10 }
0x1100   : > { %v6072_v24 = vadd.f32 %v14182_v34, %v14178_v60  ;;  %v14190_v54 = vpop.eup %8814  ;;  %8826 = vpow2.f32 %v5976_v2  ;;  %v5920_v3 = vsub.f32 %v14048_v0, %v14157_v47  ;;  %v6008_v2 = vmul.f32 1.442695, %v5912_v50 }
0x1101   : > { %v14197_v4 = vpop.eup %8816  ;;  %8828 = vpow2.f32 %v5980_v14  ;;  %v5922_v51 = vsub.f32 %v14052_v40, %v14157_v47  ;;  %v5924_v14 = vsub.f32 %v14056_v5, %v14157_v47  ;;  %v6012_v59 = vmul.f32 1.442695, %v5914_v32 }
0x1102   : > { %v6073_v20 = vadd.f32 %v14190_v54, %v6072_v24  ;;  %v14204_v31 = vpop.eup %8818  ;;  %8830 = vpow2.f32 %v5984_v30  ;;  %v14234_v10 = vmax.f32 %v5877_v26, %v5878_v41  ;;  %v5936_v50 = vsub.f32 %v14086_v35, %v14157_v47 }
0x1103   : > { %v14211_v13 = vpop.eup %8820  ;;  %8832 = vpow2.f32 %v5988_v11  ;;  %v6020_v40 = vmul.f32 1.442695, %v5918_v19  ;;  %v5940_v5 = vsub.f32 %v14110_v1, %v14157_v47  ;;  %v5942_v26 = vsub.f32 %v14131_v17, %v14157_v47  ;;  %v16047_v19 = vld [vmem:[#allocation59_spill] sm:$0xff] }
0x1104   : > { %v6074_v18 = vadd.f32 %v14197_v4, %v6073_v20  ;;  %v14218_v33 = vpop.eup %8822  ;;  %8834 = vpow2.f32 %v5992_v27  ;;  %v6032_v35 = vmul.f32 1.442695, %v5924_v14  ;;  %v5881_v1 = vsub.f32 %v13938_v57, %v14234_v10  ;;  %v16048_v14 = vld [vmem:[#allocation28_spill] sm:$0xff] }
0x1105   : > { %v14225_v20 = vpop.eup %8824  ;;  %8836 = vpow2.f32 %v5996_v28  ;;  %v6028_v28 = vmul.f32 1.442695, %v5922_v51  ;;  %v6056_v43 = vmul.f32 1.442695, %v5936_v50  ;;  %v5938_v17 = vsub.f32 %v14096_v48, %v14157_v47 }
0x1106   : > { %v6075_v21 = vadd.f32 %v14204_v31, %v6074_v18  ;;  %v14231_v30 = vpop.eup %8826  ;;  %8838 = vpow2.f32 %v6000_v46  ;;  %v6016_v18 = vmul.f32 1.442695, %v5916_v25  ;;  %v6068_v57 = vmul.f32 1.442695, %v5942_v26 }
0x1107   : > { %v14236_v11 = vpop.eup %8828  ;;  %8840 = vpow2.f32 %v6004_v38  ;;  %v5883_v38 = vsub.f32 %v16047_v19, %v14234_v10  ;;  %v5946_v48 = vmul.f32 1.442695, %v5881_v1  ;;  %v5889_v1 = vsub.f32 %v13962_v39, %v14234_v10 }
0x1108   : > { %v6076_v24 = vadd.f32 %v14211_v13, %v6075_v21  ;;  %v14240_v27 = vpop.eup %8830  ;;  %8842 = vpow2.f32 %v6008_v2  ;;  %v6024_v21 = vmul.f32 1.442695, %v5920_v3  ;;  %v6064_v2 = vmul.f32 1.442695, %v5940_v5  ;;  %v16049_v5 = vld [vmem:[#allocation90_spill] sm:$0xff] }
0x1109   : > { %v14245_v25 = vpop.eup %8832  ;;  %8844 = vpow2.f32 %v6012_v59  ;;  %v5885_v59 = vsub.f32 %v16048_v14, %v14234_v10  ;;  %v5930_v39 = vsub.f32 %v14068_v12, %v14157_v47 }
0x110a   : > { %v6077_v45 = vadd.f32 %v14218_v33, %v6076_v24  ;;  %v14249_v46 = vpop.eup %8834  ;;  %8846 = vpow2.f32 %v6016_v18 }
0x110b   : > { %v14254_v41 = vpop.eup %8836  ;;  %8848 = vpow2.f32 %v6020_v40 }
0x110c   : > { %v6078_v0 = vadd.f32 %v14225_v20, %v6077_v45  ;;  %v14258_v3 = vpop.eup %8838  ;;  %8850 = vpow2.f32 %v6024_v21  ;;  %v5887_v21 = vsub.f32 %v16049_v5, %v14234_v10 }
0x110d   : > { %v14263_v51 = vpop.eup %8840  ;;  %8852 = vpow2.f32 %v6028_v28  ;;  %v5934_v28 = vsub.f32 %v14076_v55, %v14157_v47 }
0x110e   : > { %v6079_v32 = vadd.f32 %v14231_v30, %v6078_v0  ;;  %v14267_v18 = vpop.eup %8842  ;;  %v5932_v0 = vsub.f32 %v14072_v62, %v14157_v47  ;;  %8854 = vpow2.f32 %v6032_v35 }
0x110f   : > { %v14272_v40 = vpop.eup %8844  ;;  %8856 = vpow2.f32 %v6056_v43  ;;  %v5954_v43 = vmul.f32 1.442695, %v5885_v59  ;;  %v6052_v59 = vmul.f32 1.442695, %v5934_v28  ;;  %v16050_v28 = vld [vmem:[#allocation65_spill] sm:$0xff] }
0x1110   : > { %v6080_v24 = vadd.f32 %v14236_v11, %v6079_v32  ;;  %v5950_v32 = vmul.f32 1.442695, %v5883_v38  ;;  %v14276_v26 = vpop.eup %8846  ;;  %8858 = vpow2.f32 %v6064_v2  ;;  %v5928_v38 = vsub.f32 %v14064_v9, %v14157_v47 }
0x1111   : > { %v14281_v35 = vpop.eup %8848  ;;  %8860 = vpow2.f32 %v6068_v57  ;;  %v5958_v2 = vmul.f32 1.442695, %v5887_v21 }
0x1112   : > { %v6081_v45 = vadd.f32 %v14240_v27, %v6080_v24  ;;  %v6060_v24 = vmul.f32 1.442695, %v5938_v17  ;;  %v14285_v19 = vpop.eup %8850  ;;  %8862 = vpow2.f32 %v5946_v48  ;;  %v5891_v17 = vsub.f32 %v13970_v61, %v14234_v10 }
0x1113   : > { %v14290_v55 = vpop.eup %8852  ;;  %8864 = vpow2.f32 %v5950_v32  ;;  %v5962_v48 = vmul.f32 1.442695, %v5889_v1  ;;  %v5926_v61 = vsub.f32 %v14060_v52, %v14157_v47  ;;  %v6040_v21 = vmul.f32 1.442695, %v5928_v38 }
0x1114   : > { %v6082_v50 = vadd.f32 %v14245_v25, %v6081_v45  ;;  %v6048_v45 = vmul.f32 1.442695, %v5932_v0  ;;  %v14294_v57 = vpop.eup %8854  ;;  %8866 = vpow2.f32 %v6060_v24  ;;  %v5895_v24 = vsub.f32 %v16050_v28, %v14234_v10 }
0x1115   : > { %v14299_v0 = vpop.eup %8856  ;;  %8868 = vpow2.f32 %v5954_v43  ;;  %v6162_v47 = vpack.c.bf16 %v14263_v51, %v14258_v3  ;;  %v5897_v43 = vsub.f32 %v13986_v23, %v14234_v10  ;;  %v5901_v28 = vsub.f32 %v13998_v37, %v14234_v10 }
0x1116   : > { %v6083_v62 = vadd.f32 %v14249_v46, %v6082_v50  ;;  %v5893_v50 = vsub.f32 %v13974_v6, %v14234_v10  ;;  %v14303_v5 = vpop.eup %8858  ;;  %8870 = vpow2.f32 %v6048_v45  ;;  %v6044_v6 = vmul.f32 1.442695, %v5930_v39 }
0x1117   : > { %v14308_v32 = vpop.eup %8860  ;;  %8872 = vpow2.f32 %v5958_v2  ;;  %v6036_v2 = vmul.f32 1.442695, %v5926_v61  ;;  %6186 = vmatpush.bf16.msra.mxu2 %v6162_v47 }
0x1118   : > { %v6084_v14 = vadd.f32 %v14254_v41, %v6083_v62  ;;  %v5966_v62 = vmul.f32 1.442695, %v5891_v17  ;;  %8874 = vpow2.f32 %v6052_v59  ;;  %v5970_v38 = vmul.f32 1.442695, %v5893_v50 }
0x1119   : > { %8876 = vpow2.f32 %v5962_v48  ;;  %v6178_v45 = vpack.c.bf16 %v14308_v32, %v14303_v5 }
0x111a   : > { %v6085_v9 = vadd.f32 %v14258_v3, %v6084_v14  ;;  %v14312_v14 = vpop.eup %8862  ;;  %8878 = vpow2.f32 %v6040_v21  ;;  %v6160_v21 = vpack.c.bf16 %v14254_v41, %v14249_v46  ;;  %v16053_v46 = vld [vmem:[#allocation6_spill] sm:$0xff] }
0x111b   : > { %v14317_v52 = vpop.eup %8864  ;;  %8880 = vpow2.f32 %v5966_v62  ;;  %6199 = vmatpush.bf16.msra.mxu3 %v6178_v45  ;;  %v5903_v41 = vsub.f32 %v16053_v46, %v14234_v10 }
0x111c   : > { %v6086_v12 = vadd.f32 %v14263_v51, %v6085_v9  ;;  %16051 = vst [vmem:[#allocation60_spill] sm:$0xff] %v14317_v52  ;;  %v14323_v17 = vpop.eup %8866  ;;  %v6109_v59 = vadd.f32 %v14317_v52, %v14312_v14  ;;  %v16052_v51 = vld [vmem:[#allocation71_spill] sm:$0xff]  ;;  %v5974_v9 = vmul.f32 1.442695, %v5895_v24  ;;  %8882 = vpow2.f32 %v6044_v6  ;;  %6187 = vmatpush.bf16.msra.mxu2 %v6160_v21 }
0x111d   : > { %v14328_v3 = vpop.eup %8868  ;;  %v5899_v23 = vsub.f32 %v16052_v51, %v14234_v10  ;;  %8884 = vpow2.f32 %v5970_v38  ;;  %v6176_v24 = vpack.c.bf16 %v14323_v17, %v14299_v0  ;;  %v5990_v46 = vmul.f32 1.442695, %v5903_v41 }
0x111e   : > { %v6087_v1 = vadd.f32 %v14267_v18, %v6086_v12  ;;  %v14332_v50 = vpop.eup %8870  ;;  %v6110_v61 = vadd.f32 %v14328_v3, %v6109_v59  ;;  %8886 = vpow2.f32 %v6036_v2  ;;  %v6158_v59 = vpack.c.bf16 %v14245_v25, %v14240_v27 }
0x111f   : > { %v14338_v12 = vpop.eup %8872  ;;  %8888 = vpow2.f32 %v5974_v9  ;;  %v5982_v37 = vmul.f32 1.442695, %v5899_v23  ;;  %6200 = vmatpush.bf16.msra.mxu3 %v6176_v24  ;;  %v5986_v9 = vmul.f32 1.442695, %v5901_v28  ;;  %v5913_v28 = vsub.f32 %v14034_v15, %v14234_v10 }
0x1120   : > { %v6088_v39 = vadd.f32 %v14272_v40, %v6087_v1  ;;  %v5978_v1 = vmul.f32 1.442695, %v5897_v43  ;;  %v14344_v62 = vpop.eup %8874  ;;  %v6111_v47 = vadd.f32 %v14338_v12, %v6110_v61  ;;  %6188 = vmatpush.bf16.msra.mxu2 %v6158_v59  ;;  %v6156_v59 = vpack.c.bf16 %v14236_v11, %v14231_v30  ;;  %v16056_v30 = vld [vmem:[#allocation10_spill] sm:$0xff] }
0x1121   : > { %v14348_v45 = vpop.eup %8876  ;;  %v6174_v23 = vpack.c.bf16 %v14344_v62, %v14332_v50  ;;  %v5919_v15 = vsub.f32 %v14046_v8, %v14234_v10  ;;  %v5941_v52 = vsub.f32 %v14141_v53, %v14234_v10  ;;  %v5943_v11 = vsub.f32 %v14153_v42, %v14234_v10 }
0x1122   : > { %v6089_v48 = vadd.f32 %v14276_v26, %v6088_v39  ;;  %v8879_v43 = vpop.eup %8878  ;;  %v5905_v39 = vsub.f32 %v14010_v7, %v14234_v10  ;;  %v6112_v2 = vadd.f32 %v14348_v45, %v6111_v47  ;;  %8890 = vpow2.f32 %v5978_v1  ;;  %v16055_v1 = vld [vmem:[#allocation16_spill] sm:$0xff] }
0x1123   : > { %v14358_v51 = vpop.eup %8880  ;;  %v5909_v7 = vsub.f32 %v14022_v49, %v14234_v10  ;;  %v5915_v47 = vsub.f32 %v16055_v1, %v14234_v10  ;;  %8892 = vpow2.f32 %v5982_v37  ;;  %6201 = vmatpush.bf16.msra.mxu3 %v6174_v23 }
0x1124   : > { %v6090_v6 = vadd.f32 %v14281_v35, %v6089_v48  ;;  %v16054_v48 = vld [vmem:[#allocation69_spill] sm:$0xff]  ;;  %v8883_v21 = vpop.eup %8882  ;;  %v6113_v27 = vadd.f32 %v14358_v51, %v6112_v2  ;;  %8894 = vpow2.f32 %v5986_v9  ;;  %v5994_v37 = vmul.f32 1.442695, %v5905_v39  ;;  %6189 = vmatpush.bf16.msra.mxu2 %v6156_v59 }
0x1125   : > { %v5907_v61 = vsub.f32 %v16054_v48, %v14234_v10  ;;  %v14370_v25 = vpop.eup %8884  ;;  %v6172_v41 = vpack.c.bf16 %v8883_v21, %v8879_v43  ;;  %8896 = vpow2.f32 %v5990_v46  ;;  %v6002_v8 = vmul.f32 1.442695, %v5909_v7 }
0x1126   : > { %v6091_v38 = vadd.f32 %v14285_v19, %v6090_v6  ;;  %v5911_v6 = vsub.f32 %v14030_v36, %v14234_v10  ;;  %v5917_v36 = vsub.f32 %v14042_v58, %v14234_v10  ;;  %v6114_v2 = vadd.f32 %v14370_v25, %v6113_v27 }
0x1127   : > { %v5998_v1 = vmul.f32 1.442695, %v5907_v61  ;;  %6202 = vmatpush.bf16.msra.mxu3 %v6172_v41  ;;  %v6154_v61 = vpack.c.bf16 %v14225_v20, %v14218_v33  ;;  %v5937_v59 = vsub.f32 %v14100_v63, %v14234_v10  ;;  %8898 = vpow2.f32 %v5994_v37 }
0x1128   : > { %v6092_v24 = vadd.f32 %v14290_v55, %v6091_v38  ;;  %v8887_v38 = vpop.eup %8886  ;;  %v6006_v9 = vmul.f32 1.442695, %v5911_v6  ;;  %v5939_v33 = vsub.f32 %v14121_v56, %v14234_v10  ;;  %v6014_v20 = vmul.f32 1.442695, %v5915_v47 }
0x1129   : > { %v14382_v48 = vpop.eup %8888  ;;  %v6170_v53 = vpack.c.bf16 %v8887_v38, %v14294_v57  ;;  %8900 = vpow2.f32 %v5998_v1  ;;  %6190 = vmatpush.bf16.msra.mxu2 %v6154_v61  ;;  %v6066_v63 = vmul.f32 1.442695, %v5941_v52  ;;  %v5933_v56 = vsub.f32 %v16040_v44, %v14234_v10  ;;  %v16058_v61 = vld [vmem:[#allocation27_spill] sm:$0xff] }
0x112a   : > { %v6093_v49 = vadd.f32 %v14294_v57, %v6092_v24  ;;  %v5921_v24 = vsub.f32 %v14050_v29, %v14234_v10  ;;  %v6115_v58 = vadd.f32 %v14382_v48, %v6114_v2  ;;  %v14389_v27 = vpop.eup %8890  ;;  %8902 = vpow2.f32 %v6002_v8 }
0x112b   : > { %v14398_v2 = vpop.eup %8892  ;;  %6203 = vmatpush.bf16.msra.mxu3 %v6170_v53  ;;  %8904 = vpow2.f32 %v6006_v9  ;;  %v6070_v37 = vmul.f32 1.442695, %v5943_v11  ;;  %v6168_v52 = vpack.c.bf16 %v14290_v55, %v14285_v19  ;;  %v6058_v47 = vmul.f32 1.442695, %v5937_v59  ;;  %v16057_v11 = vld [vmem:[#allocation9_spill] sm:$0xff] }
0x112c   : > { %v6094_v23 = vadd.f32 %v8887_v38, %v6093_v49  ;;  %v6116_v49 = vadd.f32 %v14389_v27, %v6115_v58  ;;  %v14406_v46 = vpop.eup %8894  ;;  %v5925_v38 = vsub.f32 %v14058_v16, %v14234_v10  ;;  %v6062_v1 = vmul.f32 1.442695, %v5939_v33 }
0x112d   : > { %v6150_v55 = vpack.c.bf16 %v14197_v4, %v14190_v54  ;;  %v5929_v8 = vsub.f32 %v16057_v11, %v14234_v10  ;;  %v5931_v59 = vsub.f32 %v16058_v61, %v14234_v10  ;;  %v6026_v54 = vmul.f32 1.442695, %v5921_v24 }
0x112e   : > { %v6095_v39 = vadd.f32 %v8879_v43, %v6094_v23  ;;  %v6010_v43 = vmul.f32 1.442695, %v5913_v28  ;;  %v6117_v6 = vadd.f32 %v14398_v2, %v6116_v49  ;;  %v14414_v28 = vpop.eup %8896  ;;  %v6018_v23 = vmul.f32 1.442695, %v5917_v36 }
0x112f   : > { %6204 = vmatpush.bf16.msra.mxu3 %v6168_v52  ;;  %v6050_v49 = vmul.f32 1.442695, %v5933_v56  ;;  %v6164_v24 = vpack.c.bf16 %v14272_v40, %v14267_v18  ;;  %v6042_v33 = vmul.f32 1.442695, %v5929_v8  ;;  %v16062_v56 = vld [vmem:[#allocation26_spill] sm:$0xff] }
0x1130   : > { %v6096_v7 = vadd.f32 %v8883_v21, %v6095_v39  ;;  %v6118_v57 = vadd.f32 %v14406_v46, %v6117_v6  ;;  %v6152_v21 = vpack.c.bf16 %v14211_v13, %v14204_v31  ;;  %8906 = vpow2.f32 %v6010_v43  ;;  %v14424_v31 = vpop.eup %8898 }
0x1131   : > { %v5935_v13 = vsub.f32 %v14084_v22, %v14234_v10  ;;  %8908 = vpow2.f32 %v6014_v20  ;;  %v8901_v44 = vpop.eup %8900  ;;  %v6022_v39 = vmul.f32 1.442695, %v5919_v15  ;;  %v6166_v22 = vpack.c.bf16 %v14281_v35, %v14276_v26 }
0x1132   : > { %v6097_v42 = vadd.f32 %v14332_v50, %v6096_v7  ;;  %v6119_v41 = vadd.f32 %v14414_v28, %v6118_v57  ;;  %6191 = vmatpush.bf16.msra.mxu2 %v6152_v21  ;;  %8910 = vpow2.f32 %v6066_v63  ;;  %v16059_v7 = vsub.f32 %v16056_v30, %v14234_v10  ;;  %v16061_v30 = vld [vmem:[#allocation11_spill] sm:$0xff] }
0x1133   : > { %8912 = vpow2.f32 %v6070_v37  ;;  %v6054_v4 = vmul.f32 1.442695, %v5935_v13  ;;  %6205 = vmatpush.bf16.msra.mxu3 %v6166_v22  ;;  %v6046_v57 = vmul.f32 1.442695, %v5931_v59  ;;  %v6183_v37 = vrot.slane %v16062_v56, 2 }
0x1134   : > { %v6098_v50 = vadd.f32 %v14344_v62, %v6097_v42  ;;  %v6120_v19 = vadd.f32 %v14424_v31, %v6119_v41  ;;  %v8903_v62 = vpop.eup %8902  ;;  %8914 = vpow2.f32 %v6058_v47  ;;  %v6030_v29 = vmul.f32 1.442695, %v16059_v7 }
0x1135   : > { %v8905_v36 = vpop.eup %8904  ;;  %8916 = vpow2.f32 %v6062_v1  ;;  %v5927_v42 = vsub.f32 %v16061_v30, %v14234_v10  ;;  %v6034_v52 = vmul.f32 1.442695, %v5925_v38 }
0x1136   : > { %v6099_v58 = vadd.f32 %v14299_v0, %v6098_v50  ;;  %v6121_v0 = vadd.f32 %v8901_v44, %v6120_v19  ;;  %6192 = vmatpush.bf16.msra.mxu2 %v6150_v55  ;;  %v14442_v15 = vpop.eup %8906  ;;  %8918 = vpow2.f32 %v6018_v23  ;;  %v6163_v43 = vpack.c.bf16 %v8905_v36, %v8903_v62 }
0x1137   : > { %v14447_v53 = vpop.eup %8908  ;;  %8920 = vpow2.f32 %v6022_v39  ;;  %6206 = vmatpush.bf16.msra.mxu3 %v6164_v24  ;;  %v6161_v50 = vpack.c.bf16 %v8901_v44, %v14424_v31  ;;  %v6038_v23 = vmul.f32 1.442695, %v5927_v42  ;;  %v6159_v31 = vpack.c.bf16 %v14414_v28, %v14406_v46 }
0x1138   : > { %v6100_v9 = vadd.f32 %v14323_v17, %v6099_v58  ;;  %v6122_v35 = vadd.f32 %v8903_v62, %v6121_v0  ;;  %v6148_v17 = vpack.c.bf16 %v14182_v34, %v14178_v60  ;;  %v14454_v6 = vpop.eup %8910  ;;  %8922 = vpow2.f32 %v6050_v49  ;;  %v16060_v34 = vld [vmem:[#allocation63_spill] sm:$0xff] }
0x1139   : > { %v14459_v60 = vpop.eup %8912  ;;  %v6182_v63 = vrot.slane %v16060_v34, 2  ;;  %8924 = vpow2.f32 %v6054_v4  ;;  %v6157_v39 = vpack.c.bf16 %v14398_v2, %v14389_v27  ;;  %v6155_v28 = vpack.c.bf16 %v14382_v48, %v14370_v25  ;;  %v16064_v34 = vld [vmem:[#allocation36_spill] sm:$0xff] }
0x113a   : > { %v6101_v26 = vadd.f32 %v14303_v5, %v6100_v9  ;;  %v6123_v20 = vadd.f32 %v8905_v36, %v6122_v35  ;;  %6193 = vmatpush.bf16.msra.mxu2 %v6148_v17  ;;  %v8915_v18 = vpop.eup %8914  ;;  %8926 = vpow2.f32 %v6026_v54  ;;  %6207 = vmatmul.bf16.vlgmr.msra.gmra.mxu3 %v6183_v37  ;;  %v6153_v54 = vpack.c.bf16 %v14358_v51, %v14348_v45  ;;  %v16063_v17 = vld [vmem:[#allocation60_spill] sm:$0xff] }
0x113b   : > { %v8917_v21 = vpop.eup %8916  ;;  %8928 = vpow2.f32 %v6030_v29  ;;  %v6149_v7 = vpack.c.bf16 %v16063_v17, %v14312_v14  ;;  %v6165_v51 = vpack.c.bf16 %v14447_v53, %v14442_v15 }
0x113c   : > { %v14457_v5 = vadd.f32 %v14308_v32, %v6101_v26  ;;  %v6124_v40 = vadd.f32 %v14442_v15, %v6123_v20  ;;  %v6179_v32 = vpack.c.bf16 %v14459_v60, %v14454_v6  ;;  %v8919_v47 = vpop.eup %8918  ;;  %8930 = vpow2.f32 %v6042_v33 }
0x113d   : > { %6194 = vmatmul.bf16.vlgmr.msra.gmra.mxu2 %v6182_v63  ;;  %v8921_v13 = vpop.eup %8920  ;;  %8932 = vpow2.f32 %v6046_v57  ;;  %v6177_v10 = vpack.c.bf16 %v8917_v21, %v8915_v18  ;;  %v6151_v26 = vpack.c.bf16 %v14338_v12, %v14328_v3 }
0x113e   : > { %6212 = vmatpush.bf16.msrb.mxu2 %v6163_v43  ;;  %v6125_v41 = vadd.f32 %v14447_v53, %v6124_v40  ;;  %6225 = vmatpush.bf16.msrb.mxu3 %v6179_v32  ;;  %v8923_v1 = vpop.eup %8922  ;;  %8934 = vpow2.f32 %v6034_v52  ;;  %v6167_v48 = vpack.c.bf16 %v8921_v13, %v8919_v47  ;;  %v6103_v3 = vrot.slane %v14457_v5, 4 }
0x113f   : > { %v8925_v38 = vpop.eup %8924  ;;  %8936 = vpow2.f32 %v6038_v23 }
0x1140   : > { %v6126_v16 = vadd.f32 %v8919_v47, %v6125_v41  ;;  %v8927_v44 = vpop.eup %8926  ;;  %v6175_v11 = vpack.c.bf16 %v8925_v38, %v8923_v1  ;;  %v6104_v14 = vadd.f32 %v6103_v3, %v14457_v5  ;;  %v14502_v41 = vld [vmem:[#allocation3] sm:$0xff] }
0x1141   : > { %v8929_v19 = vpop.eup %8928 }
0x1142   : > { %6213 = vmatpush.bf16.msrb.mxu2 %v6161_v50  ;;  %v6127_v58 = vadd.f32 %v8921_v13, %v6126_v16  ;;  %6226 = vmatpush.bf16.msrb.mxu3 %v6177_v10  ;;  %v8931_v55 = vpop.eup %8930  ;;  %v6169_v2 = vpack.c.bf16 %v8929_v19, %v8927_v44  ;;  %v6105_v12 = vrot.slane %v6104_v14, 2  ;;  %v14504_v13 = vld [vmem:[#allocation3 + $0x8] sm:$0xff] }
0x1143   : > { %v8933_v8 = vpop.eup %8932  ;;  %v7686_v23 = vpack.i.bf16 %v14504_v13, %v14502_v41 }
0x1144   : > { %v6128_v62 = vadd.f32 %v8927_v44, %v6127_v58  ;;  %v8935_v36 = vpop.eup %8934  ;;  %v6173_v49 = vpack.c.bf16 %v8933_v8, %v8931_v55  ;;  %v6106_v43 = vadd.f32 %v6105_v12, %v6104_v14  ;;  %v14509_v44 = vld [vmem:[#allocation3 + $0x38] sm:$0xff]  ;;  %v14511_v58 = vld [vmem:[#allocation3 + $0x30] sm:$0xff] }
0x1145   : > { %v8937_v46 = vpop.eup %8936 }
0x1146   : > { %6214 = vmatpush.bf16.msrb.mxu2 %v6159_v31  ;;  %v6129_v22 = vadd.f32 %v8929_v19, %v6128_v62  ;;  %6227 = vmatpush.bf16.msrb.mxu3 %v6175_v11  ;;  %v6171_v59 = vpack.c.bf16 %v8937_v46, %v8935_v36  ;;  %v6107_v33 = vrot.slane %v6106_v43, 1  ;;  %v7701_v19 = vpack.i.bf16 %v14509_v44, %v14511_v58 }
0x1148   : > { %v6130_v9 = vadd.f32 %v8935_v36, %v6129_v22 }
0x114a   : > { %6215 = vmatpush.bf16.msrb.mxu2 %v6157_v39  ;;  %v6131_v0 = vadd.f32 %v8937_v46, %v6130_v9  ;;  %6228 = vmatpush.bf16.msrb.mxu3 %v6173_v49  ;;  %v16066_v39 = vld [vmem:[#allocation47_spill] sm:$0xff]  ;;  %v14521_v49 = vld [vmem:[#allocation3 + $0x18] sm:$0xff] }
0x114b   : > { %v8958_v9 = vld [vmem:[#allocation3 + $0x10] sm:$0xff] }
0x114c   : > { %v6132_v61 = vadd.f32 %v8931_v55, %v6131_v0  ;;  %v7731_v46 = vpack.i.bf16 %v14521_v49, %v8958_v9 }
0x114e   : > { %6216 = vmatpush.bf16.msrb.mxu2 %v6155_v28  ;;  %v6133_v4 = vadd.f32 %v8933_v8, %v6132_v61  ;;  %6229 = vmatpush.bf16.msrb.mxu3 %v6171_v59  ;;  %v6335_v28 = vld [vmem:[#allocation3 + $0x40] sm:$0xff]  ;;  %v14533_v61 = vpop.permute.xlu0 %7652 }
0x114f   : > { %v7741_v0 = vpack.i.bf16 %v6335_v28, %v14509_v44 }
0x1150   : > { %v6134_v27 = vadd.f32 %v8923_v1, %v6133_v4 }
0x1152   : > { %6217 = vmatpush.bf16.msrb.mxu2 %v6153_v54  ;;  %v6135_v35 = vadd.f32 %v8925_v38, %v6134_v27  ;;  %6230 = vmatpush.bf16.msrb.mxu3 %v6169_v2  ;;  %v7036_v54 = vld [vmem:[%s15124_s6] sm:$0xff]  ;;  %v7039_v27 = vld [vmem:[%s15124_s6 + $0x18] sm:$0xff] }
0x1154   : > { %v6136_v25 = vadd.f32 %v8915_v18, %v6135_v35 }
0x1156   : > { %6218 = vmatpush.bf16.msrb.mxu2 %v6151_v26  ;;  %v6137_v29 = vadd.f32 %v8917_v21, %v6136_v25  ;;  %6231 = vmatpush.bf16.msrb.mxu3 %v6167_v48  ;;  %v16065_v21 = vld [vmem:[#allocation34_spill] sm:$0xff]  ;;  %v14536_v59 = vpop.permute.xlu0 %7677  ;;  %v14549_v25 = vpop.permute.xlu1 %7692  ;;  %v6339_v48 = vlaneseq }
0x1158   : > { %v6138_v45 = vadd.f32 %v14454_v6, %v6137_v29  ;;  %v6108_v6 = vadd.f32 %v6107_v33, %v6106_v43  ;;  %v14552_v17 = vand.u32 127, %v6339_v48  ;;  %v7695_v48 = vunpack.i.h.bf16 %v14549_v25 }
0x115a   : > { %6219 = vmatpush.bf16.msrb.mxu2 %v6149_v7  ;;  %v6139_v24 = vadd.f32 %v14459_v60, %v6138_v45  ;;  %6232 = vmatpush.bf16.msrb.mxu3 %v6165_v51  ;;  %8938 = vrcp.f32 %v6108_v6  ;;  %v14557_v29 = vadd.s32 128, %v14552_v17  ;;  %v6346_v45 = vand.u32 15, %v14552_v17 }
0x115c   : > { %v6140_v30 = vrot.slane %v6139_v24, 4  ;;  %v6353_v51 = vand.u32 15, %v14557_v29  ;;  %vm14564_vm7 = vcmp.ge.s32.totalorder %v6346_v45, 1 }
0x115d   : > { %6220 = vmatmul.bf16.vlgmr.msrb.gmra.mxu2 %v6182_v63  ;;  %6233 = vmatmul.bf16.vlgmr.msrb.gmra.mxu3 %v6183_v37  ;;  %v6396_v17 = vsel %vm14564_vm7, %v14511_v58, 0.0 }
0x115e   : > { %v6141_v57 = vadd.f32 %v6140_v30, %v6139_v24  ;;  %v14542_v4 = vpop.permute.xlu0 %7682  ;;  %v14554_v7 = vpop.permute.xlu1 %7717  ;;  %vm14570_vm8 = vcmp.ge.s32.totalorder %v6353_v51, 1 }
0x115f   : > { %v6397_v58 = vsel %vm14570_vm8, %v14509_v44, 0.0 }
0x1160   : > { %v8939_v60 = vpop.eup %8938  ;;  %v6142_v5 = vrot.slane %v6141_v57, 2 }
0x1162   : > { %v6143_v37 = vadd.f32 %v6142_v5, %v6141_v57  ;;  %v16071_v5 = vld [vmem:[#allocation51_spill] sm:$0xff] }
0x1164   : > { %v6144_v50 = vrot.slane %v6143_v37, 1 }
0x1166   : > { %v6145_v47 = vadd.f32 %v6144_v50, %v6143_v37  ;;  %v7665_v37 = vunpack.i.h.bf16 %v16071_v5  ;;  %v7655_v50 = vunpack.i.h.bf16 %v14533_v61 }
0x1168   : > { %8940 = vrcp.f32 %v6145_v47  ;;  %v7654_v47 = vunpack.i.l.bf16 %v14533_v61 }
0x116e   : > { %v8941_v38 = vpop.eup %8940 }
0x11bd   : > { %v6208_v15 = vpop.f32.mrf.mxu3 }
0x11c0   : > { %v6195_v20 = vpop.f32.mrf.mxu2 }
0x11c1   : > { %v6209_v53 = vadd.f32 %v6208_v15, %v6195_v20  ;;  %v8960_v15 = vld [vmem:[#allocation3 + $0x28] sm:$0xff] }
0x11c3   : > { %v6238_v42 = vmul.f32 %v8939_v60, %v6209_v53 }
0x11c5   : > { %v6240_v63 = vmul.f32 %v6238_v42, %v16064_v34  ;;  %v6210_v32 = vpop.f32.mrf.mxu3 }
0x11c7   : > { %v6244_v40 = vrot.slane %v6240_v63, 4  ;;  %v14601_v63 = vpop.permute.xlu2 %7697 }
0x11c8   : > { %v6197_v18 = vpop.f32.mrf.mxu2  ;;  %v7700_v29 = vunpack.i.h.bf16 %v14601_v63 }
0x11c9   : > { %v6248_v56 = vadd.f32 %v6244_v40, %v16065_v21  ;;  %v14605_v18 = vld [vmem:[#allocation3 + $0x20] sm:$0xff] }
0x11ca   : > { %v7851_v40 = vpack.i.bf16 %v8960_v15, %v14605_v18 }
0x11cb   : > { %6250 = vst [vmem:[#allocation2 + $0x28] sm:$0xf0] %v6248_v56 }
0x11cf   : > { %v7723_v32 = vpop.permute.xlu2 %7722 }
0x11d2   : > { %v6271_v52 = vld [vmem:[#allocation2 + $0x28] sm:$0xff] }
0x11d3   : > { %6293 = vrot.lane.b32.xlu0 %v6271_v52, %s8978_s17  ;;  %v7664_v52 = vunpack.i.l.bf16 %v16071_v5  ;;  %v7680_v5 = vunpack.i.h.bf16 %v14536_v59 }
0x11db   : > { %7687 = vrot.lane.b32.xlu0 %v7686_v23, %s8981_s29 }
0x11e0   : > { %v6221_v1 = vpop.f32.mrf.mxu2  ;;  %v6234_v16 = vpop.f32.mrf.mxu3 }
0x11e1   : > { %v6235_v10 = vadd.f32 %v6234_v16, %v6221_v1 }
0x11e3   : > { %v6239_v31 = vmul.f32 %v8941_v38, %v6235_v10  ;;  %7702 = vrot.lane.b32.xlu0 %v7701_v19, %s8982_s8  ;;  %v14620_v10 = vpop.permute.xlu2 %7737  ;;  %v6556_v38 = vsel %vm6554_vm9, %v7655_v50, %v7664_v52 }
0x11e5   : > { %v6241_v55 = vmul.f32 %v6239_v31, %v16064_v34  ;;  %v7037_v34 = vld [vmem:[%s15124_s6 + $0x8] sm:$0xff] }
0x11e7   : > { %v6245_v11 = vrot.slane %v6241_v55, 4  ;;  %v6555_v55 = vsel %vm6554_vm9, %v7654_v47, %v7655_v50 }
0x11e8   : > { %v6223_v62 = vpop.f32.mrf.mxu2  ;;  %v6236_v8 = vpop.f32.mrf.mxu3 }
0x11e9   : > { %v6249_v22 = vadd.f32 %v6245_v11, %v16066_v39  ;;  %v6572_v11 = vsel %vm14570_vm8, %v6556_v38, 0.0 }
0x11eb   : > { %6251 = vst [vmem:[#allocation2 + $0x38] sm:$0xf0] %v6249_v22  ;;  %7707 = vrot.lane.b32.xlu0 %v7701_v19, %s8983_s9  ;;  %v7038_v22 = vld [vmem:[%s15124_s6 + $0x10] sm:$0xff] }
0x11f2   : > { %v6272_v36 = vld [vmem:[#allocation2 + $0x38] sm:$0xff] }
0x11f3   : > { %6295 = vrot.lane.b32.xlu1 %v6272_v36, %s8978_s17  ;;  %7712 = vrot.lane.b32.xlu0 %v7686_v23, %s8982_s8  ;;  %v6571_v36 = vsel %vm14564_vm7, %v6555_v55, 0.0 }
0x11fb   : > { %7732 = vrot.lane.b32.xlu1 %v7731_v46, %s8983_s9  ;;  %7727 = vrot.lane.b32.xlu0 %v7686_v23, %s8983_s9 }
0x1203   : > { %7757 = vrot.lane.b32.xlu1 %v7731_v46, %s8984_s10  ;;  %7742 = vrot.lane.b32.xlu0 %v7741_v0, %s8980_s18  ;;  %v14646_v0 = vpop.permute.xlu2 %7762 }
0x120b   : > { %7747 = vrot.lane.b32.xlu0 %v7701_v19, %s8984_s10 }
0x1213   : > { %7752 = vrot.lane.b32.xlu0 %v7686_v23, %s8984_s10 }
0x121b   : > { %7767 = vrot.lane.b32.xlu0 %v7701_v19, %s8985_s30 }
0x1223   : > { %7832 = vrot.lane.b32.xlu0 %v7686_v23, %s8985_s30 }
0x122b   : > { %7857 = vrot.lane.b32.xlu0 %v7701_v19, %s8986_s16 }
0x1233   : > { %7867 = vrot.lane.b32.xlu0 %v7686_v23, %s8986_s16  ;;  %v16072_v23 = vld [vmem:[#allocation23_spill] sm:$0xff] }
0x1234   : > { %v7670_v1 = vunpack.i.h.bf16 %v16072_v23  ;;  %v7669_v16 = vunpack.i.l.bf16 %v16072_v23  ;;  %v7739_v23 = vunpack.i.l.bf16 %v14620_v10 }
0x1236   : > { %v6557_v31 = vsel %vm6554_vm9, %v7665_v37, %v7669_v16  ;;  %v6558_v62 = vsel %vm6554_vm9, %v7669_v16, %v7670_v1  ;;  %v7679_v37 = vunpack.i.l.bf16 %v14536_v59  ;;  %v16074_v16 = vld [vmem:[#allocation7_spill] sm:$0xff] }
0x1237   : > { %v6573_v8 = vsel %vm14564_vm7, %v6557_v31, 0.0  ;;  %v6574_v9 = vsel %vm14570_vm8, %v6558_v62, 0.0  ;;  %v16075_v38 = vunpack.i.l.bf16 %v16074_v16  ;;  %v16076_v62 = vld [vmem:[#allocation56_spill] sm:$0xff] }
0x1238   : > { %v6559_v55 = vsel %vm6554_vm9, %v7679_v37, %v7680_v5 }
0x123b   : > { %7042 = vperm.xlu0 %7643, %v7036_v54  }
0x1243   : > { %7057 = vperm.xlu0 %7643, %v7039_v27  }
0x1245   : > { %v6294_v2 = vpop.permute.xlu0 %6293 }
0x1246   : > { %6324 = vst.msk [vmem:[#allocation3 + $0x48] sm:$0xff] %vm6314_vm3, %v6294_v2 }
0x124d   : > { %v6336_v26 = vld [vmem:[#allocation3 + $0x48] sm:$0xff]  ;;  %v14595_v42 = vpop.permute.xlu0 %7687 }
0x124e   : > { %v7771_v35 = vpack.i.bf16 %v6336_v26, %v6335_v28  ;;  %v6398_v43 = vsel %vm14564_vm7, %v6336_v26, 0.0  ;;  %v14644_v28 = vpack.c.bf16 %v6574_v9, %v6573_v8  ;;  %v14705_v8 = vpack.c.bf16 %v6397_v58, %v6396_v17 }
0x1250   : > { %7772 = vrot.lane.b32.xlu1 %v7771_v35, %s8973_s14  ;;  %v6914_v27 = vunpack.c.l.b16 %v14644_v28 }
0x1255   : > { %v14603_v57 = vpop.permute.xlu0 %7702 }
0x1258   : > { %7777 = vrot.lane.b32.xlu1 %v7771_v35, %s8981_s29 }
0x125d   : > { %v14609_v21 = vpop.permute.xlu0 %7707 }
0x1260   : > { %7782 = vrot.lane.b32.xlu1 %v7771_v35, %s8982_s8 }
0x1265   : > { %v6296_v24 = vpop.permute.xlu1 %6295  ;;  %v14625_v19 = vpop.permute.xlu0 %7712 }
0x1266   : > { %v6301_v12 = vsel %vm6297_vm5, %v6294_v2, %v6296_v24  ;;  %6326 = vst.msk [vmem:[#allocation3 + $0x58] sm:$0xff] %vm6297_vm5, %v6296_v24 }
0x1267   : > { %v6399_v33 = vsel %vm14570_vm8, %v6301_v12, 0.0  ;;  %v7821_v30 = vpack.i.bf16 %v6301_v12, %v6336_v26  ;;  %v6393_v26 = vsel %vm14570_vm8, %v14504_v13, 0.0 }
0x1268   : > { %v14580_v6 = vpack.c.bf16 %v6399_v33, %v6398_v43  ;;  %7787 = vrot.lane.b32.xlu1 %v7771_v35, %s8983_s9 }
0x126d   : > { %v6338_v20 = vld [vmem:[#allocation3 + $0x58] sm:$0xff]  ;;  %v14612_v56 = vpop.permute.xlu1 %7732  ;;  %v14648_v61 = vpop.permute.xlu0 %7727 }
0x126e   : > { %v7796_v53 = vpack.i.bf16 %v8960_v15, %v6338_v20  ;;  %v7801_v60 = vpack.i.bf16 %v6338_v20, %v6301_v12  ;;  %v16073_v12 = vld [vmem:[#allocation12_spill] sm:$0xff]  ;;  %v7694_v20 = vunpack.i.l.bf16 %v14549_v25  ;;  %v14668_v15 = vadd.s32 2, %v6346_v45 }
0x126f   : > { %v6872_v43 = vunpack.c.l.b16 %v16073_v12  ;;  %v6873_v33 = vunpack.c.h.b16 %v16073_v12  ;;  %v7699_v45 = vunpack.i.l.bf16 %v14601_v63  ;;  %v7740_v63 = vunpack.i.h.bf16 %v14620_v10 }
0x1270   : > { %7797 = vrot.lane.b32.xlu2 %v7796_v53, %s8980_s18  ;;  %7792 = vrot.lane.b32.xlu1 %v7771_v35, %s8984_s10  ;;  %v14672_v53 = vadd.s32 2, %v6353_v51  ;;  %vm6384_vm12 = vcmp.le.s32.totalorder %v14668_v15, 16  ;;  %v7590_v15 = vld [vmem:[%s15123_s5 + $0x24] sm:$0xf0] }
0x1271   : > { %v6769_v44 = vsel %vm6766_vm11, %v7695_v48, %v7699_v45  ;;  %v6575_v48 = vsel %vm14564_vm7, %v6559_v55, 0.0 }
0x1272   : > { %vm6385_vm13 = vcmp.le.s32.totalorder %v14672_v53, 16 }
0x1275   : > { %v14633_v39 = vpop.permute.xlu1 %7757  ;;  %v14698_v1 = vpop.permute.xlu0 %7742 }
0x1276   : > { %v7744_v10 = vunpack.i.l.bf16 %v14698_v1 }
0x1278   : > { %7802 = vrot.lane.b32.xlu2 %v7801_v60, %s8973_s14  ;;  %7822 = vrot.lane.b32.xlu1 %v7821_v30, %s8980_s18  ;;  %v7720_v30 = vunpack.i.h.bf16 %v14554_v7 }
0x1280   : > { %7807 = vrot.lane.b32.xlu2 %v7801_v60, %s8981_s29  ;;  %7827 = vrot.lane.b32.xlu1 %v7771_v35, %s8985_s30 }
0x1288   : > { %7812 = vrot.lane.b32.xlu2 %v7801_v60, %s8982_s8  ;;  %7837 = vrot.lane.b32.xlu1 %v7731_v46, %s8985_s30 }
0x1290   : > { %7817 = vrot.lane.b32.xlu2 %v7801_v60, %s8983_s9  ;;  %7862 = vrot.lane.b32.xlu1 %v7771_v35, %s8986_s16  ;;  %v6394_v35 = vsel %vm14564_vm7, %v14521_v49, 0.0  ;;  %s15105_s9 = scalar_lea.vmem %s15125_s7, %s7604_s4 }
0x1298   : > { %7842 = vrot.lane.b32.xlu2 %v7801_v60, %s8984_s10  ;;  %7872 = vrot.lane.b32.xlu1 %v7731_v46, %s8986_s16  ;;  %v14642_v46 = vpack.c.bf16 %v6572_v11, %v6571_v36 }
0x129a   : > { %v6912_v54 = vunpack.c.l.b16 %v14642_v46 }
0x129c   : > { %v14661_v24 = vpack.c.b16 %v6914_v27, %v6912_v54 }
0x12a0   : > { %7847 = vrot.lane.b32.xlu2 %v7801_v60, %s8985_s30  ;;  %7047 = vperm.xlu1 %7644, %v7037_v34   ;;  %v7719_v34 = vunpack.i.l.bf16 %v14554_v7 }
0x12a8   : > { %7852 = vrot.lane.b32.xlu2 %v7851_v40, %s8985_s30 }
0x12b0   : > { %7877 = vrot.lane.b32.xlu2 %v7801_v60, %s8986_s16  ;;  %v7724_v60 = vunpack.i.l.bf16 %v7723_v32 }
0x12b2   : > { %v6504_v59 = vsel %vm6501_vm10, %v7720_v30, %v7724_v60  ;;  %v7765_v30 = vunpack.i.h.bf16 %v14646_v0 }
0x12b3   : > { %v6520_v9 = vsel %vm6384_vm12, %v6504_v59, 0.0 }
0x12b8   : > { %7882 = vrot.lane.b32.xlu2 %v7851_v40, %s8986_s16  ;;  %v7725_v40 = vunpack.i.h.bf16 %v7723_v32 }
0x12ba   : > { %v6505_v47 = vsel %vm6501_vm10, %v7724_v60, %v7725_v40  ;;  %v14717_v60 = vsel %vm6713_vm14, %v7739_v23, %v7740_v63  ;;  %v7764_v40 = vunpack.i.l.bf16 %v14646_v0  ;;  %v7684_v63 = vunpack.i.l.bf16 %v14542_v4 }
0x12bb   : > { %v6521_v54 = vsel %vm6385_vm13, %v6505_v47, 0.0  ;;  %v7685_v47 = vunpack.i.h.bf16 %v14542_v4 }
0x12bc   : > { %v14770_v25 = vpack.c.bf16 %v6521_v54, %v6520_v9 }
0x12c0   : > { %7052 = vperm.xlu2 %7645, %v7038_v22   ;;  %v6770_v22 = vsel %vm6766_vm11, %v7699_v45, %v7700_v29 }
0x12c2   : > { %v14652_v2 = vpop.permute.xlu1 %7772 }
0x12c3   : > { %v7774_v51 = vunpack.i.l.bf16 %v14652_v2 }
0x12c5   : > { %v6560_v36 = vsel %vm6554_vm9, %v7680_v5, %v7774_v51  ;;  %v7690_v5 = vunpack.i.h.bf16 %v14595_v42  ;;  %v7689_v51 = vunpack.i.l.bf16 %v14595_v42 }
0x12c6   : > { %v6576_v37 = vsel %vm14570_vm8, %v6560_v36, 0.0  ;;  %v6733_v36 = vsel %vm14570_vm8, %v14717_v60, 0.0 }
0x12ca   : > { %v14678_v52 = vpop.permute.xlu2 %7797  ;;  %v14690_v32 = vpop.permute.xlu1 %7777 }
0x12cb   : > { %v7800_v50 = vunpack.i.h.bf16 %v14678_v52  ;;  %v7780_v7 = vunpack.i.h.bf16 %v14690_v32 }
0x12cd   : > { %v6448_v31 = vsel %vm6444_vm6, %v16075_v38, %v7800_v50  ;;  %v7775_v50 = vunpack.i.h.bf16 %v14652_v2  ;;  %v7715_v38 = vunpack.i.h.bf16 %v14625_v19 }
0x12ce   : > { %v6470_v11 = vpack.c.bf16 %v6448_v31, %v16076_v62  ;;  %v7714_v31 = vunpack.i.l.bf16 %v14625_v19  ;;  %v7675_v62 = vunpack.i.h.bf16 %v16074_v16  ;;  %v7759_v16 = vunpack.i.l.bf16 %v14633_v39 }
0x12d0   : > { %v6874_v27 = vunpack.c.l.b16 %v6470_v11  ;;  %v6875_v12 = vunpack.c.h.b16 %v6470_v11  ;;  %v14744_v11 = vpack.c.bf16 %v6770_v22, %v6769_v44  ;;  %v14764_v22 = vsel %vm6660_vm15, %v7764_v40, %v7765_v30 }
0x12d1   : > { %v7705_v30 = vunpack.i.h.bf16 %v14603_v57 }
0x12d2   : > { %v7803_v17 = vpop.permute.xlu2 %7802  ;;  %v14726_v29 = vpack.c.b16 %v6874_v27, %v6872_v43  ;;  %v14728_v45 = vpack.c.b16 %v6875_v12, %v6873_v33  ;;  %v14736_v55 = vpop.permute.xlu1 %7782  ;;  %v14738_v43 = vpack.c.bf16 %v6576_v37, %v6575_v48  ;;  %v7779_v33 = vunpack.i.l.bf16 %v14690_v32 }
0x12d3   : > { %v7805_v59 = vunpack.i.h.bf16 %v7803_v17  ;;  %v7804_v58 = vunpack.i.l.bf16 %v7803_v17  ;;  %v6768_v27 = vsel %vm6766_vm11, %v7690_v5, %v7694_v20  ;;  %v6767_v12 = vsel %vm6766_vm11, %v7689_v51, %v7690_v5  ;;  %v14757_v48 = vpop.permute.xlu0 %7747 }
0x12d4   : > { %v6771_v37 = vsel %vm6766_vm11, %v7684_v63, %v7685_v47  ;;  %v6503_v17 = vsel %vm6501_vm10, %v7715_v38, %v7719_v34  ;;  %v6502_v20 = vsel %vm6501_vm10, %v7714_v31, %v7715_v38  ;;  %v6772_v5 = vsel %vm6766_vm11, %v7685_v47, %v7779_v33 }
0x12d5   : > { %v6561_v42 = vsel %vm6554_vm9, %v7775_v50, %v7804_v58  ;;  %v6562_v2 = vsel %vm6554_vm9, %v7804_v58, %v7805_v59  ;;  %v6916_v51 = vunpack.c.l.b16 %v14738_v43  ;;  %v14776_v59 = vpack.c.bf16 %v6768_v27, %v6767_v12 }
0x12d6   : > { %v6577_v4 = vsel %vm14564_vm7, %v6561_v42, 0.0  ;;  %v6578_v19 = vsel %vm14570_vm8, %v6562_v2, 0.0  ;;  %v7704_v58 = vunpack.i.l.bf16 %v14603_v57  ;;  %v7784_v34 = vunpack.i.l.bf16 %v14736_v55 }
0x12d7   : > { %v14759_v44 = vpack.c.bf16 %v6578_v19, %v6577_v4  ;;  %v6519_v47 = vsel %vm6385_vm13, %v6503_v17, 0.0  ;;  %v6518_v31 = vsel %vm6384_vm12, %v6502_v20, 0.0  ;;  %v7735_v33 = vunpack.i.h.bf16 %v14612_v56 }
0x12d8   : > { %v14787_v42 = vpack.c.bf16 %v6772_v5, %v6771_v37  ;;  %v7730_v57 = vunpack.i.h.bf16 %v14648_v61  ;;  %v7729_v32 = vunpack.i.l.bf16 %v14648_v61  ;;  %v6506_v27 = vsel %vm6501_vm10, %v7704_v58, %v7705_v30 }
0x12d9   : > { %v6918_v50 = vunpack.c.l.b16 %v14759_v44  ;;  %v6994_v17 = vunpack.c.l.b16 %v14744_v11  ;;  %v6894_v37 = vunpack.c.l.b16 %v14770_v25  ;;  %v7710_v20 = vunpack.i.h.bf16 %v14609_v21 }
0x12da   : > { %v7808_v63 = vpop.permute.xlu2 %7807  ;;  %v14789_v2 = vpop.permute.xlu1 %7787  ;;  %v7734_v5 = vunpack.i.l.bf16 %v14612_v56  ;;  %v6992_v61 = vunpack.c.l.b16 %v14776_v59 }
0x12db   : > { %v7810_v9 = vunpack.i.h.bf16 %v7808_v63  ;;  %v7809_v54 = vunpack.i.l.bf16 %v7808_v63  ;;  %v6922_v38 = vpack.c.b16 %v6918_v50, %v6916_v51  ;;  %v6507_v51 = vsel %vm6501_vm10, %v7705_v30, %v7784_v34  ;;  %v7753_v34 = vpop.permute.xlu0 %7752 }
0x12dc   : > { %v7709_v50 = vunpack.i.l.bf16 %v14609_v21  ;;  %v14807_v63 = vpack.c.bf16 %v6519_v47, %v6518_v31  ;;  %v6715_v56 = vsel %vm6713_vm14, %v7730_v57, %v7734_v5  ;;  %v6714_v30 = vsel %vm6713_vm14, %v7729_v32, %v7730_v57 }
0x12dd   : > { %v6773_v4 = vsel %vm6766_vm11, %v7780_v7, %v7809_v54  ;;  %v6774_v19 = vsel %vm6766_vm11, %v7809_v54, %v7810_v9  ;;  %7096 = vmatpush.bf16.msra.mxu2 %v6922_v38  ;;  %v6996_v7 = vunpack.c.l.b16 %v14787_v42  ;;  %v6522_v9 = vsel %vm6384_vm12, %v6506_v27, 0.0 }
0x12de   : > { %v14796_v12 = vpack.c.bf16 %v6774_v19, %v6773_v4  ;;  %v6716_v54 = vsel %vm6713_vm14, %v7735_v33, %v7739_v23  ;;  %v7745_v21 = vunpack.i.h.bf16 %v14698_v1  ;;  %v6523_v38 = vsel %vm6385_vm13, %v6507_v51, 0.0 }
0x12df   : > { %v7789_v47 = vunpack.i.l.bf16 %v14789_v2  ;;  %v7785_v23 = vunpack.i.h.bf16 %v14736_v55  ;;  %v6718_v57 = vsel %vm6713_vm14, %v7709_v50, %v7710_v20  ;;  %v6731_v32 = vsel %vm14570_vm8, %v6715_v56, 0.0 }
0x12e0   : > { %v6998_v58 = vunpack.c.l.b16 %v14796_v12  ;;  %v6892_v5 = vunpack.c.l.b16 %v14807_v63  ;;  %v6730_v1 = vsel %vm14564_vm7, %v6714_v30, 0.0  ;;  %v7000_v56 = vpack.c.b16 %v6994_v17, %v6992_v61 }
0x12e1   : > { %7097 = vmatpush.bf16.msra.mxu2 %v14661_v24  ;;  %v6732_v24 = vsel %vm14564_vm7, %v6716_v54, 0.0  ;;  %v6719_v50 = vsel %vm6713_vm14, %v7710_v20, %v7789_v47  ;;  %v6449_v30 = vsel %vm6444_vm6, %v7675_v62, %v7744_v10  ;;  %v7760_v20 = vunpack.i.h.bf16 %v14633_v39 }
0x12e2   : > { %v7813_v31 = vpop.permute.xlu2 %7812  ;;  %v7002_v4 = vpack.c.b16 %v6998_v58, %v6996_v7  ;;  %v14828_v27 = vpop.permute.xlu1 %7792  ;;  %v14835_v7 = vpack.c.bf16 %v6523_v38, %v6522_v9  ;;  %v6900_v38 = vpack.c.b16 %v6894_v37, %v6892_v5  ;;  %v14851_v47 = vpack.c.bf16 %v6731_v32, %v6730_v1 }
0x12e3   : > { %v7815_v33 = vunpack.i.h.bf16 %v7813_v31  ;;  %v7814_v19 = vunpack.i.l.bf16 %v7813_v31  ;;  %v6734_v31 = vsel %vm14564_vm7, %v6718_v57, 0.0  ;;  %v14857_v17 = vpack.c.bf16 %v6733_v36, %v6732_v24  ;;  %v14867_v57 = vpop.permute.xlu0 %7767 }
0x12e4   : > { %7115 = vmatpush.bf16.msra.mxu3 %v7002_v4  ;;  %v6450_v4 = vsel %vm6444_vm6, %v7744_v10, %v7745_v21  ;;  %v6735_v62 = vsel %vm14570_vm8, %v6719_v50, 0.0  ;;  %v6896_v61 = vunpack.c.l.b16 %v14835_v7  ;;  %v7755_v37 = vunpack.i.h.bf16 %v7753_v34 }
0x12e5   : > { %v6508_v55 = vsel %vm6501_vm10, %v7785_v23, %v7814_v19  ;;  %v6509_v51 = vsel %vm6501_vm10, %v7814_v19, %v7815_v33  ;;  %v14864_v10 = vpack.c.bf16 %v6450_v4, %v6449_v30  ;;  %v7754_v23 = vunpack.i.l.bf16 %v7753_v34 }
0x12e6   : > { %v6524_v58 = vsel %vm6384_vm12, %v6508_v55, 0.0  ;;  %v6525_v54 = vsel %vm6385_vm13, %v6509_v51, 0.0  ;;  %v7790_v33 = vunpack.i.h.bf16 %v14789_v2  ;;  %v7794_v60 = vunpack.i.l.bf16 %v14828_v27 }
0x12e7   : > { %v14848_v9 = vpack.c.bf16 %v6525_v54, %v6524_v58  ;;  %v7750_v32 = vunpack.i.h.bf16 %v14757_v48  ;;  %v7749_v5 = vunpack.i.l.bf16 %v14757_v48  ;;  %v7799_v1 = vunpack.i.l.bf16 %v14678_v52 }
0x12e8   : > { %7116 = vmatpush.bf16.msra.mxu3 %v7000_v56  ;;  %v14873_v51 = vpack.c.bf16 %v6735_v62, %v6734_v31  ;;  %v6662_v54 = vsel %vm6660_vm15, %v7755_v37, %v7759_v16  ;;  %v6661_v56 = vsel %vm6660_vm15, %v7754_v23, %v7755_v37  ;;  %v6663_v16 = vsel %vm6660_vm15, %v7760_v20, %v7764_v40 }
0x12e9   : > { %v6898_v21 = vunpack.c.l.b16 %v14848_v9  ;;  %v6666_v48 = vsel %vm6660_vm15, %v7750_v32, %v7794_v60  ;;  %v6974_v37 = vunpack.c.l.b16 %v14857_v17  ;;  %v6678_v23 = vsel %vm6385_vm13, %v6662_v54, 0.0 }
0x12ea   : > { %v7818_v19 = vpop.permute.xlu2 %7817  ;;  %v7823_v55 = vpop.permute.xlu1 %7822  ;;  %v6682_v0 = vsel %vm6385_vm13, %v6666_v48, 0.0  ;;  %v6876_v20 = vunpack.c.l.b16 %v14864_v10  ;;  %v7769_v48 = vunpack.i.l.bf16 %v14867_v57 }
0x12eb   : > { %v7820_v36 = vunpack.i.h.bf16 %v7818_v19  ;;  %v7819_v39 = vunpack.i.l.bf16 %v7818_v19  ;;  %v6902_v24 = vpack.c.b16 %v6898_v21, %v6896_v61  ;;  %v7825_v50 = vunpack.i.h.bf16 %v7823_v55 }
0x12ec   : > { %v7824_v58 = vunpack.i.l.bf16 %v7823_v55  ;;  %v6665_v61 = vsel %vm6660_vm15, %v7749_v5, %v7750_v32  ;;  %v6976_v19 = vunpack.c.l.b16 %v14873_v51 }
0x12ed   : > { %v6720_v34 = vsel %vm6713_vm14, %v7790_v33, %v7819_v39  ;;  %v6721_v2 = vsel %vm6713_vm14, %v7819_v39, %v7820_v36  ;;  %7098 = vmatpush.bf16.msra.mxu2 %v6902_v24  ;;  %v6452_v4 = vsel %vm6444_vm6, %v7825_v50, %v7799_v1  ;;  %v6677_v33 = vsel %vm6384_vm12, %v6661_v56, 0.0 }
0x12ee   : > { %v6736_v30 = vsel %vm14564_vm7, %v6720_v34, 0.0  ;;  %v6737_v52 = vsel %vm14570_vm8, %v6721_v2, 0.0  ;;  %v6451_v31 = vsel %vm6444_vm6, %v7824_v58, %v7825_v50  ;;  %v6972_v39 = vunpack.c.l.b16 %v14851_v47  ;;  %v14913_v58 = vpop.permute.xlu0 %7832 }
0x12ef   : > { %v14886_v62 = vpack.c.bf16 %v6737_v52, %v6736_v30  ;;  %v14892_v21 = vpack.c.bf16 %v6452_v4, %v6451_v31  ;;  %v7795_v24 = vunpack.i.h.bf16 %v14828_v27  ;;  %v6681_v55 = vsel %vm6384_vm12, %v6665_v61, 0.0 }
0x12f0   : > { %v14911_v50 = vpack.c.bf16 %v6678_v23, %v6677_v33  ;;  %v14917_v30 = vpack.c.bf16 %v6682_v0, %v6681_v55  ;;  %v7770_v52 = vunpack.i.h.bf16 %v14867_v57  ;;  %v6395_v23 = vsel %vm14570_vm8, %v14605_v18, 0.0 }
0x12f1   : > { %7099 = vmatpush.bf16.msra.mxu2 %v6900_v38  ;;  %v6978_v60 = vunpack.c.l.b16 %v14886_v62  ;;  %v6878_v36 = vunpack.c.l.b16 %v14892_v21  ;;  %v6679_v38 = vsel %vm6384_vm12, %v6663_v16, 0.0  ;;  %v6980_v16 = vpack.c.b16 %v6974_v37, %v6972_v39 }
0x12f2   : > { %v7843_v40 = vpop.permute.xlu2 %7842  ;;  %v7828_v34 = vpop.permute.xlu1 %7827  ;;  %v6680_v33 = vsel %vm6385_vm13, %v14764_v22, 0.0  ;;  %v6858_v57 = vunpack.c.l.b16 %v14580_v6  ;;  %v14941_v37 = vpack.c.bf16 %v6395_v23, %v6394_v35  ;;  %v6956_v18 = vunpack.c.l.b16 %v14917_v30 }
0x12f3   : > { %v7845_v32 = vunpack.i.h.bf16 %v7843_v40  ;;  %v7844_v5 = vunpack.i.l.bf16 %v7843_v40  ;;  %v6982_v1 = vpack.c.b16 %v6978_v60, %v6976_v19  ;;  %v6882_v2 = vpack.c.b16 %v6878_v36, %v6876_v20 }
0x12f4   : > { %v7829_v27 = vunpack.i.l.bf16 %v7828_v34  ;;  %v6392_v19 = vsel %vm14564_vm7, %v14502_v41, 0.0  ;;  %v14946_v22 = vpack.c.bf16 %v6680_v33, %v6679_v38  ;;  %v6612_v40 = vsel %vm6607_vm1, %v7769_v48, %v7770_v52 }
0x12f5   : > { %v6667_v54 = vsel %vm6660_vm15, %v7795_v24, %v7844_v5  ;;  %v6668_v56 = vsel %vm6660_vm15, %v7844_v5, %v7845_v32  ;;  %7117 = vmatpush.bf16.msra.mxu3 %v6982_v1  ;;  %7100 = vmatpush.bf16.msra.mxu2 %v6882_v2  ;;  %v6856_v41 = vunpack.c.l.b16 %v14705_v8  ;;  %v6952_v49 = vunpack.c.l.b16 %v14911_v50 }
0x12f6   : > { %v6683_v31 = vsel %vm6384_vm12, %v6667_v54, 0.0  ;;  %v6684_v4 = vsel %vm6385_vm13, %v6668_v56, 0.0  ;;  %v6613_v60 = vsel %vm6607_vm1, %v7770_v52, %v7829_v27  ;;  %v14956_v3 = vpack.c.bf16 %v6393_v26, %v6392_v19  ;;  %v7613_v54 = vld [vmem:[%s15123_s5 + $0x8] sm:$0xf0]  ;;  %v7858_v52 = vpop.permute.xlu0 %7857 }
0x12f7   : > { %v14925_v61 = vpack.c.bf16 %v6684_v4, %v6683_v31  ;;  %v7830_v35 = vunpack.i.h.bf16 %v7828_v34  ;;  %v14958_v32 = vpack.c.bf16 %v6613_v60, %v6612_v40  ;;  %v6862_v1 = vpack.c.b16 %v6858_v57, %v6856_v41  ;;  %v7576_v34 = vld [vmem:[%s15123_s5] sm:$0xf] }
0x12f8   : > { %v6954_v13 = vunpack.c.l.b16 %v14946_v22  ;;  %v6852_v26 = vunpack.c.l.b16 %v14956_v3  ;;  %v7835_v56 = vunpack.i.h.bf16 %v14913_v58  ;;  %v7834_v27 = vunpack.i.l.bf16 %v14913_v58 }
0x12f9   : > { %7118 = vmatpush.bf16.msra.mxu3 %v6980_v16  ;;  %v6958_v0 = vunpack.c.l.b16 %v14925_v61  ;;  %7101 = vmatpush.bf16.msra.mxu2 %v14726_v29  ;;  %v6854_v29 = vunpack.c.l.b16 %v14941_v37  ;;  %v6936_v4 = vunpack.c.l.b16 %v14958_v32  ;;  %v14978_v33 = vor.u32 %v7613_v54, %v7576_v34 }
0x12fa   : > { %v7848_v20 = vpop.permute.xlu2 %7847  ;;  %v7838_v5 = vpop.permute.xlu1 %7837  ;;  %v6960_v48 = vpack.c.b16 %v6954_v13, %v6952_v49  ;;  %v6608_v60 = vsel %vm6607_vm1, %v7834_v27, %v7835_v56  ;;  %v7860_v40 = vunpack.i.h.bf16 %v7858_v52  ;;  %v7859_v49 = vunpack.i.l.bf16 %v7858_v52  ;;  %v7578_v13 = vld [vmem:[%s15123_s5 + $0xc] sm:$0xf0] }
0x12fb   : > { %v7850_v36 = vunpack.i.h.bf16 %v7848_v20  ;;  %v7849_v39 = vunpack.i.l.bf16 %v7848_v20  ;;  %v6962_v24 = vpack.c.b16 %v6958_v0, %v6956_v18  ;;  %v7839_v2 = vunpack.i.l.bf16 %v7838_v5 }
0x12fc   : > { %v6860_v31 = vpack.c.b16 %v6854_v29, %v6852_v26  ;;  %v7840_v18 = vunpack.i.h.bf16 %v7838_v5  ;;  %v6919_v5 = vunpack.c.h.b16 %v14759_v44  ;;  %v6824_v26 = vsel %vm6819_vm2, %v7859_v49, %v7860_v40 }
0x12fd   : > { %v6614_v38 = vsel %vm6607_vm1, %v7830_v35, %v7849_v39  ;;  %v6615_v55 = vsel %vm6607_vm1, %v7849_v39, %v7850_v36  ;;  %7119 = vmatpush.bf16.msra.mxu3 %v6962_v24  ;;  %7102 = vmatpush.bf16.msra.mxu2 %v6862_v1  ;;  %v6609_v23 = vsel %vm6607_vm1, %v7835_v56, %v7839_v2  ;;  %v7612_v2 = vld [vmem:[%s15123_s5 + $0x4] sm:$0xf]  ;;  %v6913_v44 = vunpack.c.h.b16 %v14642_v46 }
0x12fe   : > { %v14964_v14 = vpack.c.bf16 %v6615_v55, %v6614_v38  ;;  %v14981_v20 = vpack.c.bf16 %v6609_v23, %v6608_v60  ;;  %v6917_v55 = vunpack.c.h.b16 %v14738_v43  ;;  %v7868_v34 = vpop.permute.xlu0 %7867  ;;  %v6915_v43 = vunpack.c.h.b16 %v14644_v28 }
0x12ff   : > { %v6840_v23 = vsel %vm6384_vm12, %v6824_v26, 0.0 }
0x1300   : > { %v6938_v16 = vunpack.c.l.b16 %v14964_v14  ;;  %v6932_v29 = vunpack.c.l.b16 %v14981_v20  ;;  %v6923_v52 = vpack.c.b16 %v6919_v5, %v6917_v55  ;;  %v7616_v5 = vld [vmem:[%s15123_s5 + $0x20] sm:$0xf0] }
0x1301   : > { %7120 = vmatpush.bf16.msra.mxu3 %v6960_v48  ;;  %7103 = vmatpush.bf16.msra.mxu2 %v6860_v31 }
0x1302   : > { %v7853_v57 = vpop.permute.xlu2 %7852  ;;  %v6942_v19 = vpack.c.b16 %v6938_v16, %v6936_v4  ;;  %v7863_v41 = vpop.permute.xlu1 %7862  ;;  %v15004_v16 = vor.u32 %v7612_v2, %v7578_v13 }
0x1303   : > { %v7855_v0 = vunpack.i.h.bf16 %v7853_v57  ;;  %v7854_v58 = vunpack.i.l.bf16 %v7853_v57  ;;  %v7864_v39 = vunpack.i.l.bf16 %v7863_v41  ;;  %v7865_v48 = vunpack.i.h.bf16 %v7863_v41 }
0x1304   : > { %7104 = vmatmul.bf16.vlgmr.msra.gmra.mxu2 %v14978_v33  ;;  %v7870_v57 = vunpack.i.h.bf16 %v7868_v34  ;;  %v6899_v41 = vunpack.c.h.b16 %v14848_v9 }
0x1305   : > { %v6610_v35 = vsel %vm6607_vm1, %v7840_v18, %v7854_v58  ;;  %v6611_v36 = vsel %vm6607_vm1, %v7854_v58, %v7855_v0  ;;  %7121 = vmatpush.bf16.msra.mxu3 %v6942_v19  ;;  %v6825_v1 = vsel %vm6819_vm2, %v7860_v40, %v7864_v39  ;;  %v7869_v19 = vunpack.i.l.bf16 %v7868_v34  ;;  %v7588_v39 = vld [vmem:[%s15123_s5 + $0x18] sm:$0xf] }
0x1306   : > { %v14986_v24 = vpack.c.bf16 %v6611_v36, %v6610_v35  ;;  %v6841_v54 = vsel %vm6385_vm13, %v6825_v1, 0.0  ;;  %v6921_v36 = vpack.c.b16 %v6915_v43, %v6913_v44  ;;  %v6897_v1 = vunpack.c.h.b16 %v14835_v7 }
0x1307   : > { %v15008_v60 = vpack.c.bf16 %v6841_v54, %v6840_v23  ;;  %v15033_v26 = vor.u32 %v7616_v5, %v7588_v39  ;;  %v6893_v34 = vunpack.c.h.b16 %v14807_v63  ;;  %v6979_v5 = vunpack.c.h.b16 %v14886_v62 }
0x1308   : > { %v6934_v38 = vunpack.c.l.b16 %v14986_v24  ;;  %v6903_v13 = vpack.c.b16 %v6899_v41, %v6897_v1  ;;  %v6993_v41 = vunpack.c.h.b16 %v14776_v59  ;;  %v6857_v59 = vunpack.c.h.b16 %v14705_v8 }
0x1309   : > { %v7016_v9 = vunpack.c.l.b16 %v15008_v60  ;;  %v7017_v8 = vunpack.c.h.b16 %v15008_v60  ;;  %v6975_v62 = vunpack.c.h.b16 %v14857_v17  ;;  %v6955_v17 = vunpack.c.h.b16 %v14946_v22  ;;  %v7596_v60 = vld [vmem:[%s15123_s5 + $0x20] sm:$0xf] }
0x130a   : > { %v7878_v56 = vpop.permute.xlu2 %7877  ;;  %v6940_v27 = vpack.c.b16 %v6934_v38, %v6932_v29  ;;  %v7873_v46 = vpop.permute.xlu1 %7872  ;;  %v6820_v29 = vsel %vm6819_vm2, %v7869_v19, %v7870_v57  ;;  %v6879_v19 = vunpack.c.h.b16 %v14892_v21  ;;  %v6933_v22 = vunpack.c.h.b16 %v14981_v20 }
0x130b   : > { %v7880_v31 = vunpack.i.h.bf16 %v7878_v56  ;;  %v7879_v4 = vunpack.i.l.bf16 %v7878_v56  ;;  %v7874_v58 = vunpack.i.l.bf16 %v7873_v46  ;;  %v7875_v44 = vunpack.i.h.bf16 %v7873_v46 }
0x130c   : > { %7122 = vmatpush.bf16.msra.mxu3 %v6940_v27  ;;  %v6836_v27 = vsel %vm6384_vm12, %v6820_v29, 0.0  ;;  %v6999_v46 = vunpack.c.h.b16 %v14796_v12  ;;  %v6855_v29 = vunpack.c.h.b16 %v14941_v37 }
0x130d   : > { %v6826_v18 = vsel %vm6819_vm2, %v7865_v48, %v7879_v4  ;;  %v6827_v0 = vsel %vm6819_vm2, %v7879_v4, %v7880_v31  ;;  %v6821_v35 = vsel %vm6819_vm2, %v7870_v57, %v7874_v58  ;;  %v6895_v48 = vunpack.c.h.b16 %v14770_v25 }
0x130e   : > { %v6842_v28 = vsel %vm6384_vm12, %v6826_v18, 0.0  ;;  %v6843_v40 = vsel %vm6385_vm13, %v6827_v0, 0.0  ;;  %v6837_v55 = vsel %vm6385_vm13, %v6821_v35, 0.0  ;;  %v7615_v18 = vld [vmem:[%s15123_s5 + $0x1c] sm:$0xf]  ;;  %v6877_v0 = vunpack.c.h.b16 %v14864_v10 }
0x130f   : > { %v15017_v49 = vpack.c.bf16 %v6843_v40, %v6842_v28  ;;  %7123 = vmatmul.bf16.vlgmr.msra.gmra.mxu3 %v15004_v16  ;;  %v6844_v31 = vpack.c.bf16 %v6837_v55, %v6836_v27  ;;  %v6901_v23 = vpack.c.b16 %v6895_v48, %v6893_v34  ;;  %v6997_v58 = vunpack.c.h.b16 %v14787_v42  ;;  %v7584_v42 = vld [vmem:[%s15123_s5 + $0x8] sm:$0xf]  ;;  %v7614_v10 = vld [vmem:[%s15123_s5 + $0x10] sm:$0xf0] }
0x1310   : > { %7153 = vmatpush.bf16.msrb.mxu3 %v6923_v52  ;;  %v6883_v40 = vpack.c.b16 %v6879_v19, %v6877_v0  ;;  %v15056_v21 = vor.u32 %v7615_v18, %v7590_v15  ;;  %v6995_v35 = vunpack.c.h.b16 %v14744_v11  ;;  %v7585_v11 = vor.u32 %v7614_v10, %v7584_v42 }
0x1311   : > { %v7018_v38 = vunpack.c.l.b16 %v15017_v49  ;;  %v7012_v25 = vunpack.c.l.b16 %v6844_v31  ;;  %v7003_v12 = vpack.c.b16 %v6999_v46, %v6997_v58  ;;  %v6853_v55 = vunpack.c.h.b16 %v14956_v3 }
0x1312   : > { %v7883_v2 = vpop.permute.xlu2 %7882  ;;  %v7001_v39 = vpack.c.b16 %v6995_v35, %v6993_v41  ;;  %v7013_v34 = vunpack.c.h.b16 %v6844_v31  ;;  %v6957_v3 = vunpack.c.h.b16 %v14917_v30  ;;  %v6939_v30 = vunpack.c.h.b16 %v14964_v14  ;;  %v7048_v19 = vpop.permute.xlu1 %7047 }
0x1313   : > { %v7885_v54 = vunpack.i.h.bf16 %v7883_v2  ;;  %v7884_v56 = vunpack.i.l.bf16 %v7883_v2  ;;  %v7022_v7 = vpack.c.b16 %v7018_v38, %v7016_v9  ;;  %v7019_v9 = vunpack.c.h.b16 %v15017_v49 }
0x1314   : > { %7154 = vmatpush.bf16.msrb.mxu3 %v6921_v36  ;;  %7109 = vmatmul.bf16.gmra.mxu2 %v15033_v26  ;;  %v6859_v36 = vunpack.c.h.b16 %v14580_v6  ;;  %v6977_v6 = vunpack.c.h.b16 %v14873_v51  ;;  %v6973_v2 = vunpack.c.h.b16 %v14851_v47  ;;  %v6959_v49 = vunpack.c.h.b16 %v14925_v61  ;;  %v7617_v61 = vld [vmem:[%s15123_s5 + $0x28] sm:$0xf0] }
0x1315   : > { %v6822_v52 = vsel %vm6819_vm2, %v7875_v44, %v7884_v56  ;;  %v6823_v43 = vsel %vm6819_vm2, %v7884_v56, %v7885_v54  ;;  %7140 = vmatpush.bf16.msrb.mxu2 %v7022_v7  ;;  %v6953_v54 = vunpack.c.h.b16 %v14911_v50  ;;  %v7597_v7 = vor.u32 %v7617_v61, %v7596_v60 }
0x1316   : > { %v6838_v4 = vsel %vm6384_vm12, %v6822_v52, 0.0  ;;  %v6839_v63 = vsel %vm6385_vm13, %v6823_v43, 0.0  ;;  %v6863_v1 = vpack.c.b16 %v6859_v36, %v6857_v59  ;;  %v6983_v38 = vpack.c.b16 %v6979_v5, %v6977_v6 }
0x1317   : > { %v6845_v57 = vpack.c.bf16 %v6839_v63, %v6838_v4  ;;  %v6981_v37 = vpack.c.b16 %v6975_v62, %v6973_v2  ;;  %v6963_v44 = vpack.c.b16 %v6959_v49, %v6957_v3  ;;  %v6961_v56 = vpack.c.b16 %v6955_v17, %v6953_v54  ;;  %v7043_v4 = vpop.permute.xlu0 %7042 }
0x1318   : > { %7155 = vmatpush.bf16.msrb.mxu3 %v6903_v13  ;;  %v7023_v13 = vpack.c.b16 %v7019_v9, %v7017_v8  ;;  %v6937_v50 = vunpack.c.h.b16 %v14958_v32 }
0x1319   : > { %v7014_v53 = vunpack.c.l.b16 %v6845_v57  ;;  %v7015_v51 = vunpack.c.h.b16 %v6845_v57 }
0x131a   : > { %v6943_v27 = vpack.c.b16 %v6939_v30, %v6937_v50  ;;  %v7053_v0 = vpop.permute.xlu2 %7052 }
0x131b   : > { %v7020_v28 = vpack.c.b16 %v7014_v53, %v7012_v25  ;;  %v7021_v47 = vpack.c.b16 %v7015_v51, %v7013_v34 }
0x131c   : > { %7156 = vmatpush.bf16.msrb.mxu3 %v6901_v23 }
0x131d   : > { %7141 = vmatpush.bf16.msrb.mxu2 %v7020_v28 }
0x131f   : > { %7128 = vmatmul.bf16.gmra.mxu3 %v15056_v21  ;;  %v7058_v41 = vpop.permute.xlu0 %7057 }
0x1320   : > { %7157 = vmatpush.bf16.msrb.mxu3 %v6883_v40 }
0x1321   : > { %7172 = vmatpush.bf16.msra.mxu2 %v7003_v12 }
0x1324   : > { %7158 = vmatpush.bf16.msrb.mxu3 %v14728_v45  ;;  %7598 = vmatmul.msk.bf16.vlgmr.msrb.gmra.mxu2 %vm416_vm0, %v7585_v11  ;;  %v6861_v45 = vpack.c.b16 %v6855_v29, %v6853_v55 }
0x1325   : > { %7173 = vmatpush.bf16.msra.mxu2 %v7001_v39 }
0x1328   : > { %7159 = vmatpush.bf16.msrb.mxu3 %v6863_v1 }
0x1329   : > { %7174 = vmatpush.bf16.msra.mxu2 %v6983_v38 }
0x132c   : > { %7160 = vmatpush.bf16.msrb.mxu3 %v6861_v45 }
0x132d   : > { %7175 = vmatpush.bf16.msra.mxu2 %v6981_v37 }
0x132f   : > { %7161 = vmatmul.bf16.vlgmr.msrb.gmra.mxu3 %v14978_v33  ;;  %v6935_v33 = vunpack.c.h.b16 %v14986_v24 }
0x1330   : > { %7197 = vmatpush.bf16.msra.mxu3 %v7023_v13 }
0x1331   : > { %7176 = vmatpush.bf16.msra.mxu2 %v6963_v44  ;;  %v6941_v52 = vpack.c.b16 %v6935_v33, %v6933_v22 }
0x1334   : > { %7198 = vmatpush.bf16.msra.mxu3 %v7021_v47  ;;  %7599 = vmatmul.msk.bf16.gmra.mxu2 %vm416_vm0, %v7597_v7 }
0x1335   : > { %7177 = vmatpush.bf16.msra.mxu2 %v6961_v56 }
0x1339   : > { %7178 = vmatpush.bf16.msra.mxu2 %v6943_v27 }
0x133d   : > { %7179 = vmatpush.bf16.msra.mxu2 %v6941_v52 }
0x133f   : > { %7166 = vmatmul.bf16.gmra.mxu3 %v15033_v26 }
0x1344   : > { %7180 = vmatmul.bf16.vlgmr.msra.gmra.mxu2 %v15004_v16 }
0x134f   : > { %7600 = vmatmul.msk.bf16.vlgmr.msra.gmra.mxu3 %vm416_vm0, %v7585_v11 }
0x1354   : > { %7185 = vmatmul.bf16.gmra.mxu2 %v15056_v21 }
0x135f   : > { %7601 = vmatmul.msk.bf16.gmra.mxu3 %vm416_vm0, %v7597_v7 }
0x1387   : > { %v7105_v32 = vpop.f32.mrf.mxu2 }
0x1388   : > { %v7106_v63 = vadd.f32 %v7105_v32, %v7043_v4 }
0x138f   : > { %v7107_v14 = vpop.f32.mrf.mxu2 }
0x1390   : > { %v7108_v46 = vadd.f32 %v7107_v14, %v7048_v19 }
0x1392   : > { %v7124_v24 = vpop.f32.mrf.mxu3 }
0x1393   : > { %v7125_v23 = vadd.f32 %v7124_v24, %v7106_v63 }
0x1397   : > { %v7110_v43 = vpop.f32.mrf.mxu2 }
0x1398   : > { %v7111_v58 = vadd.f32 %v7110_v43, %v7053_v0 }
0x139a   : > { %v7126_v48 = vpop.f32.mrf.mxu3 }
0x139b   : > { %v7127_v18 = vadd.f32 %v7126_v48, %v7108_v46 }
0x139f   : > { %v7112_v31 = vpop.f32.mrf.mxu2 }
0x13a0   : > { %v7113_v35 = vadd.f32 %v7112_v31, %v7058_v41 }
0x13a2   : > { %v7129_v20 = vpop.f32.mrf.mxu3 }
0x13a3   : > { %v7130_v28 = vadd.f32 %v7129_v20, %v7111_v58 }
0x13a7   : > { %v7143_v16 = vpop.f32.mrf.mxu2 }
0x13a8   : > { %v7144_v26 = vadd.f32 %v7143_v16, %v7125_v23 }
0x13aa   : > { %v7131_v57 = vpop.f32.mrf.mxu3  ;;  %7210 = vst [vmem:[%s15105_s9] sm:$0xff] %v7144_v26 }
0x13ab   : > { %v7132_v36 = vadd.f32 %v7131_v57, %v7113_v35 }
0x13af   : > { %v7145_v15 = vpop.f32.mrf.mxu2 }
0x13b0   : > { %v7146_v25 = vadd.f32 %v7145_v15, %v7127_v18 }
0x13b2   : > { %v7162_v53 = vpop.f32.mrf.mxu3  ;;  %7212 = vst [vmem:[%s15105_s9 + $0x10] sm:$0xff] %v7146_v25 }
0x13b3   : > { %v7163_v11 = vadd.f32 %v7162_v53, %v7043_v4 }
0x13b7   : > { %v7148_v40 = vpop.f32.mrf.mxu2 }
0x13b8   : > { %v7149_v21 = vadd.f32 %v7148_v40, %v7130_v28 }
0x13ba   : > { %v7164_v12 = vpop.f32.mrf.mxu3  ;;  %7214 = vst [vmem:[%s15105_s9 + $0x20] sm:$0xff] %v7149_v21 }
0x13bb   : > { %v7165_v38 = vadd.f32 %v7164_v12, %v7048_v19 }
0x13bf   : > { %v7150_v42 = vpop.f32.mrf.mxu2 }
0x13c0   : > { %v7151_v10 = vadd.f32 %v7150_v42, %v7132_v36 }
0x13c2   : > { %v7167_v39 = vpop.f32.mrf.mxu3  ;;  %7216 = vst [vmem:[%s15105_s9 + $0x30] sm:$0xff] %v7151_v10 }
0x13c3   : > { %v7168_v62 = vadd.f32 %v7167_v39, %v7053_v0 }
0x13c7   : > { %v7181_v59 = vpop.f32.mrf.mxu2 }
0x13c8   : > { %v7182_v1 = vadd.f32 %v7181_v59, %v7163_v11 }
0x13ca   : > { %v7169_v5 = vpop.f32.mrf.mxu3 }
0x13cb   : > { %v7170_v34 = vadd.f32 %v7169_v5, %v7058_v41 }
0x13cf   : > { %v7183_v6 = vpop.f32.mrf.mxu2 }
0x13d0   : > { %v7184_v55 = vadd.f32 %v7183_v6, %v7165_v38 }
0x13d2   : > { %v7200_v29 = vpop.f32.mrf.mxu3 }
0x13d3   : > { %v7201_v9 = vadd.f32 %v7200_v29, %v7182_v1 }
0x13d5   : > { %7211 = vst [vmem:[%s15105_s9 + $0x8] sm:$0xff] %v7201_v9 }
0x13d7   : > { %v7186_v45 = vpop.f32.mrf.mxu2 }
0x13d8   : > { %v7187_v13 = vadd.f32 %v7186_v45, %v7168_v62 }
0x13da   : > { %v7202_v2 = vpop.f32.mrf.mxu3 }
0x13db   : > { %v7203_v8 = vadd.f32 %v7202_v2, %v7184_v55 }
0x13dd   : > { %7213 = vst [vmem:[%s15105_s9 + $0x18] sm:$0xff] %v7203_v8 }
0x13df   : > { %v7188_v49 = vpop.f32.mrf.mxu2 }
0x13e0   : > { %v7189_v3 = vadd.f32 %v7188_v49, %v7170_v34 }
0x13e2   : > { %v7205_v51 = vpop.f32.mrf.mxu3 }
0x13e3   : > { %v7206_v37 = vadd.f32 %v7205_v51, %v7187_v13 }
0x13e5   : > { %7215 = vst [vmem:[%s15105_s9 + $0x28] sm:$0xff] %v7206_v37 }
0x13ea   : > { %v7207_v47 = vpop.f32.mrf.mxu3 }
0x13eb   : > { %v7208_v44 = vadd.f32 %v7207_v47, %v7189_v3 }
0x13ed   : > { %7217 = vst [vmem:[%s15105_s9 + $0x38] sm:$0xff] %v7208_v44 }
0x13ee PF: > { %s18_s26 = sadd.s32 1, %s8968_s26  }
0x13ef   : > { %p15_p4 = scmp.ge.s32.totalorder %s18_s26, 4  }
0x13f1   :  { %17 = sbr.rel (!%p15_p4) target bundleno = 2 (0x2), region = 78 }

</bundles_post_ra>
